<compile_context>
chip_gen: v7x
topology: tpu7x:2x2x1
jax: 0.10.0
libtpu: 0.0.40
codegen_flags: <defaults>
</compile_context>

<pallas_src>
import functools

import jax
import jax.numpy as jnp
import numpy as np
from jax.experimental import pallas as pl
from jax.experimental.pallas import tpu as pltpu


H1, H2 = 1024, 512   # self.layers = [1024, 512] (fixed by the module)
OUT_PAD = 128        # out_layer (H2 -> 1) zero-padded to 128 MXU columns


# ----------------------------------------------------------------------------
# Kernel: (folded-norm) fc1+relu -> fc2+relu -> out -> unnormalize
# ----------------------------------------------------------------------------
def pgcritic_kernel(state_ref,   # (TB, D)        f32  raw state tile
                    w1_ref,      # (D, H1)        bf16 fc1 weight, norm folded in
                    b1_ref,      # (1, H1)        ep_dtype  fc1 bias, norm folded in
                    w2_ref,      # (H1, H2)       bf16 fc2 weight
                    b2_ref,      # (1, H2)        ep_dtype  fc2 bias
                    w3_ref,      # (H2, OUT_PAD)  bf16 out weight, zero-padded cols
                    stats_ref,   # (3,)           f32 SMEM: [b3, val_mean, val_std]
                    out_ref,     # (TB, 1)        f32 unnormalized values
                    *, ep_dtype):
    # State normalization is folded into (w1, b1); raw state feeds the MXU
    # directly (bf16 operands, f32 accumulation).
    x = state_ref[...].astype(jnp.bfloat16)

    # fc1 + ReLU.  Epilogue (bias + max) runs in ep_dtype: bf16 on v6e/v7x,
    # f32 on v5e (no bf16 VALU there).
    h1 = jnp.dot(x, w1_ref[...], preferred_element_type=jnp.float32)
    h1 = jnp.maximum(h1.astype(ep_dtype) + b1_ref[...], 0.0)

    # fc2 + ReLU.
    h2 = jnp.dot(h1.astype(jnp.bfloat16), w2_ref[...],
                 preferred_element_type=jnp.float32)
    h2 = jnp.maximum(h2.astype(ep_dtype) + b2_ref[...], 0.0)

    # out_layer (H2 -> 1): plain MXU matmul against a zero-padded (H2, 128)
    # weight -- avoids the XLU transpose a transposed-B dot_general would
    # force on h2.  Column 0 is the real output column.
    v = jnp.dot(h2.astype(jnp.bfloat16), w3_ref[...],
                preferred_element_type=jnp.float32)        # (TB, OUT_PAD)
    v0 = v[:, 0:1]                                          # (TB, 1)

    # val_norm.unnormalize_pt on (h2 @ w3 + b3); scalars from SMEM.
    b3 = stats_ref[0]
    v_mean = stats_ref[1]
    v_std = stats_ref[2]
    out_ref[...] = ((v0 + b3) * v_std + v_mean).astype(out_ref.dtype)


# ----------------------------------------------------------------------------
# Wrapper helpers
# ----------------------------------------------------------------------------
def _round_up(x, m):
    return ((x + m - 1) // m) * m


def _choose_tile_b(B):
    """Batch tile: multiple of 8, <= 512, and an even number (>= 2) of grid
    tiles whenever B allows (v7x megacore keeps both TensorCores busy)."""
    if B <= 8:
        return 8
    n_tiles = _round_up(pl.cdiv(B, 512), 2)          # even, >= 2
    return min(512, _round_up(pl.cdiv(B, n_tiles), 8))


def _default_epilogue_dtype():
    """bf16 epilogues on v6e/v7x; f32 on older gens (no bf16 VPU on v5e)."""
    try:
        kind = jax.devices()[0].device_kind.lower()
    except Exception:
        return jnp.float32
    for old in ("v2", "v3", "v4", "v5"):
        if old in kind:
            return jnp.float32
    return jnp.bfloat16


# ----------------------------------------------------------------------------
# Wrapper
# ----------------------------------------------------------------------------
def pgcritic_forward(state, kernel_params, *, tile_b=None, ep_dtype=None,
                     vmem_limit_bytes=32 * 1024 * 1024):
    """state: (B, D) float32 -> (B,) float32 unnormalized values."""
    B, D = state.shape
    w1, b1, w2, b2, w3p, stats = kernel_params
    assert w1.shape == (D, H1) and w2.shape == (H1, H2) and w3p.shape == (H2, OUT_PAD)

    if ep_dtype is None:
        ep_dtype = _default_epilogue_dtype()
    if tile_b is None:
        tile_b = _choose_tile_b(B)

    num_tiles = pl.cdiv(B, tile_b)
    B_pad = num_tiles * tile_b
    if B_pad != B:
        state = jnp.pad(state, ((0, B_pad - B), (0, 0)))

    # Biases in the epilogue dtype (cast once, outside the kernel).
    b1 = b1.astype(ep_dtype)
    b2 = b2.astype(ep_dtype)

    const = lambda i: (0, 0)   # constant index_map: block stays VMEM-resident

    flops = 2 * B_pad * (D * H1 + H1 * H2 + H2 * OUT_PAD)
    bytes_accessed = (
        B_pad * D * 4 + B_pad * 4
        + w1.size * w1.dtype.itemsize + b1.size * b1.dtype.itemsize
        + w2.size * w2.dtype.itemsize + b2.size * b2.dtype.itemsize
        + w3p.size * w3p.dtype.itemsize + stats.size * 4)

    out = pl.pallas_call(
        functools.partial(pgcritic_kernel, ep_dtype=ep_dtype),
        out_shape=jax.ShapeDtypeStruct((B_pad, 1), jnp.float32),
        grid_spec=pltpu.PrefetchScalarGridSpec(
            num_scalar_prefetch=0,
            grid=(num_tiles,),
            in_specs=[
                pl.BlockSpec((tile_b, D), lambda i: (i, 0)),          # state tile
                pl.BlockSpec((D, H1), const),                         # w1 (bf16)
                pl.BlockSpec((1, H1), const),                         # b1
                pl.BlockSpec((H1, H2), const),                        # w2 (bf16)
                pl.BlockSpec((1, H2), const),                         # b2
                pl.BlockSpec((H2, OUT_PAD), const),                   # w3 padded (bf16)
                pl.BlockSpec(memory_space=pltpu.MemorySpace.SMEM),    # stats scalars
            ],
            out_specs=pl.BlockSpec((tile_b, 1), lambda i: (i, 0)),
        ),
        compiler_params=pltpu.CompilerParams(
            dimension_semantics=("parallel",),     # batch tiles -> 2 TCs on v7x
            vmem_limit_bytes=vmem_limit_bytes,
        ),
        cost_estimate=pl.CostEstimate(
            flops=flops, transcendentals=0, bytes_accessed=bytes_accessed),
    )(state, w1, b1, w2, b2, w3p, stats)

    # norm_val_pt.view(-1) equivalent (drop any batch padding).
    return out[:B, 0]


# ----------------------------------------------------------------------------
# Deterministic parameter construction (xavier_uniform weights, zero biases)
# ----------------------------------------------------------------------------
def xavier_uniform(key, fan_in, fan_out):
    bound = float(np.sqrt(6.0 / (fan_in + fan_out)))
    # PyTorch stores Linear.weight as (out, in); transpose to (in, out).
    w = jax.random.uniform(key, (fan_out, fan_in), jnp.float32, -bound, bound)
    return w.T


def make_semantic_params(key, inputdim):
    """Parameters in the module's native f32 semantics (for the reference)."""
    k1, k2, k3, k4, k5 = jax.random.split(key, 5)
    w1 = xavier_uniform(k1, inputdim, H1)                    # (D, H1)
    b1 = jnp.zeros((H1,), jnp.float32)
    w2 = xavier_uniform(k2, H1, H2)                          # (H1, H2)
    b2 = jnp.zeros((H2,), jnp.float32)
    w3 = xavier_uniform(k3, H2, 1)                           # (H2, 1)
    b3 = jnp.float32(0.0)                                    # constant_(bias, 0)
    # Synthetic normalizer statistics (deterministic).
    s_mean = jax.random.normal(k4, (inputdim,), jnp.float32) * 0.1
    s_std = jnp.abs(jax.random.normal(k5, (inputdim,), jnp.float32)) + 0.5
    v_mean, v_std = jnp.float32(0.25), jnp.float32(2.0)
    return dict(w1=w1, b1=b1, w2=w2, b2=b2, w3=w3, b3=b3,
                s_mean=s_mean, s_std=s_std, v_mean=v_mean, v_std=v_std)


def make_kernel_params(sp):
    """Fold state normalization into fc1 and pack weights for the kernel."""
    inv_std = 1.0 / sp["s_std"]                               # (D,)
    w1_fold = sp["w1"] * inv_std[:, None]                     # (D, H1) f32
    b1_fold = sp["b1"] - (sp["s_mean"] * inv_std) @ sp["w1"]  # (H1,)
    w1 = w1_fold.astype(jnp.bfloat16)
    b1 = b1_fold.reshape(1, H1)
    w2 = sp["w2"].astype(jnp.bfloat16)
    b2 = sp["b2"].reshape(1, H2)
    w3p = jnp.zeros((H2, OUT_PAD), jnp.float32).at[:, 0].set(sp["w3"][:, 0])
    w3p = w3p.astype(jnp.bfloat16)
    stats = jnp.array([sp["b3"], sp["v_mean"], sp["v_std"]], jnp.float32)
    return (w1, b1, w2, b2, w3p, stats)


# ----------------------------------------------------------------------------
# Pure-JAX references for correctness checking
# ----------------------------------------------------------------------------
def pgcritic_ref_f32(state, sp):
    """Full-f32 reference of the PyTorch forward (semantic check)."""
    x = (state - sp["s_mean"]) / sp["s_std"]
    h1 = jax.nn.relu(x @ sp["w1"] + sp["b1"])
    h2 = jax.nn.relu(h1 @ sp["w2"] + sp["b2"])
    v = (h2 @ sp["w3"])[:, 0] + sp["b3"]
    return v * sp["v_std"] + sp["v_mean"]


def pgcritic_ref_matched(state, kp, ep_dtype):
    """Mirror of the kernel's exact precision choices (folded norm, bf16 MXU)."""
    w1, b1, w2, b2, w3p, stats = kp
    b1 = b1.astype(ep_dtype)
    b2 = b2.astype(ep_dtype)
    h1 = jnp.dot(state.astype(jnp.bfloat16), w1, preferred_element_type=jnp.float32)
    h1 = jnp.maximum(h1.astype(ep_dtype) + b1, 0.0)
    h2 = jnp.dot(h1.astype(jnp.bfloat16), w2, preferred_element_type=jnp.float32)
    h2 = jnp.maximum(h2.astype(ep_dtype) + b2, 0.0)
    v = jnp.dot(h2.astype(jnp.bfloat16), w3p, preferred_element_type=jnp.float32)[:, 0]
    return (v + stats[0]) * stats[2] + stats[1]


if __name__ == "__main__":
    root = jax.random.PRNGKey(0)
    k_state_a, k_state_b, k_params = jax.random.split(root, 3)

    # Module: inputdim = len(input_tensors) * input_tensors[0].shape[-1];
    # one input tensor with feature dim 64 -> inputdim = 64; layers fixed at
    # (1024, 512) by the module.
    D = 64
    sp = make_semantic_params(k_params, D)
    kp = make_kernel_params(sp)
    ep_dtype = _default_epilogue_dtype()

    # Batch 1024: adaptive tiling picks tile_b=512 -> 2 tiles (even grid, so
    # v7x megacore keeps both TensorCores busy, step overhead amortized).
    B = 1024
    state = jax.random.normal(k_state_a, (B, D), jnp.float32)
    val = jax.block_until_ready(pgcritic_forward(state, kp, ep_dtype=ep_dtype))
    assert val.shape == (B,)
    np.testing.assert_allclose(
        np.asarray(val), np.asarray(pgcritic_ref_matched(state, kp, ep_dtype)),
        rtol=1e-2, atol=1e-2)
    np.testing.assert_allclose(
        np.asarray(val), np.asarray(pgcritic_ref_f32(state, sp)),
        rtol=7e-2, atol=7e-2)

    # Tiny batch 8: exercises the small-batch tile clamp (no padding blow-up).
    B2 = 8
    state2 = jax.random.normal(k_state_b, (B2, D), jnp.float32)
    val2 = jax.block_until_ready(pgcritic_forward(state2, kp, ep_dtype=ep_dtype))
    assert val2.shape == (B2,)
    np.testing.assert_allclose(
        np.asarray(val2), np.asarray(pgcritic_ref_matched(state2, kp, ep_dtype)),
        rtol=1e-2, atol=1e-2)

    print("KERNEL_OK")
</pallas_src>

<mosaic_0001>
module attributes {stable_mosaic.version = 11 : i64} {
  func.func @pgcritic_kernel(%arg0: i32, %arg1: memref<512x64xf32, #tpu.memory_space<vmem>>, %arg2: memref<64x1024xbf16, #tpu.memory_space<vmem>>, %arg3: memref<1x1024xbf16, #tpu.memory_space<vmem>>, %arg4: memref<1024x512xbf16, #tpu.memory_space<vmem>>, %arg5: memref<1x512xbf16, #tpu.memory_space<vmem>>, %arg6: memref<512x128xbf16, #tpu.memory_space<vmem>>, %arg7: memref<3xf32, #tpu.memory_space<smem>>, %arg8: memref<512x1xf32, #tpu.memory_space<vmem>>) attributes {dimension_semantics = [#tpu.dimension_semantics<parallel>], iteration_bounds = array<i64: 2>, scalar_prefetch = 0 : i64, scratch_operands = 0 : i64, tpu.core_type = #tpu.core_type<tc>, window_params = [{transform_indices = @transform_0, window_bounds = array<i64: 512, 64>}, {pipeline_mode = #tpu.pipeline_mode<synchronous>, transform_indices = @transform_1, window_bounds = array<i64: 64, 1024>}, {pipeline_mode = #tpu.pipeline_mode<synchronous>, transform_indices = @transform_2, window_bounds = array<i64: 1, 1024>}, {pipeline_mode = #tpu.pipeline_mode<synchronous>, transform_indices = @transform_3, window_bounds = array<i64: 1024, 512>}, {pipeline_mode = #tpu.pipeline_mode<synchronous>, transform_indices = @transform_4, window_bounds = array<i64: 1, 512>}, {pipeline_mode = #tpu.pipeline_mode<synchronous>, transform_indices = @transform_5, window_bounds = array<i64: 512, 128>}, {transform_indices = @transform_6, window_bounds = array<i64: 3>}, {transform_indices = @transform_7, window_bounds = array<i64: 512, 1>}]} {
    %c0 = arith.constant 0 : index
    %c0_0 = arith.constant 0 : index
    %0 = vector.load %arg1[%c0, %c0_0] : memref<512x64xf32, #tpu.memory_space<vmem>>, vector<512x64xf32>
    %1 = arith.truncf %0 : vector<512x64xf32> to vector<512x64xbf16>
    %c0_1 = arith.constant 0 : index
    %c0_2 = arith.constant 0 : index
    %2 = vector.load %arg2[%c0_1, %c0_2] : memref<64x1024xbf16, #tpu.memory_space<vmem>>, vector<64x1024xbf16>
    %cst = arith.constant dense<0.000000e+00> : vector<512x1024xf32>
    %3 = tpu.matmul %1, %2, %cst {dimension_numbers = #tpu.dot_dimension_numbers<[1], [0], [0], [1], [0, 0, 1, 1], [], []>} : vector<512x64xbf16>, vector<64x1024xbf16>, vector<512x1024xf32> -> vector<512x1024xf32>
    %4 = arith.truncf %3 : vector<512x1024xf32> to vector<512x1024xbf16>
    %c0_3 = arith.constant 0 : index
    %c0_4 = arith.constant 0 : index
    %5 = vector.load %arg3[%c0_3, %c0_4] : memref<1x1024xbf16, #tpu.memory_space<vmem>>, vector<1x1024xbf16>
    %6 = vector.broadcast %5 : vector<1x1024xbf16> to vector<512x1024xbf16>
    %7 = arith.addf %4, %6 : vector<512x1024xbf16>
    %cst_5 = arith.constant 0.000000e+00 : bf16
    %8 = vector.broadcast %cst_5 : bf16 to vector<512x1024xbf16>
    %9 = arith.maximumf %7, %8 : vector<512x1024xbf16>
    %c0_6 = arith.constant 0 : index
    %c0_7 = arith.constant 0 : index
    %10 = vector.load %arg4[%c0_6, %c0_7] : memref<1024x512xbf16, #tpu.memory_space<vmem>>, vector<1024x512xbf16>
    %cst_8 = arith.constant dense<0.000000e+00> : vector<512x512xf32>
    %11 = tpu.matmul %9, %10, %cst_8 {dimension_numbers = #tpu.dot_dimension_numbers<[1], [0], [0], [1], [0, 0, 1, 1], [], []>} : vector<512x1024xbf16>, vector<1024x512xbf16>, vector<512x512xf32> -> vector<512x512xf32>
    %12 = arith.truncf %11 : vector<512x512xf32> to vector<512x512xbf16>
    %c0_9 = arith.constant 0 : index
    %c0_10 = arith.constant 0 : index
    %13 = vector.load %arg5[%c0_9, %c0_10] : memref<1x512xbf16, #tpu.memory_space<vmem>>, vector<1x512xbf16>
    %14 = vector.broadcast %13 : vector<1x512xbf16> to vector<512x512xbf16>
    %15 = arith.addf %12, %14 : vector<512x512xbf16>
    %cst_11 = arith.constant 0.000000e+00 : bf16
    %16 = vector.broadcast %cst_11 : bf16 to vector<512x512xbf16>
    %17 = arith.maximumf %15, %16 : vector<512x512xbf16>
    %c0_12 = arith.constant 0 : index
    %c0_13 = arith.constant 0 : index
    %18 = vector.load %arg6[%c0_12, %c0_13] : memref<512x128xbf16, #tpu.memory_space<vmem>>, vector<512x128xbf16>
    %cst_14 = arith.constant dense<0.000000e+00> : vector<512x128xf32>
    %19 = tpu.matmul %17, %18, %cst_14 {dimension_numbers = #tpu.dot_dimension_numbers<[1], [0], [0], [1], [0, 0, 1, 1], [], []>} : vector<512x512xbf16>, vector<512x128xbf16>, vector<512x128xf32> -> vector<512x128xf32>
    %20 = vector.extract_strided_slice %19 {offsets = [0, 0], sizes = [512, 1], strides = [1, 1]} : vector<512x128xf32> to vector<512x1xf32>
    %c0_15 = arith.constant 0 : index
    %21 = memref.load %arg7[%c0_15] : memref<3xf32, #tpu.memory_space<smem>>
    %c1 = arith.constant 1 : index
    %22 = memref.load %arg7[%c1] : memref<3xf32, #tpu.memory_space<smem>>
    %c2 = arith.constant 2 : index
    %23 = memref.load %arg7[%c2] : memref<3xf32, #tpu.memory_space<smem>>
    %24 = vector.broadcast %21 : f32 to vector<512x1xf32>
    %25 = arith.addf %20, %24 : vector<512x1xf32>
    %26 = vector.broadcast %23 : f32 to vector<512x1xf32>
    %27 = arith.mulf %25, %26 : vector<512x1xf32>
    %28 = vector.broadcast %22 : f32 to vector<512x1xf32>
    %29 = arith.addf %27, %28 : vector<512x1xf32>
    %c0_16 = arith.constant 0 : index
    %c0_17 = arith.constant 0 : index
    %30 = vector.load %arg8[%c0_16, %c0_17] : memref<512x1xf32, #tpu.memory_space<vmem>>, vector<512x1xf32>
    tpu.vector_store %arg8[%c0_16, %c0_17], %29 {strides = array<i32>} : memref<512x1xf32, #tpu.memory_space<vmem>>, vector<512x1xf32>,
    return
  }
  func.func @transform_0(%arg0: i32) -> (i32, i32) {
    %c0_i32 = arith.constant 0 : i32
    %c0_i32_0 = arith.constant 0 : i32
    return %arg0, %c0_i32 : i32, i32
  }
  func.func @transform_1(%arg0: i32) -> (i32, i32) {
    %c0_i32 = arith.constant 0 : i32
    %c0_i32_0 = arith.constant 0 : i32
    %c0_i32_1 = arith.constant 0 : i32
    return %c0_i32, %c0_i32_0 : i32, i32
  }
  func.func @transform_2(%arg0: i32) -> (i32, i32) {
    %c0_i32 = arith.constant 0 : i32
    %c0_i32_0 = arith.constant 0 : i32
    %c0_i32_1 = arith.constant 0 : i32
    return %c0_i32, %c0_i32_0 : i32, i32
  }
  func.func @transform_3(%arg0: i32) -> (i32, i32) {
    %c0_i32 = arith.constant 0 : i32
    %c0_i32_0 = arith.constant 0 : i32
    %c0_i32_1 = arith.constant 0 : i32
    return %c0_i32, %c0_i32_0 : i32, i32
  }
  func.func @transform_4(%arg0: i32) -> (i32, i32) {
    %c0_i32 = arith.constant 0 : i32
    %c0_i32_0 = arith.constant 0 : i32
    %c0_i32_1 = arith.constant 0 : i32
    return %c0_i32, %c0_i32_0 : i32, i32
  }
  func.func @transform_5(%arg0: i32) -> (i32, i32) {
    %c0_i32 = arith.constant 0 : i32
    %c0_i32_0 = arith.constant 0 : i32
    %c0_i32_1 = arith.constant 0 : i32
    return %c0_i32, %c0_i32_0 : i32, i32
  }
  func.func @transform_6(%arg0: i32) -> i32 {
    %c0_i32 = arith.constant 0 : i32
    %c0_i32_0 = arith.constant 0 : i32
    return %c0_i32 : i32
  }
  func.func @transform_7(%arg0: i32) -> (i32, i32) {
    %c0_i32 = arith.constant 0 : i32
    %c0_i32_0 = arith.constant 0 : i32
    return %arg0, %c0_i32 : i32, i32
  }
}

</mosaic_0001>

<bundles_post_ra>
// kernel: tpu_custom_call.1
= control target key start
LH: loop header
LB: loop body
LE: loop exit
PB: predicated region body
PF: predicated region fallthrough
CT: control target
= control target key end

     0   :  { %12 = vsyncpa [#allocation3], 0  ;;  %s16211_s0 = inlined_call_operand.vmem [shape: f32[1024,64], index: 0, kind: input, shape index: {}]   ;;  %s16212_s1 = inlined_call_operand.vmem [shape: bf16[64,1024], index: 1, kind: input, shape index: {}]   ;;  %s16213_s2 = inlined_call_operand.vmem [shape: bf16[1,1024], index: 2, kind: input, shape index: {}]   ;;  %s16214_s3 = inlined_call_operand.hbm [shape: bf16[1024,512], index: 3, kind: input, shape index: {}]   ;;  %s16215_s4 = inlined_call_operand.vmem [shape: bf16[1,512], index: 4, kind: input, shape index: {}]   ;;  %s16216_s5 = inlined_call_operand.vmem [shape: bf16[512,128], index: 5, kind: input, shape index: {}]   ;;  %s16217_s6 = inlined_call_operand.vmem [shape: f32[3], index: 6, kind: input, shape index: {}]   ;;  %s16218_s7 = inlined_call_operand.vmem [shape: f32[1024,1], index: 7, kind: output, shape index: {}]  }
   0x1   :  { %13 = vsyncpa [#allocation4], 0  ;;  %s10750_s24 = smov 0  }
   0x2 LB: > { %s8959_s25 = sadd.s32 4294967295, %s10702_s24   ;;  %p8961_p0 = scmp.ge.s32.totalorder %s10702_s24, 1  ;;  %s10702_s24 = sphi %s10750_s24, %s19_s24  }
   0x3   : > { %p202_p1 = scmp.lt.s32.totalorder %s10702_s24, 3  ;;  %s10704_s26 = smov [#allocation2]  }
   0x4   : > { %s220_s27 = sshll.u32 %s10704_s26, 4  ;;  %p10764_p3 = scmp.eq.s32.totalorder %s8959_s25, 0  ;;  %s221_s27 = int_to_ptr.vmem [resolvable:$true] %s220_s27 }
   0x5   : > { %p10758_p2 = pnand %p8961_p0, %p202_p1  ;;  %s240_s9 = sshll.u32 %s16217_s6, 4  ;;  %s10779_s9 = int_to_ptr.vmem [resolvable:$true] %s240_s9 }
   0x6   : > { %s16657_s29 = scalar_select %p10764_p3, 1, 0 }
   0x7   : > { %s16656_s28 = scalar_select %p10758_p2, 1, 0 }
   0x8   : > { %p10201_p4 = pneg %p10758_p2  ;;  %s10645_s13 = scalar_lea.hbm %s16214_s3, 32768 }
   0x9   : > { %p10646_p6 = scmp.ne.s32.totalorder %s16214_s3, %s10645_s13  ;;  %p10652_p10 = scmp.lt.u32.totalorder %s10645_s13, %s16214_s3 }
   0xa   : > { %p10775_p5 = pnand %p10764_p3, %p10201_p4 }
   0xc   : > { %p10647_p7 = pneg %p10775_p5 }
   0xe   : > { %p10648_p8 = pnand %p10647_p7, %p10646_p6 }
  0x10   : > { %p10649_p9 = pneg %p10648_p8 }
  0x12   : > { %p10654_p11 = pnand %p10652_p10, %p10649_p9 }
  0x14   : > { %10657 = shalt.err (!%p10654_p11)
}
  0x15   : > { %s10658_s18 = scalar_lea.vmem %s221_s27, 32768  ;;  %p10666_p1 = scmp.lt.s32.totalorder %s221_s27, %s221_s27 }
  0x16   : > { %p10659_p12 = scmp.ne.s32.totalorder %s221_s27, %s10658_s18  ;;  %p10667_p4 = scmp.lt.s32.totalorder %s10658_s18, %s10658_s18 }
  0x18   : > { %p10661_p13 = pnand %p10659_p12, %p10647_p7  ;;  %p10668_p3 = por %p10667_p4, %p10666_p1 }
  0x1a   : > { %p10662_p0 = pneg %p10661_p13 }
  0x1c   : > { %p10669_p2 = pnand %p10668_p3, %p10662_p0 }
  0x1e   : > { %10672 = shalt.err (!%p10669_p2)
}
  0x1f   : > { %s10705_s19 = smov 256   ;;  %s10706_s20 = smov 16  }
  0x20   : > { %10204 = dma.hbm_to_vmem [thread:$0]  (!%p10775_p5), %s16214_s3, 32768, %s221_s27, [#allocation3], %s10705_s19, %s10705_s19, %s10706_s20  }
  0x21   : > { %s10673_s23 = scalar_lea.vmem %s10779_s9, 16  ;;  %p10681_p2 = scmp.lt.s32.totalorder %s10779_s9, %s10779_s9 }
  0x22   : > { %p10674_p6 = scmp.ne.s32.totalorder %s10779_s9, %s10673_s23  ;;  %p10682_p3 = scmp.lt.s32.totalorder %s10673_s23, %s10673_s23 }
  0x24   : > { %p10676_p8 = pnand %p10674_p6, %p10647_p7  ;;  %p10683_p10 = por %p10682_p3, %p10681_p2 }
  0x26   : > { %p10677_p9 = pneg %p10676_p8 }
  0x28   : > { %p10684_p11 = pnand %p10683_p10, %p10677_p9 }
  0x2a   : > { %10687 = shalt.err (!%p10684_p11)
}
  0x2b   : > { %s10707_s26 = smov [#allocation5]   ;;  %p16659_p12 = scmp.ne.s32.totalorder %s16656_s28, 0 }
  0x2c   : > { %10207 = dma.vmem_to_smem (!%p10775_p5), %s10779_s9, 16, %s10707_s26, [#allocation4]  }
  0x2d   : > { %262 = sbr.rel (%p16659_p12) target bundleno = 2086 (0x826), region = 48 }
  0x34   : > { %p16660_p13 = scmp.ne.s32.totalorder %s16657_s29, 0 }
  0x36   : > { %10693 = dma.done.wait (%p16660_p13), [#allocation3], 32768  }
  0x37   : > { %10695 = vsyncadd (%p16660_p13), [#allocation3], 4294934528 }
  0x38   : > { %10697 = dma.done.wait (%p16660_p13), [#allocation4], 16  }
  0x39   : > { %10699 = vsyncadd (%p16660_p13), [#allocation4], 4294967280 }
  0x3a   : > { %272 = sfence }
  0x3b   : > { %v408_v0 = vld [vmem:[%s16212_s1] sm:$0xff]  ;;  %v409_v2 = vld [vmem:[%s16212_s1 + $0x8] sm:$0xff]  ;;  %s8968_s11 = sshll.u32 %s8959_s25, 6  ;;  %v16223_v8 = vmov 0   ;;  %v410_v31 = vld [vmem:[%s16212_s1 + $0x10] sm:$0xff]  ;;  %vm600_vm0 = vcmask 523264  }
  0x3c   : > { %v412_v1 = vld [vmem:[%s16212_s1 + $0x20] sm:$0xff]  ;;  %v413_v4 = vld [vmem:[%s16212_s1 + $0x28] sm:$0xff]  ;;  %729 = vmatprep.mubr.bf16.mxu0 %v16223_v8  ;;  %1082 = vmatprep.mubr.bf16.mxu1 %v16223_v8  ;;  %p300_p5 = scmp.lt.s32.totalorder %s8968_s11, 127  ;;  %v414_v32 = vld [vmem:[%s16212_s1 + $0x30] sm:$0xff]  ;;  %s8616_s22 = sld [smem:[#allocation5]]  ;;  %vm8814_vm1 = vcmask 7168  }
  0x3d   : > { %v8973_v3 = vcombine.high %v408_v0, %v412_v1  ;;  %v8972_v5 = vcombine.low %v408_v0, %v412_v1  ;;  %v416_v6 = vld [vmem:[%s16212_s1 + $0x40] sm:$0xff]  ;;  %v8975_v9 = vcombine.high %v409_v2, %v413_v4  ;;  %v8974_v10 = vcombine.low %v409_v2, %v413_v4  ;;  %v417_v12 = vld [vmem:[%s16212_s1 + $0x48] sm:$0xff]  ;;  %v411_v33 = vld [vmem:[%s16212_s1 + $0x18] sm:$0xff]  ;;  %s9422_s23 = sld [smem:[#allocation5 + $0x2]]  ;;  %s9421_s26 = sld [smem:[#allocation5 + $0x1]] }
  0x3e   : > { %v420_v7 = vld [vmem:[%s16212_s1 + $0x60] sm:$0xff]  ;;  %v421_v13 = vld [vmem:[%s16212_s1 + $0x68] sm:$0xff]  ;;  %s17803_s11 = smov (!%p300_p5, %s8968_s11), 127  ;;  %v415_v34 = vld [vmem:[%s16212_s1 + $0x38] sm:$0xff]  ;;  %v8977_v39 = vcombine.high %v410_v31, %v414_v32  ;;  %v8976_v44 = vcombine.low %v410_v31, %v414_v32 }
  0x3f   : > { %v8981_v11 = vcombine.high %v416_v6, %v420_v7  ;;  %v424_v14 = vld [vmem:[%s16212_s1 + $0x80] sm:$0xff]  ;;  %697 = vmatprep.subr.bf16.mxu0 %v8973_v3  ;;  %v8983_v15 = vcombine.high %v417_v12, %v421_v13  ;;  %v425_v17 = vld [vmem:[%s16212_s1 + $0x88] sm:$0xff]  ;;  %1050 = vmatprep.subr.bf16.mxu1 %v8975_v9  ;;  %v8980_v19 = vcombine.low %v416_v6, %v420_v7  ;;  %s8969_s29 = sshll.u32 %s17803_s11, 3  ;;  %v418_v42 = vld [vmem:[%s16212_s1 + $0x50] sm:$0xff] }
  0x40   : > { %v428_v16 = vld [vmem:[%s16212_s1 + $0xa0] sm:$0xff]  ;;  %v429_v18 = vld [vmem:[%s16212_s1 + $0xa8] sm:$0xff]  ;;  %698 = vmatpush1.bf16.msra.mxu0 %v8972_v5  ;;  %1051 = vmatpush1.bf16.msra.mxu1 %v8974_v10  ;;  %v8982_v20 = vcombine.low %v417_v12, %v421_v13  ;;  %s10883_s18 = scalar_lea.vmem %s16211_s0, %s8969_s29  ;;  %v8979_v40 = vcombine.high %v411_v33, %v415_v34  ;;  %v422_v43 = vld [vmem:[%s16212_s1 + $0x70] sm:$0xff]  ;;  %v8978_v47 = vcombine.low %v411_v33, %v415_v34  ;;  %s15823_s28 = scalar_lea.vmem %s16218_s7, %s8969_s29 }
  0x41   : > { %699 = vmatprep.subr.bf16.mxu0 %v8981_v11  ;;  %v8989_v21 = vcombine.high %v424_v14, %v428_v16  ;;  %1052 = vmatprep.subr.bf16.mxu1 %v8983_v15  ;;  %v8991_v22 = vcombine.high %v425_v17, %v429_v18  ;;  %v432_v23 = vld [vmem:[%s16212_s1 + $0xc0] sm:$0xff]  ;;  %v433_v25 = vld [vmem:[%s16212_s1 + $0xc8] sm:$0xff]  ;;  %v8988_v27 = vcombine.low %v424_v14, %v428_v16  ;;  %v419_v45 = vld [vmem:[%s16212_s1 + $0x58] sm:$0xff] }
  0x42   : > { %v436_v24 = vld [vmem:[%s16212_s1 + $0xe0] sm:$0xff]  ;;  %v437_v26 = vld [vmem:[%s16212_s1 + $0xe8] sm:$0xff]  ;;  %v8990_v28 = vcombine.low %v425_v17, %v429_v18  ;;  %v423_v46 = vld [vmem:[%s16212_s1 + $0x78] sm:$0xff]  ;;  %v8985_v49 = vcombine.high %v418_v42, %v422_v43  ;;  %v8984_v52 = vcombine.low %v418_v42, %v422_v43 }
  0x43   : > { %v8997_v29 = vcombine.high %v432_v23, %v436_v24  ;;  %v8999_v30 = vcombine.high %v433_v25, %v437_v26  ;;  %v8996_v35 = vcombine.low %v432_v23, %v436_v24  ;;  %v312_v36 = vld [vmem:[%s10883_s18] sm:$0xff]  ;;  %v313_v37 = vld [vmem:[%s10883_s18 + $0x8] sm:$0xff]  ;;  %v8998_v38 = vcombine.low %v433_v25, %v437_v26  ;;  %v314_v48 = vld [vmem:[%s10883_s18 + $0x10] sm:$0xff] }
  0x44   : > { %700 = vmatpush1.bf16.msra.mxu0 %v8980_v19  ;;  %1053 = vmatpush1.bf16.msra.mxu1 %v8982_v20  ;;  %v10899_v41 = vpack.c.bf16 %v313_v37, %v312_v36  ;;  %v315_v50 = vld [vmem:[%s10883_s18 + $0x18] sm:$0xff]  ;;  %v8987_v51 = vcombine.high %v419_v45, %v423_v46  ;;  %v426_v53 = vld [vmem:[%s16212_s1 + $0x90] sm:$0xff]  ;;  %v8986_v56 = vcombine.low %v419_v45, %v423_v46  ;;  %v316_v62 = vld [vmem:[%s10883_s18 + $0x20] sm:$0xff] }
  0x45   : > { %701 = vmatprep.subr.bf16.mxu0 %v8989_v21  ;;  %1054 = vmatprep.subr.bf16.mxu1 %v8991_v22  ;;  %v430_v54 = vld [vmem:[%s16212_s1 + $0xb0] sm:$0xff]  ;;  %v427_v55 = vld [vmem:[%s16212_s1 + $0x98] sm:$0xff]  ;;  %v10933_v60 = vpack.c.bf16 %v315_v50, %v314_v48  ;;  %v317_v63 = vld [vmem:[%s10883_s18 + $0x28] sm:$0xff] }
  0x46   : > { %v8993_v57 = vcombine.high %v426_v53, %v430_v54  ;;  %v431_v58 = vld [vmem:[%s16212_s1 + $0xb8] sm:$0xff]  ;;  %v8992_v61 = vcombine.low %v426_v53, %v430_v54  ;;  %v10943_v1 = vpack.c.bf16 %v317_v63, %v316_v62  ;;  %v318_v2 = vld [vmem:[%s10883_s18 + $0x30] sm:$0xff]  ;;  %v320_v5 = vld [vmem:[%s10883_s18 + $0x40] sm:$0xff] }
  0x47   : > { %v8995_v59 = vcombine.high %v427_v55, %v431_v58  ;;  %v8994_v0 = vcombine.low %v427_v55, %v431_v58  ;;  %v319_v3 = vld [vmem:[%s10883_s18 + $0x38] sm:$0xff]  ;;  %v321_v6 = vld [vmem:[%s10883_s18 + $0x48] sm:$0xff]  ;;  %v322_v9 = vld [vmem:[%s10883_s18 + $0x50] sm:$0xff] }
  0x48   : > { %702 = vmatpush1.bf16.msra.mxu0 %v8988_v27  ;;  %1055 = vmatpush1.bf16.msra.mxu1 %v8990_v28  ;;  %v10953_v4 = vpack.c.bf16 %v319_v3, %v318_v2  ;;  %v10963_v7 = vpack.c.bf16 %v321_v6, %v320_v5  ;;  %v323_v10 = vld [vmem:[%s10883_s18 + $0x58] sm:$0xff]  ;;  %v324_v12 = vld [vmem:[%s10883_s18 + $0x60] sm:$0xff]  ;;  %v325_v13 = vld [vmem:[%s10883_s18 + $0x68] sm:$0xff] }
  0x49   : > { %703 = vmatprep.subr.bf16.mxu0 %v8997_v29  ;;  %1056 = vmatprep.subr.bf16.mxu1 %v8999_v30  ;;  %v10973_v11 = vpack.c.bf16 %v323_v10, %v322_v9  ;;  %v10983_v14 = vpack.c.bf16 %v325_v13, %v324_v12  ;;  %v326_v15 = vld [vmem:[%s10883_s18 + $0x70] sm:$0xff]  ;;  %v327_v16 = vld [vmem:[%s10883_s18 + $0x78] sm:$0xff]  ;;  %v328_v18 = vld [vmem:[%s10883_s18 + $0x80] sm:$0xff] }
  0x4a   : > { %v10993_v17 = vpack.c.bf16 %v327_v16, %v326_v15  ;;  %v329_v19 = vld [vmem:[%s10883_s18 + $0x88] sm:$0xff]  ;;  %v330_v21 = vld [vmem:[%s10883_s18 + $0x90] sm:$0xff]  ;;  %v331_v22 = vld [vmem:[%s10883_s18 + $0x98] sm:$0xff] }
  0x4b   : > { %v11003_v20 = vpack.c.bf16 %v329_v19, %v328_v18  ;;  %v434_v23 = vld [vmem:[%s16212_s1 + $0xd0] sm:$0xff]  ;;  %v435_v25 = vld [vmem:[%s16212_s1 + $0xd8] sm:$0xff]  ;;  %v11025_v31 = vpack.c.bf16 %v331_v22, %v330_v21  ;;  %v332_v32 = vld [vmem:[%s10883_s18 + $0xa0] sm:$0xff] }
  0x4c   : > { %704 = vmatpush1.bf16.msra.mxu0 %v8996_v35  ;;  %1057 = vmatpush1.bf16.msra.mxu1 %v8998_v38  ;;  %v438_v24 = vld [vmem:[%s16212_s1 + $0xf0] sm:$0xff]  ;;  %v439_v28 = vld [vmem:[%s16212_s1 + $0xf8] sm:$0xff]  ;;  %v333_v33 = vld [vmem:[%s10883_s18 + $0xa8] sm:$0xff] }
  0x4d   : > { %1403 = vmatprep.subr.bf16.mxu0 %v8977_v39  ;;  %1756 = vmatprep.subr.bf16.mxu1 %v8979_v40  ;;  %v9000_v26 = vcombine.low %v434_v23, %v438_v24  ;;  %v9001_v27 = vcombine.high %v434_v23, %v438_v24  ;;  %v9002_v29 = vcombine.low %v435_v25, %v439_v28  ;;  %v334_v35 = vld [vmem:[%s10883_s18 + $0xb0] sm:$0xff]  ;;  %v335_v36 = vld [vmem:[%s10883_s18 + $0xb8] sm:$0xff]  ;;  %v336_v38 = vld [vmem:[%s10883_s18 + $0xc0] sm:$0xff] }
  0x4e   : > { %v9003_v30 = vcombine.high %v435_v25, %v439_v28  ;;  %v11035_v34 = vpack.c.bf16 %v333_v33, %v332_v32  ;;  %v11045_v37 = vpack.c.bf16 %v335_v36, %v334_v35  ;;  %v337_v39 = vld [vmem:[%s10883_s18 + $0xc8] sm:$0xff]  ;;  %v338_v42 = vld [vmem:[%s10883_s18 + $0xd0] sm:$0xff]  ;;  %v339_v43 = vld [vmem:[%s10883_s18 + $0xd8] sm:$0xff] }
  0x4f   : > { %9004 = vmatmul.mubr.msk.bf16.vlgmr.msra.gmra.mrb[0].mxu0 %vm600_vm0, %v10899_v41  ;;  %9036 = vmatmul.mubr.msk.bf16.vlgmr.msra.gmra.mrb[0].mxu1 %vm600_vm0, %v10899_v41  ;;  %v11055_v40 = vpack.c.bf16 %v337_v39, %v336_v38  ;;  %v340_v45 = vld [vmem:[%s10883_s18 + $0xe0] sm:$0xff]  ;;  %v341_v46 = vld [vmem:[%s10883_s18 + $0xe8] sm:$0xff]  ;;  %v342_v48 = vld [vmem:[%s10883_s18 + $0xf0] sm:$0xff] }
  0x50   : > { %1404 = vmatpush1.bf16.msra.mxu0 %v8976_v44  ;;  %1757 = vmatpush1.bf16.msra.mxu1 %v8978_v47  ;;  %v11065_v44 = vpack.c.bf16 %v339_v43, %v338_v42  ;;  %v11075_v47 = vpack.c.bf16 %v341_v46, %v340_v45  ;;  %v346_v54 = vld [vmem:[%s10883_s18 + $0x110] sm:$0xff]  ;;  %v347_v55 = vld [vmem:[%s10883_s18 + $0x118] sm:$0xff]  ;;  %v352_v3 = vld [vmem:[%s10883_s18 + $0x140] sm:$0xff] }
  0x51   : > { %739 = vmatprep.mubr.bf16.mxu0 %v16223_v8  ;;  %1092 = vmatprep.mubr.bf16.mxu1 %v16223_v8  ;;  %v10231_v58 = vld [vmem:[#allocation2 + $0xc] ss:$16 sps:$4 sm:$0xff]   ;;  %v350_v63 = vld [vmem:[%s10883_s18 + $0x130] sm:$0xff]  ;;  %v356_v13 = vld [vmem:[%s10883_s18 + $0x160] sm:$0xff] }
  0x52   : > { %1405 = vmatprep.subr.bf16.mxu0 %v8985_v49  ;;  %1758 = vmatprep.subr.bf16.mxu1 %v8987_v51  ;;  %v343_v49 = vld [vmem:[%s10883_s18 + $0xf8] sm:$0xff]  ;;  %v344_v51 = vld [vmem:[%s10883_s18 + $0x100] sm:$0xff]  ;;  %v353_v5 = vld [vmem:[%s10883_s18 + $0x148] sm:$0xff] }
  0x53   : > { %v11085_v50 = vpack.c.bf16 %v343_v49, %v342_v48  ;;  %v11135_v6 = vpack.c.bf16 %v353_v5, %v352_v3  ;;  %v354_v9 = vld [vmem:[%s10883_s18 + $0x150] sm:$0xff]  ;;  %v355_v10 = vld [vmem:[%s10883_s18 + $0x158] sm:$0xff]  ;;  %v357_v15 = vld [vmem:[%s10883_s18 + $0x168] sm:$0xff] }
  0x54   : > { %1406 = vmatpush1.bf16.msra.mxu0 %v8984_v52  ;;  %1759 = vmatpush1.bf16.msra.mxu1 %v8986_v56  ;;  %v345_v52 = vld [vmem:[%s10883_s18 + $0x108] sm:$0xff]  ;;  %v10228_v56 = vld [vmem:[#allocation2 + $0x4] ss:$16 sps:$4 sm:$0xff]   ;;  %v11145_v12 = vpack.c.bf16 %v355_v10, %v354_v9  ;;  %v11155_v16 = vpack.c.bf16 %v357_v15, %v356_v13  ;;  %v359_v19 = vld [vmem:[%s10883_s18 + $0x178] sm:$0xff] }
  0x55   : > { %1407 = vmatprep.subr.bf16.mxu0 %v8993_v57  ;;  %1760 = vmatprep.subr.bf16.mxu1 %v8995_v59  ;;  %v11095_v53 = vpack.c.bf16 %v345_v52, %v344_v51  ;;  %v11105_v57 = vpack.c.bf16 %v347_v55, %v346_v54  ;;  %v348_v59 = vld [vmem:[%s10883_s18 + $0x120] sm:$0xff]  ;;  %v358_v18 = vld [vmem:[%s10883_s18 + $0x170] sm:$0xff]  ;;  %v361_v23 = vld [vmem:[%s10883_s18 + $0x188] sm:$0xff]  ;;  %v16678_v52 = vmov 0  }
  0x56   : > { %v11165_v21 = vpack.c.bf16 %v359_v19, %v358_v18  ;;  %v360_v22 = vld [vmem:[%s10883_s18 + $0x180] sm:$0xff]  ;;  %v362_v25 = vld [vmem:[%s10883_s18 + $0x190] sm:$0xff]  ;;  %v367_v33 = vld [vmem:[%s10883_s18 + $0x1b8] sm:$0xff] }
  0x57   : > { %9005 = vmatmul.mubr.msk.bf16.gmra.mrb[4].mxu0 %vm600_vm0, %v10933_v60  ;;  %9037 = vmatmul.mubr.msk.bf16.gmra.mrb[4].mxu1 %vm600_vm0, %v10933_v60  ;;  %v11175_v24 = vpack.c.bf16 %v361_v23, %v360_v22  ;;  %v364_v28 = vld [vmem:[%s10883_s18 + $0x1a0] sm:$0xff]  ;;  %v366_v32 = vld [vmem:[%s10883_s18 + $0x1b0] sm:$0xff]  ;;  %v371_v23 = vld [vmem:[%s10883_s18 + $0x1d8] sm:$0xff] }
  0x58   : > { %749 = vmatprep.mubr.bf16.mxu0 %v16223_v8  ;;  %1102 = vmatprep.mubr.bf16.mxu1 %v16223_v8  ;;  %v11211_v39 = vpack.c.bf16 %v367_v33, %v366_v32  ;;  %v368_v55 = vld [vmem:[%s10883_s18 + $0x1c0] sm:$0xff]  ;;  %v370_v22 = vld [vmem:[%s10883_s18 + $0x1d0] sm:$0xff] }
  0x59   : > { %1408 = vmatpush1.bf16.msra.mxu0 %v8992_v61  ;;  %1761 = vmatpush1.bf16.msra.mxu1 %v8994_v0  ;;  %v349_v61 = vld [vmem:[%s10883_s18 + $0x128] sm:$0xff]  ;;  %v351_v0 = vld [vmem:[%s10883_s18 + $0x138] sm:$0xff]  ;;  %v372_v54 = vld [vmem:[%s10883_s18 + $0x1e0] sm:$0xff] }
  0x5a   : > { %1409 = vmatprep.subr.bf16.mxu0 %v9001_v27  ;;  %1762 = vmatprep.subr.bf16.mxu1 %v9003_v30  ;;  %v11115_v62 = vpack.c.bf16 %v349_v61, %v348_v59  ;;  %v11125_v2 = vpack.c.bf16 %v351_v0, %v350_v63 }
  0x5d   : > { %1410 = vmatpush1.bf16.msra.mxu0 %v9000_v26  ;;  %1763 = vmatpush1.bf16.msra.mxu1 %v9002_v29  ;;  %v363_v26 = vld [vmem:[%s10883_s18 + $0x198] sm:$0xff]  ;;  %v365_v29 = vld [vmem:[%s10883_s18 + $0x1a8] sm:$0xff] }
  0x5e   : > { %4520 = vmatprep.subr.bf16.mxu0 %v10228_v56  ;;  %5932 = vmatprep.subr.bf16.mxu1 %v10231_v58  ;;  %v11185_v27 = vpack.c.bf16 %v363_v26, %v362_v25  ;;  %v11195_v30 = vpack.c.bf16 %v365_v29, %v364_v28  ;;  %v369_v56 = vld [vmem:[%s10883_s18 + $0x1c8] sm:$0xff]  ;;  %v11279_v29 = vpack.c.bf16 %v371_v23, %v370_v22 }
  0x5f   : > { %9006 = vmatmul.mubr.msk.bf16.gmra.mrb[8].mxu0 %vm600_vm0, %v10943_v1  ;;  %9038 = vmatmul.mubr.msk.bf16.gmra.mrb[8].mxu1 %vm600_vm0, %v10943_v1  ;;  %v11245_v63 = vpack.c.bf16 %v369_v56, %v368_v55  ;;  %v373_v55 = vld [vmem:[%s10883_s18 + $0x1e8] sm:$0xff] }
  0x60   : > { %759 = vmatprep.mubr.bf16.mxu0 %v16223_v8  ;;  %1112 = vmatprep.mubr.bf16.mxu1 %v16223_v8  ;;  %v11313_v18 = vpack.c.bf16 %v373_v55, %v372_v54 }
  0x67   : > { %9007 = vmatmul.mubr.msk.bf16.gmra.mrb[12].mxu0 %vm600_vm0, %v10953_v4  ;;  %9039 = vmatmul.mubr.msk.bf16.gmra.mrb[12].mxu1 %vm600_vm0, %v10953_v4 }
  0x68   : > { %769 = vmatprep.mubr.bf16.mxu0 %v16223_v8  ;;  %1122 = vmatprep.mubr.bf16.mxu1 %v16223_v8 }
  0x6f   : > { %9008 = vmatmul.mubr.msk.bf16.gmra.mrb[16].mxu0 %vm600_vm0, %v10963_v7  ;;  %9040 = vmatmul.mubr.msk.bf16.gmra.mrb[16].mxu1 %vm600_vm0, %v10963_v7 }
  0x70   : > { %779 = vmatprep.mubr.bf16.mxu0 %v16223_v8  ;;  %1132 = vmatprep.mubr.bf16.mxu1 %v16223_v8 }
  0x77   : > { %9009 = vmatmul.mubr.msk.bf16.gmra.mrb[20].mxu0 %vm600_vm0, %v10973_v11  ;;  %9041 = vmatmul.mubr.msk.bf16.gmra.mrb[20].mxu1 %vm600_vm0, %v10973_v11 }
  0x78   : > { %789 = vmatprep.mubr.bf16.mxu0 %v16223_v8  ;;  %1142 = vmatprep.mubr.bf16.mxu1 %v16223_v8 }
  0x7f   : > { %9010 = vmatmul.mubr.msk.bf16.gmra.mrb[24].mxu0 %vm600_vm0, %v10983_v14  ;;  %9042 = vmatmul.mubr.msk.bf16.gmra.mrb[24].mxu1 %vm600_vm0, %v10983_v14 }
  0x80   : > { %799 = vmatprep.mubr.bf16.mxu0 %v16223_v8  ;;  %1152 = vmatprep.mubr.bf16.mxu1 %v16223_v8 }
  0x87   : > { %9011 = vmatmul.mubr.msk.bf16.gmra.mrb[28].mxu0 %vm600_vm0, %v10993_v17  ;;  %9043 = vmatmul.mubr.msk.bf16.gmra.mrb[28].mxu1 %vm600_vm0, %v10993_v17 }
  0x88   : > { %809 = vmatprep.mubr.bf16.mxu0 %v16223_v8  ;;  %1162 = vmatprep.mubr.bf16.mxu1 %v16223_v8 }
  0x8f   : > { %9012 = vmatmul.mubr.msk.bf16.gmra.mrb[32].mxu0 %vm600_vm0, %v11003_v20  ;;  %9044 = vmatmul.mubr.msk.bf16.gmra.mrb[32].mxu1 %vm600_vm0, %v11003_v20 }
  0x90   : > { %819 = vmatprep.mubr.bf16.mxu0 %v16223_v8  ;;  %1172 = vmatprep.mubr.bf16.mxu1 %v16223_v8 }
  0x97   : > { %9013 = vmatmul.mubr.msk.bf16.gmra.mrb[36].mxu0 %vm600_vm0, %v11025_v31  ;;  %9045 = vmatmul.mubr.msk.bf16.gmra.mrb[36].mxu1 %vm600_vm0, %v11025_v31 }
  0x98   : > { %829 = vmatprep.mubr.bf16.mxu0 %v16223_v8  ;;  %1182 = vmatprep.mubr.bf16.mxu1 %v16223_v8 }
  0x9f   : > { %9014 = vmatmul.mubr.msk.bf16.gmra.mrb[40].mxu0 %vm600_vm0, %v11035_v34  ;;  %9046 = vmatmul.mubr.msk.bf16.gmra.mrb[40].mxu1 %vm600_vm0, %v11035_v34 }
  0xa0   : > { %839 = vmatprep.mubr.bf16.mxu0 %v16223_v8  ;;  %1192 = vmatprep.mubr.bf16.mxu1 %v16223_v8 }
  0xa7   : > { %9015 = vmatmul.mubr.msk.bf16.gmra.mrb[44].mxu0 %vm600_vm0, %v11045_v37  ;;  %9047 = vmatmul.mubr.msk.bf16.gmra.mrb[44].mxu1 %vm600_vm0, %v11045_v37 }
  0xa8   : > { %849 = vmatprep.mubr.bf16.mxu0 %v16223_v8  ;;  %1202 = vmatprep.mubr.bf16.mxu1 %v16223_v8 }
  0xaf   : > { %9016 = vmatmul.mubr.msk.bf16.gmra.mrb[48].mxu0 %vm600_vm0, %v11055_v40  ;;  %9048 = vmatmul.mubr.msk.bf16.gmra.mrb[48].mxu1 %vm600_vm0, %v11055_v40 }
  0xb0   : > { %859 = vmatprep.mubr.bf16.mxu0 %v16223_v8  ;;  %1212 = vmatprep.mubr.bf16.mxu1 %v16223_v8 }
  0xb7   : > { %9017 = vmatmul.mubr.msk.bf16.gmra.mrb[52].mxu0 %vm600_vm0, %v11065_v44  ;;  %9049 = vmatmul.mubr.msk.bf16.gmra.mrb[52].mxu1 %vm600_vm0, %v11065_v44 }
  0xb8   : > { %869 = vmatprep.mubr.bf16.mxu0 %v16223_v8  ;;  %1222 = vmatprep.mubr.bf16.mxu1 %v16223_v8 }
  0xbf   : > { %9018 = vmatmul.mubr.msk.bf16.gmra.mrb[56].mxu0 %vm600_vm0, %v11075_v47  ;;  %9050 = vmatmul.mubr.msk.bf16.gmra.mrb[56].mxu1 %vm600_vm0, %v11075_v47 }
  0xc0   : > { %879 = vmatprep.mubr.bf16.mxu0 %v16223_v8  ;;  %1232 = vmatprep.mubr.bf16.mxu1 %v16223_v8 }
  0xc7   : > { %9019 = vmatmul.mubr.msk.bf16.gmra.mrb[60].mxu0 %vm600_vm0, %v11085_v50  ;;  %9051 = vmatmul.mubr.msk.bf16.gmra.mrb[60].mxu1 %vm600_vm0, %v11085_v50 }
  0xc8   : > { %889 = vmatprep.mubr.bf16.mxu0 %v16223_v8  ;;  %1242 = vmatprep.mubr.bf16.mxu1 %v16223_v8 }
  0xcf   : > { %9020 = vmatmul.mubr.msk.bf16.gmra.mrb[64].mxu0 %vm600_vm0, %v11095_v53  ;;  %9052 = vmatmul.mubr.msk.bf16.gmra.mrb[64].mxu1 %vm600_vm0, %v11095_v53 }
  0xd0   : > { %899 = vmatprep.mubr.bf16.mxu0 %v16223_v8  ;;  %1252 = vmatprep.mubr.bf16.mxu1 %v16223_v8 }
  0xd7   : > { %9021 = vmatmul.mubr.msk.bf16.gmra.mrb[68].mxu0 %vm600_vm0, %v11105_v57  ;;  %9053 = vmatmul.mubr.msk.bf16.gmra.mrb[68].mxu1 %vm600_vm0, %v11105_v57 }
  0xd8   : > { %909 = vmatprep.mubr.bf16.mxu0 %v16223_v8  ;;  %1262 = vmatprep.mubr.bf16.mxu1 %v16223_v8 }
  0xdf   : > { %9022 = vmatmul.mubr.msk.bf16.gmra.mrb[72].mxu0 %vm600_vm0, %v11115_v62  ;;  %9054 = vmatmul.mubr.msk.bf16.gmra.mrb[72].mxu1 %vm600_vm0, %v11115_v62 }
  0xe0   : > { %919 = vmatprep.mubr.bf16.mxu0 %v16223_v8  ;;  %1272 = vmatprep.mubr.bf16.mxu1 %v16223_v8 }
  0xe7   : > { %9023 = vmatmul.mubr.msk.bf16.gmra.mrb[76].mxu0 %vm600_vm0, %v11125_v2  ;;  %9055 = vmatmul.mubr.msk.bf16.gmra.mrb[76].mxu1 %vm600_vm0, %v11125_v2 }
  0xe8   : > { %929 = vmatprep.mubr.bf16.mxu0 %v16223_v8  ;;  %1282 = vmatprep.mubr.bf16.mxu1 %v16223_v8 }
  0xef   : > { %9024 = vmatmul.mubr.msk.bf16.gmra.mrb[80].mxu0 %vm600_vm0, %v11135_v6  ;;  %9056 = vmatmul.mubr.msk.bf16.gmra.mrb[80].mxu1 %vm600_vm0, %v11135_v6 }
  0xf0   : > { %939 = vmatprep.mubr.bf16.mxu0 %v16223_v8  ;;  %1292 = vmatprep.mubr.bf16.mxu1 %v16223_v8 }
  0xf7   : > { %9025 = vmatmul.mubr.msk.bf16.gmra.mrb[84].mxu0 %vm600_vm0, %v11145_v12  ;;  %9057 = vmatmul.mubr.msk.bf16.gmra.mrb[84].mxu1 %vm600_vm0, %v11145_v12 }
  0xf8   : > { %949 = vmatprep.mubr.bf16.mxu0 %v16223_v8  ;;  %1302 = vmatprep.mubr.bf16.mxu1 %v16223_v8 }
  0xff   : > { %9026 = vmatmul.mubr.msk.bf16.gmra.mrb[88].mxu0 %vm600_vm0, %v11155_v16  ;;  %9058 = vmatmul.mubr.msk.bf16.gmra.mrb[88].mxu1 %vm600_vm0, %v11155_v16 }
 0x100   : > { %959 = vmatprep.mubr.bf16.mxu0 %v16223_v8  ;;  %1312 = vmatprep.mubr.bf16.mxu1 %v16223_v8 }
 0x107   : > { %9027 = vmatmul.mubr.msk.bf16.gmra.mrb[92].mxu0 %vm600_vm0, %v11165_v21  ;;  %9059 = vmatmul.mubr.msk.bf16.gmra.mrb[92].mxu1 %vm600_vm0, %v11165_v21 }
 0x108   : > { %969 = vmatprep.mubr.bf16.mxu0 %v16223_v8  ;;  %1322 = vmatprep.mubr.bf16.mxu1 %v16223_v8 }
 0x10f   : > { %9028 = vmatmul.mubr.msk.bf16.gmra.mrb[96].mxu0 %vm600_vm0, %v11175_v24  ;;  %9060 = vmatmul.mubr.msk.bf16.gmra.mrb[96].mxu1 %vm600_vm0, %v11175_v24 }
 0x110   : > { %979 = vmatprep.mubr.bf16.mxu0 %v16223_v8  ;;  %1332 = vmatprep.mubr.bf16.mxu1 %v16223_v8 }
 0x117   : > { %9029 = vmatmul.mubr.msk.bf16.gmra.mrb[100].mxu0 %vm600_vm0, %v11185_v27  ;;  %9061 = vmatmul.mubr.msk.bf16.gmra.mrb[100].mxu1 %vm600_vm0, %v11185_v27 }
 0x118   : > { %989 = vmatprep.mubr.bf16.mxu0 %v16223_v8  ;;  %1342 = vmatprep.mubr.bf16.mxu1 %v16223_v8 }
 0x11f   : > { %9030 = vmatmul.mubr.msk.bf16.gmra.mrb[104].mxu0 %vm600_vm0, %v11195_v30  ;;  %9062 = vmatmul.mubr.msk.bf16.gmra.mrb[104].mxu1 %vm600_vm0, %v11195_v30 }
 0x120   : > { %999 = vmatprep.mubr.bf16.mxu0 %v16223_v8  ;;  %1352 = vmatprep.mubr.bf16.mxu1 %v16223_v8 }
 0x122   : > { %v11205_v35 = vpop.f32.mrb[0].mxu0  ;;  %v11207_v36 = vpop.f32.mrb[0].mxu1 }
 0x123   : > { %16661 = vst [vmem:[#allocation8_spill] sm:$0xff] %v11207_v36  ;;  %v11209_v38 = vpop.f32.mrb[1].mxu0  ;;  %v11213_v42 = vpop.f32.mrb[1].mxu1 }
 0x124   : > { %16662 = vst [vmem:[#allocation9_spill] sm:$0xff] %v11213_v42  ;;  %v11215_v43 = vpop.f32.mrb[2].mxu0  ;;  %v11219_v46 = vpop.f32.mrb[2].mxu1  ;;  %v10229_v42 = vld [vmem:[#allocation2 + $0x8] ss:$16 sps:$4 sm:$0xff]  }
 0x125   : > { %16663 = vst [vmem:[#allocation10_spill] sm:$0xff] %v11219_v46  ;;  %v11221_v48 = vpop.f32.mrb[3].mxu0  ;;  %v11225_v51 = vpop.f32.mrb[3].mxu1  ;;  %v10226_v46 = vld [vmem:[#allocation2] ss:$16 sps:$4 sm:$0xff]  }
 0x126   : > { %16664 = vst [vmem:[#allocation11_spill] sm:$0xff] %v11225_v51  ;;  %v10235_v51 = vld [vmem:[#allocation2 + $0x28] ss:$16 sps:$4 sm:$0xff]  }
 0x127   : > { %9031 = vmatmul.mubr.msk.bf16.gmra.mrb[108].mxu0 %vm600_vm0, %v11211_v39  ;;  %9063 = vmatmul.mubr.msk.bf16.gmra.mrb[108].mxu1 %vm600_vm0, %v11211_v39 }
 0x128   : > { %1009 = vmatprep.mubr.bf16.mxu0 %v16223_v8  ;;  %1362 = vmatprep.mubr.bf16.mxu1 %v16223_v8 }
 0x12a   : > { %v11239_v58 = vpop.f32.mrb[4].mxu0  ;;  %v11241_v59 = vpop.f32.mrb[4].mxu1 }
 0x12b   : > { %16665 = vst [vmem:[#allocation12_spill] sm:$0xff] %v11241_v59  ;;  %v11243_v61 = vpop.f32.mrb[5].mxu0  ;;  %v11247_v0 = vpop.f32.mrb[5].mxu1  ;;  %v375_v59 = vld [vmem:[%s10883_s18 + $0x1f8] sm:$0xff] }
 0x12c   : > { %16666 = vst [vmem:[#allocation13_spill] sm:$0xff] %v11247_v0  ;;  %v11249_v3 = vpop.f32.mrb[6].mxu0  ;;  %v11253_v9 = vpop.f32.mrb[6].mxu1 }
 0x12d   : > { %16667 = vst [vmem:[#allocation14_spill] sm:$0xff] %v11253_v9  ;;  %v11255_v10 = vpop.f32.mrb[7].mxu0  ;;  %v11259_v15 = vpop.f32.mrb[7].mxu1 }
 0x12e   : > { %16668 = vst [vmem:[#allocation15_spill] sm:$0xff] %v11259_v15 }
 0x12f   : > { %9032 = vmatmul.mubr.msk.bf16.gmra.mrb[112].mxu0 %vm600_vm0, %v11245_v63  ;;  %9064 = vmatmul.mubr.msk.bf16.gmra.mrb[112].mxu1 %vm600_vm0, %v11245_v63 }
 0x130   : > { %1019 = vmatprep.mubr.bf16.mxu0 %v16223_v8  ;;  %1372 = vmatprep.mubr.bf16.mxu1 %v16223_v8 }
 0x132   : > { %v11273_v25 = vpop.f32.mrb[8].mxu0  ;;  %v11275_v26 = vpop.f32.mrb[8].mxu1 }
 0x133   : > { %16669 = vst [vmem:[#allocation16_spill] sm:$0xff] %v11275_v26  ;;  %v11277_v28 = vpop.f32.mrb[9].mxu0  ;;  %v11281_v32 = vpop.f32.mrb[9].mxu1 }
 0x134   : > { %16670 = vst [vmem:[#allocation17_spill] sm:$0xff] %v11281_v32  ;;  %v11283_v33 = vpop.f32.mrb[10].mxu0  ;;  %v11287_v56 = vpop.f32.mrb[10].mxu1 }
 0x135   : > { %16671 = vst [vmem:[#allocation18_spill] sm:$0xff] %v11287_v56  ;;  %v11289_v13 = vpop.f32.mrb[11].mxu0  ;;  %v11293_v49 = vpop.f32.mrb[11].mxu1 }
 0x136   : > { %16672 = vst [vmem:[#allocation19_spill] sm:$0xff] %v11293_v49  ;;  %v374_v49 = vld [vmem:[%s10883_s18 + $0x1f0] sm:$0xff] }
 0x137   : > { %9033 = vmatmul.mubr.msk.bf16.gmra.mrb[116].mxu0 %vm600_vm0, %v11279_v29  ;;  %9065 = vmatmul.mubr.msk.bf16.gmra.mrb[116].mxu1 %vm600_vm0, %v11279_v29 }
 0x138   : > { %1029 = vmatprep.mubr.bf16.mxu0 %v16223_v8  ;;  %1382 = vmatprep.mubr.bf16.mxu1 %v16223_v8 }
 0x13a   : > { %v11307_v19 = vpop.f32.mrb[12].mxu0  ;;  %v11309_v5 = vpop.f32.mrb[12].mxu1 }
 0x13b   : > { %16673 = vst [vmem:[#allocation20_spill] sm:$0xff] %v11307_v19  ;;  %16674 = vst [vmem:[#allocation21_spill] sm:$0xff] %v11309_v5  ;;  %v11311_v22 = vpop.f32.mrb[13].mxu0  ;;  %v11315_v23 = vpop.f32.mrb[13].mxu1  ;;  %v10246_v19 = vld [vmem:[#allocation2 + $0x64] ss:$16 sps:$4 sm:$0xff]  }
 0x13c   : > { %16675 = vst [vmem:[#allocation22_spill] sm:$0xff] %v11315_v23  ;;  %v11317_v45 = vpop.f32.mrb[14].mxu0  ;;  %v11321_v26 = vpop.f32.mrb[14].mxu1 }
 0x13d   : > { %16676 = vst [vmem:[#allocation23_spill] sm:$0xff] %v11321_v26  ;;  %v11323_v8 = vpop.f32.mrb[15].mxu0  ;;  %v11327_v32 = vpop.f32.mrb[15].mxu1  ;;  %v11347_v26 = vpack.c.bf16 %v375_v59, %v374_v49 }
 0x13e   : > { %16677 = vst [vmem:[#allocation24_spill] sm:$0xff] %v11327_v32 }
 0x13f   : > { %9034 = vmatmul.mubr.msk.bf16.gmra.mrb[120].mxu0 %vm600_vm0, %v11313_v18  ;;  %9066 = vmatmul.mubr.msk.bf16.gmra.mrb[120].mxu1 %vm600_vm0, %v11313_v18 }
 0x140   : > { %1039 = vmatprep.mubr.bf16.mxu0 %v16678_v52  ;;  %1392 = vmatprep.mubr.bf16.mxu1 %v16678_v52 }
 0x142   : > { %v11341_v56 = vpop.f32.mrb[16].mxu0  ;;  %v11343_v5 = vpop.f32.mrb[16].mxu1 }
 0x143   : > { %16679 = vst [vmem:[#allocation25_spill] sm:$0xff] %v11341_v56  ;;  %16680 = vst [vmem:[#allocation26_spill] sm:$0xff] %v11343_v5  ;;  %v11345_v54 = vpop.f32.mrb[17].mxu0  ;;  %v11349_v9 = vpop.f32.mrb[17].mxu1 }
 0x144   : > { %16681 = vst [vmem:[#allocation27_spill] sm:$0xff] %v11345_v54  ;;  %16682 = vst [vmem:[#allocation28_spill] sm:$0xff] %v11349_v9  ;;  %v11351_v55 = vpop.f32.mrb[18].mxu0  ;;  %v11355_v32 = vpop.f32.mrb[18].mxu1  ;;  %v10243_v54 = vld [vmem:[#allocation2 + $0x4c] ss:$16 sps:$4 sm:$0xff]  }
 0x145   : > { %16683 = vst [vmem:[#allocation29_spill] sm:$0xff] %v11351_v55  ;;  %16684 = vst [vmem:[#allocation30_spill] sm:$0xff] %v11355_v32  ;;  %v11357_v0 = vpop.f32.mrb[19].mxu0  ;;  %v11361_v36 = vpop.f32.mrb[19].mxu1  ;;  %v10234_v55 = vld [vmem:[#allocation2 + $0x24] ss:$16 sps:$4 sm:$0xff]  }
 0x146   : > { %16685 = vst [vmem:[#allocation31_spill] sm:$0xff] %v11357_v0  ;;  %16686 = vst [vmem:[#allocation32_spill] sm:$0xff] %v11361_v36  ;;  %v10237_v0 = vld [vmem:[#allocation2 + $0x2c] ss:$16 sps:$4 sm:$0xff]  }
 0x147   : > { %9035 = vmatmul.mubr.msk.bf16.gmra.mrb[124].mxu0 %vm600_vm0, %v11347_v26  ;;  %9067 = vmatmul.mubr.msk.bf16.gmra.mrb[124].mxu1 %vm600_vm0, %v11347_v26 }
 0x148   : > { %1435 = vmatprep.mubr.bf16.mxu0 %v16678_v52  ;;  %1788 = vmatprep.mubr.bf16.mxu1 %v16678_v52 }
 0x14a   : > { %v11373_v23 = vpop.f32.mrb[20].mxu0  ;;  %v11375_v15 = vpop.f32.mrb[20].mxu1 }
 0x14b   : > { %16687 = vst [vmem:[#allocation33_spill] sm:$0xff] %v11373_v23  ;;  %16688 = vst [vmem:[#allocation34_spill] sm:$0xff] %v11375_v15  ;;  %v11377_v5 = vpop.f32.mrb[21].mxu0  ;;  %v11379_v49 = vpop.f32.mrb[21].mxu1  ;;  %v10232_v23 = vld [vmem:[#allocation2 + $0x20] ss:$16 sps:$4 sm:$0xff]  }
 0x14c   : > { %16689 = vst [vmem:[#allocation35_spill] sm:$0xff] %v11377_v5  ;;  %16690 = vst [vmem:[#allocation36_spill] sm:$0xff] %v11379_v49  ;;  %v11381_v32 = vpop.f32.mrb[22].mxu0  ;;  %v11385_v9 = vpop.f32.mrb[22].mxu1  ;;  %v10240_v15 = vld [vmem:[#allocation2 + $0x44] ss:$16 sps:$4 sm:$0xff]  }
 0x14d   : > { %16691 = vst [vmem:[#allocation37_spill] sm:$0xff] %v11381_v32  ;;  %16692 = vst [vmem:[#allocation38_spill] sm:$0xff] %v11385_v9  ;;  %v11387_v36 = vpop.f32.mrb[23].mxu0  ;;  %v11391_v56 = vpop.f32.mrb[23].mxu1 }
 0x14e   : > { %16693 = vst [vmem:[#allocation39_spill] sm:$0xff] %v11387_v36  ;;  %16694 = vst [vmem:[#allocation40_spill] sm:$0xff] %v11391_v56  ;;  %v10247_v56 = vld [vmem:[#allocation2 + $0x68] ss:$16 sps:$4 sm:$0xff]  }
 0x14f   : > { %9068 = vmatmul.mubr.msk.bf16.vlgmr.msra.gmra.mrb[128].mxu0 %vm600_vm0, %v10899_v41  ;;  %9100 = vmatmul.mubr.msk.bf16.vlgmr.msra.gmra.mrb[128].mxu1 %vm600_vm0, %v10899_v41 }
 0x150   : > { %4521 = vmatpush1.bf16.msra.mxu0 %v10226_v46  ;;  %5933 = vmatpush1.bf16.msra.mxu1 %v10229_v42  ;;  %v10249_v42 = vld [vmem:[#allocation2 + $0x6c] ss:$16 sps:$4 sm:$0xff]  }
 0x151   : > { %1445 = vmatprep.mubr.bf16.mxu0 %v16678_v52  ;;  %1798 = vmatprep.mubr.bf16.mxu1 %v16678_v52 }
 0x152   : > { %v11402_v9 = vpop.f32.mrb[24].mxu0  ;;  %4522 = vmatprep.subr.bf16.mxu0 %v10234_v55  ;;  %v11405_v32 = vpop.f32.mrb[24].mxu1  ;;  %5934 = vmatprep.subr.bf16.mxu1 %v10237_v0  ;;  %v10238_v55 = vld [vmem:[#allocation2 + $0x40] ss:$16 sps:$4 sm:$0xff]   ;;  %v10241_v0 = vld [vmem:[#allocation2 + $0x48] ss:$16 sps:$4 sm:$0xff]  }
 0x153   : > { %16695 = vst [vmem:[#allocation41_spill] sm:$0xff] %v11402_v9  ;;  %16696 = vst [vmem:[#allocation42_spill] sm:$0xff] %v11405_v32  ;;  %v11407_v5 = vpop.f32.mrb[25].mxu0  ;;  %v11409_v59 = vpop.f32.mrb[25].mxu1 }
 0x154   : > { %16697 = vst [vmem:[#allocation43_spill] sm:$0xff] %v11407_v5  ;;  %16698 = vst [vmem:[#allocation44_spill] sm:$0xff] %v11409_v59  ;;  %v11411_v41 = vpop.f32.mrb[26].mxu0  ;;  %4523 = vmatpush1.bf16.msra.mxu0 %v10232_v23  ;;  %v11415_v46 = vpop.f32.mrb[26].mxu1  ;;  %5935 = vmatpush1.bf16.msra.mxu1 %v10235_v51  ;;  %v10252_v23 = vld [vmem:[#allocation2 + $0x84] ss:$16 sps:$4 sm:$0xff]  }
 0x155   : > { %16699 = vst [vmem:[#allocation45_spill] sm:$0xff] %v11411_v41  ;;  %16700 = vst [vmem:[#allocation46_spill] sm:$0xff] %v11415_v46  ;;  %v11417_v49 = vpop.f32.mrb[27].mxu0  ;;  %4524 = vmatprep.subr.bf16.mxu0 %v10240_v15  ;;  %v11421_v36 = vpop.f32.mrb[27].mxu1  ;;  %5936 = vmatprep.subr.bf16.mxu1 %v10243_v54  ;;  %v10244_v15 = vld [vmem:[#allocation2 + $0x60] ss:$16 sps:$4 sm:$0xff]  }
 0x156   : > { %16701 = vst [vmem:[#allocation47_spill] sm:$0xff] %v11417_v49  ;;  %16702 = vst [vmem:[#allocation48_spill] sm:$0xff] %v11421_v36  ;;  %v10255_v51 = vld [vmem:[#allocation2 + $0x8c] ss:$16 sps:$4 sm:$0xff]   ;;  %v10258_v5 = vld [vmem:[#allocation2 + $0xa4] ss:$16 sps:$4 sm:$0xff]  }
 0x157   : > { %9069 = vmatmul.mubr.msk.bf16.gmra.mrb[132].mxu0 %vm600_vm0, %v10933_v60  ;;  %9101 = vmatmul.mubr.msk.bf16.gmra.mrb[132].mxu1 %vm600_vm0, %v10933_v60  ;;  %v10264_v49 = vld [vmem:[#allocation2 + $0xc4] ss:$16 sps:$4 sm:$0xff]  }
 0x158   : > { %1455 = vmatprep.mubr.bf16.mxu0 %v16678_v52  ;;  %1808 = vmatprep.mubr.bf16.mxu1 %v16678_v52 }
 0x159   : > { %4525 = vmatpush1.bf16.msra.mxu0 %v10238_v55  ;;  %5937 = vmatpush1.bf16.msra.mxu1 %v10241_v0  ;;  %v10261_v55 = vld [vmem:[#allocation2 + $0xac] ss:$16 sps:$4 sm:$0xff]   ;;  %v10259_v0 = vld [vmem:[#allocation2 + $0xa8] ss:$16 sps:$4 sm:$0xff]  }
 0x15a   : > { %v11433_v54 = vpop.f32.mrb[28].mxu0  ;;  %4526 = vmatprep.subr.bf16.mxu0 %v10246_v19  ;;  %v11435_v32 = vpop.f32.mrb[28].mxu1  ;;  %5938 = vmatprep.subr.bf16.mxu1 %v10249_v42  ;;  %v10250_v19 = vld [vmem:[#allocation2 + $0x80] ss:$16 sps:$4 sm:$0xff]   ;;  %v10253_v42 = vld [vmem:[#allocation2 + $0x88] ss:$16 sps:$4 sm:$0xff]  }
 0x15b   : > { %16703 = vst [vmem:[#allocation49_spill] sm:$0xff] %v11433_v54  ;;  %16704 = vst [vmem:[#allocation50_spill] sm:$0xff] %v11435_v32  ;;  %v11437_v46 = vpop.f32.mrb[29].mxu0  ;;  %v11439_v59 = vpop.f32.mrb[29].mxu1 }
 0x15c   : > { %16705 = vst [vmem:[#allocation51_spill] sm:$0xff] %v11437_v46  ;;  %16706 = vst [vmem:[#allocation52_spill] sm:$0xff] %v11439_v59  ;;  %v11441_v60 = vpop.f32.mrb[30].mxu0  ;;  %v11445_v36 = vpop.f32.mrb[30].mxu1  ;;  %v10276_v46 = vld [vmem:[#allocation2 + $0x104] ss:$16 sps:$4 sm:$0xff]  }
 0x15d   : > { %16707 = vst [vmem:[#allocation53_spill] sm:$0xff] %v11441_v60  ;;  %16708 = vst [vmem:[#allocation54_spill] sm:$0xff] %v11445_v36  ;;  %v11447_v9 = vpop.f32.mrb[31].mxu0  ;;  %4527 = vmatpush1.bf16.msra.mxu0 %v10244_v15  ;;  %v11451_v41 = vpop.f32.mrb[31].mxu1  ;;  %5939 = vmatpush1.bf16.msra.mxu1 %v10247_v56  ;;  %v10256_v56 = vld [vmem:[#allocation2 + $0xa0] ss:$16 sps:$4 sm:$0xff]  }
 0x15e   : > { %16709 = vst [vmem:[#allocation55_spill] sm:$0xff] %v11451_v41  ;;  %4528 = vmatprep.subr.bf16.mxu0 %v10252_v23  ;;  %5940 = vmatprep.subr.bf16.mxu1 %v10255_v51  ;;  %v10267_v15 = vld [vmem:[#allocation2 + $0xcc] ss:$16 sps:$4 sm:$0xff]   ;;  %v10270_v60 = vld [vmem:[#allocation2 + $0xe4] ss:$16 sps:$4 sm:$0xff]  }
 0x15f   : > { %9070 = vmatmul.mubr.msk.bf16.gmra.mrb[136].mxu0 %vm600_vm0, %v10943_v1  ;;  %9102 = vmatmul.mubr.msk.bf16.gmra.mrb[136].mxu1 %vm600_vm0, %v10943_v1 }
 0x160   : > { %1465 = vmatprep.mubr.bf16.mxu0 %v16678_v52  ;;  %1818 = vmatprep.mubr.bf16.mxu1 %v16678_v52 }
 0x161   : > { %4529 = vmatpush1.bf16.msra.mxu0 %v10250_v19  ;;  %5941 = vmatpush1.bf16.msra.mxu1 %v10253_v42  ;;  %v10273_v19 = vld [vmem:[#allocation2 + $0xec] ss:$16 sps:$4 sm:$0xff]   ;;  %v10271_v42 = vld [vmem:[#allocation2 + $0xe8] ss:$16 sps:$4 sm:$0xff]  }
 0x162   : > { %v11463_v23 = vpop.f32.mrb[32].mxu0  ;;  %4530 = vmatprep.subr.bf16.mxu0 %v10258_v5  ;;  %v11465_v51 = vpop.f32.mrb[32].mxu1  ;;  %5942 = vmatprep.subr.bf16.mxu1 %v10261_v55  ;;  %v10262_v5 = vld [vmem:[#allocation2 + $0xc0] ss:$16 sps:$4 sm:$0xff]   ;;  %v10265_v55 = vld [vmem:[#allocation2 + $0xc8] ss:$16 sps:$4 sm:$0xff]  }
 0x163   : > { %16710 = vst [vmem:[#allocation56_spill] sm:$0xff] %v11463_v23  ;;  %16711 = vst [vmem:[#allocation57_spill] sm:$0xff] %v11465_v51  ;;  %v11467_v32 = vpop.f32.mrb[33].mxu0  ;;  %v11469_v36 = vpop.f32.mrb[33].mxu1 }
 0x164   : > { %16712 = vst [vmem:[#allocation58_spill] sm:$0xff] %v11467_v32  ;;  %16713 = vst [vmem:[#allocation59_spill] sm:$0xff] %v11469_v36  ;;  %v11471_v1 = vpop.f32.mrb[34].mxu0  ;;  %v11475_v59 = vpop.f32.mrb[34].mxu1  ;;  %v10288_v32 = vld [vmem:[#allocation2 + $0x144] ss:$16 sps:$4 sm:$0xff]  }
 0x165   : > { %16714 = vst [vmem:[#allocation60_spill] sm:$0xff] %v11471_v1  ;;  %16715 = vst [vmem:[#allocation61_spill] sm:$0xff] %v11475_v59  ;;  %v11477_v41 = vpop.f32.mrb[35].mxu0  ;;  %4531 = vmatpush1.bf16.msra.mxu0 %v10256_v56  ;;  %v11481_v54 = vpop.f32.mrb[35].mxu1  ;;  %5943 = vmatpush1.bf16.msra.mxu1 %v10259_v0  ;;  %v10279_v56 = vld [vmem:[#allocation2 + $0x10c] ss:$16 sps:$4 sm:$0xff]  }
 0x166   : > { %16716 = vst [vmem:[#allocation62_spill] sm:$0xff] %v11481_v54  ;;  %4532 = vmatprep.subr.bf16.mxu0 %v10264_v49  ;;  %5944 = vmatprep.subr.bf16.mxu1 %v10267_v15  ;;  %v10268_v49 = vld [vmem:[#allocation2 + $0xe0] ss:$16 sps:$4 sm:$0xff]   ;;  %v10282_v1 = vld [vmem:[#allocation2 + $0x124] ss:$16 sps:$4 sm:$0xff]  }
 0x167   : > { %9071 = vmatmul.mubr.msk.bf16.gmra.mrb[140].mxu0 %vm600_vm0, %v10953_v4  ;;  %9103 = vmatmul.mubr.msk.bf16.gmra.mrb[140].mxu1 %vm600_vm0, %v10953_v4 }
 0x168   : > { %1475 = vmatprep.mubr.bf16.mxu0 %v16678_v52  ;;  %1828 = vmatprep.mubr.bf16.mxu1 %v16678_v52 }
 0x169   : > { %4533 = vmatpush1.bf16.msra.mxu0 %v10262_v5  ;;  %5945 = vmatpush1.bf16.msra.mxu1 %v10265_v55  ;;  %v10285_v5 = vld [vmem:[#allocation2 + $0x12c] ss:$16 sps:$4 sm:$0xff]   ;;  %v10283_v55 = vld [vmem:[#allocation2 + $0x128] ss:$16 sps:$4 sm:$0xff]  }
 0x16a   : > { %v11493_v0 = vpop.f32.mrb[36].mxu0  ;;  %4534 = vmatprep.subr.bf16.mxu0 %v10270_v60  ;;  %v11495_v15 = vpop.f32.mrb[36].mxu1  ;;  %5946 = vmatprep.subr.bf16.mxu1 %v10273_v19  ;;  %v10274_v60 = vld [vmem:[#allocation2 + $0x100] ss:$16 sps:$4 sm:$0xff]   ;;  %v10277_v19 = vld [vmem:[#allocation2 + $0x108] ss:$16 sps:$4 sm:$0xff]  }
 0x16b   : > { %16717 = vst [vmem:[#allocation63_spill] sm:$0xff] %v11493_v0  ;;  %16718 = vst [vmem:[#allocation64_spill] sm:$0xff] %v11495_v15  ;;  %v11497_v51 = vpop.f32.mrb[37].mxu0  ;;  %v11499_v59 = vpop.f32.mrb[37].mxu1 }
 0x16c   : > { %16719 = vst [vmem:[#allocation65_spill] sm:$0xff] %v11499_v59  ;;  %v11501_v4 = vpop.f32.mrb[38].mxu0  ;;  %v11505_v36 = vpop.f32.mrb[38].mxu1 }
 0x16d   : > { %16720 = vst [vmem:[#allocation66_spill] sm:$0xff] %v11501_v4  ;;  %16721 = vst [vmem:[#allocation67_spill] sm:$0xff] %v11505_v36  ;;  %v11507_v54 = vpop.f32.mrb[39].mxu0  ;;  %4535 = vmatpush1.bf16.msra.mxu0 %v10268_v49  ;;  %v11511_v23 = vpop.f32.mrb[39].mxu1  ;;  %5947 = vmatpush1.bf16.msra.mxu1 %v10271_v42  ;;  %v10291_v49 = vld [vmem:[#allocation2 + $0x14c] ss:$16 sps:$4 sm:$0xff]  }
 0x16e   : > { %16722 = vst [vmem:[#allocation68_spill] sm:$0xff] %v11511_v23  ;;  %4536 = vmatprep.subr.bf16.mxu0 %v10276_v46  ;;  %5948 = vmatprep.subr.bf16.mxu1 %v10279_v56  ;;  %v10280_v46 = vld [vmem:[#allocation2 + $0x120] ss:$16 sps:$4 sm:$0xff]  }
 0x16f   : > { %9072 = vmatmul.mubr.msk.bf16.gmra.mrb[144].mxu0 %vm600_vm0, %v10963_v7  ;;  %9104 = vmatmul.mubr.msk.bf16.gmra.mrb[144].mxu1 %vm600_vm0, %v10963_v7 }
 0x170   : > { %1485 = vmatprep.mubr.bf16.mxu0 %v16678_v52  ;;  %1838 = vmatprep.mubr.bf16.mxu1 %v16678_v52 }
 0x171   : > { %4537 = vmatpush1.bf16.msra.mxu0 %v10274_v60  ;;  %5949 = vmatpush1.bf16.msra.mxu1 %v10277_v19 }
 0x172   : > { %v11523_v42 = vpop.f32.mrb[40].mxu0  ;;  %4538 = vmatprep.subr.bf16.mxu0 %v10282_v1  ;;  %v11525_v56 = vpop.f32.mrb[40].mxu1  ;;  %5950 = vmatprep.subr.bf16.mxu1 %v10285_v5  ;;  %v10286_v1 = vld [vmem:[#allocation2 + $0x140] ss:$16 sps:$4 sm:$0xff]   ;;  %v10289_v5 = vld [vmem:[#allocation2 + $0x148] ss:$16 sps:$4 sm:$0xff]  }
 0x173   : > { %16723 = vst [vmem:[#allocation69_spill] sm:$0xff] %v11525_v56  ;;  %v11527_v15 = vpop.f32.mrb[41].mxu0  ;;  %v11529_v36 = vpop.f32.mrb[41].mxu1 }
 0x174   : > { %16724 = vst [vmem:[#allocation70_spill] sm:$0xff] %v11529_v36  ;;  %v11531_v7 = vpop.f32.mrb[42].mxu0  ;;  %v11535_v59 = vpop.f32.mrb[42].mxu1  ;;  %v10295_v36 = vld [vmem:[#allocation2 + $0x168] ss:$16 sps:$4 sm:$0xff]  }
 0x175   : > { %16725 = vst [vmem:[#allocation71_spill] sm:$0xff] %v11535_v59  ;;  %v11537_v23 = vpop.f32.mrb[43].mxu0  ;;  %4539 = vmatpush1.bf16.msra.mxu0 %v10280_v46  ;;  %v11541_v0 = vpop.f32.mrb[43].mxu1  ;;  %5951 = vmatpush1.bf16.msra.mxu1 %v10283_v55 }
 0x176   : > { %16726 = vst [vmem:[#allocation72_spill] sm:$0xff] %v11541_v0  ;;  %4540 = vmatprep.subr.bf16.mxu0 %v10288_v32  ;;  %5952 = vmatprep.subr.bf16.mxu1 %v10291_v49  ;;  %v10297_v0 = vld [vmem:[#allocation2 + $0x16c] ss:$16 sps:$4 sm:$0xff]  }
 0x177   : > { %9073 = vmatmul.mubr.msk.bf16.gmra.mrb[148].mxu0 %vm600_vm0, %v10973_v11  ;;  %9105 = vmatmul.mubr.msk.bf16.gmra.mrb[148].mxu1 %vm600_vm0, %v10973_v11 }
 0x178   : > { %1495 = vmatprep.mubr.bf16.mxu0 %v16678_v52  ;;  %1848 = vmatprep.mubr.bf16.mxu1 %v16678_v52 }
 0x179   : > { %4541 = vmatpush1.bf16.msra.mxu0 %v10286_v1  ;;  %5953 = vmatpush1.bf16.msra.mxu1 %v10289_v5  ;;  %v10292_v1 = vld [vmem:[#allocation2 + $0x160] ss:$16 sps:$4 sm:$0xff]  }
 0x17a   : > { %v11553_v32 = vpop.f32.mrb[44].mxu0  ;;  %v11555_v55 = vpop.f32.mrb[44].mxu1  ;;  %5954 = vmatprep.subr.bf16.mxu1 %v10297_v0 }
 0x17b   : > { %16727 = vst [vmem:[#allocation73_spill] sm:$0xff] %v11553_v32  ;;  %16728 = vst [vmem:[#allocation74_spill] sm:$0xff] %v11555_v55  ;;  %v11557_v46 = vpop.f32.mrb[45].mxu0  ;;  %v11559_v19 = vpop.f32.mrb[45].mxu1  ;;  %v10294_v55 = vld [vmem:[#allocation2 + $0x164] ss:$16 sps:$4 sm:$0xff]  }
 0x17c   : > { %16729 = vst [vmem:[#allocation75_spill] sm:$0xff] %v11557_v46  ;;  %16730 = vst [vmem:[#allocation76_spill] sm:$0xff] %v11559_v19  ;;  %v11561_v49 = vpop.f32.mrb[46].mxu0  ;;  %v11565_v11 = vpop.f32.mrb[46].mxu1  ;;  %4542 = vmatprep.subr.bf16.mxu0 %v10294_v55 }
 0x17d   : > { %16731 = vst [vmem:[#allocation77_spill] sm:$0xff] %v11561_v49  ;;  %16732 = vst [vmem:[#allocation78_spill] sm:$0xff] %v11565_v11  ;;  %v11567_v4 = vpop.f32.mrb[47].mxu0  ;;  %v11571_v56 = vpop.f32.mrb[47].mxu1  ;;  %4543 = vmatpush1.bf16.msra.mxu0 %v10292_v1  ;;  %5955 = vmatpush1.bf16.msra.mxu1 %v10295_v36 }
 0x17e   : > { %16733 = vst [vmem:[#allocation79_spill] sm:$0xff] %v11567_v4  ;;  %16734 = vst [vmem:[#allocation80_spill] sm:$0xff] %v11571_v56 }
 0x17f   : > { %9074 = vmatmul.mubr.msk.bf16.gmra.mrb[152].mxu0 %vm600_vm0, %v10983_v14  ;;  %9106 = vmatmul.mubr.msk.bf16.gmra.mrb[152].mxu1 %vm600_vm0, %v10983_v14 }
 0x180   : > { %1505 = vmatprep.mubr.bf16.mxu0 %v16678_v52  ;;  %1858 = vmatprep.mubr.bf16.mxu1 %v16678_v52 }
 0x182   : > { %v11583_v60 = vpop.f32.mrb[48].mxu0  ;;  %v11585_v11 = vpop.f32.mrb[48].mxu1 }
 0x183   : > { %16735 = vst [vmem:[#allocation81_spill] sm:$0xff] %v11583_v60  ;;  %16736 = vst [vmem:[#allocation82_spill] sm:$0xff] %v11585_v11  ;;  %v11587_v5 = vpop.f32.mrb[49].mxu0  ;;  %v11589_v32 = vpop.f32.mrb[49].mxu1  ;;  %v10298_v11 = vld [vmem:[#allocation2 + $0x180] ss:$16 sps:$4 sm:$0xff]  }
 0x184   : > { %16737 = vst [vmem:[#allocation83_spill] sm:$0xff] %v11589_v32  ;;  %v11591_v59 = vpop.f32.mrb[50].mxu0  ;;  %v11595_v19 = vpop.f32.mrb[50].mxu1 }
 0x185   : > { %16738 = vst [vmem:[#allocation84_spill] sm:$0xff] %v11591_v59  ;;  %16739 = vst [vmem:[#allocation85_spill] sm:$0xff] %v11595_v19  ;;  %v11597_v56 = vpop.f32.mrb[51].mxu0  ;;  %v11601_v46 = vpop.f32.mrb[51].mxu1 }
 0x186   : > { %16740 = vst [vmem:[#allocation86_spill] sm:$0xff] %v11601_v46 }
 0x187   : > { %9075 = vmatmul.mubr.msk.bf16.gmra.mrb[156].mxu0 %vm600_vm0, %v10993_v17  ;;  %9107 = vmatmul.mubr.msk.bf16.gmra.mrb[156].mxu1 %vm600_vm0, %v10993_v17 }
 0x188   : > { %1515 = vmatprep.mubr.bf16.mxu0 %v16678_v52  ;;  %1868 = vmatprep.mubr.bf16.mxu1 %v16678_v52 }
 0x18a   : > { %v11613_v0 = vpop.f32.mrb[52].mxu0  ;;  %v11615_v1 = vpop.f32.mrb[52].mxu1 }
 0x18b   : > { %16741 = vst [vmem:[#allocation87_spill] sm:$0xff] %v11613_v0  ;;  %16742 = vst [vmem:[#allocation88_spill] sm:$0xff] %v11615_v1  ;;  %v11617_v36 = vpop.f32.mrb[53].mxu0  ;;  %v11619_v49 = vpop.f32.mrb[53].mxu1  ;;  %v10300_v1 = vld [vmem:[#allocation2 + $0x184] ss:$16 sps:$4 sm:$0xff]  }
 0x18c   : > { %16743 = vst [vmem:[#allocation89_spill] sm:$0xff] %v11617_v36  ;;  %16744 = vst [vmem:[#allocation90_spill] sm:$0xff] %v11619_v49  ;;  %v11621_v14 = vpop.f32.mrb[54].mxu0  ;;  %v11625_v4 = vpop.f32.mrb[54].mxu1  ;;  %v10301_v0 = vld [vmem:[#allocation2 + $0x188] ss:$16 sps:$4 sm:$0xff]   ;;  %4544 = vmatprep.subr.bf16.mxu0 %v10300_v1 }
 0x18d   : > { %16745 = vst [vmem:[#allocation91_spill] sm:$0xff] %v11621_v14  ;;  %16746 = vst [vmem:[#allocation92_spill] sm:$0xff] %v11625_v4  ;;  %v11627_v17 = vpop.f32.mrb[55].mxu0  ;;  %v11631_v19 = vpop.f32.mrb[55].mxu1  ;;  %v10303_v14 = vld [vmem:[#allocation2 + $0x18c] ss:$16 sps:$4 sm:$0xff]   ;;  %4545 = vmatpush1.bf16.msra.mxu0 %v10298_v11 }
 0x18e   : > { %16747 = vst [vmem:[#allocation93_spill] sm:$0xff] %v11627_v17  ;;  %16748 = vst [vmem:[#allocation94_spill] sm:$0xff] %v11631_v19  ;;  %5956 = vmatprep.subr.bf16.mxu1 %v10303_v14 }
 0x18f   : > { %9076 = vmatmul.mubr.msk.bf16.gmra.mrb[160].mxu0 %vm600_vm0, %v11003_v20  ;;  %9108 = vmatmul.mubr.msk.bf16.gmra.mrb[160].mxu1 %vm600_vm0, %v11003_v20 }
 0x190   : > { %1525 = vmatprep.mubr.bf16.mxu0 %v16678_v52  ;;  %1878 = vmatprep.mubr.bf16.mxu1 %v16678_v52 }
 0x191   : > { %5957 = vmatpush1.bf16.msra.mxu1 %v10301_v0 }
 0x192   : > { %v11643_v55 = vpop.f32.mrb[56].mxu0  ;;  %v11645_v4 = vpop.f32.mrb[56].mxu1 }
 0x193   : > { %16749 = vst [vmem:[#allocation95_spill] sm:$0xff] %v11643_v55  ;;  %16750 = vst [vmem:[#allocation96_spill] sm:$0xff] %v11645_v4  ;;  %v11647_v32 = vpop.f32.mrb[57].mxu0  ;;  %v11649_v36 = vpop.f32.mrb[57].mxu1  ;;  %v10304_v4 = vld [vmem:[#allocation2 + $0x1a0] ss:$16 sps:$4 sm:$0xff]  }
 0x194   : > { %16751 = vst [vmem:[#allocation97_spill] sm:$0xff] %v11649_v36  ;;  %v11651_v46 = vpop.f32.mrb[58].mxu0  ;;  %v11655_v49 = vpop.f32.mrb[58].mxu1 }
 0x195   : > { %16752 = vst [vmem:[#allocation98_spill] sm:$0xff] %v11651_v46  ;;  %16753 = vst [vmem:[#allocation99_spill] sm:$0xff] %v11655_v49  ;;  %v11657_v19 = vpop.f32.mrb[59].mxu0  ;;  %v11661_v60 = vpop.f32.mrb[59].mxu1 }
 0x196   : > { %16754 = vst [vmem:[#allocation100_spill] sm:$0xff] %v11661_v60 }
 0x197   : > { %9077 = vmatmul.mubr.msk.bf16.gmra.mrb[164].mxu0 %vm600_vm0, %v11025_v31  ;;  %9109 = vmatmul.mubr.msk.bf16.gmra.mrb[164].mxu1 %vm600_vm0, %v11025_v31 }
 0x198   : > { %1535 = vmatprep.mubr.bf16.mxu0 %v16678_v52  ;;  %1888 = vmatprep.mubr.bf16.mxu1 %v16678_v52 }
 0x19a   : > { %v11673_v11 = vpop.f32.mrb[60].mxu0  ;;  %v11675_v14 = vpop.f32.mrb[60].mxu1 }
 0x19b   : > { %16755 = vst [vmem:[#allocation101_spill] sm:$0xff] %v11673_v11  ;;  %16756 = vst [vmem:[#allocation102_spill] sm:$0xff] %v11675_v14  ;;  %v11677_v0 = vpop.f32.mrb[61].mxu0  ;;  %v11679_v17 = vpop.f32.mrb[61].mxu1  ;;  %v10306_v14 = vld [vmem:[#allocation2 + $0x1a4] ss:$16 sps:$4 sm:$0xff]  }
 0x19c   : > { %16757 = vst [vmem:[#allocation103_spill] sm:$0xff] %v11677_v0  ;;  %16758 = vst [vmem:[#allocation104_spill] sm:$0xff] %v11679_v17  ;;  %v11681_v20 = vpop.f32.mrb[62].mxu0  ;;  %v11685_v59 = vpop.f32.mrb[62].mxu1  ;;  %v10307_v11 = vld [vmem:[#allocation2 + $0x1a8] ss:$16 sps:$4 sm:$0xff]   ;;  %4546 = vmatprep.subr.bf16.mxu0 %v10306_v14 }
 0x19d   : > { %16759 = vst [vmem:[#allocation105_spill] sm:$0xff] %v11681_v20  ;;  %16760 = vst [vmem:[#allocation106_spill] sm:$0xff] %v11685_v59  ;;  %v11687_v31 = vpop.f32.mrb[63].mxu0  ;;  %v11691_v49 = vpop.f32.mrb[63].mxu1  ;;  %v10309_v20 = vld [vmem:[#allocation2 + $0x1ac] ss:$16 sps:$4 sm:$0xff]   ;;  %4547 = vmatpush1.bf16.msra.mxu0 %v10304_v4 }
 0x19e   : > { %16761 = vst [vmem:[#allocation107_spill] sm:$0xff] %v11687_v31  ;;  %16762 = vst [vmem:[#allocation108_spill] sm:$0xff] %v11691_v49  ;;  %5958 = vmatprep.subr.bf16.mxu1 %v10309_v20 }
 0x19f   : > { %9078 = vmatmul.mubr.msk.bf16.gmra.mrb[168].mxu0 %vm600_vm0, %v11035_v34  ;;  %9110 = vmatmul.mubr.msk.bf16.gmra.mrb[168].mxu1 %vm600_vm0, %v11035_v34 }
 0x1a0   : > { %1545 = vmatprep.mubr.bf16.mxu0 %v16678_v52  ;;  %1898 = vmatprep.mubr.bf16.mxu1 %v16678_v52 }
 0x1a1   : > { %5959 = vmatpush1.bf16.msra.mxu1 %v10307_v11 }
 0x1a2   : > { %v11703_v1 = vpop.f32.mrb[64].mxu0  ;;  %v11705_v59 = vpop.f32.mrb[64].mxu1 }
 0x1a3   : > { %16763 = vst [vmem:[#allocation109_spill] sm:$0xff] %v11703_v1  ;;  %16764 = vst [vmem:[#allocation110_spill] sm:$0xff] %v11705_v59  ;;  %v11707_v36 = vpop.f32.mrb[65].mxu0  ;;  %v11709_v0 = vpop.f32.mrb[65].mxu1  ;;  %v10311_v59 = vld [vmem:[#allocation2 + $0x1c0] ss:$16 sps:$4 sm:$0xff]  }
 0x1a4   : > { %16765 = vst [vmem:[#allocation111_spill] sm:$0xff] %v11709_v0  ;;  %v11711_v60 = vpop.f32.mrb[66].mxu0  ;;  %v11715_v17 = vpop.f32.mrb[66].mxu1 }
 0x1a5   : > { %16766 = vst [vmem:[#allocation112_spill] sm:$0xff] %v11711_v60  ;;  %16767 = vst [vmem:[#allocation113_spill] sm:$0xff] %v11715_v17  ;;  %v11717_v49 = vpop.f32.mrb[67].mxu0  ;;  %v11721_v55 = vpop.f32.mrb[67].mxu1 }
 0x1a6   : > { %16768 = vst [vmem:[#allocation114_spill] sm:$0xff] %v11721_v55 }
 0x1a7   : > { %9079 = vmatmul.mubr.msk.bf16.gmra.mrb[172].mxu0 %vm600_vm0, %v11045_v37  ;;  %9111 = vmatmul.mubr.msk.bf16.gmra.mrb[172].mxu1 %vm600_vm0, %v11045_v37 }
 0x1a8   : > { %1555 = vmatprep.mubr.bf16.mxu0 %v16678_v52  ;;  %1908 = vmatprep.mubr.bf16.mxu1 %v16678_v52 }
 0x1aa   : > { %v11733_v4 = vpop.f32.mrb[68].mxu0  ;;  %v11735_v20 = vpop.f32.mrb[68].mxu1 }
 0x1ab   : > { %16769 = vst [vmem:[#allocation115_spill] sm:$0xff] %v11733_v4  ;;  %16770 = vst [vmem:[#allocation116_spill] sm:$0xff] %v11735_v20  ;;  %v11737_v11 = vpop.f32.mrb[69].mxu0  ;;  %v11739_v31 = vpop.f32.mrb[69].mxu1  ;;  %v10313_v20 = vld [vmem:[#allocation2 + $0x1c4] ss:$16 sps:$4 sm:$0xff]  }
 0x1ac   : > { %16771 = vst [vmem:[#allocation117_spill] sm:$0xff] %v11737_v11  ;;  %16772 = vst [vmem:[#allocation118_spill] sm:$0xff] %v11739_v31  ;;  %v11741_v34 = vpop.f32.mrb[70].mxu0  ;;  %v11745_v46 = vpop.f32.mrb[70].mxu1  ;;  %v10314_v4 = vld [vmem:[#allocation2 + $0x1c8] ss:$16 sps:$4 sm:$0xff]   ;;  %4548 = vmatprep.subr.bf16.mxu0 %v10313_v20 }
 0x1ad   : > { %16773 = vst [vmem:[#allocation119_spill] sm:$0xff] %v11741_v34  ;;  %16774 = vst [vmem:[#allocation120_spill] sm:$0xff] %v11745_v46  ;;  %v11747_v37 = vpop.f32.mrb[71].mxu0  ;;  %v11751_v17 = vpop.f32.mrb[71].mxu1  ;;  %v10316_v34 = vld [vmem:[#allocation2 + $0x1cc] ss:$16 sps:$4 sm:$0xff]   ;;  %4549 = vmatpush1.bf16.msra.mxu0 %v10311_v59 }
 0x1ae   : > { %16775 = vst [vmem:[#allocation121_spill] sm:$0xff] %v11747_v37  ;;  %16776 = vst [vmem:[#allocation122_spill] sm:$0xff] %v11751_v17  ;;  %5960 = vmatprep.subr.bf16.mxu1 %v10316_v34 }
 0x1af   : > { %9080 = vmatmul.mubr.msk.bf16.gmra.mrb[176].mxu0 %vm600_vm0, %v11055_v40  ;;  %9112 = vmatmul.mubr.msk.bf16.gmra.mrb[176].mxu1 %vm600_vm0, %v11055_v40 }
 0x1b0   : > { %1565 = vmatprep.mubr.bf16.mxu0 %v16678_v52  ;;  %1918 = vmatprep.mubr.bf16.mxu1 %v16678_v52 }
 0x1b1   : > { %5961 = vmatpush1.bf16.msra.mxu1 %v10314_v4 }
 0x1b2   : > { %v11763_v14 = vpop.f32.mrb[72].mxu0  ;;  %v11765_v46 = vpop.f32.mrb[72].mxu1 }
 0x1b3   : > { %16777 = vst [vmem:[#allocation123_spill] sm:$0xff] %v11763_v14  ;;  %16778 = vst [vmem:[#allocation124_spill] sm:$0xff] %v11765_v46  ;;  %v11767_v0 = vpop.f32.mrb[73].mxu0  ;;  %v11769_v11 = vpop.f32.mrb[73].mxu1  ;;  %v10317_v46 = vld [vmem:[#allocation2 + $0x1e0] ss:$16 sps:$4 sm:$0xff]  }
 0x1b4   : > { %16779 = vst [vmem:[#allocation125_spill] sm:$0xff] %v11769_v11  ;;  %v11771_v55 = vpop.f32.mrb[74].mxu0  ;;  %v11775_v31 = vpop.f32.mrb[74].mxu1 }
 0x1b5   : > { %16780 = vst [vmem:[#allocation126_spill] sm:$0xff] %v11771_v55  ;;  %16781 = vst [vmem:[#allocation127_spill] sm:$0xff] %v11775_v31  ;;  %v11777_v17 = vpop.f32.mrb[75].mxu0  ;;  %v11781_v1 = vpop.f32.mrb[75].mxu1 }
 0x1b6   : > { %16782 = vst [vmem:[#allocation128_spill] sm:$0xff] %v11781_v1 }
 0x1b7   : > { %9081 = vmatmul.mubr.msk.bf16.gmra.mrb[180].mxu0 %vm600_vm0, %v11065_v44  ;;  %9113 = vmatmul.mubr.msk.bf16.gmra.mrb[180].mxu1 %vm600_vm0, %v11065_v44 }
 0x1b8   : > { %1575 = vmatprep.mubr.bf16.mxu0 %v16678_v52  ;;  %1928 = vmatprep.mubr.bf16.mxu1 %v16678_v52 }
 0x1ba   : > { %v11793_v59 = vpop.f32.mrb[76].mxu0  ;;  %v11795_v34 = vpop.f32.mrb[76].mxu1 }
 0x1bb   : > { %16783 = vst [vmem:[#allocation129_spill] sm:$0xff] %v11793_v59  ;;  %16784 = vst [vmem:[#allocation130_spill] sm:$0xff] %v11795_v34  ;;  %v11797_v4 = vpop.f32.mrb[77].mxu0  ;;  %v11799_v37 = vpop.f32.mrb[77].mxu1  ;;  %v10319_v34 = vld [vmem:[#allocation2 + $0x1e4] ss:$16 sps:$4 sm:$0xff]  }
 0x1bc   : > { %16785 = vst [vmem:[#allocation131_spill] sm:$0xff] %v11797_v4  ;;  %16786 = vst [vmem:[#allocation132_spill] sm:$0xff] %v11799_v37  ;;  %v11801_v40 = vpop.f32.mrb[78].mxu0  ;;  %v11805_v60 = vpop.f32.mrb[78].mxu1  ;;  %v10320_v59 = vld [vmem:[#allocation2 + $0x1e8] ss:$16 sps:$4 sm:$0xff]   ;;  %4550 = vmatprep.subr.bf16.mxu0 %v10319_v34 }
 0x1bd   : > { %16787 = vst [vmem:[#allocation133_spill] sm:$0xff] %v11801_v40  ;;  %16788 = vst [vmem:[#allocation134_spill] sm:$0xff] %v11805_v60  ;;  %v11807_v44 = vpop.f32.mrb[79].mxu0  ;;  %v11811_v31 = vpop.f32.mrb[79].mxu1  ;;  %v10322_v40 = vld [vmem:[#allocation2 + $0x1ec] ss:$16 sps:$4 sm:$0xff]   ;;  %4551 = vmatpush1.bf16.msra.mxu0 %v10317_v46 }
 0x1be   : > { %16789 = vst [vmem:[#allocation135_spill] sm:$0xff] %v11807_v44  ;;  %16790 = vst [vmem:[#allocation136_spill] sm:$0xff] %v11811_v31  ;;  %5962 = vmatprep.subr.bf16.mxu1 %v10322_v40 }
 0x1bf   : > { %9082 = vmatmul.mubr.msk.bf16.gmra.mrb[184].mxu0 %vm600_vm0, %v11075_v47  ;;  %9114 = vmatmul.mubr.msk.bf16.gmra.mrb[184].mxu1 %vm600_vm0, %v11075_v47 }
 0x1c0   : > { %1585 = vmatprep.mubr.bf16.mxu0 %v16678_v52  ;;  %1938 = vmatprep.mubr.bf16.mxu1 %v16678_v52 }
 0x1c1   : > { %5963 = vmatpush1.bf16.msra.mxu1 %v10320_v59 }
 0x1c2   : > { %v11823_v20 = vpop.f32.mrb[80].mxu0  ;;  %v11825_v60 = vpop.f32.mrb[80].mxu1 }
 0x1c3   : > { %16791 = vst [vmem:[#allocation137_spill] sm:$0xff] %v11825_v60  ;;  %v11827_v11 = vpop.f32.mrb[81].mxu0  ;;  %v11829_v4 = vpop.f32.mrb[81].mxu1  ;;  %v10325_v60 = vld [vmem:[#allocation2 + $0x204] ss:$16 sps:$4 sm:$0xff]  }
 0x1c4   : > { %16792 = vst [vmem:[#allocation138_spill] sm:$0xff] %v11829_v4  ;;  %v11831_v1 = vpop.f32.mrb[82].mxu0  ;;  %v11835_v37 = vpop.f32.mrb[82].mxu1  ;;  %v10328_v4 = vld [vmem:[#allocation2 + $0x20c] ss:$16 sps:$4 sm:$0xff]   ;;  %4873 = vmatprep.subr.bf16.mxu0 %v10325_v60 }
 0x1c5   : > { %16793 = vst [vmem:[#allocation139_spill] sm:$0xff] %v11835_v37  ;;  %v11837_v31 = vpop.f32.mrb[83].mxu0  ;;  %v11841_v14 = vpop.f32.mrb[83].mxu1  ;;  %6285 = vmatprep.subr.bf16.mxu1 %v10328_v4 }
 0x1c6   : > { %16794 = vst [vmem:[#allocation140_spill] sm:$0xff] %v11841_v14 }
 0x1c7   : > { %9083 = vmatmul.mubr.msk.bf16.gmra.mrb[188].mxu0 %vm600_vm0, %v11085_v50  ;;  %9115 = vmatmul.mubr.msk.bf16.gmra.mrb[188].mxu1 %vm600_vm0, %v11085_v50 }
 0x1c8   : > { %1595 = vmatprep.mubr.bf16.mxu0 %v16678_v52  ;;  %1948 = vmatprep.mubr.bf16.mxu1 %v16678_v52 }
 0x1ca   : > { %v11853_v46 = vpop.f32.mrb[84].mxu0  ;;  %v11855_v40 = vpop.f32.mrb[84].mxu1 }
 0x1cb   : > { %16795 = vst [vmem:[#allocation141_spill] sm:$0xff] %v11853_v46  ;;  %16796 = vst [vmem:[#allocation142_spill] sm:$0xff] %v11855_v40  ;;  %v11857_v59 = vpop.f32.mrb[85].mxu0  ;;  %v11859_v44 = vpop.f32.mrb[85].mxu1 }
 0x1cc   : > { %16797 = vst [vmem:[#allocation143_spill] sm:$0xff] %v11857_v59  ;;  %16798 = vst [vmem:[#allocation144_spill] sm:$0xff] %v11859_v44  ;;  %v11861_v47 = vpop.f32.mrb[86].mxu0  ;;  %v11865_v55 = vpop.f32.mrb[86].mxu1 }
 0x1cd   : > { %16799 = vst [vmem:[#allocation145_spill] sm:$0xff] %v11861_v47  ;;  %16800 = vst [vmem:[#allocation146_spill] sm:$0xff] %v11865_v55  ;;  %v11867_v50 = vpop.f32.mrb[87].mxu0  ;;  %v11871_v37 = vpop.f32.mrb[87].mxu1 }
 0x1ce   : > { %16801 = vst [vmem:[#allocation147_spill] sm:$0xff] %v11867_v50  ;;  %16802 = vst [vmem:[#allocation148_spill] sm:$0xff] %v11871_v37 }
 0x1cf   : > { %9084 = vmatmul.mubr.msk.bf16.gmra.mrb[192].mxu0 %vm600_vm0, %v11095_v53  ;;  %9116 = vmatmul.mubr.msk.bf16.gmra.mrb[192].mxu1 %vm600_vm0, %v11095_v53 }
 0x1d0   : > { %1605 = vmatprep.mubr.bf16.mxu0 %v16678_v52  ;;  %1958 = vmatprep.mubr.bf16.mxu1 %v16678_v52 }
 0x1d2   : > { %v11883_v34 = vpop.f32.mrb[88].mxu0  ;;  %v11885_v40 = vpop.f32.mrb[88].mxu1 }
 0x1d3   : > { %16803 = vst [vmem:[#allocation149_spill] sm:$0xff] %v11883_v34  ;;  %16804 = vst [vmem:[#allocation150_spill] sm:$0xff] %v11885_v40  ;;  %v11887_v55 = vpop.f32.mrb[89].mxu0  ;;  %v11889_v46 = vpop.f32.mrb[89].mxu1 }
 0x1d4   : > { %16805 = vst [vmem:[#allocation151_spill] sm:$0xff] %v11889_v46  ;;  %v11891_v47 = vpop.f32.mrb[90].mxu0  ;;  %v11895_v14 = vpop.f32.mrb[90].mxu1 }
 0x1d5   : > { %16806 = vst [vmem:[#allocation152_spill] sm:$0xff] %v11891_v47  ;;  %16807 = vst [vmem:[#allocation153_spill] sm:$0xff] %v11895_v14  ;;  %v11897_v44 = vpop.f32.mrb[91].mxu0  ;;  %v11901_v59 = vpop.f32.mrb[91].mxu1 }
 0x1d6   : > { %16808 = vst [vmem:[#allocation154_spill] sm:$0xff] %v11901_v59 }
 0x1d7   : > { %9085 = vmatmul.mubr.msk.bf16.gmra.mrb[196].mxu0 %vm600_vm0, %v11105_v57  ;;  %9117 = vmatmul.mubr.msk.bf16.gmra.mrb[196].mxu1 %vm600_vm0, %v11105_v57 }
 0x1d8   : > { %1615 = vmatprep.mubr.bf16.mxu0 %v16678_v52  ;;  %1968 = vmatprep.mubr.bf16.mxu1 %v16678_v52 }
 0x1da   : > { %v11913_v4 = vpop.f32.mrb[92].mxu0  ;;  %v11915_v37 = vpop.f32.mrb[92].mxu1 }
 0x1db   : > { %16809 = vst [vmem:[#allocation155_spill] sm:$0xff] %v11913_v4  ;;  %16810 = vst [vmem:[#allocation156_spill] sm:$0xff] %v11915_v37  ;;  %v11917_v53 = vpop.f32.mrb[93].mxu0  ;;  %v11919_v50 = vpop.f32.mrb[93].mxu1 }
 0x1dc   : > { %16811 = vst [vmem:[#allocation157_spill] sm:$0xff] %v11917_v53  ;;  %16812 = vst [vmem:[#allocation158_spill] sm:$0xff] %v11919_v50  ;;  %v11921_v40 = vpop.f32.mrb[94].mxu0  ;;  %v11925_v14 = vpop.f32.mrb[94].mxu1 }
 0x1dd   : > { %16813 = vst [vmem:[#allocation159_spill] sm:$0xff] %v11921_v40  ;;  %16814 = vst [vmem:[#allocation160_spill] sm:$0xff] %v11925_v14  ;;  %v11927_v57 = vpop.f32.mrb[95].mxu0  ;;  %v11931_v59 = vpop.f32.mrb[95].mxu1 }
 0x1de   : > { %16815 = vst [vmem:[#allocation161_spill] sm:$0xff] %v11931_v59 }
 0x1df   : > { %9086 = vmatmul.mubr.msk.bf16.gmra.mrb[200].mxu0 %vm600_vm0, %v11115_v62  ;;  %9118 = vmatmul.mubr.msk.bf16.gmra.mrb[200].mxu1 %vm600_vm0, %v11115_v62 }
 0x1e0   : > { %1625 = vmatprep.mubr.bf16.mxu0 %v16678_v52  ;;  %1978 = vmatprep.mubr.bf16.mxu1 %v16678_v52 }
 0x1e2   : > { %v11943_v60 = vpop.f32.mrb[96].mxu0  ;;  %v11945_v46 = vpop.f32.mrb[96].mxu1 }
 0x1e3   : > { %16816 = vst [vmem:[#allocation162_spill] sm:$0xff] %v11943_v60  ;;  %16817 = vst [vmem:[#allocation163_spill] sm:$0xff] %v11945_v46  ;;  %v11947_v37 = vpop.f32.mrb[97].mxu0  ;;  %v11949_v34 = vpop.f32.mrb[97].mxu1 }
 0x1e4   : > { %16818 = vst [vmem:[#allocation164_spill] sm:$0xff] %v11947_v37  ;;  %16819 = vst [vmem:[#allocation165_spill] sm:$0xff] %v11949_v34  ;;  %v11951_v14 = vpop.f32.mrb[98].mxu0  ;;  %v11955_v50 = vpop.f32.mrb[98].mxu1 }
 0x1e5   : > { %16820 = vst [vmem:[#allocation166_spill] sm:$0xff] %v11951_v14  ;;  %16821 = vst [vmem:[#allocation167_spill] sm:$0xff] %v11955_v50  ;;  %v11957_v62 = vpop.f32.mrb[99].mxu0  ;;  %v11961_v4 = vpop.f32.mrb[99].mxu1 }
 0x1e6   : > { %16822 = vst [vmem:[#allocation168_spill] sm:$0xff] %v11961_v4 }
 0x1e7   : > { %9087 = vmatmul.mubr.msk.bf16.gmra.mrb[204].mxu0 %vm600_vm0, %v11125_v2  ;;  %9119 = vmatmul.mubr.msk.bf16.gmra.mrb[204].mxu1 %vm600_vm0, %v11125_v2 }
 0x1e8   : > { %1635 = vmatprep.mubr.bf16.mxu0 %v16678_v52  ;;  %1988 = vmatprep.mubr.bf16.mxu1 %v16678_v52 }
 0x1ea   : > { %v11973_v47 = vpop.f32.mrb[100].mxu0  ;;  %v11975_v59 = vpop.f32.mrb[100].mxu1 }
 0x1eb   : > { %16823 = vst [vmem:[#allocation169_spill] sm:$0xff] %v11973_v47  ;;  %16824 = vst [vmem:[#allocation170_spill] sm:$0xff] %v11975_v59  ;;  %v11977_v46 = vpop.f32.mrb[101].mxu0  ;;  %v11979_v40 = vpop.f32.mrb[101].mxu1 }
 0x1ec   : > { %16825 = vst [vmem:[#allocation171_spill] sm:$0xff] %v11977_v46  ;;  %16826 = vst [vmem:[#allocation172_spill] sm:$0xff] %v11979_v40  ;;  %v11981_v50 = vpop.f32.mrb[102].mxu0  ;;  %v11985_v34 = vpop.f32.mrb[102].mxu1 }
 0x1ed   : > { %16827 = vst [vmem:[#allocation173_spill] sm:$0xff] %v11981_v50  ;;  %16828 = vst [vmem:[#allocation174_spill] sm:$0xff] %v11985_v34  ;;  %v11987_v2 = vpop.f32.mrb[103].mxu0  ;;  %v11991_v60 = vpop.f32.mrb[103].mxu1 }
 0x1ee   : > { %16829 = vst [vmem:[#allocation175_spill] sm:$0xff] %v11991_v60 }
 0x1ef   : > { %9088 = vmatmul.mubr.msk.bf16.gmra.mrb[208].mxu0 %vm600_vm0, %v11135_v6  ;;  %9120 = vmatmul.mubr.msk.bf16.gmra.mrb[208].mxu1 %vm600_vm0, %v11135_v6 }
 0x1f0   : > { %1645 = vmatprep.mubr.bf16.mxu0 %v16678_v52  ;;  %1998 = vmatprep.mubr.bf16.mxu1 %v16678_v52 }
 0x1f2   : > { %v12003_v53 = vpop.f32.mrb[104].mxu0  ;;  %v12005_v4 = vpop.f32.mrb[104].mxu1 }
 0x1f3   : > { %16830 = vst [vmem:[#allocation176_spill] sm:$0xff] %v12003_v53  ;;  %16831 = vst [vmem:[#allocation177_spill] sm:$0xff] %v12005_v4  ;;  %v12007_v59 = vpop.f32.mrb[105].mxu0  ;;  %v12009_v14 = vpop.f32.mrb[105].mxu1 }
 0x1f4   : > { %16832 = vst [vmem:[#allocation178_spill] sm:$0xff] %v12007_v59  ;;  %16833 = vst [vmem:[#allocation179_spill] sm:$0xff] %v12009_v14  ;;  %v12011_v34 = vpop.f32.mrb[106].mxu0  ;;  %v12015_v40 = vpop.f32.mrb[106].mxu1 }
 0x1f5   : > { %16834 = vst [vmem:[#allocation180_spill] sm:$0xff] %v12011_v34  ;;  %16835 = vst [vmem:[#allocation181_spill] sm:$0xff] %v12015_v40  ;;  %v12017_v6 = vpop.f32.mrb[107].mxu0  ;;  %v12021_v47 = vpop.f32.mrb[107].mxu1 }
 0x1f6   : > { %16836 = vst [vmem:[#allocation182_spill] sm:$0xff] %v12021_v47 }
 0x1f7   : > { %9089 = vmatmul.mubr.msk.bf16.gmra.mrb[212].mxu0 %vm600_vm0, %v11145_v12  ;;  %9121 = vmatmul.mubr.msk.bf16.gmra.mrb[212].mxu1 %vm600_vm0, %v11145_v12 }
 0x1f8   : > { %1655 = vmatprep.mubr.bf16.mxu0 %v16678_v52  ;;  %2008 = vmatprep.mubr.bf16.mxu1 %v16678_v52 }
 0x1fa   : > { %v12033_v37 = vpop.f32.mrb[108].mxu0  ;;  %v12035_v60 = vpop.f32.mrb[108].mxu1 }
 0x1fb   : > { %16837 = vst [vmem:[#allocation183_spill] sm:$0xff] %v12033_v37  ;;  %16838 = vst [vmem:[#allocation184_spill] sm:$0xff] %v12035_v60  ;;  %v12037_v4 = vpop.f32.mrb[109].mxu0  ;;  %v12039_v50 = vpop.f32.mrb[109].mxu1 }
 0x1fc   : > { %16839 = vst [vmem:[#allocation185_spill] sm:$0xff] %v12037_v4  ;;  %16840 = vst [vmem:[#allocation186_spill] sm:$0xff] %v12039_v50  ;;  %v12041_v40 = vpop.f32.mrb[110].mxu0  ;;  %v12045_v14 = vpop.f32.mrb[110].mxu1 }
 0x1fd   : > { %16841 = vst [vmem:[#allocation187_spill] sm:$0xff] %v12041_v40  ;;  %16842 = vst [vmem:[#allocation188_spill] sm:$0xff] %v12045_v14  ;;  %v12047_v12 = vpop.f32.mrb[111].mxu0  ;;  %v12051_v53 = vpop.f32.mrb[111].mxu1 }
 0x1fe   : > { %16843 = vst [vmem:[#allocation189_spill] sm:$0xff] %v12051_v53 }
 0x1ff   : > { %9090 = vmatmul.mubr.msk.bf16.gmra.mrb[216].mxu0 %vm600_vm0, %v11155_v16  ;;  %9122 = vmatmul.mubr.msk.bf16.gmra.mrb[216].mxu1 %vm600_vm0, %v11155_v16 }
 0x200   : > { %1665 = vmatprep.mubr.bf16.mxu0 %v16678_v52  ;;  %2018 = vmatprep.mubr.bf16.mxu1 %v16678_v52 }
 0x202   : > { %v12063_v46 = vpop.f32.mrb[112].mxu0  ;;  %v12065_v47 = vpop.f32.mrb[112].mxu1 }
 0x203   : > { %16844 = vst [vmem:[#allocation190_spill] sm:$0xff] %v12063_v46  ;;  %16845 = vst [vmem:[#allocation191_spill] sm:$0xff] %v12065_v47  ;;  %v12067_v60 = vpop.f32.mrb[113].mxu0  ;;  %v12069_v34 = vpop.f32.mrb[113].mxu1 }
 0x204   : > { %16846 = vst [vmem:[#allocation192_spill] sm:$0xff] %v12067_v60  ;;  %16847 = vst [vmem:[#allocation193_spill] sm:$0xff] %v12069_v34  ;;  %v12071_v14 = vpop.f32.mrb[114].mxu0  ;;  %v12075_v50 = vpop.f32.mrb[114].mxu1 }
 0x205   : > { %16848 = vst [vmem:[#allocation194_spill] sm:$0xff] %v12071_v14  ;;  %16849 = vst [vmem:[#allocation195_spill] sm:$0xff] %v12075_v50  ;;  %v12077_v16 = vpop.f32.mrb[115].mxu0  ;;  %v12081_v37 = vpop.f32.mrb[115].mxu1 }
 0x206   : > { %16850 = vst [vmem:[#allocation196_spill] sm:$0xff] %v12081_v37 }
 0x207   : > { %9091 = vmatmul.mubr.msk.bf16.gmra.mrb[220].mxu0 %vm600_vm0, %v11165_v21  ;;  %9123 = vmatmul.mubr.msk.bf16.gmra.mrb[220].mxu1 %vm600_vm0, %v11165_v21 }
 0x208   : > { %1675 = vmatprep.mubr.bf16.mxu0 %v16678_v52  ;;  %2028 = vmatprep.mubr.bf16.mxu1 %v16678_v52 }
 0x20a   : > { %v12093_v59 = vpop.f32.mrb[116].mxu0  ;;  %v12095_v53 = vpop.f32.mrb[116].mxu1 }
 0x20b   : > { %16851 = vst [vmem:[#allocation197_spill] sm:$0xff] %v12093_v59  ;;  %16852 = vst [vmem:[#allocation198_spill] sm:$0xff] %v12095_v53  ;;  %v12097_v47 = vpop.f32.mrb[117].mxu0  ;;  %v12099_v40 = vpop.f32.mrb[117].mxu1 }
 0x20c   : > { %16853 = vst [vmem:[#allocation199_spill] sm:$0xff] %v12097_v47  ;;  %16854 = vst [vmem:[#allocation200_spill] sm:$0xff] %v12099_v40  ;;  %v12101_v50 = vpop.f32.mrb[118].mxu0  ;;  %v12105_v34 = vpop.f32.mrb[118].mxu1 }
 0x20d   : > { %16855 = vst [vmem:[#allocation201_spill] sm:$0xff] %v12101_v50  ;;  %16856 = vst [vmem:[#allocation202_spill] sm:$0xff] %v12105_v34  ;;  %v12107_v21 = vpop.f32.mrb[119].mxu0  ;;  %v12111_v46 = vpop.f32.mrb[119].mxu1 }
 0x20e   : > { %16857 = vst [vmem:[#allocation203_spill] sm:$0xff] %v12107_v21  ;;  %16858 = vst [vmem:[#allocation204_spill] sm:$0xff] %v12111_v46 }
 0x20f   : > { %9092 = vmatmul.mubr.msk.bf16.gmra.mrb[224].mxu0 %vm600_vm0, %v11175_v24  ;;  %9124 = vmatmul.mubr.msk.bf16.gmra.mrb[224].mxu1 %vm600_vm0, %v11175_v24 }
 0x210   : > { %1685 = vmatprep.mubr.bf16.mxu0 %v16678_v52  ;;  %2038 = vmatprep.mubr.bf16.mxu1 %v16678_v52 }
 0x212   : > { %v12123_v4 = vpop.f32.mrb[120].mxu0  ;;  %v12125_v37 = vpop.f32.mrb[120].mxu1 }
 0x213   : > { %16859 = vst [vmem:[#allocation205_spill] sm:$0xff] %v12123_v4  ;;  %16860 = vst [vmem:[#allocation206_spill] sm:$0xff] %v12125_v37  ;;  %v12127_v53 = vpop.f32.mrb[121].mxu0  ;;  %v12129_v14 = vpop.f32.mrb[121].mxu1 }
 0x214   : > { %16861 = vst [vmem:[#allocation207_spill] sm:$0xff] %v12127_v53  ;;  %16862 = vst [vmem:[#allocation208_spill] sm:$0xff] %v12129_v14  ;;  %v12131_v34 = vpop.f32.mrb[122].mxu0  ;;  %v12135_v40 = vpop.f32.mrb[122].mxu1 }
 0x215   : > { %16863 = vst [vmem:[#allocation209_spill] sm:$0xff] %v12131_v34  ;;  %16864 = vst [vmem:[#allocation210_spill] sm:$0xff] %v12135_v40  ;;  %v12137_v24 = vpop.f32.mrb[123].mxu0  ;;  %v12141_v59 = vpop.f32.mrb[123].mxu1  ;;  %v10709_v34 = vmov 1966171168  }
 0x216   : > { %16865 = vst [vmem:[#allocation211_spill] sm:$0xff] %v12137_v24  ;;  %16866 = vst [vmem:[#allocation212_spill] sm:$0xff] %v12141_v59 }
 0x217   : > { %9093 = vmatmul.mubr.msk.bf16.gmra.mrb[228].mxu0 %vm600_vm0, %v11185_v27  ;;  %9125 = vmatmul.mubr.msk.bf16.gmra.mrb[228].mxu1 %vm600_vm0, %v11185_v27 }
 0x218   : > { %1695 = vmatprep.mubr.bf16.mxu0 %v16678_v52  ;;  %2048 = vmatprep.mubr.bf16.mxu1 %v16678_v52 }
 0x21a   : > { %v12153_v60 = vpop.f32.mrb[124].mxu0  ;;  %v12155_v46 = vpop.f32.mrb[124].mxu1 }
 0x21b   : > { %16867 = vst [vmem:[#allocation213_spill] sm:$0xff] %v12153_v60  ;;  %16868 = vst [vmem:[#allocation214_spill] sm:$0xff] %v12155_v46  ;;  %v12157_v37 = vpop.f32.mrb[125].mxu0  ;;  %v12159_v50 = vpop.f32.mrb[125].mxu1  ;;  %v2371_v60 = vlaneseq }
 0x21c   : > { %16869 = vst [vmem:[#allocation215_spill] sm:$0xff] %v12157_v37  ;;  %16870 = vst [vmem:[#allocation216_spill] sm:$0xff] %v12159_v50  ;;  %v12161_v40 = vpop.f32.mrb[126].mxu0  ;;  %v12165_v14 = vpop.f32.mrb[126].mxu1 }
 0x21d   : > { %16871 = vst [vmem:[#allocation217_spill] sm:$0xff] %v12161_v40  ;;  %16872 = vst [vmem:[#allocation218_spill] sm:$0xff] %v12165_v14  ;;  %v12167_v27 = vpop.f32.mrb[127].mxu0  ;;  %v12171_v4 = vpop.f32.mrb[127].mxu1  ;;  %v2369_v14 = vunpack.c.l.s4 %v10709_v34 }
 0x21e   : > { %16873 = vst [vmem:[#allocation219_spill] sm:$0xff] %v12167_v27  ;;  %16874 = vst [vmem:[#allocation220_spill] sm:$0xff] %v12171_v4 }
 0x21f   : > { %9094 = vmatmul.mubr.msk.bf16.gmra.mrb[232].mxu0 %vm600_vm0, %v11195_v30  ;;  %9126 = vmatmul.mubr.msk.bf16.gmra.mrb[232].mxu1 %vm600_vm0, %v11195_v30  ;;  %v2370_v21 = vunpack.c.0.s8 %v2369_v14  ;;  %v2372_v30 = vshrl.u32 %v2371_v60, 7 }
 0x220   : > { %1705 = vmatprep.mubr.bf16.mxu0 %v16678_v52  ;;  %2058 = vmatprep.mubr.bf16.mxu1 %v16678_v52 }
 0x222   : > { %v12183_v47 = vpop.f32.mrb[128].mxu0  ;;  %v12185_v59 = vpop.f32.mrb[128].mxu1 }
 0x223   : > { %16875 = vst [vmem:[#allocation221_spill] sm:$0xff] %v12183_v47  ;;  %16876 = vst [vmem:[#allocation222_spill] sm:$0xff] %v12185_v59  ;;  %v12187_v46 = vpop.f32.mrb[129].mxu0  ;;  %v12189_v40 = vpop.f32.mrb[129].mxu1 }
 0x224   : > { %16877 = vst [vmem:[#allocation223_spill] sm:$0xff] %v12187_v46  ;;  %16878 = vst [vmem:[#allocation224_spill] sm:$0xff] %v12189_v40  ;;  %v12191_v37 = vpop.f32.mrb[130].mxu0  ;;  %v12195_v53 = vpop.f32.mrb[130].mxu1 }
 0x225   : > { %16879 = vst [vmem:[#allocation225_spill] sm:$0xff] %v12191_v37  ;;  %16880 = vst [vmem:[#allocation226_spill] sm:$0xff] %v12195_v53  ;;  %v12197_v50 = vpop.f32.mrb[131].mxu0  ;;  %v12203_v24 = vpop.f32.mrb[131].mxu1  ;;  %v12219_v53 = vsub.s32 %v2370_v21, %v2372_v30 }
 0x226   : > { %16881 = vst [vmem:[#allocation227_spill] sm:$0xff] %v12197_v50  ;;  %16882 = vst [vmem:[#allocation228_spill] sm:$0xff] %v12203_v24 }
 0x227   : > { %9095 = vmatmul.mubr.msk.bf16.gmra.mrb[236].mxu0 %vm600_vm0, %v11211_v39  ;;  %9127 = vmatmul.mubr.msk.bf16.gmra.mrb[236].mxu1 %vm600_vm0, %v11211_v39  ;;  %16886 = vst [vmem:[#allocation232_spill] sm:$0xff] %v12219_v53  ;;  %v10644_v39 = vld.sshfl [vmem:[%s16213_s2] sm:$0xff pattern:$0x75316420] }
 0x228   : > { %1715 = vmatprep.mubr.bf16.mxu0 %v16678_v52  ;;  %2068 = vmatprep.mubr.bf16.mxu1 %v16678_v52  ;;  %v2382_v46 = vcombine.high %v10644_v39, %v10644_v39  ;;  %v12311_v50 = vrot.slane %v10644_v39, %v12219_v53  ;;  %v16909_v39 = vpack.c.bf16 %v11221_v48, %v11209_v38 }
 0x229   : > { %v16915_v38 = vpack.c.bf16 %v11215_v43, %v11205_v35 }
 0x22a   : > { %v12213_v4 = vpop.f32.mrb[132].mxu0  ;;  %v12215_v27 = vpop.f32.mrb[132].mxu1 }
 0x22b   : > { %16883 = vst [vmem:[#allocation229_spill] sm:$0xff] %v12213_v4  ;;  %16884 = vst [vmem:[#allocation230_spill] sm:$0xff] %v12215_v27  ;;  %v12217_v59 = vpop.f32.mrb[133].mxu0  ;;  %v12221_v34 = vpop.f32.mrb[133].mxu1  ;;  %v12281_v4 = vsub.s32 0, %v2372_v30 }
 0x22c   : > { %16885 = vst [vmem:[#allocation231_spill] sm:$0xff] %v12217_v59  ;;  %16887 = vst [vmem:[#allocation233_spill] sm:$0xff] %v12221_v34  ;;  %v12223_v40 = vpop.f32.mrb[134].mxu0  ;;  %v12230_v60 = vpop.f32.mrb[134].mxu1  ;;  %v12278_v34 = vrot.slane %v2382_v46, %v12219_v53 }
 0x22d   : > { %16888 = vst [vmem:[#allocation234_spill] sm:$0xff] %v12223_v40  ;;  %16889 = vst [vmem:[#allocation235_spill] sm:$0xff] %v12230_v60  ;;  %v12232_v24 = vpop.f32.mrb[135].mxu0  ;;  %v12238_v37 = vpop.f32.mrb[135].mxu1 }
 0x22e   : > { %16890 = vst [vmem:[#allocation236_spill] sm:$0xff] %v12232_v24  ;;  %16891 = vst [vmem:[#allocation237_spill] sm:$0xff] %v12238_v37  ;;  %v2424_v24 = vpack.i.b16 %v12278_v34, %v12278_v34 }
 0x22f   : > { %9096 = vmatmul.mubr.msk.bf16.gmra.mrb[240].mxu0 %vm600_vm0, %v11245_v63  ;;  %9128 = vmatmul.mubr.msk.bf16.gmra.mrb[240].mxu1 %vm600_vm0, %v11245_v63  ;;  %16900 = vst [vmem:[#allocation246_spill] sm:$0xff] %v12281_v4 }
 0x230   : > { %1725 = vmatprep.mubr.bf16.mxu0 %v16678_v52  ;;  %2078 = vmatprep.mubr.bf16.mxu1 %v16678_v52 }
 0x232   : > { %v12248_v14 = vpop.f32.mrb[136].mxu0  ;;  %v12250_v47 = vpop.f32.mrb[136].mxu1 }
 0x233   : > { %16892 = vst [vmem:[#allocation238_spill] sm:$0xff] %v12248_v14  ;;  %16893 = vst [vmem:[#allocation239_spill] sm:$0xff] %v12250_v47  ;;  %v12252_v21 = vpop.f32.mrb[137].mxu0  ;;  %v12254_v27 = vpop.f32.mrb[137].mxu1  ;;  %v2417_v14 = vpack.i.b16 %v12311_v50, %v12311_v50 }
 0x234   : > { %16894 = vst [vmem:[#allocation240_spill] sm:$0xff] %v12252_v21  ;;  %16895 = vst [vmem:[#allocation241_spill] sm:$0xff] %v12254_v27  ;;  %v12256_v60 = vpop.f32.mrb[138].mxu0  ;;  %v12260_v37 = vpop.f32.mrb[138].mxu1 }
 0x235   : > { %16896 = vst [vmem:[#allocation242_spill] sm:$0xff] %v12256_v60  ;;  %16897 = vst [vmem:[#allocation243_spill] sm:$0xff] %v12260_v37  ;;  %v12262_v63 = vpop.f32.mrb[139].mxu0  ;;  %v12268_v59 = vpop.f32.mrb[139].mxu1 }
 0x236   : > { %16898 = vst [vmem:[#allocation244_spill] sm:$0xff] %v12262_v63  ;;  %16899 = vst [vmem:[#allocation245_spill] sm:$0xff] %v12268_v59  ;;  %v12308_v63 = vrot.slane %v2424_v24, %v12281_v4 }
 0x237   : > { %9097 = vmatmul.mubr.msk.bf16.gmra.mrb[244].mxu0 %vm600_vm0, %v11279_v29  ;;  %9129 = vmatmul.mubr.msk.bf16.gmra.mrb[244].mxu1 %vm600_vm0, %v11279_v29 }
 0x238   : > { %1735 = vmatprep.mubr.bf16.mxu0 %v16678_v52  ;;  %2088 = vmatprep.mubr.bf16.mxu1 %v16678_v52  ;;  %v2473_v46 = vadd.bf16 %v12308_v63, %v16909_v39 }
 0x23a   : > { %v12283_v40 = vpop.f32.mrb[140].mxu0  ;;  %v12287_v47 = vpop.f32.mrb[140].mxu1 }
 0x23b   : > { %16901 = vst [vmem:[#allocation247_spill] sm:$0xff] %v12283_v40  ;;  %16902 = vst [vmem:[#allocation248_spill] sm:$0xff] %v12287_v47  ;;  %v12289_v37 = vpop.f32.mrb[141].mxu0  ;;  %v12291_v27 = vpop.f32.mrb[141].mxu1 }
 0x23c   : > { %16903 = vst [vmem:[#allocation249_spill] sm:$0xff] %v12289_v37  ;;  %16904 = vst [vmem:[#allocation250_spill] sm:$0xff] %v12291_v27  ;;  %v12293_v29 = vpop.f32.mrb[142].mxu0  ;;  %v12297_v59 = vpop.f32.mrb[142].mxu1  ;;  %v12338_v27 = vrot.slane %v2417_v14, %v12281_v4  ;;  %v2729_v37 = vmax.bf16 %v16678_v52, %v2473_v46  ;;  %v16917_v46 = vpack.c.bf16 %v11255_v10, %v11243_v61  ;;  %v10323_v61 = vld [vmem:[#allocation2 + $0x200] ss:$16 sps:$4 sm:$0xff]  }
 0x23d   : > { %16905 = vst [vmem:[#allocation251_spill] sm:$0xff] %v12293_v29  ;;  %16906 = vst [vmem:[#allocation252_spill] sm:$0xff] %v12297_v59  ;;  %v12299_v30 = vpop.f32.mrb[143].mxu0  ;;  %v12305_v21 = vpop.f32.mrb[143].mxu1 }
 0x23e   : > { %16907 = vst [vmem:[#allocation253_spill] sm:$0xff] %v12305_v21  ;;  %v2472_v21 = vadd.bf16 %v12338_v27, %v16915_v38  ;;  %v2481_v14 = vadd.bf16 %v12308_v63, %v16917_v46  ;;  %v10329_v46 = vld [vmem:[#allocation2 + $0x220] ss:$16 sps:$4 sm:$0xff]  }
 0x23f   : > { %9098 = vmatmul.mubr.msk.bf16.gmra.mrb[248].mxu0 %vm600_vm0, %v11313_v18  ;;  %9130 = vmatmul.mubr.msk.bf16.gmra.mrb[248].mxu1 %vm600_vm0, %v11313_v18 }
 0x240   : > { %1745 = vmatprep.mubr.bf16.mxu0 %v16678_v52  ;;  %2098 = vmatprep.mubr.bf16.mxu1 %v16678_v52  ;;  %v2728_v35 = vmax.bf16 %v16678_v52, %v2472_v21  ;;  %v10331_v21 = vld [vmem:[#allocation2 + $0x224] ss:$16 sps:$4 sm:$0xff]  }
 0x242   : > { %v12323_v24 = vpop.f32.mrb[144].mxu0  ;;  %v12329_v60 = vpop.f32.mrb[144].mxu1 }
 0x243   : > { %16908 = vst [vmem:[#allocation254_spill] sm:$0xff] %v12323_v24  ;;  %16910 = vst [vmem:[#allocation255_spill] sm:$0xff] %v12329_v60  ;;  %v12331_v47 = vpop.f32.mrb[145].mxu0  ;;  %v12333_v59 = vpop.f32.mrb[145].mxu1  ;;  %v10326_v24 = vld [vmem:[#allocation2 + $0x208] ss:$16 sps:$4 sm:$0xff]  }
 0x244   : > { %16911 = vst [vmem:[#allocation256_spill] sm:$0xff] %v12333_v59  ;;  %v12335_v18 = vpop.f32.mrb[146].mxu0  ;;  %v12342_v40 = vpop.f32.mrb[146].mxu1 }
 0x245   : > { %16912 = vst [vmem:[#allocation257_spill] sm:$0xff] %v12335_v18  ;;  %16913 = vst [vmem:[#allocation258_spill] sm:$0xff] %v12342_v40  ;;  %v12344_v29 = vpop.f32.mrb[147].mxu0  ;;  %v12350_v39 = vpop.f32.mrb[147].mxu1  ;;  %v2737_v18 = vmax.bf16 %v16678_v52, %v2481_v14  ;;  %v16926_v14 = vpack.c.bf16 %v11289_v13, %v11277_v28  ;;  %v10343_v13 = vld [vmem:[#allocation2 + $0x264] ss:$16 sps:$4 sm:$0xff]  }
 0x246   : > { %16914 = vst [vmem:[#allocation259_spill] sm:$0xff] %v12350_v39 }
 0x247   : > { %9099 = vmatmul.mubr.msk.bf16.gmra.mrb[252].mxu0 %vm600_vm0, %v11347_v26  ;;  %9131 = vmatmul.mubr.msk.bf16.gmra.mrb[252].mxu1 %vm600_vm0, %v11347_v26  ;;  %v2489_v43 = vadd.bf16 %v12308_v63, %v16926_v14 }
 0x248   : > { %4552 = vmatprep.mubr.bf16.mxu0 %v2729_v37  ;;  %5964 = vmatprep.mubr.bf16.mxu1 %v2729_v37 }
 0x24a   : > { %v12363_v48 = vpop.f32.mrb[148].mxu0  ;;  %v12369_v60 = vpop.f32.mrb[148].mxu1 }
 0x24b   : > { %16916 = vst [vmem:[#allocation260_spill] sm:$0xff] %v12363_v48  ;;  %16918 = vst [vmem:[#allocation261_spill] sm:$0xff] %v12369_v60  ;;  %v12371_v40 = vpop.f32.mrb[149].mxu0  ;;  %v12373_v59 = vpop.f32.mrb[149].mxu1  ;;  %v10334_v48 = vld [vmem:[#allocation2 + $0x22c] ss:$16 sps:$4 sm:$0xff]  }
 0x24c   : > { %16919 = vst [vmem:[#allocation262_spill] sm:$0xff] %v12371_v40  ;;  %16920 = vst [vmem:[#allocation263_spill] sm:$0xff] %v12373_v59  ;;  %v12375_v26 = vpop.f32.mrb[150].mxu0  ;;  %v12380_v37 = vpop.f32.mrb[150].mxu1  ;;  %v2745_v40 = vmax.bf16 %v16678_v52, %v2489_v43  ;;  %v10341_v43 = vld [vmem:[#allocation2 + $0x260] ss:$16 sps:$4 sm:$0xff]  }
 0x24d   : > { %16921 = vst [vmem:[#allocation264_spill] sm:$0xff] %v12375_v26  ;;  %16922 = vst [vmem:[#allocation265_spill] sm:$0xff] %v12380_v37  ;;  %v12382_v38 = vpop.f32.mrb[151].mxu0  ;;  %v12388_v39 = vpop.f32.mrb[151].mxu1  ;;  %v16924_v26 = vpack.c.bf16 %v11249_v3, %v11239_v58  ;;  %v10332_v37 = vld [vmem:[#allocation2 + $0x228] ss:$16 sps:$4 sm:$0xff]  }
 0x24e   : > { %16923 = vst [vmem:[#allocation266_spill] sm:$0xff] %v12388_v39  ;;  %v10340_v58 = vld [vmem:[#allocation2 + $0x24c] ss:$16 sps:$4 sm:$0xff]  }
 0x24f   : > { %4553 = vmatmul.mubr.bf16.vlgmr.msra.gmra.mrb[0].mxu0 %v2728_v35  ;;  %5965 = vmatmul.mubr.bf16.vlgmr.msra.gmra.mrb[0].mxu1 %v2728_v35  ;;  %v2480_v10 = vadd.bf16 %v12338_v27, %v16924_v26  ;;  %v10337_v35 = vld [vmem:[#allocation2 + $0x244] ss:$16 sps:$4 sm:$0xff]  }
 0x250   : > { %4562 = vmatprep.mubr.bf16.mxu0 %v2737_v18  ;;  %4874 = vmatpush1.bf16.msra.mxu0 %v10323_v61  ;;  %v10335_v61 = vld [vmem:[#allocation2 + $0x240] ss:$16 sps:$4 sm:$0xff]  }
 0x251   : > { %5974 = vmatprep.mubr.bf16.mxu1 %v2737_v18  ;;  %6286 = vmatpush1.bf16.msra.mxu1 %v10326_v24  ;;  %v2736_v24 = vmax.bf16 %v16678_v52, %v2480_v10  ;;  %v10338_v10 = vld [vmem:[#allocation2 + $0x248] ss:$16 sps:$4 sm:$0xff]  }
 0x252   : > { %v12397_v60 = vpop.f32.mrb[152].mxu0  ;;  %4875 = vmatprep.subr.bf16.mxu0 %v10331_v21  ;;  %v12403_v59 = vpop.f32.mrb[152].mxu1  ;;  %6287 = vmatprep.subr.bf16.mxu1 %v10334_v48  ;;  %v16931_v21 = vpack.c.bf16 %v11283_v33, %v11273_v25  ;;  %v10352_v25 = vld [vmem:[#allocation2 + $0x28c] ss:$16 sps:$4 sm:$0xff]  }
 0x253   : > { %16925 = vst [vmem:[#allocation267_spill] sm:$0xff] %v12397_v60  ;;  %16927 = vst [vmem:[#allocation268_spill] sm:$0xff] %v12403_v59  ;;  %v12405_v39 = vpop.f32.mrb[153].mxu0  ;;  %v12407_v3 = vpop.f32.mrb[153].mxu1 }
 0x254   : > { %16928 = vst [vmem:[#allocation269_spill] sm:$0xff] %v12407_v3  ;;  %v12409_v18 = vpop.f32.mrb[154].mxu0  ;;  %v12414_v28 = vpop.f32.mrb[154].mxu1  ;;  %4876 = vmatpush1.bf16.msra.mxu0 %v10329_v46  ;;  %v10346_v46 = vld [vmem:[#allocation2 + $0x26c] ss:$16 sps:$4 sm:$0xff]   ;;  %v2488_v48 = vadd.bf16 %v12338_v27, %v16931_v21 }
 0x255   : > { %16929 = vst [vmem:[#allocation270_spill] sm:$0xff] %v12414_v28  ;;  %v12416_v26 = vpop.f32.mrb[155].mxu0  ;;  %v12422_v14 = vpop.f32.mrb[155].mxu1  ;;  %6288 = vmatpush1.bf16.msra.mxu1 %v10332_v37  ;;  %4877 = vmatprep.subr.bf16.mxu0 %v10337_v35  ;;  %v16933_v35 = vpack.c.bf16 %v11323_v8, %v11311_v22  ;;  %v10347_v21 = vld [vmem:[#allocation2 + $0x280] ss:$16 sps:$4 sm:$0xff]  }
 0x256   : > { %16930 = vst [vmem:[#allocation271_spill] sm:$0xff] %v12422_v14  ;;  %6289 = vmatprep.subr.bf16.mxu1 %v10340_v58  ;;  %v10344_v58 = vld [vmem:[#allocation2 + $0x268] ss:$16 sps:$4 sm:$0xff]   ;;  %v10355_v8 = vld [vmem:[#allocation2 + $0x2a4] ss:$16 sps:$4 sm:$0xff]  }
 0x257   : > { %4563 = vmatmul.mubr.bf16.gmra.mrb[4].mxu0 %v2736_v24  ;;  %5975 = vmatmul.mubr.bf16.gmra.mrb[4].mxu1 %v2736_v24  ;;  %v2497_v60 = vadd.bf16 %v12308_v63, %v16933_v35  ;;  %v10349_v24 = vld [vmem:[#allocation2 + $0x284] ss:$16 sps:$4 sm:$0xff]  }
 0x258   : > { %4572 = vmatprep.mubr.bf16.mxu0 %v2745_v40  ;;  %5984 = vmatprep.mubr.bf16.mxu1 %v2745_v40 }
 0x259   : > { %4878 = vmatpush1.bf16.msra.mxu0 %v10335_v61  ;;  %6290 = vmatpush1.bf16.msra.mxu1 %v10338_v10  ;;  %v2744_v61 = vmax.bf16 %v16678_v52, %v2488_v48  ;;  %v2753_v3 = vmax.bf16 %v16678_v52, %v2497_v60  ;;  %v10350_v48 = vld [vmem:[#allocation2 + $0x288] ss:$16 sps:$4 sm:$0xff]   ;;  %v16939_v10 = vld [vmem:[#allocation20_spill] sm:$0xff] }
 0x25a   : > { %v12431_v37 = vpop.f32.mrb[156].mxu0  ;;  %4879 = vmatprep.subr.bf16.mxu0 %v10343_v13  ;;  %v12437_v59 = vpop.f32.mrb[156].mxu1  ;;  %6291 = vmatprep.subr.bf16.mxu1 %v10346_v46  ;;  %v10353_v60 = vld [vmem:[#allocation2 + $0x2a0] ss:$16 sps:$4 sm:$0xff]  }
 0x25b   : > { %16932 = vst [vmem:[#allocation272_spill] sm:$0xff] %v12431_v37  ;;  %16934 = vst [vmem:[#allocation273_spill] sm:$0xff] %v12437_v59  ;;  %v12439_v28 = vpop.f32.mrb[157].mxu0  ;;  %v12441_v33 = vpop.f32.mrb[157].mxu1  ;;  %v16940_v59 = vpack.c.bf16 %v11317_v45, %v16939_v10  ;;  %v10364_v45 = vld [vmem:[#allocation2 + $0x2cc] ss:$16 sps:$4 sm:$0xff]  }
 0x25c   : > { %16935 = vst [vmem:[#allocation274_spill] sm:$0xff] %v12441_v33  ;;  %v12443_v40 = vpop.f32.mrb[158].mxu0  ;;  %v12448_v22 = vpop.f32.mrb[158].mxu1  ;;  %v10359_v10 = vld [vmem:[#allocation2 + $0x2c0] ss:$16 sps:$4 sm:$0xff]  }
 0x25d   : > { %16936 = vst [vmem:[#allocation275_spill] sm:$0xff] %v12443_v40  ;;  %16937 = vst [vmem:[#allocation276_spill] sm:$0xff] %v12448_v22  ;;  %v12450_v13 = vpop.f32.mrb[159].mxu0  ;;  %4880 = vmatpush1.bf16.msra.mxu0 %v10341_v43  ;;  %v12456_v35 = vpop.f32.mrb[159].mxu1  ;;  %6292 = vmatpush1.bf16.msra.mxu1 %v10344_v58  ;;  %v10358_v43 = vld [vmem:[#allocation2 + $0x2ac] ss:$16 sps:$4 sm:$0xff]   ;;  %v2496_v46 = vadd.bf16 %v12338_v27, %v16940_v59 }
 0x25e   : > { %16938 = vst [vmem:[#allocation277_spill] sm:$0xff] %v12456_v35  ;;  %4881 = vmatprep.subr.bf16.mxu0 %v10349_v24  ;;  %6293 = vmatprep.subr.bf16.mxu1 %v10352_v25  ;;  %v16942_v24 = vld [vmem:[#allocation31_spill] sm:$0xff] }
 0x25f   : > { %4573 = vmatmul.mubr.bf16.gmra.mrb[8].mxu0 %v2744_v61  ;;  %5985 = vmatmul.mubr.bf16.gmra.mrb[8].mxu1 %v2744_v61  ;;  %v16943_v22 = vld [vmem:[#allocation27_spill] sm:$0xff]  ;;  %v10361_v61 = vld [vmem:[#allocation2 + $0x2c4] ss:$16 sps:$4 sm:$0xff]  }
 0x260   : > { %4582 = vmatprep.mubr.bf16.mxu0 %v2753_v3  ;;  %5994 = vmatprep.mubr.bf16.mxu1 %v2753_v3  ;;  %v16944_v37 = vpack.c.bf16 %v16942_v24, %v16943_v22  ;;  %v10356_v25 = vld [vmem:[#allocation2 + $0x2a8] ss:$16 sps:$4 sm:$0xff]   ;;  %v10367_v22 = vld [vmem:[#allocation2 + $0x2e4] ss:$16 sps:$4 sm:$0xff]  }
 0x261   : > { %4882 = vmatpush1.bf16.msra.mxu0 %v10347_v21  ;;  %6294 = vmatpush1.bf16.msra.mxu1 %v10350_v48  ;;  %v2752_v21 = vmax.bf16 %v16678_v52, %v2496_v46  ;;  %v10362_v46 = vld [vmem:[#allocation2 + $0x2c8] ss:$16 sps:$4 sm:$0xff]  }
 0x262   : > { %v12465_v58 = vpop.f32.mrb[160].mxu0  ;;  %v2505_v14 = vadd.bf16 %v12308_v63, %v16944_v37  ;;  %4883 = vmatprep.subr.bf16.mxu0 %v10355_v8  ;;  %v12471_v33 = vpop.f32.mrb[160].mxu1  ;;  %6295 = vmatprep.subr.bf16.mxu1 %v10358_v43  ;;  %v16952_v48 = vld [vmem:[#allocation29_spill] sm:$0xff] }
 0x263   : > { %16941 = vst [vmem:[#allocation20_spill] sm:$0xff] %v12465_v58  ;;  %16945 = vst [vmem:[#allocation31_spill] sm:$0xff] %v12471_v33  ;;  %v12473_v35 = vpop.f32.mrb[161].mxu0  ;;  %v12475_v59 = vpop.f32.mrb[161].mxu1  ;;  %v16953_v33 = vld [vmem:[#allocation25_spill] sm:$0xff] }
 0x264   : > { %16946 = vst [vmem:[#allocation27_spill] sm:$0xff] %v12473_v35  ;;  %16947 = vst [vmem:[#allocation278_spill] sm:$0xff] %v12475_v59  ;;  %v12477_v3 = vpop.f32.mrb[162].mxu0  ;;  %v12482_v37 = vpop.f32.mrb[162].mxu1  ;;  %v2761_v40 = vmax.bf16 %v16678_v52, %v2505_v14  ;;  %v10365_v14 = vld [vmem:[#allocation2 + $0x2e0] ss:$16 sps:$4 sm:$0xff]  }
 0x265   : > { %16948 = vst [vmem:[#allocation279_spill] sm:$0xff] %v12477_v3  ;;  %16949 = vst [vmem:[#allocation280_spill] sm:$0xff] %v12482_v37  ;;  %v12484_v8 = vpop.f32.mrb[163].mxu0  ;;  %4884 = vmatpush1.bf16.msra.mxu0 %v10353_v60  ;;  %v12490_v24 = vpop.f32.mrb[163].mxu1  ;;  %6296 = vmatpush1.bf16.msra.mxu1 %v10356_v25  ;;  %v10370_v60 = vld [vmem:[#allocation2 + $0x2ec] ss:$16 sps:$4 sm:$0xff]   ;;  %v16954_v37 = vpack.c.bf16 %v16952_v48, %v16953_v33 }
 0x266   : > { %16950 = vst [vmem:[#allocation281_spill] sm:$0xff] %v12484_v8  ;;  %16951 = vst [vmem:[#allocation282_spill] sm:$0xff] %v12490_v24  ;;  %4885 = vmatprep.subr.bf16.mxu0 %v10361_v61  ;;  %6297 = vmatprep.subr.bf16.mxu1 %v10364_v45  ;;  %v16956_v61 = vld [vmem:[#allocation39_spill] sm:$0xff]  ;;  %v10371_v48 = vld [vmem:[#allocation2 + $0x300] ss:$16 sps:$4 sm:$0xff]  }
 0x267   : > { %4583 = vmatmul.mubr.bf16.gmra.mrb[12].mxu0 %v2752_v21  ;;  %5995 = vmatmul.mubr.bf16.gmra.mrb[12].mxu1 %v2752_v21  ;;  %v2504_v43 = vadd.bf16 %v12338_v27, %v16954_v37  ;;  %v16957_v3 = vld [vmem:[#allocation35_spill] sm:$0xff]  ;;  %v10373_v21 = vld [vmem:[#allocation2 + $0x304] ss:$16 sps:$4 sm:$0xff]  }
 0x268   : > { %4592 = vmatprep.mubr.bf16.mxu0 %v2761_v40  ;;  %6004 = vmatprep.mubr.bf16.mxu1 %v2761_v40  ;;  %v16958_v35 = vpack.c.bf16 %v16956_v61, %v16957_v3  ;;  %v10368_v45 = vld [vmem:[#allocation2 + $0x2e8] ss:$16 sps:$4 sm:$0xff]   ;;  %v10376_v33 = vld [vmem:[#allocation2 + $0x30c] ss:$16 sps:$4 sm:$0xff]   ;;  %v10379_v3 = vld [vmem:[#allocation2 + $0x324] ss:$16 sps:$4 sm:$0xff]  }
 0x269   : > { %4886 = vmatpush1.bf16.msra.mxu0 %v10359_v10  ;;  %6298 = vmatpush1.bf16.msra.mxu1 %v10362_v46  ;;  %v2760_v10 = vmax.bf16 %v16678_v52, %v2504_v43  ;;  %v10374_v43 = vld [vmem:[#allocation2 + $0x308] ss:$16 sps:$4 sm:$0xff]  }
 0x26a   : > { %v12499_v25 = vpop.f32.mrb[164].mxu0  ;;  %v2513_v58 = vadd.bf16 %v12308_v63, %v16958_v35  ;;  %4887 = vmatprep.subr.bf16.mxu0 %v10367_v22  ;;  %v12505_v59 = vpop.f32.mrb[164].mxu1  ;;  %6299 = vmatprep.subr.bf16.mxu1 %v10370_v60  ;;  %v16966_v46 = vld [vmem:[#allocation37_spill] sm:$0xff] }
 0x26b   : > { %16955 = vst [vmem:[#allocation29_spill] sm:$0xff] %v12499_v25  ;;  %16959 = vst [vmem:[#allocation25_spill] sm:$0xff] %v12505_v59  ;;  %v12507_v24 = vpop.f32.mrb[165].mxu0  ;;  %v12509_v40 = vpop.f32.mrb[165].mxu1  ;;  %v16967_v59 = vld [vmem:[#allocation33_spill] sm:$0xff] }
 0x26c   : > { %16960 = vst [vmem:[#allocation39_spill] sm:$0xff] %v12507_v24  ;;  %16961 = vst [vmem:[#allocation35_spill] sm:$0xff] %v12509_v40  ;;  %v12511_v37 = vpop.f32.mrb[166].mxu0  ;;  %v12516_v35 = vpop.f32.mrb[166].mxu1  ;;  %v2769_v8 = vmax.bf16 %v16678_v52, %v2513_v58  ;;  %v10377_v58 = vld [vmem:[#allocation2 + $0x320] ss:$16 sps:$4 sm:$0xff]  }
 0x26d   : > { %16962 = vst [vmem:[#allocation283_spill] sm:$0xff] %v12511_v37  ;;  %16963 = vst [vmem:[#allocation284_spill] sm:$0xff] %v12516_v35  ;;  %v12518_v22 = vpop.f32.mrb[167].mxu0  ;;  %4888 = vmatpush1.bf16.msra.mxu0 %v10365_v14  ;;  %v12524_v61 = vpop.f32.mrb[167].mxu1  ;;  %6300 = vmatpush1.bf16.msra.mxu1 %v10368_v45  ;;  %v10382_v14 = vld [vmem:[#allocation2 + $0x32c] ss:$16 sps:$4 sm:$0xff]   ;;  %v16968_v35 = vpack.c.bf16 %v16966_v46, %v16967_v59 }
 0x26e   : > { %16964 = vst [vmem:[#allocation285_spill] sm:$0xff] %v12518_v22  ;;  %16965 = vst [vmem:[#allocation286_spill] sm:$0xff] %v12524_v61  ;;  %4889 = vmatprep.subr.bf16.mxu0 %v10373_v21  ;;  %6301 = vmatprep.subr.bf16.mxu1 %v10376_v33  ;;  %v16970_v21 = vld [vmem:[#allocation47_spill] sm:$0xff]  ;;  %v10383_v46 = vld [vmem:[#allocation2 + $0x340] ss:$16 sps:$4 sm:$0xff]  }
 0x26f   : > { %4593 = vmatmul.mubr.bf16.gmra.mrb[16].mxu0 %v2760_v10  ;;  %6005 = vmatmul.mubr.bf16.gmra.mrb[16].mxu1 %v2760_v10  ;;  %v2512_v60 = vadd.bf16 %v12338_v27, %v16968_v35  ;;  %v16971_v37 = vld [vmem:[#allocation43_spill] sm:$0xff]  ;;  %v10385_v10 = vld [vmem:[#allocation2 + $0x344] ss:$16 sps:$4 sm:$0xff]  }
 0x270   : > { %4602 = vmatprep.mubr.bf16.mxu0 %v2769_v8  ;;  %6014 = vmatprep.mubr.bf16.mxu1 %v2769_v8  ;;  %v16972_v24 = vpack.c.bf16 %v16970_v21, %v16971_v37  ;;  %v10380_v33 = vld [vmem:[#allocation2 + $0x328] ss:$16 sps:$4 sm:$0xff]   ;;  %v10388_v59 = vld [vmem:[#allocation2 + $0x34c] ss:$16 sps:$4 sm:$0xff]  }
 0x271   : > { %4890 = vmatpush1.bf16.msra.mxu0 %v10371_v48  ;;  %6302 = vmatpush1.bf16.msra.mxu1 %v10374_v43  ;;  %v2768_v48 = vmax.bf16 %v16678_v52, %v2512_v60  ;;  %v10386_v60 = vld [vmem:[#allocation2 + $0x348] ss:$16 sps:$4 sm:$0xff]  }
 0x272   : > { %v12533_v45 = vpop.f32.mrb[168].mxu0  ;;  %v2521_v25 = vadd.bf16 %v12308_v63, %v16972_v24  ;;  %4891 = vmatprep.subr.bf16.mxu0 %v10379_v3  ;;  %v12539_v40 = vpop.f32.mrb[168].mxu1  ;;  %6303 = vmatprep.subr.bf16.mxu1 %v10382_v14 }
 0x273   : > { %16969 = vst [vmem:[#allocation37_spill] sm:$0xff] %v12533_v45  ;;  %16973 = vst [vmem:[#allocation33_spill] sm:$0xff] %v12539_v40  ;;  %v12541_v61 = vpop.f32.mrb[169].mxu0  ;;  %v12543_v8 = vpop.f32.mrb[169].mxu1  ;;  %v16978_v45 = vld [vmem:[#allocation41_spill] sm:$0xff] }
 0x274   : > { %16974 = vst [vmem:[#allocation47_spill] sm:$0xff] %v12543_v8  ;;  %v12545_v35 = vpop.f32.mrb[170].mxu0  ;;  %v12550_v24 = vpop.f32.mrb[170].mxu1  ;;  %v2777_v22 = vmax.bf16 %v16678_v52, %v2521_v25  ;;  %v16981_v25 = vld [vmem:[#allocation51_spill] sm:$0xff] }
 0x275   : > { %16975 = vst [vmem:[#allocation43_spill] sm:$0xff] %v12550_v24  ;;  %v12552_v3 = vpop.f32.mrb[171].mxu0  ;;  %4892 = vmatpush1.bf16.msra.mxu0 %v10377_v58  ;;  %v12558_v21 = vpop.f32.mrb[171].mxu1  ;;  %6304 = vmatpush1.bf16.msra.mxu1 %v10380_v33  ;;  %v16977_v58 = vld [vmem:[#allocation45_spill] sm:$0xff]  ;;  %v16982_v33 = vpack.c.bf16 %v11447_v9, %v16981_v25 }
 0x276   : > { %16976 = vst [vmem:[#allocation287_spill] sm:$0xff] %v12558_v21  ;;  %4893 = vmatprep.subr.bf16.mxu0 %v10385_v10  ;;  %6305 = vmatprep.subr.bf16.mxu1 %v10388_v59  ;;  %v16979_v43 = vpack.c.bf16 %v16977_v58, %v16978_v45 }
 0x277   : > { %4603 = vmatmul.mubr.bf16.gmra.mrb[20].mxu0 %v2768_v48  ;;  %6015 = vmatmul.mubr.bf16.gmra.mrb[20].mxu1 %v2768_v48  ;;  %v2529_v10 = vadd.bf16 %v12308_v63, %v16982_v33  ;;  %v16989_v33 = vld [vmem:[#allocation53_spill] sm:$0xff] }
 0x278   : > { %4612 = vmatprep.mubr.bf16.mxu0 %v2777_v22  ;;  %v2520_v40 = vadd.bf16 %v12338_v27, %v16979_v43  ;;  %6024 = vmatprep.mubr.bf16.mxu1 %v2777_v22  ;;  %v16990_v22 = vld [vmem:[#allocation49_spill] sm:$0xff] }
 0x279   : > { %4894 = vmatpush1.bf16.msra.mxu0 %v10383_v46  ;;  %6306 = vmatpush1.bf16.msra.mxu1 %v10386_v60  ;;  %v2785_v25 = vmax.bf16 %v16678_v52, %v2529_v10  ;;  %v16991_v8 = vpack.c.bf16 %v16989_v33, %v16990_v22  ;;  %v16993_v60 = vld [vmem:[#allocation58_spill] sm:$0xff]  ;;  %v17003_v33 = vpack.c.bf16 %v11507_v54, %v11497_v51 }
 0x27a   : > { %v12567_v14 = vpop.f32.mrb[172].mxu0  ;;  %v12573_v37 = vpop.f32.mrb[172].mxu1  ;;  %v2776_v45 = vmax.bf16 %v16678_v52, %v2520_v40  ;;  %v10389_v10 = vld [vmem:[#allocation2 + $0x360] ss:$16 sps:$4 sm:$0xff]   ;;  %v17013_v51 = vpack.c.bf16 %v11537_v23, %v11527_v15  ;;  %v17020_v23 = vld [vmem:[#allocation79_spill] sm:$0xff] }
 0x27b   : > { %16980 = vst [vmem:[#allocation45_spill] sm:$0xff] %v12567_v14  ;;  %16983 = vst [vmem:[#allocation41_spill] sm:$0xff] %v12573_v37  ;;  %v12575_v59 = vpop.f32.mrb[173].mxu0  ;;  %v12577_v48 = vpop.f32.mrb[173].mxu1  ;;  %v2528_v21 = vadd.bf16 %v12338_v27, %v16991_v8  ;;  %v16994_v37 = vpack.c.bf16 %v11477_v41, %v16993_v60  ;;  %v10391_v14 = vld [vmem:[#allocation2 + $0x364] ss:$16 sps:$4 sm:$0xff]  }
 0x27c   : > { %16984 = vst [vmem:[#allocation51_spill] sm:$0xff] %v12575_v59  ;;  %16985 = vst [vmem:[#allocation288_spill] sm:$0xff] %v12577_v48  ;;  %v12579_v24 = vpop.f32.mrb[174].mxu0  ;;  %v12584_v46 = vpop.f32.mrb[174].mxu1  ;;  %v10394_v48 = vld [vmem:[#allocation2 + $0x36c] ss:$16 sps:$4 sm:$0xff]   ;;  %4895 = vmatprep.subr.bf16.mxu0 %v10391_v14 }
 0x27d   : > { %16986 = vst [vmem:[#allocation289_spill] sm:$0xff] %v12579_v24  ;;  %16987 = vst [vmem:[#allocation290_spill] sm:$0xff] %v12584_v46  ;;  %v12586_v43 = vpop.f32.mrb[175].mxu0  ;;  %v12592_v58 = vpop.f32.mrb[175].mxu1  ;;  %v2537_v46 = vadd.bf16 %v12308_v63, %v16994_v37  ;;  %v2784_v8 = vmax.bf16 %v16678_v52, %v2528_v21  ;;  %6307 = vmatprep.subr.bf16.mxu1 %v10394_v48  ;;  %4896 = vmatpush1.bf16.msra.mxu0 %v10389_v10  ;;  %v16999_v41 = vld [vmem:[#allocation60_spill] sm:$0xff] }
 0x27e   : > { %16988 = vst [vmem:[#allocation291_spill] sm:$0xff] %v12592_v58  ;;  %v17000_v48 = vld [vmem:[#allocation56_spill] sm:$0xff] }
 0x27f   : > { %4613 = vmatmul.mubr.bf16.gmra.mrb[24].mxu0 %v2776_v45  ;;  %6025 = vmatmul.mubr.bf16.gmra.mrb[24].mxu1 %v2776_v45  ;;  %v10392_v45 = vld [vmem:[#allocation2 + $0x368] ss:$16 sps:$4 sm:$0xff]   ;;  %v2793_v14 = vmax.bf16 %v16678_v52, %v2537_v46  ;;  %v17001_v10 = vpack.c.bf16 %v16999_v41, %v17000_v48  ;;  %v2545_v46 = vadd.bf16 %v12308_v63, %v17003_v33 }
 0x280   : > { %4622 = vmatprep.mubr.bf16.mxu0 %v2785_v25  ;;  %6034 = vmatprep.mubr.bf16.mxu1 %v2785_v25 }
 0x281   : > { %6308 = vmatpush1.bf16.msra.mxu1 %v10392_v45 }
 0x282   : > { %v12601_v9 = vpop.f32.mrb[176].mxu0  ;;  %v12607_v24 = vpop.f32.mrb[176].mxu1 }
 0x283   : > { %16992 = vst [vmem:[#allocation53_spill] sm:$0xff] %v12601_v9  ;;  %16995 = vst [vmem:[#allocation49_spill] sm:$0xff] %v12607_v24  ;;  %v12609_v40 = vpop.f32.mrb[177].mxu0  ;;  %v12611_v58 = vpop.f32.mrb[177].mxu1  ;;  %v2536_v9 = vadd.bf16 %v12338_v27, %v17001_v10 }
 0x284   : > { %16996 = vst [vmem:[#allocation58_spill] sm:$0xff] %v12611_v58  ;;  %v12613_v22 = vpop.f32.mrb[178].mxu0  ;;  %v12618_v60 = vpop.f32.mrb[178].mxu1  ;;  %v17011_v58 = vld [vmem:[#allocation63_spill] sm:$0xff] }
 0x285   : > { %16997 = vst [vmem:[#allocation292_spill] sm:$0xff] %v12618_v60  ;;  %v12620_v37 = vpop.f32.mrb[179].mxu0  ;;  %v12626_v59 = vpop.f32.mrb[179].mxu1  ;;  %v2792_v41 = vmax.bf16 %v16678_v52, %v2536_v9  ;;  %v2801_v60 = vmax.bf16 %v16678_v52, %v2545_v46  ;;  %v10395_v46 = vld [vmem:[#allocation2 + $0x380] ss:$16 sps:$4 sm:$0xff]  }
 0x286   : > { %16998 = vst [vmem:[#allocation293_spill] sm:$0xff] %v12626_v59 }
 0x287   : > { %4623 = vmatmul.mubr.bf16.gmra.mrb[28].mxu0 %v2784_v8  ;;  %6035 = vmatmul.mubr.bf16.gmra.mrb[28].mxu1 %v2784_v8 }
 0x288   : > { %4632 = vmatprep.mubr.bf16.mxu0 %v2793_v14  ;;  %6044 = vmatprep.mubr.bf16.mxu1 %v2793_v14  ;;  %v17010_v14 = vld [vmem:[#allocation66_spill] sm:$0xff] }
 0x289   : > { %v17012_v59 = vpack.c.bf16 %v17010_v14, %v17011_v58 }
 0x28a   : > { %v12635_v25 = vpop.f32.mrb[180].mxu0  ;;  %v12641_v45 = vpop.f32.mrb[180].mxu1 }
 0x28b   : > { %17002 = vst [vmem:[#allocation60_spill] sm:$0xff] %v12635_v25  ;;  %17004 = vst [vmem:[#allocation56_spill] sm:$0xff] %v12641_v45  ;;  %v12643_v24 = vpop.f32.mrb[181].mxu0  ;;  %v12645_v21 = vpop.f32.mrb[181].mxu1  ;;  %v2544_v25 = vadd.bf16 %v12338_v27, %v17012_v59  ;;  %v2553_v45 = vadd.bf16 %v12308_v63, %v17013_v51  ;;  %v17021_v51 = vld [vmem:[#allocation75_spill] sm:$0xff] }
 0x28c   : > { %17005 = vst [vmem:[#allocation294_spill] sm:$0xff] %v12643_v24  ;;  %17006 = vst [vmem:[#allocation295_spill] sm:$0xff] %v12645_v21  ;;  %v12647_v8 = vpop.f32.mrb[182].mxu0  ;;  %v12652_v48 = vpop.f32.mrb[182].mxu1  ;;  %v10400_v21 = vld [vmem:[#allocation2 + $0x38c] ss:$16 sps:$4 sm:$0xff]  }
 0x28d   : > { %17007 = vst [vmem:[#allocation296_spill] sm:$0xff] %v12647_v8  ;;  %17008 = vst [vmem:[#allocation297_spill] sm:$0xff] %v12652_v48  ;;  %v12654_v10 = vpop.f32.mrb[183].mxu0  ;;  %v12660_v33 = vpop.f32.mrb[183].mxu1  ;;  %v10397_v48 = vld [vmem:[#allocation2 + $0x384] ss:$16 sps:$4 sm:$0xff]   ;;  %v2800_v59 = vmax.bf16 %v16678_v52, %v2544_v25  ;;  %6309 = vmatprep.subr.bf16.mxu1 %v10400_v21  ;;  %v17018_v21 = vpack.c.bf16 %v11531_v7, %v11523_v42 }
 0x28e   : > { %17009 = vst [vmem:[#allocation298_spill] sm:$0xff] %v12660_v33  ;;  %4897 = vmatprep.subr.bf16.mxu0 %v10397_v48  ;;  %v2809_v48 = vmax.bf16 %v16678_v52, %v2553_v45  ;;  %v17030_v7 = vld [vmem:[#allocation77_spill] sm:$0xff] }
 0x28f   : > { %4633 = vmatmul.mubr.bf16.gmra.mrb[32].mxu0 %v2792_v41  ;;  %6045 = vmatmul.mubr.bf16.gmra.mrb[32].mxu1 %v2792_v41  ;;  %v10398_v41 = vld [vmem:[#allocation2 + $0x388] ss:$16 sps:$4 sm:$0xff]  }
 0x290   : > { %4642 = vmatprep.mubr.bf16.mxu0 %v2801_v60  ;;  %6054 = vmatprep.mubr.bf16.mxu1 %v2801_v60 }
 0x291   : > { %4898 = vmatpush1.bf16.msra.mxu0 %v10395_v46  ;;  %6310 = vmatpush1.bf16.msra.mxu1 %v10398_v41  ;;  %v2552_v46 = vadd.bf16 %v12338_v27, %v17018_v21 }
 0x292   : > { %v12669_v54 = vpop.f32.mrb[184].mxu0  ;;  %v12675_v8 = vpop.f32.mrb[184].mxu1 }
 0x293   : > { %17014 = vst [vmem:[#allocation66_spill] sm:$0xff] %v12675_v8  ;;  %v12677_v9 = vpop.f32.mrb[185].mxu0  ;;  %v12679_v33 = vpop.f32.mrb[185].mxu1  ;;  %v17022_v8 = vpack.c.bf16 %v17020_v23, %v17021_v51  ;;  %v2808_v42 = vmax.bf16 %v16678_v52, %v2552_v46  ;;  %v17034_v23 = vpack.c.bf16 %v11597_v56, %v11587_v5  ;;  %v17042_v56 = vld [vmem:[#allocation84_spill] sm:$0xff] }
 0x294   : > { %17015 = vst [vmem:[#allocation63_spill] sm:$0xff] %v12679_v33  ;;  %v12681_v58 = vpop.f32.mrb[186].mxu0  ;;  %v12686_v15 = vpop.f32.mrb[186].mxu1 }
 0x295   : > { %17016 = vst [vmem:[#allocation299_spill] sm:$0xff] %v12686_v15  ;;  %v12688_v60 = vpop.f32.mrb[187].mxu0  ;;  %v12694_v24 = vpop.f32.mrb[187].mxu1  ;;  %v2561_v45 = vadd.bf16 %v12308_v63, %v17022_v8 }
 0x296   : > { %17017 = vst [vmem:[#allocation300_spill] sm:$0xff] %v12694_v24  ;;  %v17031_v24 = vld [vmem:[#allocation73_spill] sm:$0xff] }
 0x297   : > { %4643 = vmatmul.mubr.bf16.gmra.mrb[36].mxu0 %v2800_v59  ;;  %6055 = vmatmul.mubr.bf16.gmra.mrb[36].mxu1 %v2800_v59  ;;  %v2817_v33 = vmax.bf16 %v16678_v52, %v2561_v45  ;;  %v10401_v45 = vld [vmem:[#allocation2 + $0x3a0] ss:$16 sps:$4 sm:$0xff]  }
 0x298   : > { %4652 = vmatprep.mubr.bf16.mxu0 %v2809_v48  ;;  %6064 = vmatprep.mubr.bf16.mxu1 %v2809_v48 }
 0x29a   : > { %v12703_v14 = vpop.f32.mrb[188].mxu0  ;;  %v12709_v41 = vpop.f32.mrb[188].mxu1 }
 0x29b   : > { %17019 = vst [vmem:[#allocation301_spill] sm:$0xff] %v12703_v14  ;;  %17023 = vst [vmem:[#allocation79_spill] sm:$0xff] %v12709_v41  ;;  %v12711_v15 = vpop.f32.mrb[189].mxu0  ;;  %v12713_v25 = vpop.f32.mrb[189].mxu1  ;;  %v17032_v14 = vpack.c.bf16 %v17030_v7, %v17031_v24  ;;  %v2569_v41 = vadd.bf16 %v12308_v63, %v17034_v23  ;;  %v17046_v23 = vld [vmem:[#allocation93_spill] sm:$0xff] }
 0x29c   : > { %17024 = vst [vmem:[#allocation75_spill] sm:$0xff] %v12711_v15  ;;  %17025 = vst [vmem:[#allocation302_spill] sm:$0xff] %v12713_v25  ;;  %v12715_v59 = vpop.f32.mrb[190].mxu0  ;;  %v12720_v48 = vpop.f32.mrb[190].mxu1  ;;  %v10406_v25 = vld [vmem:[#allocation2 + $0x3ac] ss:$16 sps:$4 sm:$0xff]  }
 0x29d   : > { %17026 = vst [vmem:[#allocation303_spill] sm:$0xff] %v12715_v59  ;;  %17027 = vst [vmem:[#allocation304_spill] sm:$0xff] %v12720_v48  ;;  %v12722_v21 = vpop.f32.mrb[191].mxu0  ;;  %v12728_v51 = vpop.f32.mrb[191].mxu1  ;;  %v2560_v59 = vadd.bf16 %v12338_v27, %v17032_v14  ;;  %v10403_v48 = vld [vmem:[#allocation2 + $0x3a4] ss:$16 sps:$4 sm:$0xff]   ;;  %6311 = vmatprep.subr.bf16.mxu1 %v10406_v25 }
 0x29e   : > { %17028 = vst [vmem:[#allocation305_spill] sm:$0xff] %v12722_v21  ;;  %17029 = vst [vmem:[#allocation306_spill] sm:$0xff] %v12728_v51  ;;  %4899 = vmatprep.subr.bf16.mxu0 %v10403_v48  ;;  %v2825_v48 = vmax.bf16 %v16678_v52, %v2569_v41  ;;  %v17043_v25 = vld [vmem:[#allocation81_spill] sm:$0xff] }
 0x29f   : > { %4653 = vmatmul.mubr.bf16.gmra.mrb[40].mxu0 %v2808_v42  ;;  %6065 = vmatmul.mubr.bf16.gmra.mrb[40].mxu1 %v2808_v42  ;;  %v10404_v42 = vld [vmem:[#allocation2 + $0x3a8] ss:$16 sps:$4 sm:$0xff]  }
 0x2a0   : > { %4662 = vmatprep.mubr.bf16.mxu0 %v2817_v33  ;;  %6074 = vmatprep.mubr.bf16.mxu1 %v2817_v33  ;;  %v2816_v33 = vmax.bf16 %v16678_v52, %v2560_v59 }
 0x2a1   : > { %4900 = vmatpush1.bf16.msra.mxu0 %v10401_v45  ;;  %6312 = vmatpush1.bf16.msra.mxu1 %v10404_v42  ;;  %v17044_v45 = vpack.c.bf16 %v17042_v56, %v17043_v25 }
 0x2a2   : > { %v12737_v8 = vpop.f32.mrb[192].mxu0  ;;  %v12743_v15 = vpop.f32.mrb[192].mxu1 }
 0x2a3   : > { %17033 = vst [vmem:[#allocation77_spill] sm:$0xff] %v12737_v8  ;;  %17035 = vst [vmem:[#allocation73_spill] sm:$0xff] %v12743_v15  ;;  %v12745_v46 = vpop.f32.mrb[193].mxu0  ;;  %v12747_v51 = vpop.f32.mrb[193].mxu1  ;;  %v2568_v8 = vadd.bf16 %v12338_v27, %v17044_v45  ;;  %v17047_v15 = vld [vmem:[#allocation89_spill] sm:$0xff] }
 0x2a4   : > { %17036 = vst [vmem:[#allocation307_spill] sm:$0xff] %v12745_v46  ;;  %17037 = vst [vmem:[#allocation308_spill] sm:$0xff] %v12747_v51  ;;  %v12749_v24 = vpop.f32.mrb[194].mxu0  ;;  %v12754_v5 = vpop.f32.mrb[194].mxu1  ;;  %v17054_v46 = vld [vmem:[#allocation91_spill] sm:$0xff] }
 0x2a5   : > { %17038 = vst [vmem:[#allocation309_spill] sm:$0xff] %v12749_v24  ;;  %17039 = vst [vmem:[#allocation310_spill] sm:$0xff] %v12754_v5  ;;  %v12756_v14 = vpop.f32.mrb[195].mxu0  ;;  %v12762_v21 = vpop.f32.mrb[195].mxu1  ;;  %v17048_v5 = vpack.c.bf16 %v17046_v23, %v17047_v15  ;;  %v2824_v56 = vmax.bf16 %v16678_v52, %v2568_v8 }
 0x2a6   : > { %17040 = vst [vmem:[#allocation311_spill] sm:$0xff] %v12756_v14  ;;  %17041 = vst [vmem:[#allocation312_spill] sm:$0xff] %v12762_v21  ;;  %v10407_v21 = vld [vmem:[#allocation2 + $0x3c0] ss:$16 sps:$4 sm:$0xff]   ;;  %v17055_v14 = vld [vmem:[#allocation87_spill] sm:$0xff] }
 0x2a7   : > { %4663 = vmatmul.mubr.bf16.gmra.mrb[44].mxu0 %v2816_v33  ;;  %6075 = vmatmul.mubr.bf16.gmra.mrb[44].mxu1 %v2816_v33  ;;  %v2577_v41 = vadd.bf16 %v12308_v63, %v17048_v5  ;;  %v17056_v15 = vpack.c.bf16 %v17054_v46, %v17055_v14 }
 0x2a8   : > { %4672 = vmatprep.mubr.bf16.mxu0 %v2825_v48  ;;  %6084 = vmatprep.mubr.bf16.mxu1 %v2825_v48  ;;  %v10409_v48 = vld [vmem:[#allocation2 + $0x3c4] ss:$16 sps:$4 sm:$0xff]  }
 0x2a9   : > { %v2833_v51 = vmax.bf16 %v16678_v52, %v2577_v41  ;;  %4901 = vmatprep.subr.bf16.mxu0 %v10409_v48  ;;  %v17058_v41 = vpack.c.bf16 %v11657_v19, %v11647_v32 }
 0x2aa   : > { %v12771_v7 = vpop.f32.mrb[196].mxu0  ;;  %v12777_v42 = vpop.f32.mrb[196].mxu1  ;;  %4902 = vmatpush1.bf16.msra.mxu0 %v10407_v21  ;;  %v17071_v21 = vld [vmem:[#allocation103_spill] sm:$0xff] }
 0x2ab   : > { %17045 = vst [vmem:[#allocation84_spill] sm:$0xff] %v12771_v7  ;;  %17049 = vst [vmem:[#allocation81_spill] sm:$0xff] %v12777_v42  ;;  %v12779_v24 = vpop.f32.mrb[197].mxu0  ;;  %v12781_v59 = vpop.f32.mrb[197].mxu1  ;;  %v10410_v7 = vld [vmem:[#allocation2 + $0x3c8] ss:$16 sps:$4 sm:$0xff]   ;;  %v2576_v42 = vadd.bf16 %v12338_v27, %v17056_v15  ;;  %v2585_v8 = vadd.bf16 %v12308_v63, %v17058_v41 }
 0x2ac   : > { %17050 = vst [vmem:[#allocation93_spill] sm:$0xff] %v12781_v59  ;;  %v12783_v33 = vpop.f32.mrb[198].mxu0  ;;  %v12788_v25 = vpop.f32.mrb[198].mxu1  ;;  %v17066_v15 = vld [vmem:[#allocation98_spill] sm:$0xff]  ;;  %v17067_v41 = vld [vmem:[#allocation95_spill] sm:$0xff] }
 0x2ad   : > { %17051 = vst [vmem:[#allocation89_spill] sm:$0xff] %v12783_v33  ;;  %17052 = vst [vmem:[#allocation313_spill] sm:$0xff] %v12788_v25  ;;  %v12790_v45 = vpop.f32.mrb[199].mxu0  ;;  %v12796_v23 = vpop.f32.mrb[199].mxu1  ;;  %v10412_v33 = vld [vmem:[#allocation2 + $0x3cc] ss:$16 sps:$4 sm:$0xff]   ;;  %v17068_v14 = vpack.c.bf16 %v17066_v15, %v17067_v41 }
 0x2ae   : > { %17053 = vst [vmem:[#allocation314_spill] sm:$0xff] %v12796_v23  ;;  %6313 = vmatprep.subr.bf16.mxu1 %v10412_v33  ;;  %v2841_v33 = vmax.bf16 %v16678_v52, %v2585_v8 }
 0x2af   : > { %4673 = vmatmul.mubr.bf16.gmra.mrb[48].mxu0 %v2824_v56  ;;  %6085 = vmatmul.mubr.bf16.gmra.mrb[48].mxu1 %v2824_v56  ;;  %v2584_v23 = vadd.bf16 %v12338_v27, %v17068_v14  ;;  %v10415_v14 = vld [vmem:[#allocation2 + $0x3e4] ss:$16 sps:$4 sm:$0xff]  }
 0x2b0   : > { %4682 = vmatprep.mubr.bf16.mxu0 %v2833_v51  ;;  %6094 = vmatprep.mubr.bf16.mxu1 %v2833_v51  ;;  %v2832_v51 = vmax.bf16 %v16678_v52, %v2576_v42 }
 0x2b1   : > { %6314 = vmatpush1.bf16.msra.mxu1 %v10410_v7  ;;  %v2840_v15 = vmax.bf16 %v16678_v52, %v2584_v23  ;;  %4903 = vmatprep.subr.bf16.mxu0 %v10415_v14 }
 0x2b2   : > { %v12805_v5 = vpop.f32.mrb[200].mxu0  ;;  %v12811_v56 = vpop.f32.mrb[200].mxu1 }
 0x2b3   : > { %17057 = vst [vmem:[#allocation91_spill] sm:$0xff] %v12805_v5  ;;  %17059 = vst [vmem:[#allocation87_spill] sm:$0xff] %v12811_v56  ;;  %v12813_v25 = vpop.f32.mrb[201].mxu0  ;;  %v12815_v59 = vpop.f32.mrb[201].mxu1  ;;  %v17070_v56 = vld [vmem:[#allocation107_spill] sm:$0xff] }
 0x2b4   : > { %17060 = vst [vmem:[#allocation315_spill] sm:$0xff] %v12813_v25  ;;  %17061 = vst [vmem:[#allocation316_spill] sm:$0xff] %v12815_v59  ;;  %v12817_v46 = vpop.f32.mrb[202].mxu0  ;;  %v12822_v48 = vpop.f32.mrb[202].mxu1  ;;  %v17078_v25 = vld [vmem:[#allocation105_spill] sm:$0xff] }
 0x2b5   : > { %17062 = vst [vmem:[#allocation317_spill] sm:$0xff] %v12817_v46  ;;  %17063 = vst [vmem:[#allocation318_spill] sm:$0xff] %v12822_v48  ;;  %v12824_v19 = vpop.f32.mrb[203].mxu0  ;;  %v12830_v7 = vpop.f32.mrb[203].mxu1  ;;  %v17072_v48 = vpack.c.bf16 %v17070_v56, %v17071_v21 }
 0x2b6   : > { %17064 = vst [vmem:[#allocation319_spill] sm:$0xff] %v12824_v19  ;;  %17065 = vst [vmem:[#allocation320_spill] sm:$0xff] %v12830_v7  ;;  %v10413_v7 = vld [vmem:[#allocation2 + $0x3e0] ss:$16 sps:$4 sm:$0xff]   ;;  %v17079_v19 = vld [vmem:[#allocation101_spill] sm:$0xff] }
 0x2b7   : > { %4683 = vmatmul.mubr.bf16.gmra.mrb[52].mxu0 %v2832_v51  ;;  %6095 = vmatmul.mubr.bf16.gmra.mrb[52].mxu1 %v2832_v51  ;;  %v2593_v5 = vadd.bf16 %v12308_v63, %v17072_v48  ;;  %v17080_v56 = vpack.c.bf16 %v17078_v25, %v17079_v19 }
 0x2b8   : > { %4692 = vmatprep.mubr.bf16.mxu0 %v2841_v33  ;;  %6104 = vmatprep.mubr.bf16.mxu1 %v2841_v33 }
 0x2b9   : > { %v2849_v59 = vmax.bf16 %v16678_v52, %v2593_v5  ;;  %v17082_v5 = vpack.c.bf16 %v11717_v49, %v11707_v36  ;;  %4904 = vmatpush1.bf16.msra.mxu0 %v10413_v7  ;;  %v17094_v7 = vld [vmem:[#allocation117_spill] sm:$0xff] }
 0x2ba   : > { %v12839_v32 = vpop.f32.mrb[204].mxu0  ;;  %v12845_v8 = vpop.f32.mrb[204].mxu1 }
 0x2bb   : > { %17069 = vst [vmem:[#allocation98_spill] sm:$0xff] %v12839_v32  ;;  %17073 = vst [vmem:[#allocation95_spill] sm:$0xff] %v12845_v8  ;;  %v12847_v46 = vpop.f32.mrb[205].mxu0  ;;  %v12849_v42 = vpop.f32.mrb[205].mxu1  ;;  %v10416_v32 = vld [vmem:[#allocation2 + $0x3e8] ss:$16 sps:$4 sm:$0xff]   ;;  %v2592_v8 = vadd.bf16 %v12338_v27, %v17080_v56  ;;  %v2601_v23 = vadd.bf16 %v12308_v63, %v17082_v5 }
 0x2bc   : > { %17074 = vst [vmem:[#allocation107_spill] sm:$0xff] %v12849_v42  ;;  %v12851_v51 = vpop.f32.mrb[206].mxu0  ;;  %v12856_v33 = vpop.f32.mrb[206].mxu1  ;;  %v17089_v56 = vld [vmem:[#allocation112_spill] sm:$0xff]  ;;  %v17090_v5 = vld [vmem:[#allocation109_spill] sm:$0xff] }
 0x2bd   : > { %17075 = vst [vmem:[#allocation103_spill] sm:$0xff] %v12851_v51  ;;  %17076 = vst [vmem:[#allocation321_spill] sm:$0xff] %v12856_v33  ;;  %v12858_v41 = vpop.f32.mrb[207].mxu0  ;;  %v12864_v21 = vpop.f32.mrb[207].mxu1  ;;  %v10418_v51 = vld [vmem:[#allocation2 + $0x3ec] ss:$16 sps:$4 sm:$0xff]   ;;  %v17091_v19 = vpack.c.bf16 %v17089_v56, %v17090_v5 }
 0x2be   : > { %17077 = vst [vmem:[#allocation322_spill] sm:$0xff] %v12864_v21  ;;  %6315 = vmatprep.subr.bf16.mxu1 %v10418_v51  ;;  %v2857_v51 = vmax.bf16 %v16678_v52, %v2601_v23 }
 0x2bf   : > { %4693 = vmatmul.mubr.bf16.gmra.mrb[56].mxu0 %v2840_v15  ;;  %6105 = vmatmul.mubr.bf16.gmra.mrb[56].mxu1 %v2840_v15  ;;  %v2600_v21 = vadd.bf16 %v12338_v27, %v17091_v19  ;;  %v10424_v19 = vld [vmem:[#allocation2 + $0x40c] ss:$16 sps:$4 sm:$0xff]  }
 0x2c0   : > { %4702 = vmatprep.mubr.bf16.mxu0 %v2849_v59  ;;  %6114 = vmatprep.mubr.bf16.mxu1 %v2849_v59  ;;  %v2848_v59 = vmax.bf16 %v16678_v52, %v2592_v8 }
 0x2c1   : > { %6316 = vmatpush1.bf16.msra.mxu1 %v10416_v32  ;;  %v2856_v56 = vmax.bf16 %v16678_v52, %v2600_v21 }
 0x2c2   : > { %v12873_v48 = vpop.f32.mrb[208].mxu0  ;;  %v12879_v15 = vpop.f32.mrb[208].mxu1  ;;  %6638 = vmatprep.subr.bf16.mxu1 %v10424_v19 }
 0x2c3   : > { %17081 = vst [vmem:[#allocation105_spill] sm:$0xff] %v12873_v48  ;;  %17083 = vst [vmem:[#allocation101_spill] sm:$0xff] %v12879_v15  ;;  %v12881_v33 = vpop.f32.mrb[209].mxu0  ;;  %v12883_v42 = vpop.f32.mrb[209].mxu1  ;;  %v17093_v15 = vld [vmem:[#allocation121_spill] sm:$0xff] }
 0x2c4   : > { %17084 = vst [vmem:[#allocation323_spill] sm:$0xff] %v12881_v33  ;;  %17085 = vst [vmem:[#allocation324_spill] sm:$0xff] %v12883_v42  ;;  %v12885_v25 = vpop.f32.mrb[210].mxu0  ;;  %v12890_v14 = vpop.f32.mrb[210].mxu1 }
 0x2c5   : > { %17086 = vst [vmem:[#allocation325_spill] sm:$0xff] %v12885_v25  ;;  %17087 = vst [vmem:[#allocation326_spill] sm:$0xff] %v12890_v14  ;;  %v12892_v49 = vpop.f32.mrb[211].mxu0  ;;  %v12898_v32 = vpop.f32.mrb[211].mxu1  ;;  %v17095_v14 = vpack.c.bf16 %v17093_v15, %v17094_v7 }
 0x2c6   : > { %17088 = vst [vmem:[#allocation327_spill] sm:$0xff] %v12898_v32  ;;  %v10421_v32 = vld [vmem:[#allocation2 + $0x404] ss:$16 sps:$4 sm:$0xff]  }
 0x2c7   : > { %4703 = vmatmul.mubr.bf16.gmra.mrb[60].mxu0 %v2848_v59  ;;  %6115 = vmatmul.mubr.bf16.gmra.mrb[60].mxu1 %v2848_v59  ;;  %v2609_v48 = vadd.bf16 %v12308_v63, %v17095_v14 }
 0x2c8   : > { %4712 = vmatprep.mubr.bf16.mxu0 %v2857_v51  ;;  %6124 = vmatprep.mubr.bf16.mxu1 %v2857_v51 }
 0x2c9   : > { %v2865_v42 = vmax.bf16 %v16678_v52, %v2609_v48  ;;  %5226 = vmatprep.subr.bf16.mxu0 %v10421_v32  ;;  %v17105_v48 = vpack.c.bf16 %v11777_v17, %v11767_v0  ;;  %v17117_v0 = vld [vmem:[#allocation131_spill] sm:$0xff] }
 0x2ca   : > { %v12907_v36 = vpop.f32.mrb[212].mxu0  ;;  %v12913_v23 = vpop.f32.mrb[212].mxu1 }
 0x2cb   : > { %17092 = vst [vmem:[#allocation112_spill] sm:$0xff] %v12907_v36  ;;  %17096 = vst [vmem:[#allocation109_spill] sm:$0xff] %v12913_v23  ;;  %v12915_v25 = vpop.f32.mrb[213].mxu0  ;;  %v12917_v8 = vpop.f32.mrb[213].mxu1  ;;  %v17101_v36 = vld [vmem:[#allocation119_spill] sm:$0xff]  ;;  %v2617_v23 = vadd.bf16 %v12308_v63, %v17105_v48  ;;  %v17112_v48 = vld [vmem:[#allocation126_spill] sm:$0xff] }
 0x2cc   : > { %17097 = vst [vmem:[#allocation121_spill] sm:$0xff] %v12917_v8  ;;  %v12919_v59 = vpop.f32.mrb[214].mxu0  ;;  %v12924_v51 = vpop.f32.mrb[214].mxu1 }
 0x2cd   : > { %17098 = vst [vmem:[#allocation117_spill] sm:$0xff] %v12919_v59  ;;  %17099 = vst [vmem:[#allocation328_spill] sm:$0xff] %v12924_v51  ;;  %v12926_v5 = vpop.f32.mrb[215].mxu0  ;;  %v12932_v7 = vpop.f32.mrb[215].mxu1  ;;  %v17102_v59 = vld [vmem:[#allocation115_spill] sm:$0xff]  ;;  %v2873_v19 = vmax.bf16 %v16678_v52, %v2617_v23 }
 0x2ce   : > { %17100 = vst [vmem:[#allocation329_spill] sm:$0xff] %v12932_v7  ;;  %v17103_v33 = vpack.c.bf16 %v17101_v36, %v17102_v59 }
 0x2cf   : > { %4713 = vmatmul.mubr.bf16.gmra.mrb[64].mxu0 %v2856_v56  ;;  %6125 = vmatmul.mubr.bf16.gmra.mrb[64].mxu1 %v2856_v56 }
 0x2d0   : > { %4722 = vmatprep.mubr.bf16.mxu0 %v2865_v42  ;;  %v2608_v15 = vadd.bf16 %v12338_v27, %v17103_v33  ;;  %6134 = vmatprep.mubr.bf16.mxu1 %v2865_v42  ;;  %v17113_v42 = vld [vmem:[#allocation123_spill] sm:$0xff] }
 0x2d1   : > { %v17114_v7 = vpack.c.bf16 %v17112_v48, %v17113_v42 }
 0x2d2   : > { %v12941_v14 = vpop.f32.mrb[216].mxu0  ;;  %v12947_v21 = vpop.f32.mrb[216].mxu1  ;;  %v2864_v33 = vmax.bf16 %v16678_v52, %v2608_v15 }
 0x2d3   : > { %17104 = vst [vmem:[#allocation119_spill] sm:$0xff] %v12941_v14  ;;  %17106 = vst [vmem:[#allocation115_spill] sm:$0xff] %v12947_v21  ;;  %v12949_v56 = vpop.f32.mrb[217].mxu0  ;;  %v12951_v51 = vpop.f32.mrb[217].mxu1  ;;  %v2616_v14 = vadd.bf16 %v12338_v27, %v17114_v7  ;;  %v17116_v21 = vld [vmem:[#allocation135_spill] sm:$0xff]  ;;  %v17124_v7 = vld [vmem:[#allocation133_spill] sm:$0xff] }
 0x2d4   : > { %17107 = vst [vmem:[#allocation330_spill] sm:$0xff] %v12949_v56  ;;  %17108 = vst [vmem:[#allocation331_spill] sm:$0xff] %v12951_v51  ;;  %v12953_v8 = vpop.f32.mrb[218].mxu0  ;;  %v12958_v36 = vpop.f32.mrb[218].mxu1 }
 0x2d5   : > { %17109 = vst [vmem:[#allocation332_spill] sm:$0xff] %v12953_v8  ;;  %17110 = vst [vmem:[#allocation333_spill] sm:$0xff] %v12958_v36  ;;  %v12960_v32 = vpop.f32.mrb[219].mxu0  ;;  %v12966_v59 = vpop.f32.mrb[219].mxu1  ;;  %v17118_v36 = vpack.c.bf16 %v17116_v21, %v17117_v0  ;;  %v2872_v42 = vmax.bf16 %v16678_v52, %v2616_v14 }
 0x2d6   : > { %17111 = vst [vmem:[#allocation334_spill] sm:$0xff] %v12966_v59  ;;  %v17125_v59 = vld [vmem:[#allocation129_spill] sm:$0xff] }
 0x2d7   : > { %4723 = vmatmul.mubr.bf16.gmra.mrb[68].mxu0 %v2864_v33  ;;  %6135 = vmatmul.mubr.bf16.gmra.mrb[68].mxu1 %v2864_v33  ;;  %v2625_v8 = vadd.bf16 %v12308_v63, %v17118_v36  ;;  %v17128_v36 = vpack.c.bf16 %v11837_v31, %v11827_v11  ;;  %v17137_v11 = vld [vmem:[#allocation143_spill] sm:$0xff] }
 0x2d8   : > { %4732 = vmatprep.mubr.bf16.mxu0 %v2873_v19  ;;  %6144 = vmatprep.mubr.bf16.mxu1 %v2873_v19 }
 0x2d9   : > { %v2881_v51 = vmax.bf16 %v16678_v52, %v2625_v8 }
 0x2da   : > { %v12975_v17 = vpop.f32.mrb[220].mxu0  ;;  %v12981_v23 = vpop.f32.mrb[220].mxu1 }
 0x2db   : > { %17115 = vst [vmem:[#allocation126_spill] sm:$0xff] %v12975_v17  ;;  %17119 = vst [vmem:[#allocation123_spill] sm:$0xff] %v12981_v23  ;;  %v12983_v56 = vpop.f32.mrb[221].mxu0  ;;  %v12985_v15 = vpop.f32.mrb[221].mxu1  ;;  %v17126_v17 = vpack.c.bf16 %v17124_v7, %v17125_v59  ;;  %v2633_v23 = vadd.bf16 %v12308_v63, %v17128_v36 }
 0x2dc   : > { %17120 = vst [vmem:[#allocation135_spill] sm:$0xff] %v12985_v15  ;;  %v12987_v33 = vpop.f32.mrb[222].mxu0  ;;  %v12992_v19 = vpop.f32.mrb[222].mxu1 }
 0x2dd   : > { %17121 = vst [vmem:[#allocation131_spill] sm:$0xff] %v12987_v33  ;;  %17122 = vst [vmem:[#allocation335_spill] sm:$0xff] %v12992_v19  ;;  %v12994_v48 = vpop.f32.mrb[223].mxu0  ;;  %v13000_v0 = vpop.f32.mrb[223].mxu1  ;;  %v2624_v33 = vadd.bf16 %v12338_v27, %v17126_v17  ;;  %v2889_v15 = vmax.bf16 %v16678_v52, %v2633_v23 }
 0x2de   : > { %17123 = vst [vmem:[#allocation336_spill] sm:$0xff] %v13000_v0 }
 0x2df   : > { %4733 = vmatmul.mubr.bf16.gmra.mrb[72].mxu0 %v2872_v42  ;;  %6145 = vmatmul.mubr.bf16.gmra.mrb[72].mxu1 %v2872_v42  ;;  %v2880_v59 = vmax.bf16 %v16678_v52, %v2624_v33 }
 0x2e0   : > { %4742 = vmatprep.mubr.bf16.mxu0 %v2881_v51  ;;  %6154 = vmatprep.mubr.bf16.mxu1 %v2881_v51  ;;  %v17134_v51 = vpack.c.bf16 %v11831_v1, %v11823_v20  ;;  %v17144_v20 = vld [vmem:[#allocation145_spill] sm:$0xff] }
 0x2e2   : > { %v13009_v21 = vpop.f32.mrb[224].mxu0  ;;  %v13015_v8 = vpop.f32.mrb[224].mxu1  ;;  %v2632_v0 = vadd.bf16 %v12338_v27, %v17134_v51 }
 0x2e3   : > { %17127 = vst [vmem:[#allocation133_spill] sm:$0xff] %v13009_v21  ;;  %17129 = vst [vmem:[#allocation129_spill] sm:$0xff] %v13015_v8  ;;  %v13017_v19 = vpop.f32.mrb[225].mxu0  ;;  %v13019_v14 = vpop.f32.mrb[225].mxu1  ;;  %v17136_v8 = vld [vmem:[#allocation147_spill] sm:$0xff] }
 0x2e4   : > { %17130 = vst [vmem:[#allocation337_spill] sm:$0xff] %v13019_v14  ;;  %v13021_v42 = vpop.f32.mrb[226].mxu0  ;;  %v13026_v17 = vpop.f32.mrb[226].mxu1  ;;  %v2888_v1 = vmax.bf16 %v16678_v52, %v2632_v0 }
 0x2e5   : > { %17131 = vst [vmem:[#allocation338_spill] sm:$0xff] %v13021_v42  ;;  %17132 = vst [vmem:[#allocation339_spill] sm:$0xff] %v13026_v17  ;;  %v13028_v7 = vpop.f32.mrb[227].mxu0  ;;  %v13034_v36 = vpop.f32.mrb[227].mxu1  ;;  %v17138_v17 = vpack.c.bf16 %v17136_v8, %v17137_v11 }
 0x2e6   : > { %17133 = vst [vmem:[#allocation340_spill] sm:$0xff] %v13034_v36  ;;  %v17145_v36 = vld [vmem:[#allocation141_spill] sm:$0xff] }
 0x2e7   : > { %4743 = vmatmul.mubr.bf16.gmra.mrb[76].mxu0 %v2880_v59  ;;  %6155 = vmatmul.mubr.bf16.gmra.mrb[76].mxu1 %v2880_v59  ;;  %v2641_v21 = vadd.bf16 %v12308_v63, %v17138_v17  ;;  %v17148_v17 = vpack.c.bf16 %v11897_v44, %v11887_v55  ;;  %v17159_v44 = vld [vmem:[#allocation157_spill] sm:$0xff] }
 0x2e8   : > { %4752 = vmatprep.mubr.bf16.mxu0 %v2889_v15  ;;  %6164 = vmatprep.mubr.bf16.mxu1 %v2889_v15 }
 0x2e9   : > { %v2897_v14 = vmax.bf16 %v16678_v52, %v2641_v21 }
 0x2ea   : > { %v13043_v31 = vpop.f32.mrb[228].mxu0  ;;  %v13049_v23 = vpop.f32.mrb[228].mxu1 }
 0x2eb   : > { %17135 = vst [vmem:[#allocation341_spill] sm:$0xff] %v13043_v31  ;;  %17139 = vst [vmem:[#allocation147_spill] sm:$0xff] %v13049_v23  ;;  %v13051_v42 = vpop.f32.mrb[229].mxu0  ;;  %v13053_v33 = vpop.f32.mrb[229].mxu1  ;;  %v17146_v31 = vpack.c.bf16 %v17144_v20, %v17145_v36  ;;  %v2649_v23 = vadd.bf16 %v12308_v63, %v17148_v17 }
 0x2ec   : > { %17140 = vst [vmem:[#allocation143_spill] sm:$0xff] %v13053_v33  ;;  %v13055_v59 = vpop.f32.mrb[230].mxu0  ;;  %v13060_v15 = vpop.f32.mrb[230].mxu1 }
 0x2ed   : > { %17141 = vst [vmem:[#allocation342_spill] sm:$0xff] %v13055_v59  ;;  %17142 = vst [vmem:[#allocation343_spill] sm:$0xff] %v13060_v15  ;;  %v13062_v51 = vpop.f32.mrb[231].mxu0  ;;  %v13068_v11 = vpop.f32.mrb[231].mxu1  ;;  %v2640_v59 = vadd.bf16 %v12338_v27, %v17146_v31  ;;  %v2905_v33 = vmax.bf16 %v16678_v52, %v2649_v23 }
 0x2ee   : > { %17143 = vst [vmem:[#allocation344_spill] sm:$0xff] %v13068_v11  ;;  %v17156_v11 = vld [vmem:[#allocation149_spill] sm:$0xff] }
 0x2ef   : > { %4753 = vmatmul.mubr.bf16.gmra.mrb[80].mxu0 %v2888_v1  ;;  %6165 = vmatmul.mubr.bf16.gmra.mrb[80].mxu1 %v2888_v1  ;;  %v2896_v36 = vmax.bf16 %v16678_v52, %v2640_v59 }
 0x2f0   : > { %4762 = vmatprep.mubr.bf16.mxu0 %v2897_v14  ;;  %6174 = vmatprep.mubr.bf16.mxu1 %v2897_v14  ;;  %v17155_v14 = vld [vmem:[#allocation152_spill] sm:$0xff] }
 0x2f2   : > { %v13077_v8 = vpop.f32.mrb[232].mxu0  ;;  %v13083_v21 = vpop.f32.mrb[232].mxu1 }
 0x2f3   : > { %17147 = vst [vmem:[#allocation145_spill] sm:$0xff] %v13077_v8  ;;  %17149 = vst [vmem:[#allocation141_spill] sm:$0xff] %v13083_v21  ;;  %v13085_v15 = vpop.f32.mrb[233].mxu0  ;;  %v13087_v0 = vpop.f32.mrb[233].mxu1  ;;  %v17157_v8 = vpack.c.bf16 %v17155_v14, %v17156_v11  ;;  %v17160_v21 = vpack.c.bf16 %v11927_v57, %v17159_v44 }
 0x2f4   : > { %17150 = vst [vmem:[#allocation345_spill] sm:$0xff] %v13085_v15  ;;  %17151 = vst [vmem:[#allocation346_spill] sm:$0xff] %v13087_v0  ;;  %v13089_v1 = vpop.f32.mrb[234].mxu0  ;;  %v13094_v31 = vpop.f32.mrb[234].mxu1 }
 0x2f5   : > { %17152 = vst [vmem:[#allocation347_spill] sm:$0xff] %v13089_v1  ;;  %17153 = vst [vmem:[#allocation348_spill] sm:$0xff] %v13094_v31  ;;  %v13096_v20 = vpop.f32.mrb[235].mxu0  ;;  %v13102_v17 = vpop.f32.mrb[235].mxu1  ;;  %v2648_v1 = vadd.bf16 %v12338_v27, %v17157_v8  ;;  %v2657_v31 = vadd.bf16 %v12308_v63, %v17160_v21  ;;  %v17171_v21 = vld [vmem:[#allocation164_spill] sm:$0xff] }
 0x2f6   : > { %17154 = vst [vmem:[#allocation349_spill] sm:$0xff] %v13102_v17  ;;  %v17168_v17 = vld [vmem:[#allocation155_spill] sm:$0xff] }
 0x2f7   : > { %4763 = vmatmul.mubr.bf16.gmra.mrb[84].mxu0 %v2896_v36  ;;  %6175 = vmatmul.mubr.bf16.gmra.mrb[84].mxu1 %v2896_v36  ;;  %v2904_v11 = vmax.bf16 %v16678_v52, %v2648_v1  ;;  %v2913_v0 = vmax.bf16 %v16678_v52, %v2657_v31 }
 0x2f8   : > { %4772 = vmatprep.mubr.bf16.mxu0 %v2905_v33  ;;  %6184 = vmatprep.mubr.bf16.mxu1 %v2905_v33  ;;  %v17167_v33 = vld [vmem:[#allocation159_spill] sm:$0xff] }
 0x2fa   : > { %v13111_v55 = vpop.f32.mrb[236].mxu0  ;;  %v13117_v23 = vpop.f32.mrb[236].mxu1 }
 0x2fb   : > { %17158 = vst [vmem:[#allocation152_spill] sm:$0xff] %v13111_v55  ;;  %17161 = vst [vmem:[#allocation149_spill] sm:$0xff] %v13117_v23  ;;  %v13119_v15 = vpop.f32.mrb[237].mxu0  ;;  %v13121_v59 = vpop.f32.mrb[237].mxu1  ;;  %v17169_v55 = vpack.c.bf16 %v17167_v33, %v17168_v17  ;;  %v17172_v23 = vpack.c.bf16 %v11957_v62, %v17171_v21 }
 0x2fc   : > { %17162 = vst [vmem:[#allocation157_spill] sm:$0xff] %v13119_v15  ;;  %17163 = vst [vmem:[#allocation350_spill] sm:$0xff] %v13121_v59  ;;  %v13123_v36 = vpop.f32.mrb[238].mxu0  ;;  %v13128_v8 = vpop.f32.mrb[238].mxu1 }
 0x2fd   : > { %17164 = vst [vmem:[#allocation351_spill] sm:$0xff] %v13123_v36  ;;  %17165 = vst [vmem:[#allocation352_spill] sm:$0xff] %v13128_v8  ;;  %v13130_v14 = vpop.f32.mrb[239].mxu0  ;;  %v13136_v44 = vpop.f32.mrb[239].mxu1  ;;  %v2656_v36 = vadd.bf16 %v12338_v27, %v17169_v55  ;;  %v2665_v8 = vadd.bf16 %v12308_v63, %v17172_v23  ;;  %v17183_v23 = vld [vmem:[#allocation171_spill] sm:$0xff] }
 0x2fe   : > { %17166 = vst [vmem:[#allocation353_spill] sm:$0xff] %v13136_v44  ;;  %v17180_v44 = vld [vmem:[#allocation162_spill] sm:$0xff] }
 0x2ff   : > { %4773 = vmatmul.mubr.bf16.gmra.mrb[88].mxu0 %v2904_v11  ;;  %6185 = vmatmul.mubr.bf16.gmra.mrb[88].mxu1 %v2904_v11  ;;  %v2912_v17 = vmax.bf16 %v16678_v52, %v2656_v36  ;;  %v2921_v59 = vmax.bf16 %v16678_v52, %v2665_v8 }
 0x300   : > { %4782 = vmatprep.mubr.bf16.mxu0 %v2913_v0  ;;  %6194 = vmatprep.mubr.bf16.mxu1 %v2913_v0  ;;  %v17179_v0 = vld [vmem:[#allocation166_spill] sm:$0xff] }
 0x302   : > { %v13145_v57 = vpop.f32.mrb[240].mxu0  ;;  %v13151_v31 = vpop.f32.mrb[240].mxu1 }
 0x303   : > { %17170 = vst [vmem:[#allocation159_spill] sm:$0xff] %v13145_v57  ;;  %17173 = vst [vmem:[#allocation155_spill] sm:$0xff] %v13151_v31  ;;  %v13153_v15 = vpop.f32.mrb[241].mxu0  ;;  %v13155_v1 = vpop.f32.mrb[241].mxu1  ;;  %v17181_v57 = vpack.c.bf16 %v17179_v0, %v17180_v44  ;;  %v17184_v31 = vpack.c.bf16 %v11987_v2, %v17183_v23 }
 0x304   : > { %17174 = vst [vmem:[#allocation164_spill] sm:$0xff] %v13153_v15  ;;  %17175 = vst [vmem:[#allocation354_spill] sm:$0xff] %v13155_v1  ;;  %v13157_v11 = vpop.f32.mrb[242].mxu0  ;;  %v13162_v55 = vpop.f32.mrb[242].mxu1 }
 0x305   : > { %17176 = vst [vmem:[#allocation355_spill] sm:$0xff] %v13157_v11  ;;  %17177 = vst [vmem:[#allocation356_spill] sm:$0xff] %v13162_v55  ;;  %v13164_v33 = vpop.f32.mrb[243].mxu0  ;;  %v13170_v21 = vpop.f32.mrb[243].mxu1  ;;  %v2664_v11 = vadd.bf16 %v12338_v27, %v17181_v57  ;;  %v2673_v55 = vadd.bf16 %v12308_v63, %v17184_v31  ;;  %v17195_v31 = vld [vmem:[#allocation178_spill] sm:$0xff] }
 0x306   : > { %17178 = vst [vmem:[#allocation357_spill] sm:$0xff] %v13170_v21  ;;  %v17192_v21 = vld [vmem:[#allocation169_spill] sm:$0xff] }
 0x307   : > { %4783 = vmatmul.mubr.bf16.gmra.mrb[92].mxu0 %v2912_v17  ;;  %6195 = vmatmul.mubr.bf16.gmra.mrb[92].mxu1 %v2912_v17  ;;  %v2920_v44 = vmax.bf16 %v16678_v52, %v2664_v11  ;;  %v2929_v1 = vmax.bf16 %v16678_v52, %v2673_v55 }
 0x308   : > { %4792 = vmatprep.mubr.bf16.mxu0 %v2921_v59  ;;  %6204 = vmatprep.mubr.bf16.mxu1 %v2921_v59  ;;  %v17191_v59 = vld [vmem:[#allocation173_spill] sm:$0xff] }
 0x30a   : > { %v13179_v62 = vpop.f32.mrb[244].mxu0  ;;  %v13185_v8 = vpop.f32.mrb[244].mxu1 }
 0x30b   : > { %17182 = vst [vmem:[#allocation166_spill] sm:$0xff] %v13179_v62  ;;  %17185 = vst [vmem:[#allocation162_spill] sm:$0xff] %v13185_v8  ;;  %v13187_v15 = vpop.f32.mrb[245].mxu0  ;;  %v13189_v36 = vpop.f32.mrb[245].mxu1  ;;  %v17193_v62 = vpack.c.bf16 %v17191_v59, %v17192_v21  ;;  %v17196_v8 = vpack.c.bf16 %v12017_v6, %v17195_v31 }
 0x30c   : > { %17186 = vst [vmem:[#allocation171_spill] sm:$0xff] %v13187_v15  ;;  %17187 = vst [vmem:[#allocation358_spill] sm:$0xff] %v13189_v36  ;;  %v13191_v17 = vpop.f32.mrb[246].mxu0  ;;  %v13196_v57 = vpop.f32.mrb[246].mxu1 }
 0x30d   : > { %17188 = vst [vmem:[#allocation359_spill] sm:$0xff] %v13191_v17  ;;  %17189 = vst [vmem:[#allocation360_spill] sm:$0xff] %v13196_v57  ;;  %v13198_v0 = vpop.f32.mrb[247].mxu0  ;;  %v13204_v23 = vpop.f32.mrb[247].mxu1  ;;  %v2672_v17 = vadd.bf16 %v12338_v27, %v17193_v62  ;;  %v2681_v57 = vadd.bf16 %v12308_v63, %v17196_v8  ;;  %v17207_v8 = vld [vmem:[#allocation185_spill] sm:$0xff] }
 0x30e   : > { %17190 = vst [vmem:[#allocation361_spill] sm:$0xff] %v13204_v23  ;;  %v17204_v23 = vld [vmem:[#allocation176_spill] sm:$0xff] }
 0x30f   : > { %4793 = vmatmul.mubr.bf16.gmra.mrb[96].mxu0 %v2920_v44  ;;  %6205 = vmatmul.mubr.bf16.gmra.mrb[96].mxu1 %v2920_v44  ;;  %v2928_v21 = vmax.bf16 %v16678_v52, %v2672_v17  ;;  %v2937_v36 = vmax.bf16 %v16678_v52, %v2681_v57 }
 0x310   : > { %4802 = vmatprep.mubr.bf16.mxu0 %v2929_v1  ;;  %6214 = vmatprep.mubr.bf16.mxu1 %v2929_v1  ;;  %v17203_v1 = vld [vmem:[#allocation180_spill] sm:$0xff] }
 0x312   : > { %v13213_v2 = vpop.f32.mrb[248].mxu0  ;;  %v13219_v55 = vpop.f32.mrb[248].mxu1 }
 0x313   : > { %17194 = vst [vmem:[#allocation173_spill] sm:$0xff] %v13213_v2  ;;  %17197 = vst [vmem:[#allocation169_spill] sm:$0xff] %v13219_v55  ;;  %v13221_v15 = vpop.f32.mrb[249].mxu0  ;;  %v13223_v11 = vpop.f32.mrb[249].mxu1  ;;  %v17205_v2 = vpack.c.bf16 %v17203_v1, %v17204_v23  ;;  %v17208_v55 = vpack.c.bf16 %v12047_v12, %v17207_v8  ;;  %v17218_v12 = vld [vmem:[#allocation192_spill] sm:$0xff] }
 0x314   : > { %17198 = vst [vmem:[#allocation178_spill] sm:$0xff] %v13221_v15  ;;  %17199 = vst [vmem:[#allocation362_spill] sm:$0xff] %v13223_v11  ;;  %v13225_v44 = vpop.f32.mrb[250].mxu0  ;;  %v13230_v62 = vpop.f32.mrb[250].mxu1 }
 0x315   : > { %17200 = vst [vmem:[#allocation363_spill] sm:$0xff] %v13225_v44  ;;  %17201 = vst [vmem:[#allocation364_spill] sm:$0xff] %v13230_v62  ;;  %v13232_v59 = vpop.f32.mrb[251].mxu0  ;;  %v13238_v31 = vpop.f32.mrb[251].mxu1  ;;  %v2680_v44 = vadd.bf16 %v12338_v27, %v17205_v2  ;;  %v2689_v62 = vadd.bf16 %v12308_v63, %v17208_v55 }
 0x316   : > { %17202 = vst [vmem:[#allocation365_spill] sm:$0xff] %v13238_v31  ;;  %v17216_v31 = vld [vmem:[#allocation183_spill] sm:$0xff] }
 0x317   : > { %4803 = vmatmul.mubr.bf16.gmra.mrb[100].mxu0 %v2928_v21  ;;  %6215 = vmatmul.mubr.bf16.gmra.mrb[100].mxu1 %v2928_v21  ;;  %v2936_v23 = vmax.bf16 %v16678_v52, %v2680_v44  ;;  %v2945_v11 = vmax.bf16 %v16678_v52, %v2689_v62  ;;  %v17221_v44 = vld [vmem:[#allocation190_spill] sm:$0xff] }
 0x318   : > { %4812 = vmatprep.mubr.bf16.mxu0 %v2937_v36  ;;  %6224 = vmatprep.mubr.bf16.mxu1 %v2937_v36  ;;  %v17215_v36 = vld [vmem:[#allocation187_spill] sm:$0xff] }
 0x31a   : > { %v13247_v6 = vpop.f32.mrb[252].mxu0  ;;  %v13253_v57 = vpop.f32.mrb[252].mxu1 }
 0x31b   : > { %17206 = vst [vmem:[#allocation180_spill] sm:$0xff] %v13247_v6  ;;  %17209 = vst [vmem:[#allocation176_spill] sm:$0xff] %v13253_v57  ;;  %v13255_v15 = vpop.f32.mrb[253].mxu0  ;;  %v13257_v17 = vpop.f32.mrb[253].mxu1  ;;  %v17217_v6 = vpack.c.bf16 %v17215_v36, %v17216_v31  ;;  %v17219_v57 = vpack.c.bf16 %v12077_v16, %v17218_v12  ;;  %v17227_v12 = vld [vmem:[#allocation197_spill] sm:$0xff] }
 0x31c   : > { %17210 = vst [vmem:[#allocation185_spill] sm:$0xff] %v13255_v15  ;;  %17211 = vst [vmem:[#allocation366_spill] sm:$0xff] %v13257_v17  ;;  %v13259_v21 = vpop.f32.mrb[254].mxu0  ;;  %v13264_v2 = vpop.f32.mrb[254].mxu1 }
 0x31d   : > { %17212 = vst [vmem:[#allocation367_spill] sm:$0xff] %v13259_v21  ;;  %17213 = vst [vmem:[#allocation368_spill] sm:$0xff] %v13264_v2  ;;  %v13266_v1 = vpop.f32.mrb[255].mxu0  ;;  %v13272_v8 = vpop.f32.mrb[255].mxu1  ;;  %v2688_v21 = vadd.bf16 %v12338_v27, %v17217_v6  ;;  %v2697_v55 = vadd.bf16 %v12308_v63, %v17219_v57  ;;  %v17223_v6 = vld [vmem:[#allocation203_spill] sm:$0xff] }
 0x31e   : > { %17214 = vst [vmem:[#allocation369_spill] sm:$0xff] %v13272_v8  ;;  %v10433_v8 = vld [vmem:[#allocation2 + $0x444] ss:$16 sps:$4 sm:$0xff]  }
 0x31f   : > { %4813 = vmatmul.mubr.bf16.gmra.mrb[104].mxu0 %v2936_v23  ;;  %6225 = vmatmul.mubr.bf16.gmra.mrb[104].mxu1 %v2936_v23  ;;  %v2944_v2 = vmax.bf16 %v16678_v52, %v2688_v21  ;;  %v2953_v62 = vmax.bf16 %v16678_v52, %v2697_v55  ;;  %v17220_v23 = vld [vmem:[#allocation194_spill] sm:$0xff] }
 0x320   : > { %4822 = vmatprep.mubr.bf16.mxu0 %v2945_v11  ;;  %6234 = vmatprep.mubr.bf16.mxu1 %v2945_v11  ;;  %v17222_v17 = vpack.c.bf16 %v17220_v23, %v17221_v44  ;;  %v17224_v11 = vld [vmem:[#allocation199_spill] sm:$0xff] }
 0x321   : > { %v17225_v36 = vpack.c.bf16 %v17223_v6, %v17224_v11 }
 0x322   : > { %v2696_v31 = vadd.bf16 %v12338_v27, %v17222_v17  ;;  %v17229_v17 = vld [vmem:[#allocation211_spill] sm:$0xff] }
 0x323   : > { %v2705_v16 = vadd.bf16 %v12308_v63, %v17225_v36  ;;  %v2414_v36 = vcombine.high %v12278_v34, %v12278_v34 }
 0x324   : > { %v2952_v57 = vmax.bf16 %v16678_v52, %v2696_v31 }
 0x325   : > { %v2961_v21 = vmax.bf16 %v16678_v52, %v2705_v16  ;;  %v17232_v16 = vld [vmem:[#allocation209_spill] sm:$0xff] }
 0x327   : > { %4823 = vmatmul.mubr.bf16.gmra.mrb[108].mxu0 %v2944_v2  ;;  %6235 = vmatmul.mubr.bf16.gmra.mrb[108].mxu1 %v2944_v2  ;;  %v17226_v2 = vld [vmem:[#allocation201_spill] sm:$0xff] }
 0x328   : > { %4832 = vmatprep.mubr.bf16.mxu0 %v2953_v62  ;;  %6244 = vmatprep.mubr.bf16.mxu1 %v2953_v62  ;;  %v17228_v55 = vpack.c.bf16 %v17226_v2, %v17227_v12  ;;  %v17230_v62 = vld [vmem:[#allocation207_spill] sm:$0xff] }
 0x329   : > { %v17231_v23 = vpack.c.bf16 %v17229_v17, %v17230_v62  ;;  %v17235_v12 = vld [vmem:[#allocation219_spill] sm:$0xff] }
 0x32a   : > { %v2704_v44 = vadd.bf16 %v12338_v27, %v17228_v55  ;;  %v17236_v55 = vld [vmem:[#allocation215_spill] sm:$0xff] }
 0x32b   : > { %v2713_v6 = vadd.bf16 %v12308_v63, %v17231_v23  ;;  %v17237_v17 = vpack.c.bf16 %v17235_v12, %v17236_v55  ;;  %v2412_v23 = vcombine.high %v12311_v50, %v12311_v50  ;;  %v17242_v12 = vld [vmem:[#allocation9_spill] sm:$0xff] }
 0x32c   : > { %v2960_v11 = vmax.bf16 %v16678_v52, %v2704_v44  ;;  %v2438_v44 = vpack.i.b16 %v2414_v36, %v2414_v36  ;;  %v17241_v36 = vld [vmem:[#allocation11_spill] sm:$0xff] }
 0x32d   : > { %v2969_v31 = vmax.bf16 %v16678_v52, %v2713_v6  ;;  %v2721_v62 = vadd.bf16 %v12308_v63, %v17237_v17  ;;  %v17243_v50 = vpack.c.bf16 %v17241_v36, %v17242_v12  ;;  %v10419_v36 = vld [vmem:[#allocation2 + $0x400] ss:$16 sps:$4 sm:$0xff]  }
 0x32f   : > { %4833 = vmatmul.mubr.bf16.gmra.mrb[112].mxu0 %v2952_v57  ;;  %6245 = vmatmul.mubr.bf16.gmra.mrb[112].mxu1 %v2952_v57  ;;  %v17233_v57 = vld [vmem:[#allocation205_spill] sm:$0xff]  ;;  %v2977_v6 = vmax.bf16 %v16678_v52, %v2721_v62 }
 0x330   : > { %4842 = vmatprep.mubr.bf16.mxu0 %v2961_v21  ;;  %6254 = vmatprep.mubr.bf16.mxu1 %v2961_v21  ;;  %v17234_v2 = vpack.c.bf16 %v17232_v16, %v17233_v57  ;;  %v17238_v16 = vld [vmem:[#allocation217_spill] sm:$0xff] }
 0x331   : > { %v17239_v57 = vld [vmem:[#allocation213_spill] sm:$0xff] }
 0x332   : > { %v2712_v21 = vadd.bf16 %v12338_v27, %v17234_v2  ;;  %v17240_v2 = vpack.c.bf16 %v17238_v16, %v17239_v57  ;;  %v17248_v16 = vld [vmem:[#allocation13_spill] sm:$0xff] }
 0x334   : > { %v2968_v34 = vmax.bf16 %v16678_v52, %v2712_v21  ;;  %v2720_v63 = vadd.bf16 %v12338_v27, %v17240_v2 }
 0x336   : > { %v2976_v17 = vmax.bf16 %v16678_v52, %v2720_v63  ;;  %v10422_v63 = vld [vmem:[#allocation2 + $0x408] ss:$16 sps:$4 sm:$0xff]  }
 0x337   : > { %4843 = vmatmul.mubr.bf16.gmra.mrb[116].mxu0 %v2960_v11  ;;  %6255 = vmatmul.mubr.bf16.gmra.mrb[116].mxu1 %v2960_v11  ;;  %v13322_v11 = vrot.slane %v2438_v44, %v12281_v4  ;;  %v17244_v44 = vld [vmem:[#allocation10_spill] sm:$0xff] }
 0x338   : > { %4852 = vmatprep.mubr.bf16.mxu0 %v2969_v31  ;;  %6264 = vmatprep.mubr.bf16.mxu1 %v2969_v31  ;;  %v2431_v31 = vpack.i.b16 %v2412_v23, %v2412_v23  ;;  %v17245_v23 = vld [vmem:[#allocation8_spill] sm:$0xff] }
 0x339   : > { %v2475_v21 = vadd.bf16 %v13322_v11, %v17243_v50  ;;  %v10427_v50 = vld [vmem:[#allocation2 + $0x424] ss:$16 sps:$4 sm:$0xff]  }
 0x33a   : > { %v13333_v55 = vrot.slane %v2431_v31, %v12281_v4 }
 0x33b   : > { %v2731_v62 = vmax.bf16 %v16678_v52, %v2475_v21  ;;  %v10430_v21 = vld [vmem:[#allocation2 + $0x42c] ss:$16 sps:$4 sm:$0xff]  }
 0x33f   : > { %4853 = vmatmul.mubr.bf16.gmra.mrb[120].mxu0 %v2968_v34  ;;  %6265 = vmatmul.mubr.bf16.gmra.mrb[120].mxu1 %v2968_v34  ;;  %v17246_v34 = vpack.c.bf16 %v17244_v44, %v17245_v23  ;;  %v17251_v44 = vld [vmem:[#allocation12_spill] sm:$0xff] }
 0x340   : > { %4862 = vmatprep.mubr.bf16.mxu0 %v2977_v6  ;;  %6274 = vmatprep.mubr.bf16.mxu1 %v2977_v6  ;;  %v17247_v6 = vld [vmem:[#allocation15_spill] sm:$0xff] }
 0x341   : > { %v2474_v27 = vadd.bf16 %v13333_v55, %v17246_v34  ;;  %v17249_v57 = vpack.c.bf16 %v17247_v6, %v17248_v16  ;;  %v10425_v34 = vld [vmem:[#allocation2 + $0x420] ss:$16 sps:$4 sm:$0xff]   ;;  %v17253_v6 = vld [vmem:[#allocation19_spill] sm:$0xff] }
 0x343   : > { %v2483_v2 = vadd.bf16 %v13322_v11, %v17249_v57  ;;  %v2730_v31 = vmax.bf16 %v16678_v52, %v2474_v27  ;;  %v17254_v27 = vld [vmem:[#allocation17_spill] sm:$0xff] }
 0x344   : > { %v17255_v16 = vpack.c.bf16 %v17253_v6, %v17254_v27  ;;  %v17260_v27 = vld [vmem:[#allocation22_spill] sm:$0xff] }
 0x345   : > { %v2739_v12 = vmax.bf16 %v16678_v52, %v2483_v2  ;;  %v10428_v2 = vld [vmem:[#allocation2 + $0x428] ss:$16 sps:$4 sm:$0xff]  }
 0x346   : > { %v2491_v57 = vadd.bf16 %v13322_v11, %v17255_v16 }
 0x347   : > { %4863 = vmatmul.mubr.bf16.gmra.mrb[124].mxu0 %v2976_v17  ;;  %6275 = vmatmul.mubr.bf16.gmra.mrb[124].mxu1 %v2976_v17  ;;  %v17250_v17 = vld [vmem:[#allocation14_spill] sm:$0xff] }
 0x348   : > { %4905 = vmatprep.mubr.bf16.mxu0 %v2731_v62  ;;  %6317 = vmatprep.mubr.bf16.mxu1 %v2731_v62  ;;  %v17252_v23 = vpack.c.bf16 %v17250_v17, %v17251_v44  ;;  %v10431_v17 = vld [vmem:[#allocation2 + $0x440] ss:$16 sps:$4 sm:$0xff]   ;;  %v2747_v44 = vmax.bf16 %v16678_v52, %v2491_v57  ;;  %v10440_v57 = vld [vmem:[#allocation2 + $0x468] ss:$16 sps:$4 sm:$0xff]  }
 0x34a   : > { %v2482_v62 = vadd.bf16 %v13333_v55, %v17252_v23  ;;  %v17257_v23 = vld [vmem:[#allocation16_spill] sm:$0xff] }
 0x34c   : > { %v2738_v15 = vmax.bf16 %v16678_v52, %v2482_v62  ;;  %v10437_v62 = vld [vmem:[#allocation2 + $0x460] ss:$16 sps:$4 sm:$0xff]  }
 0x34f   : > { %4906 = vmatmul.mubr.bf16.vlgmr.msra.gmra.mrb[0].mxu0 %v2730_v31  ;;  %6318 = vmatmul.mubr.bf16.vlgmr.msra.gmra.mrb[0].mxu1 %v2730_v31  ;;  %v10436_v31 = vld [vmem:[#allocation2 + $0x44c] ss:$16 sps:$4 sm:$0xff]  }
 0x350   : > { %4915 = vmatprep.mubr.bf16.mxu0 %v2739_v12  ;;  %5227 = vmatpush1.bf16.msra.mxu0 %v10419_v36  ;;  %v10434_v36 = vld [vmem:[#allocation2 + $0x448] ss:$16 sps:$4 sm:$0xff]  }
 0x351   : > { %6327 = vmatprep.mubr.bf16.mxu1 %v2739_v12  ;;  %6639 = vmatpush1.bf16.msra.mxu1 %v10422_v63  ;;  %v10439_v63 = vld [vmem:[#allocation2 + $0x464] ss:$16 sps:$4 sm:$0xff]   ;;  %v10442_v12 = vld [vmem:[#allocation2 + $0x46c] ss:$16 sps:$4 sm:$0xff]  }
 0x352   : > { %5228 = vmatprep.subr.bf16.mxu0 %v10427_v50  ;;  %6640 = vmatprep.subr.bf16.mxu1 %v10430_v21  ;;  %v17256_v50 = vld [vmem:[#allocation18_spill] sm:$0xff] }
 0x353   : > { %v17258_v6 = vpack.c.bf16 %v17256_v50, %v17257_v23  ;;  %v10443_v50 = vld [vmem:[#allocation2 + $0x480] ss:$16 sps:$4 sm:$0xff]  }
 0x354   : > { %5229 = vmatpush1.bf16.msra.mxu0 %v10425_v34  ;;  %v17259_v34 = vld [vmem:[#allocation24_spill] sm:$0xff] }
 0x355   : > { %6641 = vmatpush1.bf16.msra.mxu1 %v10428_v2  ;;  %5230 = vmatprep.subr.bf16.mxu0 %v10433_v8  ;;  %v2490_v21 = vadd.bf16 %v13333_v55, %v17258_v6  ;;  %v17261_v16 = vpack.c.bf16 %v17259_v34, %v17260_v27  ;;  %v10445_v2 = vld [vmem:[#allocation2 + $0x484] ss:$16 sps:$4 sm:$0xff]   ;;  %v10454_v6 = vld [vmem:[#allocation2 + $0x4ac] ss:$16 sps:$4 sm:$0xff]  }
 0x356   : > { %6642 = vmatprep.subr.bf16.mxu1 %v10436_v31  ;;  %v17266_v27 = vld [vmem:[#allocation28_spill] sm:$0xff] }
 0x357   : > { %4916 = vmatmul.mubr.bf16.gmra.mrb[4].mxu0 %v2738_v15  ;;  %6328 = vmatmul.mubr.bf16.gmra.mrb[4].mxu1 %v2738_v15  ;;  %v2499_v8 = vadd.bf16 %v13322_v11, %v17261_v16  ;;  %v10448_v15 = vld [vmem:[#allocation2 + $0x48c] ss:$16 sps:$4 sm:$0xff]   ;;  %v2746_v31 = vmax.bf16 %v16678_v52, %v2490_v21  ;;  %v10449_v21 = vld [vmem:[#allocation2 + $0x4a0] ss:$16 sps:$4 sm:$0xff]  }
 0x358   : > { %4925 = vmatprep.mubr.bf16.mxu0 %v2747_v44  ;;  %6337 = vmatprep.mubr.bf16.mxu1 %v2747_v44  ;;  %v10451_v44 = vld [vmem:[#allocation2 + $0x4a4] ss:$16 sps:$4 sm:$0xff]  }
 0x359   : > { %5231 = vmatpush1.bf16.msra.mxu0 %v10431_v17  ;;  %6643 = vmatpush1.bf16.msra.mxu1 %v10434_v36  ;;  %v2755_v23 = vmax.bf16 %v16678_v52, %v2499_v8  ;;  %v10446_v17 = vld [vmem:[#allocation2 + $0x488] ss:$16 sps:$4 sm:$0xff]  }
 0x35a   : > { %5232 = vmatprep.subr.bf16.mxu0 %v10439_v63  ;;  %6644 = vmatprep.subr.bf16.mxu1 %v10442_v12  ;;  %v17262_v36 = vld [vmem:[#allocation23_spill] sm:$0xff]  ;;  %v17263_v63 = vld [vmem:[#allocation21_spill] sm:$0xff] }
 0x35b   : > { %v17264_v34 = vpack.c.bf16 %v17262_v36, %v17263_v63  ;;  %v10455_v36 = vld [vmem:[#allocation2 + $0x4c0] ss:$16 sps:$4 sm:$0xff]  }
 0x35d   : > { %5233 = vmatpush1.bf16.msra.mxu0 %v10437_v62  ;;  %6645 = vmatpush1.bf16.msra.mxu1 %v10440_v57  ;;  %v2498_v12 = vadd.bf16 %v13333_v55, %v17264_v34  ;;  %v17265_v62 = vld [vmem:[#allocation32_spill] sm:$0xff]  ;;  %v10452_v57 = vld [vmem:[#allocation2 + $0x4a8] ss:$16 sps:$4 sm:$0xff]   ;;  %v10466_v34 = vld [vmem:[#allocation2 + $0x4ec] ss:$16 sps:$4 sm:$0xff]  }
 0x35e   : > { %5234 = vmatprep.subr.bf16.mxu0 %v10445_v2  ;;  %6646 = vmatprep.subr.bf16.mxu1 %v10448_v15  ;;  %v17267_v16 = vpack.c.bf16 %v17265_v62, %v17266_v27  ;;  %v10457_v2 = vld [vmem:[#allocation2 + $0x4c4] ss:$16 sps:$4 sm:$0xff]   ;;  %v10460_v15 = vld [vmem:[#allocation2 + $0x4cc] ss:$16 sps:$4 sm:$0xff]  }
 0x35f   : > { %4926 = vmatmul.mubr.bf16.gmra.mrb[8].mxu0 %v2746_v31  ;;  %6338 = vmatmul.mubr.bf16.gmra.mrb[8].mxu1 %v2746_v31  ;;  %v2754_v31 = vmax.bf16 %v16678_v52, %v2498_v12  ;;  %v10461_v12 = vld [vmem:[#allocation2 + $0x4e0] ss:$16 sps:$4 sm:$0xff]  }
 0x360   : > { %4935 = vmatprep.mubr.bf16.mxu0 %v2755_v23  ;;  %6347 = vmatprep.mubr.bf16.mxu1 %v2755_v23  ;;  %v2507_v8 = vadd.bf16 %v13322_v11, %v17267_v16  ;;  %v10463_v23 = vld [vmem:[#allocation2 + $0x4e4] ss:$16 sps:$4 sm:$0xff]  }
 0x361   : > { %5235 = vmatpush1.bf16.msra.mxu0 %v10443_v50  ;;  %6647 = vmatpush1.bf16.msra.mxu1 %v10446_v17  ;;  %v10458_v50 = vld [vmem:[#allocation2 + $0x4c8] ss:$16 sps:$4 sm:$0xff]   ;;  %v17268_v17 = vld [vmem:[#allocation30_spill] sm:$0xff]  ;;  %v17272_v27 = vld [vmem:[#allocation36_spill] sm:$0xff] }
 0x362   : > { %5236 = vmatprep.subr.bf16.mxu0 %v10451_v44  ;;  %6648 = vmatprep.subr.bf16.mxu1 %v10454_v6  ;;  %v2763_v63 = vmax.bf16 %v16678_v52, %v2507_v8  ;;  %v17269_v44 = vld [vmem:[#allocation26_spill] sm:$0xff] }
 0x363   : > { %v17270_v62 = vpack.c.bf16 %v17268_v17, %v17269_v44  ;;  %v10467_v17 = vld [vmem:[#allocation2 + $0x500] ss:$16 sps:$4 sm:$0xff]  }
 0x365   : > { %5237 = vmatpush1.bf16.msra.mxu0 %v10449_v21  ;;  %6649 = vmatpush1.bf16.msra.mxu1 %v10452_v57  ;;  %v2506_v6 = vadd.bf16 %v13333_v55, %v17270_v62  ;;  %v17271_v21 = vld [vmem:[#allocation40_spill] sm:$0xff]  ;;  %v10464_v57 = vld [vmem:[#allocation2 + $0x4e8] ss:$16 sps:$4 sm:$0xff]   ;;  %v10478_v62 = vld [vmem:[#allocation2 + $0x52c] ss:$16 sps:$4 sm:$0xff]  }
 0x366   : > { %5238 = vmatprep.subr.bf16.mxu0 %v10457_v2  ;;  %6650 = vmatprep.subr.bf16.mxu1 %v10460_v15  ;;  %v17273_v16 = vpack.c.bf16 %v17271_v21, %v17272_v27  ;;  %v10469_v2 = vld [vmem:[#allocation2 + $0x504] ss:$16 sps:$4 sm:$0xff]   ;;  %v10472_v15 = vld [vmem:[#allocation2 + $0x50c] ss:$16 sps:$4 sm:$0xff]  }
 0x367   : > { %4936 = vmatmul.mubr.bf16.gmra.mrb[12].mxu0 %v2754_v31  ;;  %6348 = vmatmul.mubr.bf16.gmra.mrb[12].mxu1 %v2754_v31  ;;  %v2762_v31 = vmax.bf16 %v16678_v52, %v2506_v6  ;;  %v10473_v6 = vld [vmem:[#allocation2 + $0x520] ss:$16 sps:$4 sm:$0xff]  }
 0x368   : > { %4945 = vmatprep.mubr.bf16.mxu0 %v2763_v63  ;;  %6357 = vmatprep.mubr.bf16.mxu1 %v2763_v63  ;;  %v2515_v8 = vadd.bf16 %v13322_v11, %v17273_v16  ;;  %v10475_v63 = vld [vmem:[#allocation2 + $0x524] ss:$16 sps:$4 sm:$0xff]  }
 0x369   : > { %5239 = vmatpush1.bf16.msra.mxu0 %v10455_v36  ;;  %6651 = vmatpush1.bf16.msra.mxu1 %v10458_v50  ;;  %v10470_v36 = vld [vmem:[#allocation2 + $0x508] ss:$16 sps:$4 sm:$0xff]   ;;  %v17274_v50 = vld [vmem:[#allocation38_spill] sm:$0xff]  ;;  %v17278_v27 = vld [vmem:[#allocation44_spill] sm:$0xff] }
 0x36a   : > { %5240 = vmatprep.subr.bf16.mxu0 %v10463_v23  ;;  %6652 = vmatprep.subr.bf16.mxu1 %v10466_v34  ;;  %v2771_v44 = vmax.bf16 %v16678_v52, %v2515_v8  ;;  %v17275_v23 = vld [vmem:[#allocation34_spill] sm:$0xff] }
 0x36b   : > { %v17276_v21 = vpack.c.bf16 %v17274_v50, %v17275_v23  ;;  %v10479_v50 = vld [vmem:[#allocation2 + $0x540] ss:$16 sps:$4 sm:$0xff]  }
 0x36d   : > { %5241 = vmatpush1.bf16.msra.mxu0 %v10461_v12  ;;  %6653 = vmatpush1.bf16.msra.mxu1 %v10464_v57  ;;  %v2514_v34 = vadd.bf16 %v13333_v55, %v17276_v21  ;;  %v17277_v12 = vld [vmem:[#allocation48_spill] sm:$0xff]  ;;  %v10476_v57 = vld [vmem:[#allocation2 + $0x528] ss:$16 sps:$4 sm:$0xff]  }
 0x36e   : > { %5242 = vmatprep.subr.bf16.mxu0 %v10469_v2  ;;  %6654 = vmatprep.subr.bf16.mxu1 %v10472_v15  ;;  %v17279_v16 = vpack.c.bf16 %v17277_v12, %v17278_v27  ;;  %v10481_v2 = vld [vmem:[#allocation2 + $0x544] ss:$16 sps:$4 sm:$0xff]   ;;  %v10484_v15 = vld [vmem:[#allocation2 + $0x54c] ss:$16 sps:$4 sm:$0xff]  }
 0x36f   : > { %4946 = vmatmul.mubr.bf16.gmra.mrb[16].mxu0 %v2762_v31  ;;  %6358 = vmatmul.mubr.bf16.gmra.mrb[16].mxu1 %v2762_v31  ;;  %v2770_v31 = vmax.bf16 %v16678_v52, %v2514_v34  ;;  %v17284_v34 = vld [vmem:[#allocation52_spill] sm:$0xff] }
 0x370   : > { %4955 = vmatprep.mubr.bf16.mxu0 %v2771_v44  ;;  %6367 = vmatprep.mubr.bf16.mxu1 %v2771_v44  ;;  %v2523_v8 = vadd.bf16 %v13322_v11, %v17279_v16  ;;  %v17280_v44 = vld [vmem:[#allocation46_spill] sm:$0xff] }
 0x371   : > { %5243 = vmatpush1.bf16.msra.mxu0 %v10467_v17  ;;  %6655 = vmatpush1.bf16.msra.mxu1 %v10470_v36  ;;  %v10482_v17 = vld [vmem:[#allocation2 + $0x548] ss:$16 sps:$4 sm:$0xff]   ;;  %v17281_v36 = vld [vmem:[#allocation42_spill] sm:$0xff] }
 0x372   : > { %5244 = vmatprep.subr.bf16.mxu0 %v10475_v63  ;;  %6656 = vmatprep.subr.bf16.mxu1 %v10478_v62  ;;  %v2779_v23 = vmax.bf16 %v16678_v52, %v2523_v8  ;;  %v17282_v63 = vpack.c.bf16 %v17280_v44, %v17281_v36  ;;  %v17283_v62 = vld [vmem:[#allocation55_spill] sm:$0xff]  ;;  %v10485_v8 = vld [vmem:[#allocation2 + $0x560] ss:$16 sps:$4 sm:$0xff]  }
 0x373   : > { %v17289_v36 = vld [vmem:[#allocation62_spill] sm:$0xff] }
 0x374   : > { %v2522_v21 = vadd.bf16 %v13333_v55, %v17282_v63 }
 0x375   : > { %5245 = vmatpush1.bf16.msra.mxu0 %v10473_v6  ;;  %6657 = vmatpush1.bf16.msra.mxu1 %v10476_v57  ;;  %v17285_v6 = vpack.c.bf16 %v17283_v62, %v17284_v34  ;;  %v10487_v57 = vld [vmem:[#allocation2 + $0x564] ss:$16 sps:$4 sm:$0xff]  }
 0x376   : > { %5246 = vmatprep.subr.bf16.mxu0 %v10481_v2  ;;  %6658 = vmatprep.subr.bf16.mxu1 %v10484_v15  ;;  %v2778_v27 = vmax.bf16 %v16678_v52, %v2522_v21  ;;  %v10488_v2 = vld [vmem:[#allocation2 + $0x568] ss:$16 sps:$4 sm:$0xff]   ;;  %v10490_v15 = vld [vmem:[#allocation2 + $0x56c] ss:$16 sps:$4 sm:$0xff]  }
 0x377   : > { %4956 = vmatmul.mubr.bf16.gmra.mrb[20].mxu0 %v2770_v31  ;;  %6368 = vmatmul.mubr.bf16.gmra.mrb[20].mxu1 %v2770_v31  ;;  %v2531_v12 = vadd.bf16 %v13322_v11, %v17285_v6  ;;  %v17286_v31 = vld [vmem:[#allocation54_spill] sm:$0xff]  ;;  %v17292_v6 = vld [vmem:[#allocation61_spill] sm:$0xff] }
 0x378   : > { %4965 = vmatprep.mubr.bf16.mxu0 %v2779_v23  ;;  %6377 = vmatprep.mubr.bf16.mxu1 %v2779_v23  ;;  %v17287_v23 = vld [vmem:[#allocation50_spill] sm:$0xff] }
 0x379   : > { %5247 = vmatpush1.bf16.msra.mxu0 %v10479_v50  ;;  %6659 = vmatpush1.bf16.msra.mxu1 %v10482_v17  ;;  %v2787_v16 = vmax.bf16 %v16678_v52, %v2531_v12  ;;  %v17288_v50 = vpack.c.bf16 %v17286_v31, %v17287_v23  ;;  %v17290_v17 = vld [vmem:[#allocation59_spill] sm:$0xff]  ;;  %v17293_v12 = vld [vmem:[#allocation57_spill] sm:$0xff] }
 0x37a   : > { %5248 = vmatprep.subr.bf16.mxu0 %v10487_v57  ;;  %v17291_v63 = vpack.c.bf16 %v17289_v36, %v17290_v17  ;;  %6660 = vmatprep.subr.bf16.mxu1 %v10490_v15  ;;  %v17295_v57 = vld [vmem:[#allocation68_spill] sm:$0xff]  ;;  %v17296_v31 = vld [vmem:[#allocation65_spill] sm:$0xff] }
 0x37b   : > { %v2530_v44 = vadd.bf16 %v13333_v55, %v17288_v50  ;;  %v17297_v23 = vpack.c.bf16 %v17295_v57, %v17296_v31  ;;  %v10491_v50 = vld [vmem:[#allocation2 + $0x580] ss:$16 sps:$4 sm:$0xff]   ;;  %v10494_v36 = vld [vmem:[#allocation2 + $0x588] ss:$16 sps:$4 sm:$0xff]   ;;  %v10496_v17 = vld [vmem:[#allocation2 + $0x58c] ss:$16 sps:$4 sm:$0xff]  }
 0x37c   : > { %v2539_v21 = vadd.bf16 %v13322_v11, %v17291_v63  ;;  %v17298_v63 = vld [vmem:[#allocation67_spill] sm:$0xff] }
 0x37d   : > { %5249 = vmatpush1.bf16.msra.mxu0 %v10485_v8  ;;  %6661 = vmatpush1.bf16.msra.mxu1 %v10488_v2  ;;  %v2786_v62 = vmax.bf16 %v16678_v52, %v2530_v44  ;;  %v2547_v15 = vadd.bf16 %v13322_v11, %v17297_v23  ;;  %v10493_v44 = vld [vmem:[#allocation2 + $0x584] ss:$16 sps:$4 sm:$0xff]   ;;  %v17304_v23 = vld [vmem:[#allocation71_spill] sm:$0xff] }
 0x37e   : > { %v2795_v34 = vmax.bf16 %v16678_v52, %v2539_v21  ;;  %v17299_v21 = vld [vmem:[#allocation64_spill] sm:$0xff]  ;;  %5250 = vmatprep.subr.bf16.mxu0 %v10493_v44  ;;  %6662 = vmatprep.subr.bf16.mxu1 %v10496_v17 }
 0x37f   : > { %4966 = vmatmul.mubr.bf16.gmra.mrb[24].mxu0 %v2778_v27  ;;  %6378 = vmatmul.mubr.bf16.gmra.mrb[24].mxu1 %v2778_v27  ;;  %v17294_v27 = vpack.c.bf16 %v17292_v6, %v17293_v12  ;;  %v2803_v2 = vmax.bf16 %v16678_v52, %v2547_v15  ;;  %v17301_v6 = vld [vmem:[#allocation72_spill] sm:$0xff]  ;;  %v17302_v12 = vld [vmem:[#allocation70_spill] sm:$0xff]  ;;  %v17305_v15 = vld [vmem:[#allocation69_spill] sm:$0xff] }
 0x380   : > { %4975 = vmatprep.mubr.bf16.mxu0 %v2787_v16  ;;  %6387 = vmatprep.mubr.bf16.mxu1 %v2787_v16  ;;  %v17307_v44 = vld [vmem:[#allocation80_spill] sm:$0xff] }
 0x381   : > { %v2538_v16 = vadd.bf16 %v13333_v55, %v17294_v27  ;;  %v17303_v27 = vpack.c.bf16 %v17301_v6, %v17302_v12  ;;  %5251 = vmatpush1.bf16.msra.mxu0 %v10491_v50  ;;  %6663 = vmatpush1.bf16.msra.mxu1 %v10494_v36  ;;  %v10500_v6 = vld [vmem:[#allocation2 + $0x5a8] ss:$16 sps:$4 sm:$0xff]   ;;  %v10502_v12 = vld [vmem:[#allocation2 + $0x5ac] ss:$16 sps:$4 sm:$0xff]  }
 0x382   : > { %6664 = vmatprep.subr.bf16.mxu1 %v10502_v12 }
 0x383   : > { %v2794_v8 = vmax.bf16 %v16678_v52, %v2538_v16  ;;  %v2555_v16 = vadd.bf16 %v13322_v11, %v17303_v27  ;;  %v17310_v27 = vld [vmem:[#allocation78_spill] sm:$0xff] }
 0x385   : > { %v2811_v31 = vmax.bf16 %v16678_v52, %v2555_v16  ;;  %v17311_v16 = vld [vmem:[#allocation74_spill] sm:$0xff]  ;;  %6665 = vmatpush1.bf16.msra.mxu1 %v10500_v6 }
 0x387   : > { %4976 = vmatmul.mubr.bf16.gmra.mrb[28].mxu0 %v2786_v62  ;;  %6388 = vmatmul.mubr.bf16.gmra.mrb[28].mxu1 %v2786_v62  ;;  %v17300_v62 = vpack.c.bf16 %v17298_v63, %v17299_v21  ;;  %v17308_v63 = vld [vmem:[#allocation76_spill] sm:$0xff] }
 0x388   : > { %4985 = vmatprep.mubr.bf16.mxu0 %v2795_v34  ;;  %6397 = vmatprep.mubr.bf16.mxu1 %v2795_v34  ;;  %v17309_v21 = vpack.c.bf16 %v17307_v44, %v17308_v63 }
 0x389   : > { %v2546_v34 = vadd.bf16 %v13333_v55, %v17300_v62  ;;  %v10497_v62 = vld [vmem:[#allocation2 + $0x5a0] ss:$16 sps:$4 sm:$0xff]  }
 0x38a   : > { %v2563_v17 = vadd.bf16 %v13322_v11, %v17309_v21  ;;  %v17316_v21 = vld [vmem:[#allocation85_spill] sm:$0xff] }
 0x38b   : > { %v2802_v57 = vmax.bf16 %v16678_v52, %v2546_v34  ;;  %v10499_v34 = vld [vmem:[#allocation2 + $0x5a4] ss:$16 sps:$4 sm:$0xff]  }
 0x38c   : > { %v2819_v36 = vmax.bf16 %v16678_v52, %v2563_v17  ;;  %5252 = vmatprep.subr.bf16.mxu0 %v10499_v34  ;;  %v17317_v17 = vld [vmem:[#allocation82_spill] sm:$0xff] }
 0x38d   : > { %5253 = vmatpush1.bf16.msra.mxu0 %v10497_v62  ;;  %v17319_v34 = vld [vmem:[#allocation94_spill] sm:$0xff] }
 0x38f   : > { %4986 = vmatmul.mubr.bf16.gmra.mrb[32].mxu0 %v2794_v8  ;;  %6398 = vmatmul.mubr.bf16.gmra.mrb[32].mxu1 %v2794_v8  ;;  %v17306_v8 = vpack.c.bf16 %v17304_v23, %v17305_v15  ;;  %v17313_v23 = vld [vmem:[#allocation86_spill] sm:$0xff]  ;;  %v17314_v15 = vld [vmem:[#allocation83_spill] sm:$0xff] }
 0x390   : > { %4995 = vmatprep.mubr.bf16.mxu0 %v2803_v2  ;;  %6407 = vmatprep.mubr.bf16.mxu1 %v2803_v2 }
 0x391   : > { %v2554_v2 = vadd.bf16 %v13333_v55, %v17306_v8  ;;  %v17315_v8 = vpack.c.bf16 %v17313_v23, %v17314_v15  ;;  %v10506_v23 = vld [vmem:[#allocation2 + $0x5c8] ss:$16 sps:$4 sm:$0xff]   ;;  %v10508_v15 = vld [vmem:[#allocation2 + $0x5cc] ss:$16 sps:$4 sm:$0xff]  }
 0x392   : > { %6666 = vmatprep.subr.bf16.mxu1 %v10508_v15 }
 0x393   : > { %v2810_v50 = vmax.bf16 %v16678_v52, %v2554_v2  ;;  %v2571_v2 = vadd.bf16 %v13322_v11, %v17315_v8  ;;  %v17322_v8 = vld [vmem:[#allocation92_spill] sm:$0xff]  ;;  %6667 = vmatpush1.bf16.msra.mxu1 %v10506_v23 }
 0x395   : > { %v2827_v63 = vmax.bf16 %v16678_v52, %v2571_v2  ;;  %v17323_v2 = vld [vmem:[#allocation88_spill] sm:$0xff] }
 0x397   : > { %4996 = vmatmul.mubr.bf16.gmra.mrb[36].mxu0 %v2802_v57  ;;  %6408 = vmatmul.mubr.bf16.gmra.mrb[36].mxu1 %v2802_v57  ;;  %v17312_v57 = vpack.c.bf16 %v17310_v27, %v17311_v16  ;;  %v17320_v27 = vld [vmem:[#allocation90_spill] sm:$0xff] }
 0x398   : > { %5005 = vmatprep.mubr.bf16.mxu0 %v2811_v31  ;;  %6417 = vmatprep.mubr.bf16.mxu1 %v2811_v31  ;;  %v17321_v16 = vpack.c.bf16 %v17319_v34, %v17320_v27 }
 0x399   : > { %v2562_v31 = vadd.bf16 %v13333_v55, %v17312_v57  ;;  %v10503_v57 = vld [vmem:[#allocation2 + $0x5c0] ss:$16 sps:$4 sm:$0xff]  }
 0x39a   : > { %v2579_v12 = vadd.bf16 %v13322_v11, %v17321_v16  ;;  %v17328_v16 = vld [vmem:[#allocation99_spill] sm:$0xff] }
 0x39b   : > { %v2818_v44 = vmax.bf16 %v16678_v52, %v2562_v31  ;;  %v10505_v31 = vld [vmem:[#allocation2 + $0x5c4] ss:$16 sps:$4 sm:$0xff]  }
 0x39c   : > { %v2835_v6 = vmax.bf16 %v16678_v52, %v2579_v12  ;;  %5254 = vmatprep.subr.bf16.mxu0 %v10505_v31  ;;  %v17329_v12 = vld [vmem:[#allocation96_spill] sm:$0xff] }
 0x39d   : > { %5255 = vmatpush1.bf16.msra.mxu0 %v10503_v57  ;;  %v17331_v31 = vld [vmem:[#allocation108_spill] sm:$0xff] }
 0x39f   : > { %5006 = vmatmul.mubr.bf16.gmra.mrb[40].mxu0 %v2810_v50  ;;  %6418 = vmatmul.mubr.bf16.gmra.mrb[40].mxu1 %v2810_v50  ;;  %v17318_v50 = vpack.c.bf16 %v17316_v21, %v17317_v17  ;;  %v17325_v21 = vld [vmem:[#allocation100_spill] sm:$0xff]  ;;  %v17326_v17 = vld [vmem:[#allocation97_spill] sm:$0xff] }
 0x3a0   : > { %5015 = vmatprep.mubr.bf16.mxu0 %v2819_v36  ;;  %6427 = vmatprep.mubr.bf16.mxu1 %v2819_v36 }
 0x3a1   : > { %v2570_v36 = vadd.bf16 %v13333_v55, %v17318_v50  ;;  %v17327_v50 = vpack.c.bf16 %v17325_v21, %v17326_v17  ;;  %v10512_v21 = vld [vmem:[#allocation2 + $0x5e8] ss:$16 sps:$4 sm:$0xff]   ;;  %v10514_v17 = vld [vmem:[#allocation2 + $0x5ec] ss:$16 sps:$4 sm:$0xff]  }
 0x3a2   : > { %6668 = vmatprep.subr.bf16.mxu1 %v10514_v17 }
 0x3a3   : > { %v2826_v62 = vmax.bf16 %v16678_v52, %v2570_v36  ;;  %v2587_v36 = vadd.bf16 %v13322_v11, %v17327_v50  ;;  %v17334_v50 = vld [vmem:[#allocation106_spill] sm:$0xff]  ;;  %6669 = vmatpush1.bf16.msra.mxu1 %v10512_v21 }
 0x3a5   : > { %v2843_v27 = vmax.bf16 %v16678_v52, %v2587_v36  ;;  %v17335_v36 = vld [vmem:[#allocation102_spill] sm:$0xff] }
 0x3a7   : > { %5016 = vmatmul.mubr.bf16.gmra.mrb[44].mxu0 %v2818_v44  ;;  %6428 = vmatmul.mubr.bf16.gmra.mrb[44].mxu1 %v2818_v44  ;;  %v17324_v44 = vpack.c.bf16 %v17322_v8, %v17323_v2  ;;  %v17332_v8 = vld [vmem:[#allocation104_spill] sm:$0xff] }
 0x3a8   : > { %5025 = vmatprep.mubr.bf16.mxu0 %v2827_v63  ;;  %6437 = vmatprep.mubr.bf16.mxu1 %v2827_v63  ;;  %v17333_v2 = vpack.c.bf16 %v17331_v31, %v17332_v8 }
 0x3a9   : > { %v2578_v63 = vadd.bf16 %v13333_v55, %v17324_v44  ;;  %v10509_v44 = vld [vmem:[#allocation2 + $0x5e0] ss:$16 sps:$4 sm:$0xff]  }
 0x3aa   : > { %v2595_v15 = vadd.bf16 %v13322_v11, %v17333_v2  ;;  %v17340_v2 = vld [vmem:[#allocation113_spill] sm:$0xff] }
 0x3ab   : > { %v2834_v34 = vmax.bf16 %v16678_v52, %v2578_v63  ;;  %v10511_v63 = vld [vmem:[#allocation2 + $0x5e4] ss:$16 sps:$4 sm:$0xff]  }
 0x3ac   : > { %v2851_v23 = vmax.bf16 %v16678_v52, %v2595_v15  ;;  %5256 = vmatprep.subr.bf16.mxu0 %v10511_v63  ;;  %v17341_v15 = vld [vmem:[#allocation110_spill] sm:$0xff] }
 0x3ad   : > { %5257 = vmatpush1.bf16.msra.mxu0 %v10509_v44  ;;  %v17343_v63 = vld [vmem:[#allocation122_spill] sm:$0xff] }
 0x3af   : > { %5026 = vmatmul.mubr.bf16.gmra.mrb[48].mxu0 %v2826_v62  ;;  %6438 = vmatmul.mubr.bf16.gmra.mrb[48].mxu1 %v2826_v62  ;;  %v17330_v62 = vpack.c.bf16 %v17328_v16, %v17329_v12  ;;  %v17337_v16 = vld [vmem:[#allocation114_spill] sm:$0xff]  ;;  %v17338_v12 = vld [vmem:[#allocation111_spill] sm:$0xff] }
 0x3b0   : > { %5035 = vmatprep.mubr.bf16.mxu0 %v2835_v6  ;;  %6447 = vmatprep.mubr.bf16.mxu1 %v2835_v6 }
 0x3b1   : > { %v2586_v6 = vadd.bf16 %v13333_v55, %v17330_v62  ;;  %v17339_v62 = vpack.c.bf16 %v17337_v16, %v17338_v12  ;;  %v17346_v16 = vld [vmem:[#allocation120_spill] sm:$0xff] }
 0x3b2   : > { %v17347_v12 = vld [vmem:[#allocation116_spill] sm:$0xff] }
 0x3b3   : > { %v2842_v57 = vmax.bf16 %v16678_v52, %v2586_v6  ;;  %v2603_v6 = vadd.bf16 %v13322_v11, %v17339_v62  ;;  %v17348_v62 = vpack.c.bf16 %v17346_v16, %v17347_v12 }
 0x3b5   : > { %v2859_v8 = vmax.bf16 %v16678_v52, %v2603_v6  ;;  %v2610_v6 = vadd.bf16 %v13333_v55, %v17348_v62  ;;  %v17358_v62 = vld [vmem:[#allocation134_spill] sm:$0xff] }
 0x3b7   : > { %5036 = vmatmul.mubr.bf16.gmra.mrb[52].mxu0 %v2834_v34  ;;  %6448 = vmatmul.mubr.bf16.gmra.mrb[52].mxu1 %v2834_v34  ;;  %v17336_v34 = vpack.c.bf16 %v17334_v50, %v17335_v36  ;;  %v17344_v50 = vld [vmem:[#allocation118_spill] sm:$0xff] }
 0x3b8   : > { %5045 = vmatprep.mubr.bf16.mxu0 %v2843_v27  ;;  %6457 = vmatprep.mubr.bf16.mxu1 %v2843_v27  ;;  %v17345_v36 = vpack.c.bf16 %v17343_v63, %v17344_v50  ;;  %v17352_v63 = vld [vmem:[#allocation127_spill] sm:$0xff]  ;;  %v17353_v50 = vld [vmem:[#allocation124_spill] sm:$0xff] }
 0x3b9   : > { %v2594_v27 = vadd.bf16 %v13333_v55, %v17336_v34  ;;  %v10517_v34 = vld [vmem:[#allocation2 + $0x604] ss:$16 sps:$4 sm:$0xff]  }
 0x3ba   : > { %v2611_v17 = vadd.bf16 %v13322_v11, %v17345_v36  ;;  %5579 = vmatprep.subr.bf16.mxu0 %v10517_v34  ;;  %v17354_v36 = vpack.c.bf16 %v17352_v63, %v17353_v50 }
 0x3bb   : > { %v2850_v31 = vmax.bf16 %v16678_v52, %v2594_v27  ;;  %v10520_v27 = vld [vmem:[#allocation2 + $0x60c] ss:$16 sps:$4 sm:$0xff]  }
 0x3bc   : > { %v2867_v21 = vmax.bf16 %v16678_v52, %v2611_v17  ;;  %6991 = vmatprep.subr.bf16.mxu1 %v10520_v27  ;;  %v2618_v17 = vadd.bf16 %v13333_v55, %v17354_v36  ;;  %v17364_v36 = vld [vmem:[#allocation139_spill] sm:$0xff] }
 0x3be   : > { %v2874_v27 = vmax.bf16 %v16678_v52, %v2618_v17  ;;  %v17365_v17 = vld [vmem:[#allocation137_spill] sm:$0xff] }
 0x3bf   : > { %5046 = vmatmul.mubr.bf16.gmra.mrb[56].mxu0 %v2842_v57  ;;  %6458 = vmatmul.mubr.bf16.gmra.mrb[56].mxu1 %v2842_v57  ;;  %v17342_v57 = vpack.c.bf16 %v17340_v2, %v17341_v15 }
 0x3c0   : > { %5055 = vmatprep.mubr.bf16.mxu0 %v2851_v23  ;;  %6467 = vmatprep.mubr.bf16.mxu1 %v2851_v23 }
 0x3c1   : > { %v2602_v23 = vadd.bf16 %v13333_v55, %v17342_v57  ;;  %v2866_v57 = vmax.bf16 %v16678_v52, %v2610_v6  ;;  %v17359_v6 = vld [vmem:[#allocation130_spill] sm:$0xff] }
 0x3c3   : > { %v2858_v44 = vmax.bf16 %v16678_v52, %v2602_v23 }
 0x3c7   : > { %5056 = vmatmul.mubr.bf16.gmra.mrb[60].mxu0 %v2850_v31  ;;  %6468 = vmatmul.mubr.bf16.gmra.mrb[60].mxu1 %v2850_v31  ;;  %v17349_v31 = vld [vmem:[#allocation128_spill] sm:$0xff] }
 0x3c8   : > { %5065 = vmatprep.mubr.bf16.mxu0 %v2859_v8  ;;  %6477 = vmatprep.mubr.bf16.mxu1 %v2859_v8  ;;  %v17350_v8 = vld [vmem:[#allocation125_spill] sm:$0xff] }
 0x3c9   : > { %v17351_v2 = vpack.c.bf16 %v17349_v31, %v17350_v8  ;;  %v17360_v31 = vpack.c.bf16 %v17358_v62, %v17359_v6 }
 0x3cb   : > { %v2619_v15 = vadd.bf16 %v13322_v11, %v17351_v2  ;;  %v2626_v8 = vadd.bf16 %v13333_v55, %v17360_v31  ;;  %v17361_v2 = vld [vmem:[#allocation140_spill] sm:$0xff]  ;;  %v17370_v31 = vld [vmem:[#allocation146_spill] sm:$0xff] }
 0x3cd   : > { %v2875_v23 = vmax.bf16 %v16678_v52, %v2619_v15  ;;  %v17362_v15 = vld [vmem:[#allocation138_spill] sm:$0xff]  ;;  %v2882_v63 = vmax.bf16 %v16678_v52, %v2626_v8 }
 0x3ce   : > { %v17371_v8 = vld [vmem:[#allocation142_spill] sm:$0xff] }
 0x3cf   : > { %5066 = vmatmul.mubr.bf16.gmra.mrb[64].mxu0 %v2858_v44  ;;  %6478 = vmatmul.mubr.bf16.gmra.mrb[64].mxu1 %v2858_v44  ;;  %v17355_v44 = vld [vmem:[#allocation136_spill] sm:$0xff] }
 0x3d0   : > { %5075 = vmatprep.mubr.bf16.mxu0 %v2867_v21  ;;  %6487 = vmatprep.mubr.bf16.mxu1 %v2867_v21  ;;  %v17356_v21 = vld [vmem:[#allocation132_spill] sm:$0xff] }
 0x3d1   : > { %v17357_v34 = vpack.c.bf16 %v17355_v44, %v17356_v21  ;;  %v17366_v44 = vpack.c.bf16 %v17364_v36, %v17365_v17 }
 0x3d3   : > { %v2627_v16 = vadd.bf16 %v13322_v11, %v17357_v34  ;;  %v2634_v21 = vadd.bf16 %v13333_v55, %v17366_v44  ;;  %v17367_v34 = vld [vmem:[#allocation148_spill] sm:$0xff]  ;;  %v17376_v44 = vld [vmem:[#allocation153_spill] sm:$0xff] }
 0x3d5   : > { %v2883_v12 = vmax.bf16 %v16678_v52, %v2627_v16  ;;  %v17368_v16 = vld [vmem:[#allocation144_spill] sm:$0xff]  ;;  %v2890_v62 = vmax.bf16 %v16678_v52, %v2634_v21  ;;  %v17377_v21 = vld [vmem:[#allocation150_spill] sm:$0xff] }
 0x3d7   : > { %5076 = vmatmul.mubr.bf16.gmra.mrb[68].mxu0 %v2866_v57  ;;  %6488 = vmatmul.mubr.bf16.gmra.mrb[68].mxu1 %v2866_v57  ;;  %v17363_v57 = vpack.c.bf16 %v17361_v2, %v17362_v15  ;;  %v17372_v2 = vpack.c.bf16 %v17370_v31, %v17371_v8 }
 0x3d8   : > { %5085 = vmatprep.mubr.bf16.mxu0 %v2875_v23  ;;  %6497 = vmatprep.mubr.bf16.mxu1 %v2875_v23 }
 0x3d9   : > { %v2635_v23 = vadd.bf16 %v13322_v11, %v17363_v57  ;;  %v2642_v15 = vadd.bf16 %v13333_v55, %v17372_v2  ;;  %v17373_v57 = vld [vmem:[#allocation154_spill] sm:$0xff]  ;;  %v17382_v2 = vld [vmem:[#allocation160_spill] sm:$0xff] }
 0x3db   : > { %v2891_v50 = vmax.bf16 %v16678_v52, %v2635_v23  ;;  %v17374_v23 = vld [vmem:[#allocation151_spill] sm:$0xff]  ;;  %v2898_v36 = vmax.bf16 %v16678_v52, %v2642_v15  ;;  %v17383_v15 = vld [vmem:[#allocation156_spill] sm:$0xff] }
 0x3df   : > { %5086 = vmatmul.mubr.bf16.gmra.mrb[72].mxu0 %v2874_v27  ;;  %6498 = vmatmul.mubr.bf16.gmra.mrb[72].mxu1 %v2874_v27  ;;  %v17369_v27 = vpack.c.bf16 %v17367_v34, %v17368_v16  ;;  %v17378_v34 = vpack.c.bf16 %v17376_v44, %v17377_v21 }
 0x3e0   : > { %5095 = vmatprep.mubr.bf16.mxu0 %v2883_v12  ;;  %6507 = vmatprep.mubr.bf16.mxu1 %v2883_v12 }
 0x3e1   : > { %v2643_v12 = vadd.bf16 %v13322_v11, %v17369_v27  ;;  %v2650_v16 = vadd.bf16 %v13333_v55, %v17378_v34  ;;  %v17379_v27 = vld [vmem:[#allocation161_spill] sm:$0xff]  ;;  %v17388_v34 = vld [vmem:[#allocation167_spill] sm:$0xff] }
 0x3e3   : > { %v2899_v6 = vmax.bf16 %v16678_v52, %v2643_v12  ;;  %v17380_v12 = vld [vmem:[#allocation158_spill] sm:$0xff]  ;;  %v2906_v31 = vmax.bf16 %v16678_v52, %v2650_v16  ;;  %v17389_v16 = vld [vmem:[#allocation163_spill] sm:$0xff] }
 0x3e7   : > { %5096 = vmatmul.mubr.bf16.gmra.mrb[76].mxu0 %v2882_v63  ;;  %6508 = vmatmul.mubr.bf16.gmra.mrb[76].mxu1 %v2882_v63  ;;  %v17375_v63 = vpack.c.bf16 %v17373_v57, %v17374_v23  ;;  %v17384_v57 = vpack.c.bf16 %v17382_v2, %v17383_v15 }
 0x3e8   : > { %5105 = vmatprep.mubr.bf16.mxu0 %v2891_v50  ;;  %6517 = vmatprep.mubr.bf16.mxu1 %v2891_v50 }
 0x3e9   : > { %v2651_v50 = vadd.bf16 %v13322_v11, %v17375_v63  ;;  %v2658_v23 = vadd.bf16 %v13333_v55, %v17384_v57  ;;  %v17385_v63 = vld [vmem:[#allocation168_spill] sm:$0xff]  ;;  %v17394_v57 = vld [vmem:[#allocation174_spill] sm:$0xff] }
 0x3eb   : > { %v2907_v17 = vmax.bf16 %v16678_v52, %v2651_v50  ;;  %v17386_v50 = vld [vmem:[#allocation165_spill] sm:$0xff]  ;;  %v2914_v44 = vmax.bf16 %v16678_v52, %v2658_v23  ;;  %v17395_v23 = vld [vmem:[#allocation170_spill] sm:$0xff] }
 0x3ef   : > { %5106 = vmatmul.mubr.bf16.gmra.mrb[80].mxu0 %v2890_v62  ;;  %6518 = vmatmul.mubr.bf16.gmra.mrb[80].mxu1 %v2890_v62  ;;  %v17381_v62 = vpack.c.bf16 %v17379_v27, %v17380_v12  ;;  %v17390_v27 = vpack.c.bf16 %v17388_v34, %v17389_v16 }
 0x3f0   : > { %5115 = vmatprep.mubr.bf16.mxu0 %v2899_v6  ;;  %6527 = vmatprep.mubr.bf16.mxu1 %v2899_v6 }
 0x3f1   : > { %v2659_v6 = vadd.bf16 %v13322_v11, %v17381_v62  ;;  %v2666_v12 = vadd.bf16 %v13333_v55, %v17390_v27  ;;  %v17391_v62 = vld [vmem:[#allocation175_spill] sm:$0xff]  ;;  %v17400_v27 = vld [vmem:[#allocation181_spill] sm:$0xff] }
 0x3f3   : > { %v2915_v8 = vmax.bf16 %v16678_v52, %v2659_v6  ;;  %v17392_v6 = vld [vmem:[#allocation172_spill] sm:$0xff]  ;;  %v2922_v2 = vmax.bf16 %v16678_v52, %v2666_v12  ;;  %v17401_v12 = vld [vmem:[#allocation177_spill] sm:$0xff] }
 0x3f7   : > { %5116 = vmatmul.mubr.bf16.gmra.mrb[84].mxu0 %v2898_v36  ;;  %6528 = vmatmul.mubr.bf16.gmra.mrb[84].mxu1 %v2898_v36  ;;  %v17387_v36 = vpack.c.bf16 %v17385_v63, %v17386_v50  ;;  %v17396_v63 = vpack.c.bf16 %v17394_v57, %v17395_v23 }
 0x3f8   : > { %5125 = vmatprep.mubr.bf16.mxu0 %v2907_v17  ;;  %6537 = vmatprep.mubr.bf16.mxu1 %v2907_v17 }
 0x3f9   : > { %v2667_v17 = vadd.bf16 %v13322_v11, %v17387_v36  ;;  %v2674_v50 = vadd.bf16 %v13333_v55, %v17396_v63  ;;  %v17397_v36 = vld [vmem:[#allocation182_spill] sm:$0xff]  ;;  %v17406_v63 = vld [vmem:[#allocation188_spill] sm:$0xff] }
 0x3fb   : > { %v2923_v21 = vmax.bf16 %v16678_v52, %v2667_v17  ;;  %v17398_v17 = vld [vmem:[#allocation179_spill] sm:$0xff]  ;;  %v2930_v34 = vmax.bf16 %v16678_v52, %v2674_v50  ;;  %v17407_v50 = vld [vmem:[#allocation184_spill] sm:$0xff] }
 0x3ff   : > { %5126 = vmatmul.mubr.bf16.gmra.mrb[88].mxu0 %v2906_v31  ;;  %6538 = vmatmul.mubr.bf16.gmra.mrb[88].mxu1 %v2906_v31  ;;  %v17393_v31 = vpack.c.bf16 %v17391_v62, %v17392_v6  ;;  %v17402_v62 = vpack.c.bf16 %v17400_v27, %v17401_v12 }
 0x400   : > { %5135 = vmatprep.mubr.bf16.mxu0 %v2915_v8  ;;  %6547 = vmatprep.mubr.bf16.mxu1 %v2915_v8 }
 0x401   : > { %v2675_v8 = vadd.bf16 %v13322_v11, %v17393_v31  ;;  %v2682_v6 = vadd.bf16 %v13333_v55, %v17402_v62  ;;  %v17403_v31 = vld [vmem:[#allocation189_spill] sm:$0xff]  ;;  %v17412_v62 = vld [vmem:[#allocation195_spill] sm:$0xff] }
 0x403   : > { %v2931_v15 = vmax.bf16 %v16678_v52, %v2675_v8  ;;  %v17404_v8 = vld [vmem:[#allocation186_spill] sm:$0xff]  ;;  %v2938_v57 = vmax.bf16 %v16678_v52, %v2682_v6  ;;  %v17413_v6 = vld [vmem:[#allocation191_spill] sm:$0xff] }
 0x407   : > { %5136 = vmatmul.mubr.bf16.gmra.mrb[92].mxu0 %v2914_v44  ;;  %6548 = vmatmul.mubr.bf16.gmra.mrb[92].mxu1 %v2914_v44  ;;  %v17399_v44 = vpack.c.bf16 %v17397_v36, %v17398_v17  ;;  %v17408_v36 = vpack.c.bf16 %v17406_v63, %v17407_v50  ;;  %v10643_v63 = vld [vmem:[%s16213_s2] sm:$0xff] }
 0x408   : > { %5145 = vmatprep.mubr.bf16.mxu0 %v2923_v21  ;;  %6557 = vmatprep.mubr.bf16.mxu1 %v2923_v21  ;;  %v2367_v50 = vcombine.high %v10643_v63, %v10643_v63  ;;  %v17425_v63 = vld [vmem:[#allocation206_spill] sm:$0xff] }
 0x409   : > { %v2683_v21 = vadd.bf16 %v13322_v11, %v17399_v44  ;;  %v2690_v17 = vadd.bf16 %v13333_v55, %v17408_v36  ;;  %v17409_v44 = vld [vmem:[#allocation196_spill] sm:$0xff] }
 0x40b   : > { %v2939_v16 = vmax.bf16 %v16678_v52, %v2683_v21  ;;  %v17410_v21 = vld [vmem:[#allocation193_spill] sm:$0xff]  ;;  %v2946_v27 = vmax.bf16 %v16678_v52, %v2690_v17 }
 0x40f   : > { %5146 = vmatmul.mubr.bf16.gmra.mrb[96].mxu0 %v2922_v2  ;;  %6558 = vmatmul.mubr.bf16.gmra.mrb[96].mxu1 %v2922_v2  ;;  %v17405_v2 = vpack.c.bf16 %v17403_v31, %v17404_v8  ;;  %v17414_v31 = vpack.c.bf16 %v17412_v62, %v17413_v6  ;;  %v17422_v62 = vld [vmem:[#allocation208_spill] sm:$0xff] }
 0x410   : > { %5155 = vmatprep.mubr.bf16.mxu0 %v2931_v15  ;;  %6567 = vmatprep.mubr.bf16.mxu1 %v2931_v15 }
 0x411   : > { %v2691_v15 = vadd.bf16 %v13322_v11, %v17405_v2  ;;  %v2698_v8 = vadd.bf16 %v13333_v55, %v17414_v31  ;;  %v17415_v2 = vld [vmem:[#allocation204_spill] sm:$0xff] }
 0x413   : > { %v2947_v23 = vmax.bf16 %v16678_v52, %v2691_v15  ;;  %v17416_v15 = vld [vmem:[#allocation200_spill] sm:$0xff]  ;;  %v2954_v36 = vmax.bf16 %v16678_v52, %v2698_v8 }
 0x417   : > { %5156 = vmatmul.mubr.bf16.gmra.mrb[100].mxu0 %v2930_v34  ;;  %6568 = vmatmul.mubr.bf16.gmra.mrb[100].mxu1 %v2930_v34  ;;  %v17411_v34 = vpack.c.bf16 %v17409_v44, %v17410_v21  ;;  %v2381_v44 = vrot.slane %v2367_v50, %v12219_v53  ;;  %v17418_v21 = vld [vmem:[#allocation202_spill] sm:$0xff] }
 0x418   : > { %5165 = vmatprep.mubr.bf16.mxu0 %v2939_v16  ;;  %6577 = vmatprep.mubr.bf16.mxu1 %v2939_v16 }
 0x419   : > { %v2699_v16 = vadd.bf16 %v13322_v11, %v17411_v34  ;;  %v17419_v34 = vld [vmem:[#allocation198_spill] sm:$0xff] }
 0x41b   : > { %v2955_v12 = vmax.bf16 %v16678_v52, %v2699_v16  ;;  %v17420_v16 = vpack.c.bf16 %v17418_v21, %v17419_v34  ;;  %v17427_v21 = vld [vmem:[#allocation220_spill] sm:$0xff] }
 0x41c   : > { %v17428_v34 = vld [vmem:[#allocation216_spill] sm:$0xff] }
 0x41f   : > { %5166 = vmatmul.mubr.bf16.gmra.mrb[104].mxu0 %v2938_v57  ;;  %6578 = vmatmul.mubr.bf16.gmra.mrb[104].mxu1 %v2938_v57  ;;  %v17417_v57 = vpack.c.bf16 %v17415_v2, %v17416_v15  ;;  %v2383_v2 = vcombine.high %v2381_v44, %v2381_v44 }
 0x420   : > { %5175 = vmatprep.mubr.bf16.mxu0 %v2947_v23  ;;  %6587 = vmatprep.mubr.bf16.mxu1 %v2947_v23 }
 0x421   : > { %v2707_v23 = vadd.bf16 %v13322_v11, %v17417_v57  ;;  %v13642_v57 = vrot.slane %v2383_v2, %v12219_v53  ;;  %v17430_v2 = vld [vmem:[#allocation218_spill] sm:$0xff] }
 0x423   : > { %v2963_v17 = vmax.bf16 %v16678_v52, %v2707_v23  ;;  %v17424_v23 = vld [vmem:[#allocation210_spill] sm:$0xff] }
 0x424   : > { %v17426_v50 = vpack.c.bf16 %v17424_v23, %v17425_v63  ;;  %v17433_v63 = vld [vmem:[#allocation227_spill] sm:$0xff] }
 0x427   : > { %5176 = vmatmul.mubr.bf16.gmra.mrb[108].mxu0 %v2946_v27  ;;  %6588 = vmatmul.mubr.bf16.gmra.mrb[108].mxu1 %v2946_v27  ;;  %v2706_v27 = vadd.bf16 %v13333_v55, %v17420_v16  ;;  %v17429_v16 = vpack.c.bf16 %v17427_v21, %v17428_v34 }
 0x428   : > { %5185 = vmatprep.mubr.bf16.mxu0 %v2955_v12  ;;  %6597 = vmatprep.mubr.bf16.mxu1 %v2955_v12  ;;  %v17421_v12 = vld [vmem:[#allocation212_spill] sm:$0xff] }
 0x429   : > { %v17423_v6 = vpack.c.bf16 %v17421_v12, %v17422_v62  ;;  %v2962_v8 = vmax.bf16 %v16678_v52, %v2706_v27  ;;  %v2723_v27 = vadd.bf16 %v13322_v11, %v17429_v16  ;;  %v17437_v16 = vld [vmem:[#allocation221_spill] sm:$0xff] }
 0x42b   : > { %v2715_v31 = vadd.bf16 %v13322_v11, %v17423_v6  ;;  %v2979_v6 = vmax.bf16 %v16678_v52, %v2723_v27 }
 0x42d   : > { %v2971_v15 = vmax.bf16 %v16678_v52, %v2715_v31  ;;  %v13660_v31 = vrot.slane %v2381_v44, %v12219_v53  ;;  %v10529_v53 = vld [vmem:[#allocation2 + $0x644] ss:$16 sps:$4 sm:$0xff]  }
 0x42f   : > { %5186 = vmatmul.mubr.bf16.gmra.mrb[112].mxu0 %v2954_v36  ;;  %6598 = vmatmul.mubr.bf16.gmra.mrb[112].mxu1 %v2954_v36  ;;  %v2714_v36 = vadd.bf16 %v13333_v55, %v17426_v50  ;;  %v2445_v11 = vpack.i.b16 %v13660_v31, %v13660_v31  ;;  %v17434_v50 = vld [vmem:[#allocation223_spill] sm:$0xff] }
 0x430   : > { %5195 = vmatprep.mubr.bf16.mxu0 %v2963_v17  ;;  %6607 = vmatprep.mubr.bf16.mxu1 %v2963_v17  ;;  %v2452_v17 = vpack.i.b16 %v13642_v57, %v13642_v57 }
 0x431   : > { %v2970_v12 = vmax.bf16 %v16678_v52, %v2714_v36  ;;  %v17435_v36 = vpack.c.bf16 %v17433_v63, %v17434_v50  ;;  %v13674_v21 = vrot.slane %v2445_v11, %v12281_v4  ;;  %v10515_v11 = vld [vmem:[#allocation2 + $0x600] ss:$16 sps:$4 sm:$0xff]   ;;  %v10518_v63 = vld [vmem:[#allocation2 + $0x608] ss:$16 sps:$4 sm:$0xff]  }
 0x432   : > { %v13656_v62 = vrot.slane %v2452_v17, %v12281_v4 }
 0x434   : > { %v2477_v17 = vadd.bf16 %v13656_v62, %v17435_v36  ;;  %v10523_v36 = vld [vmem:[#allocation2 + $0x624] ss:$16 sps:$4 sm:$0xff]  }
 0x436   : > { %v2733_v34 = vmax.bf16 %v16678_v52, %v2477_v17  ;;  %v10526_v17 = vld [vmem:[#allocation2 + $0x62c] ss:$16 sps:$4 sm:$0xff]  }
 0x437   : > { %5196 = vmatmul.mubr.bf16.gmra.mrb[116].mxu0 %v2962_v8  ;;  %6608 = vmatmul.mubr.bf16.gmra.mrb[116].mxu1 %v2962_v8  ;;  %v17431_v8 = vld [vmem:[#allocation214_spill] sm:$0xff] }
 0x438   : > { %5205 = vmatprep.mubr.bf16.mxu0 %v2971_v15  ;;  %6617 = vmatprep.mubr.bf16.mxu1 %v2971_v15  ;;  %v17432_v15 = vpack.c.bf16 %v17430_v2, %v17431_v8  ;;  %v17440_v2 = vld [vmem:[#allocation231_spill] sm:$0xff] }
 0x43a   : > { %v2722_v23 = vadd.bf16 %v13333_v55, %v17432_v15  ;;  %v17436_v55 = vld [vmem:[#allocation225_spill] sm:$0xff] }
 0x43b   : > { %v17438_v27 = vpack.c.bf16 %v17436_v55, %v17437_v16  ;;  %v17443_v55 = vld [vmem:[#allocation229_spill] sm:$0xff] }
 0x43c   : > { %v2978_v44 = vmax.bf16 %v16678_v52, %v2722_v23 }
 0x43f   : > { %5206 = vmatmul.mubr.bf16.gmra.mrb[120].mxu0 %v2970_v12  ;;  %6618 = vmatmul.mubr.bf16.gmra.mrb[120].mxu1 %v2970_v12  ;;  %v2476_v12 = vadd.bf16 %v13674_v21, %v17438_v27  ;;  %v10521_v27 = vld [vmem:[#allocation2 + $0x620] ss:$16 sps:$4 sm:$0xff]  }
 0x440   : > { %5215 = vmatprep.mubr.bf16.mxu0 %v2979_v6  ;;  %6627 = vmatprep.mubr.bf16.mxu1 %v2979_v6  ;;  %v17439_v6 = vld [vmem:[#allocation236_spill] sm:$0xff] }
 0x441   : > { %v17441_v8 = vpack.c.bf16 %v17439_v6, %v17440_v2  ;;  %v2732_v23 = vmax.bf16 %v16678_v52, %v2476_v12  ;;  %v17445_v6 = vld [vmem:[#allocation244_spill] sm:$0xff] }
 0x442   : > { %v17446_v2 = vld [vmem:[#allocation240_spill] sm:$0xff] }
 0x443   : > { %v2485_v15 = vadd.bf16 %v13656_v62, %v17441_v8  ;;  %v17447_v12 = vpack.c.bf16 %v17445_v6, %v17446_v2 }
 0x445   : > { %v2741_v50 = vmax.bf16 %v16678_v52, %v2485_v15  ;;  %v2493_v8 = vadd.bf16 %v13656_v62, %v17447_v12  ;;  %v10524_v15 = vld [vmem:[#allocation2 + $0x628] ss:$16 sps:$4 sm:$0xff]  }
 0x446   : > { %v10536_v12 = vld [vmem:[#allocation2 + $0x668] ss:$16 sps:$4 sm:$0xff]  }
 0x447   : > { %5216 = vmatmul.mubr.bf16.gmra.mrb[124].mxu0 %v2978_v44  ;;  %6628 = vmatmul.mubr.bf16.gmra.mrb[124].mxu1 %v2978_v44  ;;  %v17442_v44 = vld [vmem:[#allocation234_spill] sm:$0xff] }
 0x448   : > { %5258 = vmatprep.mubr.bf16.mxu0 %v2733_v34  ;;  %6670 = vmatprep.mubr.bf16.mxu1 %v2733_v34  ;;  %v17444_v16 = vpack.c.bf16 %v17442_v44, %v17443_v55  ;;  %v10527_v44 = vld [vmem:[#allocation2 + $0x640] ss:$16 sps:$4 sm:$0xff]   ;;  %v2749_v55 = vmax.bf16 %v16678_v52, %v2493_v8  ;;  %v10541_v8 = vld [vmem:[#allocation2 + $0x684] ss:$16 sps:$4 sm:$0xff]  }
 0x44a   : > { %v2484_v34 = vadd.bf16 %v13674_v21, %v17444_v16  ;;  %v10538_v16 = vld [vmem:[#allocation2 + $0x66c] ss:$16 sps:$4 sm:$0xff]  }
 0x44c   : > { %v2740_v4 = vmax.bf16 %v16678_v52, %v2484_v34  ;;  %v10533_v34 = vld [vmem:[#allocation2 + $0x660] ss:$16 sps:$4 sm:$0xff]  }
 0x44f   : > { %5259 = vmatmul.mubr.bf16.vlgmr.msra.gmra.mrb[0].mxu0 %v2732_v23  ;;  %6671 = vmatmul.mubr.bf16.vlgmr.msra.gmra.mrb[0].mxu1 %v2732_v23  ;;  %v10532_v23 = vld [vmem:[#allocation2 + $0x64c] ss:$16 sps:$4 sm:$0xff]  }
 0x450   : > { %5268 = vmatprep.mubr.bf16.mxu0 %v2741_v50  ;;  %5580 = vmatpush1.bf16.msra.mxu0 %v10515_v11  ;;  %v10530_v11 = vld [vmem:[#allocation2 + $0x648] ss:$16 sps:$4 sm:$0xff]  }
 0x451   : > { %6680 = vmatprep.mubr.bf16.mxu1 %v2741_v50  ;;  %6992 = vmatpush1.bf16.msra.mxu1 %v10518_v63  ;;  %v10535_v50 = vld [vmem:[#allocation2 + $0x664] ss:$16 sps:$4 sm:$0xff]  }
 0x452   : > { %5581 = vmatprep.subr.bf16.mxu0 %v10523_v36  ;;  %6993 = vmatprep.subr.bf16.mxu1 %v10526_v17  ;;  %v17448_v63 = vld [vmem:[#allocation242_spill] sm:$0xff] }
 0x453   : > { %v17449_v36 = vld [vmem:[#allocation238_spill] sm:$0xff] }
 0x454   : > { %5582 = vmatpush1.bf16.msra.mxu0 %v10521_v27  ;;  %v17450_v6 = vpack.c.bf16 %v17448_v63, %v17449_v36  ;;  %v17451_v27 = vld [vmem:[#allocation249_spill] sm:$0xff] }
 0x455   : > { %6994 = vmatpush1.bf16.msra.mxu1 %v10524_v15  ;;  %5583 = vmatprep.subr.bf16.mxu0 %v10529_v53  ;;  %v17452_v2 = vpack.c.bf16 %v12299_v30, %v17451_v27  ;;  %v10550_v30 = vld [vmem:[#allocation2 + $0x6ac] ss:$16 sps:$4 sm:$0xff]   ;;  %v10548_v27 = vld [vmem:[#allocation2 + $0x6a8] ss:$16 sps:$4 sm:$0xff]  }
 0x456   : > { %6995 = vmatprep.subr.bf16.mxu1 %v10532_v23  ;;  %v2492_v17 = vadd.bf16 %v13674_v21, %v17450_v6  ;;  %v10539_v23 = vld [vmem:[#allocation2 + $0x680] ss:$16 sps:$4 sm:$0xff]  }
 0x457   : > { %5269 = vmatmul.mubr.bf16.gmra.mrb[4].mxu0 %v2740_v4  ;;  %6681 = vmatmul.mubr.bf16.gmra.mrb[4].mxu1 %v2740_v4  ;;  %v2501_v53 = vadd.bf16 %v13656_v62, %v17452_v2  ;;  %v10544_v4 = vld [vmem:[#allocation2 + $0x68c] ss:$16 sps:$4 sm:$0xff]   ;;  %v10545_v6 = vld [vmem:[#allocation2 + $0x6a0] ss:$16 sps:$4 sm:$0xff]   ;;  %v10553_v2 = vld [vmem:[#allocation2 + $0x6c4] ss:$16 sps:$4 sm:$0xff]  }
 0x458   : > { %5278 = vmatprep.mubr.bf16.mxu0 %v2749_v55  ;;  %6690 = vmatprep.mubr.bf16.mxu1 %v2749_v55  ;;  %v2748_v15 = vmax.bf16 %v16678_v52, %v2492_v17  ;;  %v10547_v55 = vld [vmem:[#allocation2 + $0x6a4] ss:$16 sps:$4 sm:$0xff]   ;;  %v17456_v17 = vpack.c.bf16 %v12344_v29, %v12331_v47  ;;  %v10562_v47 = vld [vmem:[#allocation2 + $0x6ec] ss:$16 sps:$4 sm:$0xff]  }
 0x459   : > { %5584 = vmatpush1.bf16.msra.mxu0 %v10527_v44  ;;  %6996 = vmatpush1.bf16.msra.mxu1 %v10530_v11  ;;  %v2757_v63 = vmax.bf16 %v16678_v52, %v2501_v53  ;;  %v10542_v44 = vld [vmem:[#allocation2 + $0x688] ss:$16 sps:$4 sm:$0xff]   ;;  %v10556_v53 = vld [vmem:[#allocation2 + $0x6cc] ss:$16 sps:$4 sm:$0xff]  }
 0x45a   : > { %5585 = vmatprep.subr.bf16.mxu0 %v10535_v50  ;;  %6997 = vmatprep.subr.bf16.mxu1 %v10538_v16  ;;  %v17453_v11 = vld [vmem:[#allocation251_spill] sm:$0xff]  ;;  %v17457_v29 = vld [vmem:[#allocation257_spill] sm:$0xff] }
 0x45b   : > { %v17454_v50 = vld [vmem:[#allocation247_spill] sm:$0xff] }
 0x45c   : > { %v17455_v36 = vpack.c.bf16 %v17453_v11, %v17454_v50  ;;  %v17460_v11 = vld [vmem:[#allocation262_spill] sm:$0xff] }
 0x45d   : > { %5586 = vmatpush1.bf16.msra.mxu0 %v10533_v34  ;;  %6998 = vmatpush1.bf16.msra.mxu1 %v10536_v12  ;;  %v2509_v34 = vadd.bf16 %v13656_v62, %v17456_v17  ;;  %v17461_v50 = vpack.c.bf16 %v12382_v38, %v17460_v11  ;;  %v10568_v17 = vld [vmem:[#allocation2 + $0x70c] ss:$16 sps:$4 sm:$0xff]  }
 0x45e   : > { %5587 = vmatprep.subr.bf16.mxu0 %v10541_v8  ;;  %6999 = vmatprep.subr.bf16.mxu1 %v10544_v4  ;;  %v2500_v16 = vadd.bf16 %v13674_v21, %v17455_v36  ;;  %v10551_v8 = vld [vmem:[#allocation2 + $0x6c0] ss:$16 sps:$4 sm:$0xff]   ;;  %v10574_v38 = vld [vmem:[#allocation2 + $0x72c] ss:$16 sps:$4 sm:$0xff]  }
 0x45f   : > { %5279 = vmatmul.mubr.bf16.gmra.mrb[8].mxu0 %v2748_v15  ;;  %6691 = vmatmul.mubr.bf16.gmra.mrb[8].mxu1 %v2748_v15  ;;  %v2765_v4 = vmax.bf16 %v16678_v52, %v2509_v34  ;;  %v10554_v15 = vld [vmem:[#allocation2 + $0x6c8] ss:$16 sps:$4 sm:$0xff]   ;;  %v2517_v36 = vadd.bf16 %v13656_v62, %v17461_v50  ;;  %v10575_v50 = vld [vmem:[#allocation2 + $0x740] ss:$16 sps:$4 sm:$0xff]  }
 0x460   : > { %5288 = vmatprep.mubr.bf16.mxu0 %v2757_v63  ;;  %6700 = vmatprep.mubr.bf16.mxu1 %v2757_v63  ;;  %v2756_v12 = vmax.bf16 %v16678_v52, %v2500_v16  ;;  %v17458_v63 = vld [vmem:[#allocation254_spill] sm:$0xff]  ;;  %v10560_v16 = vld [vmem:[#allocation2 + $0x6e8] ss:$16 sps:$4 sm:$0xff]  }
 0x461   : > { %5588 = vmatpush1.bf16.msra.mxu0 %v10539_v23  ;;  %7000 = vmatpush1.bf16.msra.mxu1 %v10542_v44  ;;  %v10559_v23 = vld [vmem:[#allocation2 + $0x6e4] ss:$16 sps:$4 sm:$0xff]   ;;  %v17459_v44 = vpack.c.bf16 %v17457_v29, %v17458_v63  ;;  %v17465_v29 = vpack.c.bf16 %v12416_v26, %v12405_v39  ;;  %v17466_v39 = vld [vmem:[#allocation267_spill] sm:$0xff] }
 0x462   : > { %5589 = vmatprep.subr.bf16.mxu0 %v10547_v55  ;;  %7001 = vmatprep.subr.bf16.mxu1 %v10550_v30  ;;  %v10557_v30 = vld [vmem:[#allocation2 + $0x6e0] ss:$16 sps:$4 sm:$0xff]   ;;  %v17467_v26 = vpack.c.bf16 %v12409_v18, %v17466_v39  ;;  %v10584_v18 = vld [vmem:[#allocation2 + $0x768] ss:$16 sps:$4 sm:$0xff]  }
 0x463   : > { %v2508_v55 = vadd.bf16 %v13674_v21, %v17459_v44  ;;  %v2525_v63 = vadd.bf16 %v13656_v62, %v17465_v29  ;;  %v10572_v44 = vld [vmem:[#allocation2 + $0x728] ss:$16 sps:$4 sm:$0xff]  }
 0x465   : > { %5590 = vmatpush1.bf16.msra.mxu0 %v10545_v6  ;;  %7002 = vmatpush1.bf16.msra.mxu1 %v10548_v27  ;;  %v10565_v6 = vld [vmem:[#allocation2 + $0x704] ss:$16 sps:$4 sm:$0xff]   ;;  %v2764_v34 = vmax.bf16 %v16678_v52, %v2508_v55  ;;  %v10563_v27 = vld [vmem:[#allocation2 + $0x700] ss:$16 sps:$4 sm:$0xff]  }
 0x466   : > { %5591 = vmatprep.subr.bf16.mxu0 %v10553_v2  ;;  %7003 = vmatprep.subr.bf16.mxu1 %v10556_v53  ;;  %v2773_v2 = vmax.bf16 %v16678_v52, %v2517_v36  ;;  %v10566_v53 = vld [vmem:[#allocation2 + $0x708] ss:$16 sps:$4 sm:$0xff]   ;;  %v10577_v55 = vld [vmem:[#allocation2 + $0x744] ss:$16 sps:$4 sm:$0xff]   ;;  %v2781_v36 = vmax.bf16 %v16678_v52, %v2525_v63 }
 0x467   : > { %5289 = vmatmul.mubr.bf16.gmra.mrb[12].mxu0 %v2756_v12  ;;  %6701 = vmatmul.mubr.bf16.gmra.mrb[12].mxu1 %v2756_v12  ;;  %v10571_v12 = vld [vmem:[#allocation2 + $0x724] ss:$16 sps:$4 sm:$0xff]  }
 0x468   : > { %5298 = vmatprep.mubr.bf16.mxu0 %v2765_v4  ;;  %6710 = vmatprep.mubr.bf16.mxu1 %v2765_v4  ;;  %v17463_v4 = vld [vmem:[#allocation260_spill] sm:$0xff] }
 0x469   : > { %5592 = vmatpush1.bf16.msra.mxu0 %v10551_v8  ;;  %7004 = vmatpush1.bf16.msra.mxu1 %v10554_v15  ;;  %v17462_v8 = vld [vmem:[#allocation264_spill] sm:$0xff] }
 0x46a   : > { %5593 = vmatprep.subr.bf16.mxu0 %v10559_v23  ;;  %7005 = vmatprep.subr.bf16.mxu1 %v10562_v47  ;;  %v17464_v15 = vpack.c.bf16 %v17462_v8, %v17463_v4  ;;  %v10569_v47 = vld [vmem:[#allocation2 + $0x720] ss:$16 sps:$4 sm:$0xff]   ;;  %v17469_v8 = vld [vmem:[#allocation275_spill] sm:$0xff] }
 0x46b   : > { %v17470_v4 = vld [vmem:[#allocation272_spill] sm:$0xff] }
 0x46c   : > { %v2516_v23 = vadd.bf16 %v13674_v21, %v17464_v15  ;;  %v17471_v15 = vpack.c.bf16 %v17469_v8, %v17470_v4  ;;  %v17484_v4 = vpack.c.bf16 %v12552_v3, %v12541_v61  ;;  %v17487_v61 = vld [vmem:[#allocation51_spill] sm:$0xff] }
 0x46d   : > { %5594 = vmatpush1.bf16.msra.mxu0 %v10557_v30  ;;  %7006 = vmatpush1.bf16.msra.mxu1 %v10560_v16  ;;  %v10580_v30 = vld [vmem:[#allocation2 + $0x74c] ss:$16 sps:$4 sm:$0xff]   ;;  %v10578_v16 = vld [vmem:[#allocation2 + $0x748] ss:$16 sps:$4 sm:$0xff]   ;;  %v17488_v3 = vpack.c.bf16 %v12586_v43, %v17487_v61  ;;  %v17492_v43 = vpack.c.bf16 %v12620_v37, %v12609_v40  ;;  %v17495_v40 = vld [vmem:[#allocation294_spill] sm:$0xff] }
 0x46e   : > { %5595 = vmatprep.subr.bf16.mxu0 %v10565_v6  ;;  %7007 = vmatprep.subr.bf16.mxu1 %v10568_v17  ;;  %v2772_v11 = vmax.bf16 %v16678_v52, %v2516_v23  ;;  %v2524_v6 = vadd.bf16 %v13674_v21, %v17467_v26  ;;  %v17468_v17 = vpack.c.bf16 %v12450_v13, %v12439_v28  ;;  %v17472_v28 = vld [vmem:[#allocation281_spill] sm:$0xff]  ;;  %v17473_v13 = vld [vmem:[#allocation27_spill] sm:$0xff] }
 0x46f   : > { %5299 = vmatmul.mubr.bf16.gmra.mrb[16].mxu0 %v2764_v34  ;;  %6711 = vmatmul.mubr.bf16.gmra.mrb[16].mxu1 %v2764_v34  ;;  %v2532_v23 = vadd.bf16 %v13674_v21, %v17471_v15  ;;  %v2557_v15 = vadd.bf16 %v13656_v62, %v17484_v4  ;;  %v17496_v37 = vpack.c.bf16 %v12654_v10, %v17495_v40  ;;  %v10601_v4 = vld [vmem:[#allocation2 + $0x7c4] ss:$16 sps:$4 sm:$0xff]   ;;  %v17511_v40 = vld [vmem:[#allocation309_spill] sm:$0xff] }
 0x470   : > { %5308 = vmatprep.mubr.bf16.mxu0 %v2773_v2  ;;  %6720 = vmatprep.mubr.bf16.mxu1 %v2773_v2  ;;  %v2533_v34 = vadd.bf16 %v13656_v62, %v17468_v17  ;;  %v17500_v10 = vpack.c.bf16 %v12688_v60, %v12677_v9  ;;  %v17503_v9 = vld [vmem:[#allocation75_spill] sm:$0xff] }
 0x471   : > { %5596 = vmatpush1.bf16.msra.mxu0 %v10563_v27  ;;  %7008 = vmatpush1.bf16.msra.mxu1 %v10566_v53  ;;  %v2780_v27 = vmax.bf16 %v16678_v52, %v2524_v6  ;;  %v10581_v53 = vld [vmem:[#allocation2 + $0x760] ss:$16 sps:$4 sm:$0xff]   ;;  %v2788_v63 = vmax.bf16 %v16678_v52, %v2532_v23 }
 0x472   : > { %5597 = vmatprep.subr.bf16.mxu0 %v10571_v12  ;;  %7009 = vmatprep.subr.bf16.mxu1 %v10574_v38  ;;  %v2789_v2 = vmax.bf16 %v16678_v52, %v2533_v34  ;;  %v10583_v12 = vld [vmem:[#allocation2 + $0x764] ss:$16 sps:$4 sm:$0xff]   ;;  %v10586_v38 = vld [vmem:[#allocation2 + $0x76c] ss:$16 sps:$4 sm:$0xff]   ;;  %v10587_v34 = vld [vmem:[#allocation2 + $0x780] ss:$16 sps:$4 sm:$0xff]  }
 0x475   : > { %5598 = vmatpush1.bf16.msra.mxu0 %v10569_v47  ;;  %7010 = vmatpush1.bf16.msra.mxu1 %v10572_v44  ;;  %v17474_v47 = vpack.c.bf16 %v17472_v28, %v17473_v13  ;;  %v2813_v28 = vmax.bf16 %v16678_v52, %v2557_v15  ;;  %v17485_v13 = vld [vmem:[#allocation37_spill] sm:$0xff] }
 0x476   : > { %5599 = vmatprep.subr.bf16.mxu0 %v10577_v55  ;;  %7011 = vmatprep.subr.bf16.mxu1 %v10580_v30  ;;  %v17475_v55 = vld [vmem:[#allocation279_spill] sm:$0xff]  ;;  %v17476_v30 = vld [vmem:[#allocation20_spill] sm:$0xff] }
 0x477   : > { %5309 = vmatmul.mubr.bf16.gmra.mrb[20].mxu0 %v2772_v11  ;;  %6721 = vmatmul.mubr.bf16.gmra.mrb[20].mxu1 %v2772_v11  ;;  %v2541_v29 = vadd.bf16 %v13656_v62, %v17474_v47  ;;  %v17477_v11 = vpack.c.bf16 %v17475_v55, %v17476_v30  ;;  %v17486_v47 = vpack.c.bf16 %v12545_v35, %v17485_v13  ;;  %v10593_v30 = vld [vmem:[#allocation2 + $0x7a0] ss:$16 sps:$4 sm:$0xff]   ;;  %v17489_v35 = vld [vmem:[#allocation289_spill] sm:$0xff] }
 0x478   : > { %5318 = vmatprep.mubr.bf16.mxu0 %v2781_v36  ;;  %6730 = vmatprep.mubr.bf16.mxu1 %v2781_v36  ;;  %v17478_v36 = vld [vmem:[#allocation285_spill] sm:$0xff] }
 0x479   : > { %5600 = vmatpush1.bf16.msra.mxu0 %v10575_v50  ;;  %7012 = vmatpush1.bf16.msra.mxu1 %v10578_v16  ;;  %v2797_v44 = vmax.bf16 %v16678_v52, %v2541_v29  ;;  %v2540_v50 = vadd.bf16 %v13674_v21, %v17477_v11  ;;  %v17479_v16 = vld [vmem:[#allocation39_spill] sm:$0xff]  ;;  %v2556_v29 = vadd.bf16 %v13674_v21, %v17486_v47  ;;  %v10595_v11 = vld [vmem:[#allocation2 + $0x7a4] ss:$16 sps:$4 sm:$0xff]  }
 0x47a   : > { %5601 = vmatprep.subr.bf16.mxu0 %v10583_v12  ;;  %7013 = vmatprep.subr.bf16.mxu1 %v10586_v38  ;;  %v17480_v39 = vpack.c.bf16 %v17478_v36, %v17479_v16  ;;  %v17481_v12 = vld [vmem:[#allocation283_spill] sm:$0xff]  ;;  %v17490_v16 = vld [vmem:[#allocation45_spill] sm:$0xff] }
 0x47b   : > { %v2796_v6 = vmax.bf16 %v16678_v52, %v2540_v50  ;;  %v10596_v50 = vld [vmem:[#allocation2 + $0x7a8] ss:$16 sps:$4 sm:$0xff]   ;;  %v10598_v36 = vld [vmem:[#allocation2 + $0x7ac] ss:$16 sps:$4 sm:$0xff]  }
 0x47c   : > { %v2549_v26 = vadd.bf16 %v13656_v62, %v17480_v39  ;;  %v17491_v39 = vpack.c.bf16 %v17489_v35, %v17490_v16  ;;  %v10602_v15 = vld [vmem:[#allocation2 + $0x7c8] ss:$16 sps:$4 sm:$0xff]   ;;  %v10607_v35 = vld [vmem:[#allocation2 + $0x7e4] ss:$16 sps:$4 sm:$0xff]  }
 0x47d   : > { %5602 = vmatpush1.bf16.msra.mxu0 %v10581_v53  ;;  %7014 = vmatpush1.bf16.msra.mxu1 %v10584_v18  ;;  %v10592_v53 = vld [vmem:[#allocation2 + $0x78c] ss:$16 sps:$4 sm:$0xff]   ;;  %v10608_v16 = vld [vmem:[#allocation2 + $0x7e8] ss:$16 sps:$4 sm:$0xff]  }
 0x47e   : > { %v2805_v17 = vmax.bf16 %v16678_v52, %v2549_v26  ;;  %v17482_v18 = vld [vmem:[#allocation29_spill] sm:$0xff]  ;;  %7015 = vmatprep.subr.bf16.mxu1 %v10592_v53  ;;  %v2564_v26 = vadd.bf16 %v13674_v21, %v17491_v39 }
 0x47f   : > { %5319 = vmatmul.mubr.bf16.gmra.mrb[24].mxu0 %v2780_v27  ;;  %6731 = vmatmul.mubr.bf16.gmra.mrb[24].mxu1 %v2780_v27  ;;  %v10589_v27 = vld [vmem:[#allocation2 + $0x784] ss:$16 sps:$4 sm:$0xff]   ;;  %v17483_v38 = vpack.c.bf16 %v17481_v12, %v17482_v18  ;;  %v2581_v12 = vadd.bf16 %v13656_v62, %v17496_v37  ;;  %v10610_v39 = vld [vmem:[#allocation2 + $0x7ec] ss:$16 sps:$4 sm:$0xff]  }
 0x480   : > { %5328 = vmatprep.mubr.bf16.mxu0 %v2789_v2  ;;  %6740 = vmatprep.mubr.bf16.mxu1 %v2789_v2  ;;  %v10590_v2 = vld [vmem:[#allocation2 + $0x788] ss:$16 sps:$4 sm:$0xff]  }
 0x481   : > { %v2548_v8 = vadd.bf16 %v13674_v21, %v17483_v38  ;;  %5603 = vmatprep.subr.bf16.mxu0 %v10589_v27  ;;  %7016 = vmatpush1.bf16.msra.mxu1 %v10590_v2  ;;  %v17493_v27 = vld [vmem:[#allocation53_spill] sm:$0xff]  ;;  %v2837_v38 = vmax.bf16 %v16678_v52, %v2581_v12 }
 0x482   : > { %5604 = vmatpush1.bf16.msra.mxu0 %v10587_v34  ;;  %7017 = vmatprep.subr.bf16.mxu1 %v10598_v36  ;;  %v17494_v2 = vpack.c.bf16 %v12613_v22, %v17493_v27  ;;  %v17497_v22 = vld [vmem:[#allocation296_spill] sm:$0xff]  ;;  %v17512_v37 = vld [vmem:[#allocation77_spill] sm:$0xff] }
 0x483   : > { %v2804_v23 = vmax.bf16 %v16678_v52, %v2548_v8  ;;  %5605 = vmatprep.subr.bf16.mxu0 %v10595_v11  ;;  %v10599_v8 = vld [vmem:[#allocation2 + $0x7c0] ss:$16 sps:$4 sm:$0xff]   ;;  %v17513_v12 = vpack.c.bf16 %v17511_v40, %v17512_v37 }
 0x484   : > { %v2572_v53 = vadd.bf16 %v13674_v21, %v17494_v2  ;;  %v10605_v36 = vld [vmem:[#allocation2 + $0x7e0] ss:$16 sps:$4 sm:$0xff]  }
 0x485   : > { %7018 = vmatpush1.bf16.msra.mxu1 %v10596_v50  ;;  %v17535_v40 = vld [vmem:[#allocation112_spill] sm:$0xff] }
 0x486   : > { %5606 = vmatpush1.bf16.msra.mxu0 %v10593_v30  ;;  %v2828_v18 = vmax.bf16 %v16678_v52, %v2572_v53 }
 0x487   : > { %5329 = vmatmul.mubr.bf16.gmra.mrb[28].mxu0 %v2788_v63  ;;  %6741 = vmatmul.mubr.bf16.gmra.mrb[28].mxu1 %v2788_v63  ;;  %v2565_v63 = vadd.bf16 %v13656_v62, %v17488_v3 }
 0x488   : > { %5338 = vmatprep.mubr.bf16.mxu0 %v2797_v44  ;;  %6750 = vmatprep.mubr.bf16.mxu1 %v2797_v44  ;;  %v2812_v44 = vmax.bf16 %v16678_v52, %v2556_v29  ;;  %v2589_v29 = vadd.bf16 %v13656_v62, %v17500_v10  ;;  %v17519_v10 = vld [vmem:[#allocation315_spill] sm:$0xff] }
 0x489   : > { %v2821_v55 = vmax.bf16 %v16678_v52, %v2565_v63  ;;  %5607 = vmatprep.subr.bf16.mxu0 %v10601_v4  ;;  %v17501_v63 = vpack.c.bf16 %v12681_v58, %v12669_v54  ;;  %v17505_v54 = vld [vmem:[#allocation303_spill] sm:$0xff]  ;;  %v17506_v58 = vld [vmem:[#allocation301_spill] sm:$0xff] }
 0x48a   : > { %5608 = vmatpush1.bf16.msra.mxu0 %v10599_v8  ;;  %v2845_v3 = vmax.bf16 %v16678_v52, %v2589_v29 }
 0x48b   : > { %5609 = vmatprep.subr.bf16.mxu0 %v10607_v35 }
 0x48e   : > { %5610 = vmatpush1.bf16.msra.mxu0 %v10605_v36  ;;  %v17526_v36 = vld [vmem:[#allocation98_spill] sm:$0xff] }
 0x48f   : > { %5339 = vmatmul.mubr.bf16.gmra.mrb[32].mxu0 %v2796_v6  ;;  %6751 = vmatmul.mubr.bf16.gmra.mrb[32].mxu1 %v2796_v6  ;;  %v2573_v6 = vadd.bf16 %v13656_v62, %v17492_v43 }
 0x490   : > { %5348 = vmatprep.mubr.bf16.mxu0 %v2805_v17  ;;  %6760 = vmatprep.mubr.bf16.mxu1 %v2805_v17  ;;  %v2820_v17 = vmax.bf16 %v16678_v52, %v2564_v26  ;;  %v17507_v26 = vpack.c.bf16 %v17505_v54, %v17506_v58 }
 0x491   : > { %v2829_v34 = vmax.bf16 %v16678_v52, %v2573_v6  ;;  %v17508_v6 = vld [vmem:[#allocation311_spill] sm:$0xff]  ;;  %8038 = vmatprep.subr.bf16.mxu0 %v16678_v52 }
 0x492   : > { %v2596_v43 = vadd.bf16 %v13674_v21, %v17507_v26  ;;  %v17530_v26 = vld [vmem:[#allocation325_spill] sm:$0xff] }
 0x494   : > { %v2852_v2 = vmax.bf16 %v16678_v52, %v2596_v43  ;;  %v17531_v43 = vld [vmem:[#allocation105_spill] sm:$0xff] }
 0x497   : > { %5349 = vmatmul.mubr.bf16.gmra.mrb[36].mxu0 %v2804_v23  ;;  %6761 = vmatmul.mubr.bf16.gmra.mrb[36].mxu1 %v2804_v23  ;;  %v10604_v23 = vld [vmem:[#allocation2 + $0x7cc] ss:$16 sps:$4 sm:$0xff]  }
 0x498   : > { %5358 = vmatprep.mubr.bf16.mxu0 %v2813_v28  ;;  %6770 = vmatprep.mubr.bf16.mxu1 %v2813_v28  ;;  %v17498_v28 = vld [vmem:[#allocation60_spill] sm:$0xff] }
 0x499   : > { %v17499_v13 = vpack.c.bf16 %v17497_v22, %v17498_v28  ;;  %7019 = vmatprep.subr.bf16.mxu1 %v10604_v23  ;;  %v17515_v23 = vld [vmem:[#allocation89_spill] sm:$0xff]  ;;  %v17516_v22 = vld [vmem:[#allocation84_spill] sm:$0xff] }
 0x49a   : > { %7020 = vmatpush1.bf16.msra.mxu1 %v10602_v15  ;;  %v17517_v28 = vpack.c.bf16 %v17515_v23, %v17516_v22 }
 0x49b   : > { %v2580_v47 = vadd.bf16 %v13674_v21, %v17499_v13  ;;  %7021 = vmatprep.subr.bf16.mxu1 %v10610_v39  ;;  %v17528_v39 = vld [vmem:[#allocation323_spill] sm:$0xff] }
 0x49c   : > { %v2612_v13 = vadd.bf16 %v13674_v21, %v17517_v28  ;;  %v17529_v54 = vpack.c.bf16 %v12892_v49, %v17528_v39  ;;  %v17542_v28 = vpack.c.bf16 %v12994_v48, %v12983_v56 }
 0x49d   : > { %v2836_v61 = vmax.bf16 %v16678_v52, %v2580_v47  ;;  %v17518_v47 = vld [vmem:[#allocation319_spill] sm:$0xff] }
 0x49e   : > { %7022 = vmatpush1.bf16.msra.mxu1 %v10608_v16  ;;  %v17520_v29 = vpack.c.bf16 %v17518_v47, %v17519_v10  ;;  %v17543_v10 = vld [vmem:[#allocation131_spill] sm:$0xff] }
 0x49f   : > { %5359 = vmatmul.mubr.bf16.gmra.mrb[40].mxu0 %v2812_v44  ;;  %6771 = vmatmul.mubr.bf16.gmra.mrb[40].mxu1 %v2812_v44  ;;  %v2588_v44 = vadd.bf16 %v13674_v21, %v17501_v63  ;;  %v17522_v63 = vld [vmem:[#allocation91_spill] sm:$0xff] }
 0x4a0   : > { %5368 = vmatprep.mubr.bf16.mxu0 %v2821_v55  ;;  %6780 = vmatprep.mubr.bf16.mxu1 %v2821_v55  ;;  %v17502_v55 = vld [vmem:[#allocation305_spill] sm:$0xff] }
 0x4a1   : > { %v17504_v60 = vpack.c.bf16 %v17502_v55, %v17503_v9  ;;  %v2844_v11 = vmax.bf16 %v16678_v52, %v2588_v44  ;;  %8327 = vmatprep.subr.bf16.mxu1 %v16678_v52  ;;  %v17524_v9 = vpack.c.bf16 %v12858_v41, %v12847_v46  ;;  %v2637_v46 = vadd.bf16 %v13656_v62, %v17529_v54 }
 0x4a3   : > { %v2597_v30 = vadd.bf16 %v13656_v62, %v17504_v60  ;;  %v2629_v60 = vadd.bf16 %v13656_v62, %v17524_v9  ;;  %v2893_v58 = vmax.bf16 %v16678_v52, %v2637_v46  ;;  %v17556_v46 = vld [vmem:[#allocation347_spill] sm:$0xff] }
 0x4a5   : > { %v2853_v50 = vmax.bf16 %v16678_v52, %v2597_v30 }
 0x4a7   : > { %5369 = vmatmul.mubr.bf16.gmra.mrb[44].mxu0 %v2820_v17  ;;  %6781 = vmatmul.mubr.bf16.gmra.mrb[44].mxu1 %v2820_v17  ;;  %v17509_v17 = vld [vmem:[#allocation307_spill] sm:$0xff] }
 0x4a8   : > { %5378 = vmatprep.mubr.bf16.mxu0 %v2829_v34  ;;  %6790 = vmatprep.mubr.bf16.mxu1 %v2829_v34  ;;  %v17510_v34 = vpack.c.bf16 %v17508_v6, %v17509_v17  ;;  %v17532_v6 = vpack.c.bf16 %v17530_v26, %v17531_v43  ;;  %v17559_v43 = vld [vmem:[#allocation157_spill] sm:$0xff] }
 0x4aa   : > { %v2605_v27 = vadd.bf16 %v13656_v62, %v17510_v34  ;;  %v2636_v17 = vadd.bf16 %v13674_v21, %v17532_v6  ;;  %v17533_v34 = vpack.c.bf16 %v12926_v5, %v12915_v25  ;;  %v17560_v6 = vpack.c.bf16 %v13130_v14, %v17559_v43  ;;  %v17592_v43 = vld [vmem:[#allocation233_spill] sm:$0xff] }
 0x4ac   : > { %v2861_v53 = vmax.bf16 %v16678_v52, %v2605_v27  ;;  %v2645_v49 = vadd.bf16 %v13656_v62, %v17533_v34  ;;  %v2892_v27 = vmax.bf16 %v16678_v52, %v2636_v17 }
 0x4af   : > { %5379 = vmatmul.mubr.bf16.gmra.mrb[48].mxu0 %v2828_v18  ;;  %6791 = vmatmul.mubr.bf16.gmra.mrb[48].mxu1 %v2828_v18  ;;  %v2604_v18 = vadd.bf16 %v13674_v21, %v17513_v12 }
 0x4b0   : > { %5388 = vmatprep.mubr.bf16.mxu0 %v2837_v38  ;;  %6800 = vmatprep.mubr.bf16.mxu1 %v2837_v38  ;;  %v17514_v38 = vpack.c.bf16 %v12790_v45, %v12779_v24  ;;  %v2621_v24 = vadd.bf16 %v13656_v62, %v17520_v29  ;;  %v2868_v45 = vmax.bf16 %v16678_v52, %v2612_v13  ;;  %v17544_v29 = vld [vmem:[#allocation126_spill] sm:$0xff] }
 0x4b1   : > { %v2860_v4 = vmax.bf16 %v16678_v52, %v2604_v18  ;;  %v17537_v18 = vld [vmem:[#allocation330_spill] sm:$0xff] }
 0x4b2   : > { %v2613_v8 = vadd.bf16 %v13656_v62, %v17514_v38  ;;  %v17538_v38 = vpack.c.bf16 %v12960_v32, %v17537_v18  ;;  %v2661_v32 = vadd.bf16 %v13656_v62, %v17542_v28  ;;  %v17571_v28 = vld [vmem:[#allocation359_spill] sm:$0xff] }
 0x4b4   : > { %v2869_v15 = vmax.bf16 %v16678_v52, %v2613_v8  ;;  %v2653_v25 = vadd.bf16 %v13656_v62, %v17538_v38  ;;  %v2917_v47 = vmax.bf16 %v16678_v52, %v2661_v32  ;;  %v17566_v38 = vld [vmem:[#allocation355_spill] sm:$0xff]  ;;  %v17572_v32 = vld [vmem:[#allocation166_spill] sm:$0xff] }
 0x4b6   : > { %v2909_v8 = vmax.bf16 %v16678_v52, %v2653_v25  ;;  %v17567_v25 = vld [vmem:[#allocation159_spill] sm:$0xff] }
 0x4b7   : > { %5389 = vmatmul.mubr.bf16.gmra.mrb[52].mxu0 %v2836_v61  ;;  %6801 = vmatmul.mubr.bf16.gmra.mrb[52].mxu1 %v2836_v61  ;;  %v2877_v61 = vmax.bf16 %v16678_v52, %v2621_v24  ;;  %v17545_v24 = vpack.c.bf16 %v17543_v10, %v17544_v29  ;;  %v17574_v10 = vld [vmem:[#allocation178_spill] sm:$0xff] }
 0x4b8   : > { %5398 = vmatprep.mubr.bf16.mxu0 %v2845_v3  ;;  %6810 = vmatprep.mubr.bf16.mxu1 %v2845_v3  ;;  %v17521_v3 = vld [vmem:[#allocation317_spill] sm:$0xff]  ;;  %v17575_v29 = vpack.c.bf16 %v13232_v59, %v17574_v10  ;;  %v17604_v10 = vld [vmem:[#allocation250_spill] sm:$0xff] }
 0x4b9   : > { %v17523_v44 = vpack.c.bf16 %v17521_v3, %v17522_v63  ;;  %v17547_v63 = vld [vmem:[#allocation338_spill] sm:$0xff]  ;;  %v17579_v59 = vld [vmem:[#allocation185_spill] sm:$0xff] }
 0x4bb   : > { %v2620_v55 = vadd.bf16 %v13674_v21, %v17523_v44  ;;  %v17548_v44 = vld [vmem:[#allocation133_spill] sm:$0xff] }
 0x4bd   : > { %v2876_v30 = vmax.bf16 %v16678_v52, %v2620_v55  ;;  %v17549_v55 = vpack.c.bf16 %v17547_v63, %v17548_v44 }
 0x4bf   : > { %5399 = vmatmul.mubr.bf16.gmra.mrb[56].mxu0 %v2844_v11  ;;  %6811 = vmatmul.mubr.bf16.gmra.mrb[56].mxu1 %v2844_v11  ;;  %v2885_v11 = vmax.bf16 %v16678_v52, %v2629_v60  ;;  %v2668_v9 = vadd.bf16 %v13674_v21, %v17549_v55  ;;  %v17550_v60 = vpack.c.bf16 %v13062_v51, %v13051_v42 }
 0x4c0   : > { %5408 = vmatprep.mubr.bf16.mxu0 %v2853_v50  ;;  %6820 = vmatprep.mubr.bf16.mxu1 %v2853_v50  ;;  %v17525_v50 = vld [vmem:[#allocation103_spill] sm:$0xff]  ;;  %v17580_v55 = vpack.c.bf16 %v13266_v1, %v17579_v59 }
 0x4c1   : > { %v17527_v35 = vpack.c.bf16 %v17525_v50, %v17526_v36  ;;  %v17552_v50 = vld [vmem:[#allocation341_spill] sm:$0xff] }
 0x4c3   : > { %v2628_v16 = vadd.bf16 %v13674_v21, %v17527_v35 }
 0x4c5   : > { %v2884_v41 = vmax.bf16 %v16678_v52, %v2628_v16  ;;  %v17554_v16 = vld [vmem:[#allocation345_spill] sm:$0xff] }
 0x4c6   : > { %v17555_v39 = vpack.c.bf16 %v13096_v20, %v17554_v16  ;;  %v2693_v20 = vadd.bf16 %v13656_v62, %v17560_v6  ;;  %v17586_v16 = vld [vmem:[#allocation224_spill] sm:$0xff] }
 0x4c7   : > { %5409 = vmatmul.mubr.bf16.gmra.mrb[60].mxu0 %v2852_v2  ;;  %6821 = vmatmul.mubr.bf16.gmra.mrb[60].mxu1 %v2852_v2  ;;  %v2901_v2 = vmax.bf16 %v16678_v52, %v2645_v49  ;;  %v17561_v49 = vld [vmem:[#allocation351_spill] sm:$0xff] }
 0x4c8   : > { %5418 = vmatprep.mubr.bf16.mxu0 %v2861_v53  ;;  %6830 = vmatprep.mubr.bf16.mxu1 %v2861_v53  ;;  %v17534_v53 = vld [vmem:[#allocation117_spill] sm:$0xff]  ;;  %v2685_v42 = vadd.bf16 %v13656_v62, %v17555_v39  ;;  %v2949_v34 = vmax.bf16 %v16678_v52, %v2693_v20 }
 0x4c9   : > { %v17536_v37 = vpack.c.bf16 %v17534_v53, %v17535_v40  ;;  %v17564_v40 = vld [vmem:[#allocation164_spill] sm:$0xff] }
 0x4ca   : > { %v2941_v54 = vmax.bf16 %v16678_v52, %v2685_v42 }
 0x4cb   : > { %v2644_v12 = vadd.bf16 %v13674_v21, %v17536_v37  ;;  %v17565_v37 = vpack.c.bf16 %v13164_v33, %v17564_v40 }
 0x4cd   : > { %v2900_v5 = vmax.bf16 %v16678_v52, %v2644_v12  ;;  %v2701_v14 = vadd.bf16 %v13656_v62, %v17565_v37 }
 0x4cf   : > { %5419 = vmatmul.mubr.bf16.gmra.mrb[64].mxu0 %v2860_v4  ;;  %6831 = vmatmul.mubr.bf16.gmra.mrb[64].mxu1 %v2860_v4  ;;  %v17539_v4 = vld [vmem:[#allocation332_spill] sm:$0xff]  ;;  %v2957_v18 = vmax.bf16 %v16678_v52, %v2701_v14  ;;  %v10613_v14 = vld [vmem:[%s16216_s5 + $0x8] sm:$0xff]  }
 0x4d0   : > { %5428 = vmatprep.mubr.bf16.mxu0 %v2869_v15  ;;  %6840 = vmatprep.mubr.bf16.mxu1 %v2869_v15  ;;  %v17540_v15 = vld [vmem:[#allocation119_spill] sm:$0xff] }
 0x4d1   : > { %v17541_v23 = vpack.c.bf16 %v17539_v4, %v17540_v15  ;;  %v17569_v4 = vld [vmem:[#allocation171_spill] sm:$0xff] }
 0x4d2   : > { %v17570_v15 = vpack.c.bf16 %v13198_v0, %v17569_v4  ;;  %v2717_v0 = vadd.bf16 %v13656_v62, %v17575_v29  ;;  %v10615_v4 = vld [vmem:[%s16216_s5 + $0x10] sm:$0xff]  }
 0x4d3   : > { %v2652_v22 = vadd.bf16 %v13674_v21, %v17541_v23 }
 0x4d4   : > { %v2709_v33 = vadd.bf16 %v13656_v62, %v17570_v15 }
 0x4d5   : > { %v2908_v13 = vmax.bf16 %v16678_v52, %v2652_v22 }
 0x4d6   : > { %v2965_v22 = vmax.bf16 %v16678_v52, %v2709_v33  ;;  %v10616_v33 = vld [vmem:[%s16216_s5 + $0x90] sm:$0xff]  }
 0x4d7   : > { %5429 = vmatmul.mubr.bf16.gmra.mrb[68].mxu0 %v2868_v45  ;;  %6841 = vmatmul.mubr.bf16.gmra.mrb[68].mxu1 %v2868_v45  ;;  %v2660_v45 = vadd.bf16 %v13674_v21, %v17545_v24 }
 0x4d8   : > { %5438 = vmatprep.mubr.bf16.mxu0 %v2877_v61  ;;  %6850 = vmatprep.mubr.bf16.mxu1 %v2877_v61  ;;  %v17546_v61 = vpack.c.bf16 %v13028_v7, %v13017_v19  ;;  %v2677_v19 = vadd.bf16 %v13656_v62, %v17550_v60  ;;  %v2924_v7 = vmax.bf16 %v16678_v52, %v2668_v9 }
 0x4d9   : > { %v2916_v48 = vmax.bf16 %v16678_v52, %v2660_v45  ;;  %v2415_v45 = vcombine.high %v13642_v57, %v13642_v57  ;;  %v2725_v9 = vadd.bf16 %v13656_v62, %v17580_v55  ;;  %v2413_v57 = vcombine.high %v13660_v31, %v13660_v31  ;;  %v10621_v55 = vld [vmem:[%s16216_s5 + $0x28] sm:$0xff]  }
 0x4da   : > { %v2669_v56 = vadd.bf16 %v13656_v62, %v17546_v61  ;;  %v2973_v61 = vmax.bf16 %v16678_v52, %v2717_v0  ;;  %v17585_v62 = vld [vmem:[#allocation228_spill] sm:$0xff] }
 0x4db   : > { %v2466_v44 = vpack.i.b16 %v2415_v45, %v2415_v45  ;;  %v17587_v31 = vpack.c.bf16 %v17585_v62, %v17586_v16  ;;  %v17612_v62 = vld [vmem:[#allocation258_spill] sm:$0xff]  ;;  %v17613_v16 = vld [vmem:[#allocation255_spill] sm:$0xff] }
 0x4dc   : > { %v2925_v3 = vmax.bf16 %v16678_v52, %v2669_v56  ;;  %v17576_v56 = vld [vmem:[#allocation363_spill] sm:$0xff] }
 0x4df   : > { %5439 = vmatmul.mubr.bf16.gmra.mrb[72].mxu0 %v2876_v30  ;;  %6851 = vmatmul.mubr.bf16.gmra.mrb[72].mxu1 %v2876_v30  ;;  %v2933_v30 = vmax.bf16 %v16678_v52, %v2677_v19  ;;  %v17581_v19 = vld [vmem:[#allocation246_spill] sm:$0xff] }
 0x4e0   : > { %5448 = vmatprep.mubr.bf16.mxu0 %v2885_v11  ;;  %6860 = vmatprep.mubr.bf16.mxu1 %v2885_v11  ;;  %v17551_v11 = vld [vmem:[#allocation342_spill] sm:$0xff] }
 0x4e1   : > { %v17553_v36 = vpack.c.bf16 %v17551_v11, %v17552_v50  ;;  %v2459_v11 = vpack.i.b16 %v2413_v57, %v2413_v57  ;;  %v17582_v50 = vld [vmem:[#allocation367_spill] sm:$0xff]  ;;  %v17610_v57 = vld [vmem:[#allocation256_spill] sm:$0xff] }
 0x4e3   : > { %v2676_v35 = vadd.bf16 %v13674_v21, %v17553_v36  ;;  %v17583_v36 = vld [vmem:[#allocation180_spill] sm:$0xff]  ;;  %v14005_v42 = vrot.slane %v2459_v11, %v17581_v19  ;;  %v10622_v11 = vld [vmem:[%s16216_s5 + $0xa8] sm:$0xff]  }
 0x4e5   : > { %v2932_v51 = vmax.bf16 %v16678_v52, %v2676_v35  ;;  %v17584_v35 = vpack.c.bf16 %v17582_v50, %v17583_v36  ;;  %v10623_v36 = vld [vmem:[%s16216_s5 + $0x30] sm:$0xff]  }
 0x4e7   : > { %5449 = vmatmul.mubr.bf16.gmra.mrb[76].mxu0 %v2884_v41  ;;  %6861 = vmatmul.mubr.bf16.gmra.mrb[76].mxu1 %v2884_v41  ;;  %v17557_v41 = vld [vmem:[#allocation145_spill] sm:$0xff]  ;;  %v2724_v1 = vadd.bf16 %v13674_v21, %v17584_v35 }
 0x4e8   : > { %5458 = vmatprep.mubr.bf16.mxu0 %v2893_v58  ;;  %6870 = vmatprep.mubr.bf16.mxu1 %v2893_v58  ;;  %v17558_v58 = vpack.c.bf16 %v17556_v46, %v17557_v41  ;;  %v17588_v46 = vld [vmem:[#allocation226_spill] sm:$0xff] }
 0x4e9   : > { %v17589_v41 = vld [vmem:[#allocation222_spill] sm:$0xff] }
 0x4ea   : > { %v2684_v26 = vadd.bf16 %v13674_v21, %v17558_v58  ;;  %v17590_v58 = vpack.c.bf16 %v17588_v46, %v17589_v41  ;;  %v17616_v46 = vld [vmem:[#allocation263_spill] sm:$0xff] }
 0x4ec   : > { %v2940_v17 = vmax.bf16 %v16678_v52, %v2684_v26  ;;  %v17591_v26 = vld [vmem:[#allocation237_spill] sm:$0xff] }
 0x4ed   : > { %v17593_v6 = vpack.c.bf16 %v17591_v26, %v17592_v43  ;;  %v10627_v43 = vld [vmem:[%s16216_s5 + $0x40] sm:$0xff]  }
 0x4ef   : > { %5459 = vmatmul.mubr.bf16.gmra.mrb[80].mxu0 %v2892_v27  ;;  %6871 = vmatmul.mubr.bf16.gmra.mrb[80].mxu1 %v2892_v27  ;;  %v17562_v27 = vld [vmem:[#allocation152_spill] sm:$0xff] }
 0x4f0   : > { %5468 = vmatprep.mubr.bf16.mxu0 %v2901_v2  ;;  %6880 = vmatprep.mubr.bf16.mxu1 %v2901_v2  ;;  %v17563_v2 = vpack.c.bf16 %v17561_v49, %v17562_v27  ;;  %v10612_v27 = vld [vmem:[%s16216_s5 + $0x80] sm:$0xff]  }
 0x4f2   : > { %v2692_v53 = vadd.bf16 %v13674_v21, %v17563_v2  ;;  %v17594_v2 = vld [vmem:[#allocation235_spill] sm:$0xff] }
 0x4f4   : > { %v2948_v12 = vmax.bf16 %v16678_v52, %v2692_v53  ;;  %v17595_v53 = vld [vmem:[#allocation230_spill] sm:$0xff] }
 0x4f5   : > { %v17596_v40 = vpack.c.bf16 %v17594_v2, %v17595_v53  ;;  %v10629_v2 = vld [vmem:[%s16216_s5 + $0x48] sm:$0xff]   ;;  %v17621_v53 = vld [vmem:[#allocation271_spill] sm:$0xff] }
 0x4f7   : > { %5469 = vmatmul.mubr.bf16.gmra.mrb[84].mxu0 %v2900_v5  ;;  %6881 = vmatmul.mubr.bf16.gmra.mrb[84].mxu1 %v2900_v5  ;;  %v17568_v5 = vpack.c.bf16 %v17566_v38, %v17567_v25  ;;  %v2486_v37 = vadd.bf16 %v14005_v42, %v17596_v40  ;;  %v17622_v40 = vld [vmem:[#allocation269_spill] sm:$0xff] }
 0x4f8   : > { %5478 = vmatprep.mubr.bf16.mxu0 %v2909_v8  ;;  %6890 = vmatprep.mubr.bf16.mxu1 %v2909_v8 }
 0x4f9   : > { %v2700_v8 = vadd.bf16 %v13674_v21, %v17568_v5  ;;  %v10614_v5 = vld [vmem:[%s16216_s5 + $0x88] sm:$0xff]  }
 0x4fb   : > { %v2956_v23 = vmax.bf16 %v16678_v52, %v2700_v8  ;;  %v2742_v8 = vmax.bf16 %v16678_v52, %v2486_v37  ;;  %v17623_v37 = vpack.c.bf16 %v17621_v53, %v17622_v40 }
 0x4ff   : > { %5479 = vmatmul.mubr.bf16.gmra.mrb[88].mxu0 %v2908_v13  ;;  %6891 = vmatmul.mubr.bf16.gmra.mrb[88].mxu1 %v2908_v13  ;;  %v17573_v13 = vpack.c.bf16 %v17571_v28, %v17572_v32 }
 0x500   : > { %5488 = vmatprep.mubr.bf16.mxu0 %v2917_v47  ;;  %6900 = vmatprep.mubr.bf16.mxu1 %v2917_v47 }
 0x501   : > { %v2708_v47 = vadd.bf16 %v13674_v21, %v17573_v13  ;;  %v10617_v13 = vld [vmem:[%s16216_s5 + $0x18] sm:$0xff]  }
 0x503   : > { %v2964_v24 = vmax.bf16 %v16678_v52, %v2708_v47  ;;  %v17603_v47 = vld [vmem:[#allocation253_spill] sm:$0xff] }
 0x504   : > { %v17605_v29 = vpack.c.bf16 %v17603_v47, %v17604_v10  ;;  %v17630_v10 = vld [vmem:[#allocation276_spill] sm:$0xff] }
 0x507   : > { %5489 = vmatmul.mubr.bf16.gmra.mrb[92].mxu0 %v2916_v48  ;;  %6901 = vmatmul.mubr.bf16.gmra.mrb[92].mxu1 %v2916_v48  ;;  %v17577_v48 = vld [vmem:[#allocation173_spill] sm:$0xff] }
 0x508   : > { %5498 = vmatprep.mubr.bf16.mxu0 %v2925_v3  ;;  %6910 = vmatprep.mubr.bf16.mxu1 %v2925_v3  ;;  %v17578_v3 = vpack.c.bf16 %v17576_v56, %v17577_v48  ;;  %v10620_v48 = vld [vmem:[%s16216_s5 + $0xa0] sm:$0xff]  }
 0x50a   : > { %v2716_v63 = vadd.bf16 %v13674_v21, %v17578_v3  ;;  %v2478_v21 = vadd.bf16 %v14005_v42, %v17590_v58  ;;  %v17606_v3 = vld [vmem:[#allocation252_spill] sm:$0xff] }
 0x50c   : > { %v2972_v60 = vmax.bf16 %v16678_v52, %v2716_v63  ;;  %v17607_v63 = vld [vmem:[#allocation248_spill] sm:$0xff] }
 0x50f   : > { %5499 = vmatmul.mubr.bf16.gmra.mrb[96].mxu0 %v2924_v7  ;;  %6911 = vmatmul.mubr.bf16.gmra.mrb[96].mxu1 %v2924_v7  ;;  %v13993_v7 = vrot.slane %v2466_v44, %v17581_v19  ;;  %v17608_v44 = vpack.c.bf16 %v17606_v3, %v17607_v63 }
 0x510   : > { %5508 = vmatprep.mubr.bf16.mxu0 %v2933_v30  ;;  %6920 = vmatprep.mubr.bf16.mxu1 %v2933_v30  ;;  %v2981_v30 = vmax.bf16 %v16678_v52, %v2725_v9  ;;  %v17609_v9 = vld [vmem:[#allocation259_spill] sm:$0xff] }
 0x511   : > { %v2479_v39 = vadd.bf16 %v13993_v7, %v17587_v31  ;;  %v2487_v20 = vadd.bf16 %v13993_v7, %v17593_v6  ;;  %v2503_v0 = vadd.bf16 %v13993_v7, %v17605_v29  ;;  %v2502_v59 = vadd.bf16 %v14005_v42, %v17608_v44  ;;  %v17631_v29 = vld [vmem:[#allocation273_spill] sm:$0xff] }
 0x512   : > { %v17614_v31 = vpack.c.bf16 %v17612_v62, %v17613_v16  ;;  %v17642_v62 = vld [vmem:[#allocation284_spill] sm:$0xff]  ;;  %v17643_v16 = vld [vmem:[#allocation25_spill] sm:$0xff] }
 0x513   : > { %v2743_v49 = vmax.bf16 %v16678_v52, %v2487_v20  ;;  %v2759_v56 = vmax.bf16 %v16678_v52, %v2503_v0  ;;  %v2758_v50 = vmax.bf16 %v16678_v52, %v2502_v59  ;;  %v10628_v20 = vld [vmem:[%s16216_s5 + $0xc0] sm:$0xff]   ;;  %v17632_v0 = vpack.c.bf16 %v17630_v10, %v17631_v29  ;;  %v17663_v10 = vld [vmem:[#allocation298_spill] sm:$0xff]  ;;  %v17664_v29 = vld [vmem:[#allocation295_spill] sm:$0xff] }
 0x517   : > { %5509 = vmatmul.mubr.bf16.gmra.mrb[100].mxu0 %v2932_v51  ;;  %6921 = vmatmul.mubr.bf16.gmra.mrb[100].mxu1 %v2932_v51  ;;  %v2980_v51 = vmax.bf16 %v16678_v52, %v2724_v1  ;;  %v10624_v1 = vld [vmem:[%s16216_s5 + $0xb0] sm:$0xff]  }
 0x518   : > { %5518 = vmatprep.mubr.bf16.mxu0 %v2941_v54  ;;  %6930 = vmatprep.mubr.bf16.mxu1 %v2941_v54  ;;  %v2735_v54 = vmax.bf16 %v16678_v52, %v2479_v39  ;;  %v2510_v39 = vadd.bf16 %v14005_v42, %v17614_v31  ;;  %v17644_v31 = vpack.c.bf16 %v17642_v62, %v17643_v16  ;;  %v17675_v62 = vld [vmem:[#allocation306_spill] sm:$0xff] }
 0x519   : > { %v17676_v16 = vld [vmem:[#allocation302_spill] sm:$0xff] }
 0x51a   : > { %v2766_v26 = vmax.bf16 %v16678_v52, %v2510_v39  ;;  %v2550_v39 = vadd.bf16 %v14005_v42, %v17644_v31  ;;  %v17677_v31 = vpack.c.bf16 %v17675_v62, %v17676_v16 }
 0x51f   : > { %5519 = vmatmul.mubr.bf16.gmra.mrb[104].mxu0 %v2940_v17  ;;  %6931 = vmatmul.mubr.bf16.gmra.mrb[104].mxu1 %v2940_v17  ;;  %v2734_v17 = vmax.bf16 %v16678_v52, %v2478_v21  ;;  %v10626_v21 = vld [vmem:[%s16216_s5 + $0xb8] sm:$0xff]  }
 0x520   : > { %5528 = vmatprep.mubr.bf16.mxu0 %v2949_v34  ;;  %6940 = vmatprep.mubr.bf16.mxu1 %v2949_v34  ;;  %v10611_v34 = vld [vmem:[%s16216_s5] sm:$0xff]  }
 0x527   : > { %5529 = vmatmul.mubr.bf16.gmra.mrb[108].mxu0 %v2948_v12  ;;  %6941 = vmatmul.mubr.bf16.gmra.mrb[108].mxu1 %v2948_v12  ;;  %v17597_v12 = vld [vmem:[#allocation245_spill] sm:$0xff] }
 0x528   : > { %5538 = vmatprep.mubr.bf16.mxu0 %v2957_v18  ;;  %6950 = vmatprep.mubr.bf16.mxu1 %v2957_v18  ;;  %v17598_v18 = vld [vmem:[#allocation241_spill] sm:$0xff] }
 0x529   : > { %v17599_v38 = vpack.c.bf16 %v17597_v12, %v17598_v18  ;;  %v10630_v12 = vld [vmem:[%s16216_s5 + $0xc8] sm:$0xff]  }
 0x52b   : > { %v2495_v25 = vadd.bf16 %v13993_v7, %v17599_v38  ;;  %v10631_v38 = vld [vmem:[%s16216_s5 + $0x50] sm:$0xff]  }
 0x52d   : > { %v2751_v15 = vmax.bf16 %v16678_v52, %v2495_v25 }
 0x52f   : > { %5539 = vmatmul.mubr.bf16.gmra.mrb[112].mxu0 %v2956_v23  ;;  %6951 = vmatmul.mubr.bf16.gmra.mrb[112].mxu1 %v2956_v23  ;;  %v17600_v23 = vld [vmem:[#allocation243_spill] sm:$0xff] }
 0x530   : > { %5548 = vmatprep.mubr.bf16.mxu0 %v2965_v22  ;;  %6960 = vmatprep.mubr.bf16.mxu1 %v2965_v22  ;;  %v17601_v22 = vld [vmem:[#allocation239_spill] sm:$0xff] }
 0x531   : > { %v17602_v28 = vpack.c.bf16 %v17600_v23, %v17601_v22  ;;  %v17627_v23 = vld [vmem:[#allocation277_spill] sm:$0xff]  ;;  %v17628_v22 = vld [vmem:[#allocation274_spill] sm:$0xff] }
 0x533   : > { %v2494_v32 = vadd.bf16 %v14005_v42, %v17602_v28  ;;  %v17629_v28 = vpack.c.bf16 %v17627_v23, %v17628_v22 }
 0x535   : > { %v2750_v45 = vmax.bf16 %v16678_v52, %v2494_v32  ;;  %v2535_v32 = vadd.bf16 %v13993_v7, %v17629_v28  ;;  %v17660_v28 = vld [vmem:[#allocation292_spill] sm:$0xff] }
 0x537   : > { %5549 = vmatmul.mubr.bf16.gmra.mrb[116].mxu0 %v2964_v24  ;;  %6961 = vmatmul.mubr.bf16.gmra.mrb[116].mxu1 %v2964_v24  ;;  %v10618_v24 = vld [vmem:[%s16216_s5 + $0x98] sm:$0xff]   ;;  %v2791_v47 = vmax.bf16 %v16678_v52, %v2535_v32  ;;  %v17661_v32 = vld [vmem:[#allocation49_spill] sm:$0xff] }
 0x538   : > { %5558 = vmatprep.mubr.bf16.mxu0 %v2973_v61  ;;  %6970 = vmatprep.mubr.bf16.mxu1 %v2973_v61  ;;  %v10619_v61 = vld [vmem:[%s16216_s5 + $0x20] sm:$0xff]  }
 0x53f   : > { %5559 = vmatmul.mubr.bf16.gmra.mrb[120].mxu0 %v2972_v60  ;;  %6971 = vmatmul.mubr.bf16.gmra.mrb[120].mxu1 %v2972_v60  ;;  %v17611_v60 = vpack.c.bf16 %v17609_v9, %v17610_v57  ;;  %v17637_v9 = vld [vmem:[#allocation31_spill] sm:$0xff] }
 0x540   : > { %5568 = vmatprep.mubr.bf16.mxu0 %v2981_v30  ;;  %6980 = vmatprep.mubr.bf16.mxu1 %v2981_v30 }
 0x541   : > { %v2511_v30 = vadd.bf16 %v13993_v7, %v17611_v60 }
 0x543   : > { %v2767_v35 = vmax.bf16 %v16678_v52, %v2511_v30  ;;  %v17639_v30 = vld [vmem:[#allocation286_spill] sm:$0xff] }
 0x547   : > { %5569 = vmatmul.mubr.bf16.gmra.mrb[124].mxu0 %v2980_v51  ;;  %6981 = vmatmul.mubr.bf16.gmra.mrb[124].mxu1 %v2980_v51  ;;  %v10625_v51 = vld [vmem:[%s16216_s5 + $0x38] sm:$0xff]  }
 0x548   : > { %5611 = vmatprep.mubr.bf16.mxu0 %v2735_v54  ;;  %7023 = vmatprep.mubr.bf16.mxu1 %v2735_v54  ;;  %v17615_v54 = vld [vmem:[#allocation266_spill] sm:$0xff] }
 0x549   : > { %v17617_v41 = vpack.c.bf16 %v17615_v54, %v17616_v46  ;;  %v10636_v54 = vld [vmem:[%s16216_s5 + $0xe0] sm:$0xff]   ;;  %v17645_v46 = vld [vmem:[#allocation287_spill] sm:$0xff] }
 0x54b   : > { %v2519_v58 = vadd.bf16 %v13993_v7, %v17617_v41  ;;  %v17646_v41 = vld [vmem:[#allocation47_spill] sm:$0xff] }
 0x54d   : > { %v2775_v6 = vmax.bf16 %v16678_v52, %v2519_v58  ;;  %v17647_v58 = vpack.c.bf16 %v17645_v46, %v17646_v41  ;;  %v17678_v46 = vld [vmem:[#allocation304_spill] sm:$0xff]  ;;  %v17679_v41 = vld [vmem:[#allocation79_spill] sm:$0xff] }
 0x54f   : > { %5612 = vmatmul.mubr.bf16.vlgmr.msra.gmra.mrb[0].mxu0 %v2734_v17  ;;  %7024 = vmatmul.mubr.bf16.vlgmr.msra.gmra.mrb[0].mxu1 %v2734_v17  ;;  %v17618_v17 = vld [vmem:[#allocation265_spill] sm:$0xff] }
 0x550   : > { %5621 = vmatprep.mubr.bf16.mxu0 %v2743_v49  ;;  %7033 = vmatprep.mubr.bf16.mxu1 %v2743_v49 }
 0x551   : > { %8039 = vmatpush1.bf16.msra.mxu0 %v10611_v34  ;;  %8328 = vmatpush1.bf16.msra.mxu1 %v10612_v27  ;;  %v17619_v34 = vld [vmem:[#allocation261_spill] sm:$0xff] }
 0x552   : > { %8040 = vmatprep.subr.bf16.mxu0 %v16678_v52  ;;  %8329 = vmatprep.subr.bf16.mxu1 %v16678_v52  ;;  %v17620_v49 = vpack.c.bf16 %v17618_v17, %v17619_v34 }
 0x554   : > { %v2518_v27 = vadd.bf16 %v14005_v42, %v17620_v49  ;;  %v17651_v49 = vld [vmem:[#allocation291_spill] sm:$0xff] }
 0x555   : > { %8041 = vmatpush1.bf16.msra.mxu0 %v10613_v14  ;;  %8330 = vmatpush1.bf16.msra.mxu1 %v10614_v5  ;;  %v2527_v14 = vadd.bf16 %v13993_v7, %v17623_v37  ;;  %v10632_v5 = vld [vmem:[%s16216_s5 + $0xd0] sm:$0xff]  }
 0x556   : > { %8042 = vmatprep.subr.bf16.mxu0 %v16678_v52  ;;  %8331 = vmatprep.subr.bf16.mxu1 %v16678_v52  ;;  %v2774_v18 = vmax.bf16 %v16678_v52, %v2518_v27  ;;  %v17652_v27 = vld [vmem:[#allocation288_spill] sm:$0xff] }
 0x557   : > { %5622 = vmatmul.mubr.bf16.gmra.mrb[4].mxu0 %v2742_v8  ;;  %7034 = vmatmul.mubr.bf16.gmra.mrb[4].mxu1 %v2742_v8  ;;  %v2783_v25 = vmax.bf16 %v16678_v52, %v2527_v14  ;;  %v17624_v8 = vld [vmem:[#allocation270_spill] sm:$0xff] }
 0x558   : > { %5631 = vmatprep.mubr.bf16.mxu0 %v2751_v15  ;;  %7043 = vmatprep.mubr.bf16.mxu1 %v2751_v15  ;;  %v17654_v14 = vld [vmem:[#allocation290_spill] sm:$0xff] }
 0x559   : > { %8043 = vmatpush1.bf16.msra.mxu0 %v10615_v4  ;;  %8332 = vmatpush1.bf16.msra.mxu1 %v10616_v33  ;;  %v17625_v4 = vld [vmem:[#allocation268_spill] sm:$0xff] }
 0x55a   : > { %8044 = vmatprep.subr.bf16.mxu0 %v16678_v52  ;;  %8333 = vmatprep.subr.bf16.mxu1 %v16678_v52  ;;  %v17626_v15 = vpack.c.bf16 %v17624_v8, %v17625_v4  ;;  %v17657_v8 = vld [vmem:[#allocation293_spill] sm:$0xff]  ;;  %v17658_v4 = vld [vmem:[#allocation58_spill] sm:$0xff] }
 0x55c   : > { %v2526_v33 = vadd.bf16 %v14005_v42, %v17626_v15  ;;  %v17659_v15 = vpack.c.bf16 %v17657_v8, %v17658_v4  ;;  %v17690_v8 = vld [vmem:[#allocation313_spill] sm:$0xff] }
 0x55d   : > { %8045 = vmatpush1.bf16.msra.mxu0 %v10617_v13  ;;  %8334 = vmatpush1.bf16.msra.mxu1 %v10618_v24  ;;  %v2534_v24 = vadd.bf16 %v14005_v42, %v17632_v0  ;;  %v17665_v0 = vpack.c.bf16 %v17663_v10, %v17664_v29  ;;  %v17691_v4 = vld [vmem:[#allocation81_spill] sm:$0xff]  ;;  %v17696_v10 = vld [vmem:[#allocation318_spill] sm:$0xff]  ;;  %v17697_v29 = vld [vmem:[#allocation87_spill] sm:$0xff] }
 0x55e   : > { %8046 = vmatprep.subr.bf16.mxu0 %v16678_v52  ;;  %8335 = vmatprep.subr.bf16.mxu1 %v16678_v52  ;;  %v2782_v13 = vmax.bf16 %v16678_v52, %v2526_v33  ;;  %v2575_v33 = vadd.bf16 %v13993_v7, %v17659_v15  ;;  %v17692_v15 = vpack.c.bf16 %v17690_v8, %v17691_v4  ;;  %v17726_v8 = vld [vmem:[#allocation335_spill] sm:$0xff] }
 0x55f   : > { %5632 = vmatmul.mubr.bf16.gmra.mrb[8].mxu0 %v2750_v45  ;;  %7044 = vmatmul.mubr.bf16.gmra.mrb[8].mxu1 %v2750_v45  ;;  %v10633_v45 = vld [vmem:[%s16216_s5 + $0x58] sm:$0xff]   ;;  %v2790_v44 = vmax.bf16 %v16678_v52, %v2534_v24  ;;  %v2583_v24 = vadd.bf16 %v13993_v7, %v17665_v0  ;;  %v17698_v0 = vpack.c.bf16 %v17696_v10, %v17697_v29  ;;  %v17733_v29 = vld [vmem:[#allocation129_spill] sm:$0xff] }
 0x560   : > { %5641 = vmatprep.mubr.bf16.mxu0 %v2759_v56  ;;  %7053 = vmatprep.mubr.bf16.mxu1 %v2759_v56  ;;  %v17633_v56 = vld [vmem:[#allocation282_spill] sm:$0xff]  ;;  %v2831_v22 = vmax.bf16 %v16678_v52, %v2575_v33  ;;  %v2614_v33 = vadd.bf16 %v14005_v42, %v17692_v15  ;;  %v17727_v4 = vld [vmem:[#allocation123_spill] sm:$0xff] }
 0x561   : > { %8047 = vmatpush1.bf16.msra.mxu0 %v10619_v61  ;;  %8336 = vmatpush1.bf16.msra.mxu1 %v10620_v48  ;;  %v10634_v61 = vld [vmem:[%s16216_s5 + $0xd8] sm:$0xff]   ;;  %v17634_v48 = vld [vmem:[#allocation278_spill] sm:$0xff]  ;;  %v17728_v15 = vpack.c.bf16 %v17726_v8, %v17727_v4 }
 0x562   : > { %8048 = vmatprep.subr.bf16.mxu0 %v16678_v52  ;;  %8337 = vmatprep.subr.bf16.mxu1 %v16678_v52  ;;  %v17635_v3 = vpack.c.bf16 %v17633_v56, %v17634_v48  ;;  %v17666_v56 = vld [vmem:[#allocation297_spill] sm:$0xff]  ;;  %v17667_v48 = vld [vmem:[#allocation56_spill] sm:$0xff]  ;;  %v17732_v10 = vld [vmem:[#allocation339_spill] sm:$0xff] }
 0x564   : > { %v2543_v63 = vadd.bf16 %v13993_v7, %v17635_v3  ;;  %v17668_v3 = vpack.c.bf16 %v17666_v56, %v17667_v48 }
 0x565   : > { %8049 = vmatpush1.bf16.msra.mxu0 %v10621_v55  ;;  %8338 = vmatpush1.bf16.msra.mxu1 %v10622_v11  ;;  %v17636_v55 = vld [vmem:[#allocation280_spill] sm:$0xff]  ;;  %v17640_v11 = vld [vmem:[#allocation35_spill] sm:$0xff] }
 0x566   : > { %8050 = vmatprep.subr.bf16.mxu0 %v16678_v52  ;;  %8339 = vmatprep.subr.bf16.mxu1 %v16678_v52  ;;  %v2799_v59 = vmax.bf16 %v16678_v52, %v2543_v63  ;;  %v17638_v57 = vpack.c.bf16 %v17636_v55, %v17637_v9  ;;  %v2582_v63 = vadd.bf16 %v14005_v42, %v17668_v3 }
 0x567   : > { %5642 = vmatmul.mubr.bf16.gmra.mrb[12].mxu0 %v2758_v50  ;;  %7054 = vmatmul.mubr.bf16.gmra.mrb[12].mxu1 %v2758_v50  ;;  %v17641_v50 = vpack.c.bf16 %v17639_v30, %v17640_v11 }
 0x568   : > { %5651 = vmatprep.mubr.bf16.mxu0 %v2767_v35  ;;  %7063 = vmatprep.mubr.bf16.mxu1 %v2767_v35  ;;  %v2542_v60 = vadd.bf16 %v14005_v42, %v17638_v57  ;;  %v10639_v57 = vld [vmem:[%s16216_s5 + $0x70] sm:$0xff]   ;;  %v2838_v30 = vmax.bf16 %v16678_v52, %v2582_v63 }
 0x569   : > { %8051 = vmatpush1.bf16.msra.mxu0 %v10623_v36  ;;  %8340 = vmatpush1.bf16.msra.mxu1 %v10624_v1  ;;  %v2551_v36 = vadd.bf16 %v13993_v7, %v17641_v50  ;;  %v17672_v50 = vld [vmem:[#allocation299_spill] sm:$0xff] }
 0x56a   : > { %8052 = vmatprep.subr.bf16.mxu0 %v16678_v52  ;;  %8341 = vmatprep.subr.bf16.mxu1 %v16678_v52  ;;  %v2798_v35 = vmax.bf16 %v16678_v52, %v2542_v60  ;;  %v10640_v60 = vld [vmem:[%s16216_s5 + $0xf0] sm:$0xff]  }
 0x56b   : > { %v2807_v1 = vmax.bf16 %v16678_v52, %v2551_v36  ;;  %v17673_v36 = vld [vmem:[#allocation66_spill] sm:$0xff] }
 0x56d   : > { %8053 = vmatpush1.bf16.msra.mxu0 %v10625_v51  ;;  %8342 = vmatpush1.bf16.msra.mxu1 %v10626_v21  ;;  %v10635_v51 = vld [vmem:[%s16216_s5 + $0x60] sm:$0xff]   ;;  %v2559_v21 = vadd.bf16 %v13993_v7, %v17647_v58  ;;  %v17680_v58 = vpack.c.bf16 %v17678_v46, %v17679_v41 }
 0x56e   : > { %8054 = vmatprep.subr.bf16.mxu0 %v16678_v52  ;;  %8343 = vmatprep.subr.bf16.mxu1 %v16678_v52 }
 0x56f   : > { %5652 = vmatmul.mubr.bf16.gmra.mrb[16].mxu0 %v2766_v26  ;;  %7064 = vmatmul.mubr.bf16.gmra.mrb[16].mxu1 %v2766_v26  ;;  %v2806_v26 = vmax.bf16 %v16678_v52, %v2550_v39  ;;  %v2599_v39 = vadd.bf16 %v13993_v7, %v17677_v31  ;;  %v17711_v31 = vld [vmem:[#allocation329_spill] sm:$0xff] }
 0x570   : > { %5661 = vmatprep.mubr.bf16.mxu0 %v2775_v6  ;;  %7073 = vmatprep.mubr.bf16.mxu1 %v2775_v6  ;;  %v17648_v6 = vld [vmem:[#allocation43_spill] sm:$0xff] }
 0x571   : > { %8055 = vmatpush1.bf16.msra.mxu0 %v10627_v43  ;;  %8344 = vmatpush1.bf16.msra.mxu1 %v10628_v20  ;;  %v2815_v43 = vmax.bf16 %v16678_v52, %v2559_v21  ;;  %v17649_v20 = vld [vmem:[#allocation33_spill] sm:$0xff]  ;;  %v2598_v21 = vadd.bf16 %v14005_v42, %v17680_v58  ;;  %v17714_v58 = vld [vmem:[#allocation328_spill] sm:$0xff] }
 0x572   : > { %8056 = vmatprep.subr.bf16.mxu0 %v16678_v52  ;;  %8345 = vmatprep.subr.bf16.mxu1 %v16678_v52  ;;  %v17650_v17 = vpack.c.bf16 %v17648_v6, %v17649_v20 }
 0x574   : > { %v2558_v34 = vadd.bf16 %v14005_v42, %v17650_v17  ;;  %v10641_v17 = vld [vmem:[%s16216_s5 + $0x78] sm:$0xff]  }
 0x575   : > { %8057 = vmatpush1.bf16.msra.mxu0 %v10629_v2  ;;  %8346 = vmatpush1.bf16.msra.mxu1 %v10630_v12  ;;  %v17653_v2 = vpack.c.bf16 %v17651_v49, %v17652_v27  ;;  %v17655_v12 = vld [vmem:[#allocation41_spill] sm:$0xff]  ;;  %v2854_v49 = vmax.bf16 %v16678_v52, %v2598_v21 }
 0x576   : > { %8058 = vmatprep.subr.bf16.mxu0 %v16678_v52  ;;  %8347 = vmatprep.subr.bf16.mxu1 %v16678_v52  ;;  %v2814_v40 = vmax.bf16 %v16678_v52, %v2558_v34  ;;  %v10642_v34 = vld [vmem:[%s16216_s5 + $0xf8] sm:$0xff]   ;;  %v17715_v21 = vld [vmem:[#allocation109_spill] sm:$0xff] }
 0x577   : > { %5662 = vmatmul.mubr.bf16.gmra.mrb[20].mxu0 %v2774_v18  ;;  %7074 = vmatmul.mubr.bf16.gmra.mrb[20].mxu1 %v2774_v18  ;;  %v2567_v53 = vadd.bf16 %v13993_v7, %v17653_v2  ;;  %v17656_v18 = vpack.c.bf16 %v17654_v14, %v17655_v12  ;;  %v17684_v2 = vld [vmem:[#allocation310_spill] sm:$0xff]  ;;  %v17688_v12 = vld [vmem:[#allocation93_spill] sm:$0xff] }
 0x578   : > { %5671 = vmatprep.mubr.bf16.mxu0 %v2783_v25  ;;  %7083 = vmatprep.mubr.bf16.mxu1 %v2783_v25  ;;  %v10637_v25 = vld [vmem:[%s16216_s5 + $0x68] sm:$0xff]   ;;  %v17687_v14 = vld [vmem:[#allocation314_spill] sm:$0xff] }
 0x579   : > { %8059 = vmatpush1.bf16.msra.mxu0 %v10631_v38  ;;  %8348 = vmatpush1.bf16.msra.mxu1 %v10632_v5  ;;  %v2823_v37 = vmax.bf16 %v16678_v52, %v2567_v53  ;;  %v2566_v38 = vadd.bf16 %v14005_v42, %v17656_v18  ;;  %v10638_v5 = vld [vmem:[%s16216_s5 + $0xe8] sm:$0xff]   ;;  %v17689_v18 = vpack.c.bf16 %v17687_v14, %v17688_v12  ;;  %v17723_v14 = vld [vmem:[#allocation336_spill] sm:$0xff]  ;;  %v17724_v12 = vld [vmem:[#allocation135_spill] sm:$0xff] }
 0x57a   : > { %8060 = vmatprep.subr.bf16.mxu0 %v16678_v52  ;;  %8349 = vmatprep.subr.bf16.mxu1 %v16678_v52  ;;  %v17685_v53 = vld [vmem:[#allocation73_spill] sm:$0xff] }
 0x57b   : > { %v2822_v23 = vmax.bf16 %v16678_v52, %v2566_v38  ;;  %v2615_v38 = vadd.bf16 %v13993_v7, %v17689_v18  ;;  %v17725_v18 = vpack.c.bf16 %v17723_v14, %v17724_v12 }
 0x57d   : > { %8061 = vmatpush1.bf16.msra.mxu0 %v10633_v45  ;;  %8350 = vmatpush1.bf16.msra.mxu1 %v10634_v61  ;;  %v2839_v61 = vmax.bf16 %v16678_v52, %v2583_v24  ;;  %v2622_v24 = vadd.bf16 %v14005_v42, %v17698_v0  ;;  %v17734_v0 = vpack.c.bf16 %v17732_v10, %v17733_v29 }
 0x57e   : > { %8062 = vmatprep.subr.bf16.mxu0 %v16678_v52  ;;  %8351 = vmatprep.subr.bf16.mxu1 %v16678_v52 }
 0x57f   : > { %5672 = vmatmul.mubr.bf16.gmra.mrb[24].mxu0 %v2782_v13  ;;  %7084 = vmatmul.mubr.bf16.gmra.mrb[24].mxu1 %v2782_v13  ;;  %v17662_v13 = vpack.c.bf16 %v17660_v28, %v17661_v32  ;;  %v2878_v3 = vmax.bf16 %v16678_v52, %v2622_v24  ;;  %v2670_v24 = vadd.bf16 %v14005_v42, %v17734_v0 }
 0x580   : > { %5681 = vmatprep.mubr.bf16.mxu0 %v2791_v47  ;;  %7093 = vmatprep.mubr.bf16.mxu1 %v2791_v47 }
 0x581   : > { %8063 = vmatpush1.bf16.msra.mxu0 %v10635_v51  ;;  %8352 = vmatpush1.bf16.msra.mxu1 %v10636_v54  ;;  %v2574_v47 = vadd.bf16 %v14005_v42, %v17662_v13  ;;  %v2855_v54 = vmax.bf16 %v16678_v52, %v2599_v39  ;;  %v2870_v13 = vmax.bf16 %v16678_v52, %v2614_v33  ;;  %v17712_v39 = vld [vmem:[#allocation121_spill] sm:$0xff] }
 0x582   : > { %8064 = vmatprep.subr.bf16.mxu0 %v16678_v52  ;;  %8353 = vmatprep.subr.bf16.mxu1 %v16678_v52  ;;  %v2662_v33 = vadd.bf16 %v14005_v42, %v17728_v15  ;;  %v17756_v15 = vld [vmem:[#allocation356_spill] sm:$0xff] }
 0x583   : > { %v2830_v45 = vmax.bf16 %v16678_v52, %v2574_v47 }
 0x585   : > { %8065 = vmatpush1.bf16.msra.mxu0 %v10637_v25  ;;  %8354 = vmatpush1.bf16.msra.mxu1 %v10638_v5  ;;  %v2871_v5 = vmax.bf16 %v16678_v52, %v2615_v38  ;;  %v2663_v38 = vadd.bf16 %v13993_v7, %v17725_v18 }
 0x586   : > { %8066 = vmatprep.subr.bf16.mxu0 %v16678_v52  ;;  %8355 = vmatprep.subr.bf16.mxu1 %v16678_v52 }
 0x587   : > { %5682 = vmatmul.mubr.bf16.gmra.mrb[28].mxu0 %v2790_v44  ;;  %7094 = vmatmul.mubr.bf16.gmra.mrb[28].mxu1 %v2790_v44  ;;  %v17669_v44 = vld [vmem:[#allocation300_spill] sm:$0xff] }
 0x588   : > { %5691 = vmatprep.mubr.bf16.mxu0 %v2799_v59  ;;  %7103 = vmatprep.mubr.bf16.mxu1 %v2799_v59  ;;  %v17670_v59 = vld [vmem:[#allocation63_spill] sm:$0xff] }
 0x589   : > { %v17671_v55 = vpack.c.bf16 %v17669_v44, %v17670_v59  ;;  %8067 = vmatpush1.bf16.msra.mxu0 %v10639_v57  ;;  %8356 = vmatpush1.bf16.msra.mxu1 %v10640_v60  ;;  %v17702_v44 = vld [vmem:[#allocation321_spill] sm:$0xff]  ;;  %v17703_v59 = vld [vmem:[#allocation95_spill] sm:$0xff]  ;;  %v17706_v60 = vld [vmem:[#allocation324_spill] sm:$0xff] }
 0x58a   : > { %8068 = vmatprep.subr.bf16.mxu0 %v16678_v52  ;;  %8357 = vmatprep.subr.bf16.mxu1 %v16678_v52  ;;  %v17705_v57 = vld [vmem:[#allocation327_spill] sm:$0xff] }
 0x58b   : > { %v2591_v9 = vadd.bf16 %v13993_v7, %v17671_v55  ;;  %v17704_v55 = vpack.c.bf16 %v17702_v44, %v17703_v59  ;;  %v17738_v44 = vld [vmem:[#allocation343_spill] sm:$0xff] }
 0x58c   : > { %v17739_v59 = vld [vmem:[#allocation147_spill] sm:$0xff] }
 0x58d   : > { %v2847_v11 = vmax.bf16 %v16678_v52, %v2591_v9  ;;  %8069 = vmatpush1.bf16.msra.mxu0 %v10641_v17  ;;  %8358 = vmatpush1.bf16.msra.mxu1 %v10642_v34  ;;  %v2630_v9 = vadd.bf16 %v14005_v42, %v17704_v55  ;;  %v17740_v55 = vpack.c.bf16 %v17738_v44, %v17739_v59 }
 0x58f   : > { %5692 = vmatmul.mubr.bf16.gmra.mrb[32].mxu0 %v2798_v35  ;;  %7104 = vmatmul.mubr.bf16.gmra.mrb[32].mxu1 %v2798_v35  ;;  %v17674_v35 = vpack.c.bf16 %v17672_v50, %v17673_v36  ;;  %v2886_v50 = vmax.bf16 %v16678_v52, %v2630_v9  ;;  %v2678_v9 = vadd.bf16 %v14005_v42, %v17740_v55 }
 0x590   : > { %5701 = vmatprep.mubr.bf16.mxu0 %v2807_v1  ;;  %7113 = vmatprep.mubr.bf16.mxu1 %v2807_v1 }
 0x591   : > { %v2590_v1 = vadd.bf16 %v14005_v42, %v17674_v35  ;;  %v17708_v35 = vld [vmem:[#allocation326_spill] sm:$0xff] }
 0x593   : > { %v2846_v51 = vmax.bf16 %v16678_v52, %v2590_v1  ;;  %v17709_v1 = vld [vmem:[#allocation101_spill] sm:$0xff] }
 0x594   : > { %v17710_v62 = vpack.c.bf16 %v17708_v35, %v17709_v1  ;;  %v17744_v35 = vld [vmem:[#allocation348_spill] sm:$0xff]  ;;  %v17745_v1 = vld [vmem:[#allocation141_spill] sm:$0xff] }
 0x596   : > { %v2638_v16 = vadd.bf16 %v14005_v42, %v17710_v62  ;;  %v17746_v62 = vpack.c.bf16 %v17744_v35, %v17745_v1  ;;  %v17765_v35 = vld [vmem:[#allocation365_spill] sm:$0xff]  ;;  %v17766_v1 = vld [vmem:[#allocation362_spill] sm:$0xff] }
 0x597   : > { %5702 = vmatmul.mubr.bf16.gmra.mrb[36].mxu0 %v2806_v26  ;;  %7114 = vmatmul.mubr.bf16.gmra.mrb[36].mxu1 %v2806_v26  ;;  %v17681_v26 = vld [vmem:[#allocation312_spill] sm:$0xff] }
 0x598   : > { %5711 = vmatprep.mubr.bf16.mxu0 %v2815_v43  ;;  %7123 = vmatprep.mubr.bf16.mxu1 %v2815_v43  ;;  %v17682_v43 = vld [vmem:[#allocation308_spill] sm:$0xff]  ;;  %v2894_v46 = vmax.bf16 %v16678_v52, %v2638_v16  ;;  %v2686_v16 = vadd.bf16 %v14005_v42, %v17746_v62  ;;  %v17767_v62 = vpack.c.bf16 %v17765_v35, %v17766_v1 }
 0x599   : > { %v17683_v6 = vpack.c.bf16 %v17681_v26, %v17682_v43  ;;  %v17716_v26 = vpack.c.bf16 %v17714_v58, %v17715_v21  ;;  %v17750_v58 = vld [vmem:[#allocation352_spill] sm:$0xff]  ;;  %v17751_v21 = vld [vmem:[#allocation149_spill] sm:$0xff] }
 0x59b   : > { %v2607_v20 = vadd.bf16 %v13993_v7, %v17683_v6  ;;  %v2646_v43 = vadd.bf16 %v14005_v42, %v17716_v26  ;;  %v17717_v6 = vld [vmem:[#allocation334_spill] sm:$0xff]  ;;  %v17752_v26 = vpack.c.bf16 %v17750_v58, %v17751_v21 }
 0x59d   : > { %v2863_v27 = vmax.bf16 %v16678_v52, %v2607_v20  ;;  %v17718_v20 = vld [vmem:[#allocation331_spill] sm:$0xff] }
 0x59e   : > { %v17719_v17 = vpack.c.bf16 %v17717_v6, %v17718_v20  ;;  %v17753_v6 = vld [vmem:[#allocation357_spill] sm:$0xff]  ;;  %v17754_v20 = vld [vmem:[#allocation354_spill] sm:$0xff] }
 0x59f   : > { %5712 = vmatmul.mubr.bf16.gmra.mrb[40].mxu0 %v2814_v40  ;;  %7124 = vmatmul.mubr.bf16.gmra.mrb[40].mxu1 %v2814_v40  ;;  %v17686_v40 = vpack.c.bf16 %v17684_v2, %v17685_v53  ;;  %v17720_v2 = vld [vmem:[#allocation333_spill] sm:$0xff]  ;;  %v17721_v53 = vld [vmem:[#allocation115_spill] sm:$0xff] }
 0x5a0   : > { %5721 = vmatprep.mubr.bf16.mxu0 %v2823_v37  ;;  %7133 = vmatprep.mubr.bf16.mxu1 %v2823_v37  ;;  %v2655_v34 = vadd.bf16 %v13993_v7, %v17719_v17  ;;  %v17755_v17 = vpack.c.bf16 %v17753_v6, %v17754_v20 }
 0x5a1   : > { %v2606_v37 = vadd.bf16 %v14005_v42, %v17686_v40  ;;  %v17722_v40 = vpack.c.bf16 %v17720_v2, %v17721_v53 }
 0x5a3   : > { %v2862_v25 = vmax.bf16 %v16678_v52, %v2606_v37  ;;  %v2654_v37 = vadd.bf16 %v14005_v42, %v17722_v40 }
 0x5a7   : > { %5722 = vmatmul.mubr.bf16.gmra.mrb[44].mxu0 %v2822_v23  ;;  %7134 = vmatmul.mubr.bf16.gmra.mrb[44].mxu1 %v2822_v23  ;;  %v17693_v23 = vld [vmem:[#allocation320_spill] sm:$0xff] }
 0x5a8   : > { %5731 = vmatprep.mubr.bf16.mxu0 %v2831_v22  ;;  %7143 = vmatprep.mubr.bf16.mxu1 %v2831_v22  ;;  %v17694_v22 = vld [vmem:[#allocation316_spill] sm:$0xff] }
 0x5a9   : > { %v17695_v28 = vpack.c.bf16 %v17693_v23, %v17694_v22  ;;  %v17729_v23 = vld [vmem:[#allocation340_spill] sm:$0xff]  ;;  %v17730_v22 = vld [vmem:[#allocation337_spill] sm:$0xff] }
 0x5ab   : > { %v2623_v32 = vadd.bf16 %v13993_v7, %v17695_v28  ;;  %v17731_v28 = vpack.c.bf16 %v17729_v23, %v17730_v22 }
 0x5ad   : > { %v2879_v47 = vmax.bf16 %v16678_v52, %v2623_v32  ;;  %v2671_v32 = vadd.bf16 %v13993_v7, %v17731_v28  ;;  %v17759_v28 = vld [vmem:[#allocation361_spill] sm:$0xff] }
 0x5af   : > { %5732 = vmatmul.mubr.bf16.gmra.mrb[48].mxu0 %v2830_v45  ;;  %7144 = vmatmul.mubr.bf16.gmra.mrb[48].mxu1 %v2830_v45  ;;  %v17699_v45 = vld [vmem:[#allocation322_spill] sm:$0xff] }
 0x5b0   : > { %5741 = vmatprep.mubr.bf16.mxu0 %v2839_v61  ;;  %7153 = vmatprep.mubr.bf16.mxu1 %v2839_v61  ;;  %v17700_v61 = vld [vmem:[#allocation107_spill] sm:$0xff] }
 0x5b1   : > { %v17701_v56 = vpack.c.bf16 %v17699_v45, %v17700_v61  ;;  %v17735_v45 = vld [vmem:[#allocation344_spill] sm:$0xff]  ;;  %v17736_v61 = vld [vmem:[#allocation143_spill] sm:$0xff] }
 0x5b3   : > { %v2631_v48 = vadd.bf16 %v13993_v7, %v17701_v56  ;;  %v17737_v56 = vpack.c.bf16 %v17735_v45, %v17736_v61 }
 0x5b5   : > { %v2887_v63 = vmax.bf16 %v16678_v52, %v2631_v48  ;;  %v2679_v48 = vadd.bf16 %v13993_v7, %v17737_v56 }
 0x5b7   : > { %5742 = vmatmul.mubr.bf16.gmra.mrb[52].mxu0 %v2838_v30  ;;  %7154 = vmatmul.mubr.bf16.gmra.mrb[52].mxu1 %v2838_v30  ;;  %v17707_v30 = vpack.c.bf16 %v17705_v57, %v17706_v60  ;;  %v17741_v57 = vld [vmem:[#allocation349_spill] sm:$0xff]  ;;  %v17742_v60 = vld [vmem:[#allocation346_spill] sm:$0xff] }
 0x5b8   : > { %5751 = vmatprep.mubr.bf16.mxu0 %v2847_v11  ;;  %7163 = vmatprep.mubr.bf16.mxu1 %v2847_v11 }
 0x5b9   : > { %v2639_v11 = vadd.bf16 %v13993_v7, %v17707_v30  ;;  %v17743_v30 = vpack.c.bf16 %v17741_v57, %v17742_v60 }
 0x5bb   : > { %v2895_v36 = vmax.bf16 %v16678_v52, %v2639_v11  ;;  %v2687_v11 = vadd.bf16 %v13993_v7, %v17743_v30  ;;  %v17762_v30 = vld [vmem:[#allocation360_spill] sm:$0xff] }
 0x5bf   : > { %5752 = vmatmul.mubr.bf16.gmra.mrb[56].mxu0 %v2846_v51  ;;  %7164 = vmatmul.mubr.bf16.gmra.mrb[56].mxu1 %v2846_v51  ;;  %v17713_v51 = vpack.c.bf16 %v17711_v31, %v17712_v39  ;;  %v17747_v31 = vld [vmem:[#allocation353_spill] sm:$0xff]  ;;  %v17748_v39 = vld [vmem:[#allocation350_spill] sm:$0xff] }
 0x5c0   : > { %5761 = vmatprep.mubr.bf16.mxu0 %v2855_v54  ;;  %7173 = vmatprep.mubr.bf16.mxu1 %v2855_v54 }
 0x5c1   : > { %v2647_v54 = vadd.bf16 %v13993_v7, %v17713_v51  ;;  %v17749_v51 = vpack.c.bf16 %v17747_v31, %v17748_v39  ;;  %v17768_v39 = vld [vmem:[#allocation232_spill] sm:$0xff] }
 0x5c3   : > { %v2903_v41 = vmax.bf16 %v16678_v52, %v2647_v54  ;;  %v2695_v54 = vadd.bf16 %v13993_v7, %v17749_v51 }
 0x5c7   : > { %5762 = vmatmul.mubr.bf16.gmra.mrb[60].mxu0 %v2854_v49  ;;  %7174 = vmatmul.mubr.bf16.gmra.mrb[60].mxu1 %v2854_v49  ;;  %v2902_v49 = vmax.bf16 %v16678_v52, %v2646_v43  ;;  %v2694_v43 = vadd.bf16 %v14005_v42, %v17752_v26 }
 0x5c8   : > { %5771 = vmatprep.mubr.bf16.mxu0 %v2863_v27  ;;  %7183 = vmatprep.mubr.bf16.mxu1 %v2863_v27  ;;  %v2911_v27 = vmax.bf16 %v16678_v52, %v2655_v34  ;;  %v2703_v34 = vadd.bf16 %v13993_v7, %v17755_v17 }
 0x5ca   : > { %v2959_v8 = vmax.bf16 %v16678_v52, %v2703_v34 }
 0x5cf   : > { %5772 = vmatmul.mubr.bf16.gmra.mrb[64].mxu0 %v2862_v25  ;;  %7184 = vmatmul.mubr.bf16.gmra.mrb[64].mxu1 %v2862_v25  ;;  %v2910_v25 = vmax.bf16 %v16678_v52, %v2654_v37  ;;  %v2950_v37 = vmax.bf16 %v16678_v52, %v2694_v43 }
 0x5d0   : > { %5781 = vmatprep.mubr.bf16.mxu0 %v2871_v5  ;;  %7193 = vmatprep.mubr.bf16.mxu1 %v2871_v5  ;;  %v2919_v5 = vmax.bf16 %v16678_v52, %v2663_v38 }
 0x5d7   : > { %5782 = vmatmul.mubr.bf16.gmra.mrb[68].mxu0 %v2870_v13  ;;  %7194 = vmatmul.mubr.bf16.gmra.mrb[68].mxu1 %v2870_v13  ;;  %v2918_v13 = vmax.bf16 %v16678_v52, %v2662_v33  ;;  %v17757_v33 = vld [vmem:[#allocation155_spill] sm:$0xff] }
 0x5d8   : > { %5791 = vmatprep.mubr.bf16.mxu0 %v2879_v47  ;;  %7203 = vmatprep.mubr.bf16.mxu1 %v2879_v47  ;;  %v2927_v47 = vmax.bf16 %v16678_v52, %v2671_v32  ;;  %v17758_v23 = vpack.c.bf16 %v17756_v15, %v17757_v33  ;;  %v17760_v32 = vld [vmem:[#allocation358_spill] sm:$0xff]  ;;  %v17769_v33 = vld [vmem:[#allocation364_spill] sm:$0xff] }
 0x5da   : > { %v2702_v22 = vadd.bf16 %v14005_v42, %v17758_v23  ;;  %v17770_v23 = vld [vmem:[#allocation169_spill] sm:$0xff] }
 0x5dc   : > { %v2958_v56 = vmax.bf16 %v16678_v52, %v2702_v22  ;;  %v17771_v22 = vpack.c.bf16 %v17769_v33, %v17770_v23 }
 0x5df   : > { %5792 = vmatmul.mubr.bf16.gmra.mrb[72].mxu0 %v2878_v3  ;;  %7204 = vmatmul.mubr.bf16.gmra.mrb[72].mxu1 %v2878_v3  ;;  %v2926_v3 = vmax.bf16 %v16678_v52, %v2670_v24  ;;  %v9388_v24 = vld.sshfl [vmem:[%s16215_s4] sm:$0x33 pattern:$0x75316420] }
 0x5e0   : > { %5801 = vmatprep.mubr.bf16.mxu0 %v2887_v63  ;;  %7213 = vmatprep.mubr.bf16.mxu1 %v2887_v63  ;;  %v2935_v63 = vmax.bf16 %v16678_v52, %v2679_v48  ;;  %v7481_v57 = vcombine.high %v9388_v24, %v9388_v24 }
 0x5e2   : > { %v7495_v51 = vrot.slane %v7481_v57, %v17768_v39 }
 0x5e4   : > { %v7506_v57 = vpack.i.b16 %v7495_v51, %v7495_v51 }
 0x5e7   : > { %5802 = vmatmul.mubr.bf16.gmra.mrb[76].mxu0 %v2886_v50  ;;  %7214 = vmatmul.mubr.bf16.gmra.mrb[76].mxu1 %v2886_v50  ;;  %v2934_v50 = vmax.bf16 %v16678_v52, %v2678_v9 }
 0x5e8   : > { %5811 = vmatprep.mubr.bf16.mxu0 %v2895_v36  ;;  %7223 = vmatprep.mubr.bf16.mxu1 %v2895_v36  ;;  %v2943_v36 = vmax.bf16 %v16678_v52, %v2687_v11  ;;  %v17763_v11 = vld [vmem:[#allocation162_spill] sm:$0xff] }
 0x5ef   : > { %5812 = vmatmul.mubr.bf16.gmra.mrb[80].mxu0 %v2894_v46  ;;  %7224 = vmatmul.mubr.bf16.gmra.mrb[80].mxu1 %v2894_v46  ;;  %v2942_v46 = vmax.bf16 %v16678_v52, %v2686_v16  ;;  %v2719_v16 = vadd.bf16 %v13993_v7, %v17767_v62 }
 0x5f0   : > { %5821 = vmatprep.mubr.bf16.mxu0 %v2903_v41  ;;  %7233 = vmatprep.mubr.bf16.mxu1 %v2903_v41  ;;  %v2951_v41 = vmax.bf16 %v16678_v52, %v2695_v54 }
 0x5f7   : > { %5822 = vmatmul.mubr.bf16.gmra.mrb[84].mxu0 %v2902_v49  ;;  %7234 = vmatmul.mubr.bf16.gmra.mrb[84].mxu1 %v2902_v49 }
 0x5f8   : > { %5831 = vmatprep.mubr.bf16.mxu0 %v2911_v27  ;;  %7243 = vmatprep.mubr.bf16.mxu1 %v2911_v27 }
 0x5ff   : > { %5832 = vmatmul.mubr.bf16.gmra.mrb[88].mxu0 %v2910_v25  ;;  %7244 = vmatmul.mubr.bf16.gmra.mrb[88].mxu1 %v2910_v25 }
 0x600   : > { %5841 = vmatprep.mubr.bf16.mxu0 %v2919_v5  ;;  %7253 = vmatprep.mubr.bf16.mxu1 %v2919_v5 }
 0x607   : > { %5842 = vmatmul.mubr.bf16.gmra.mrb[92].mxu0 %v2918_v13  ;;  %7254 = vmatmul.mubr.bf16.gmra.mrb[92].mxu1 %v2918_v13  ;;  %v17761_v13 = vpack.c.bf16 %v17759_v28, %v17760_v32  ;;  %v2718_v28 = vadd.bf16 %v14005_v42, %v17771_v22  ;;  %v17772_v32 = vld [vmem:[#allocation369_spill] sm:$0xff] }
 0x608   : > { %5851 = vmatprep.mubr.bf16.mxu0 %v2927_v47  ;;  %7263 = vmatprep.mubr.bf16.mxu1 %v2927_v47 }
 0x609   : > { %v2711_v47 = vadd.bf16 %v13993_v7, %v17761_v13  ;;  %v17773_v13 = vld [vmem:[#allocation366_spill] sm:$0xff]  ;;  %v2974_v62 = vmax.bf16 %v16678_v52, %v2718_v28  ;;  %v17775_v28 = vld [vmem:[#allocation368_spill] sm:$0xff] }
 0x60b   : > { %v2967_v9 = vmax.bf16 %v16678_v52, %v2711_v47  ;;  %v17774_v47 = vpack.c.bf16 %v17772_v32, %v17773_v13  ;;  %v17776_v32 = vld [vmem:[#allocation176_spill] sm:$0xff] }
 0x60c   : > { %v17777_v13 = vpack.c.bf16 %v17775_v28, %v17776_v32 }
 0x60f   : > { %5852 = vmatmul.mubr.bf16.gmra.mrb[96].mxu0 %v2926_v3  ;;  %7264 = vmatmul.mubr.bf16.gmra.mrb[96].mxu1 %v2926_v3 }
 0x610   : > { %5861 = vmatprep.mubr.bf16.mxu0 %v2935_v63  ;;  %7273 = vmatprep.mubr.bf16.mxu1 %v2935_v63 }
 0x617   : > { %5862 = vmatmul.mubr.bf16.gmra.mrb[100].mxu0 %v2934_v50  ;;  %7274 = vmatmul.mubr.bf16.gmra.mrb[100].mxu1 %v2934_v50  ;;  %v17764_v50 = vpack.c.bf16 %v17762_v30, %v17763_v11 }
 0x618   : > { %5871 = vmatprep.mubr.bf16.mxu0 %v2943_v36  ;;  %7283 = vmatprep.mubr.bf16.mxu1 %v2943_v36 }
 0x619   : > { %v2710_v36 = vadd.bf16 %v14005_v42, %v17764_v50 }
 0x61b   : > { %v2966_v21 = vmax.bf16 %v16678_v52, %v2710_v36 }
 0x61f   : > { %5872 = vmatmul.mubr.bf16.gmra.mrb[104].mxu0 %v2942_v46  ;;  %7284 = vmatmul.mubr.bf16.gmra.mrb[104].mxu1 %v2942_v46 }
 0x620   : > { %5881 = vmatprep.mubr.bf16.mxu0 %v2951_v41  ;;  %7293 = vmatprep.mubr.bf16.mxu1 %v2951_v41 }
 0x622   : > { %v14413_v49 = vpop.f32.mrb[0].mxu0  ;;  %v14415_v27 = vpop.f32.mrb[0].mxu1 }
 0x623   : > { %v14417_v2 = vpop.f32.mrb[1].mxu0  ;;  %v14419_v53 = vpop.f32.mrb[1].mxu1 }
 0x624   : > { %v14421_v40 = vpop.f32.mrb[2].mxu0  ;;  %v14426_v12 = vpop.f32.mrb[2].mxu1 }
 0x625   : > { %v7344_v14 = vpack.c.bf16 %v14421_v40, %v14413_v49  ;;  %v14428_v18 = vpop.f32.mrb[3].mxu0  ;;  %v7346_v38 = vpack.c.bf16 %v14426_v12, %v14415_v27  ;;  %v14434_v5 = vpop.f32.mrb[3].mxu1 }
 0x626   : > { %v7345_v25 = vpack.c.bf16 %v14428_v18, %v14417_v2  ;;  %v7347_v4 = vpack.c.bf16 %v14434_v5, %v14419_v53 }
 0x627   : > { %5882 = vmatmul.mubr.bf16.gmra.mrb[108].mxu0 %v2950_v37  ;;  %7294 = vmatmul.mubr.bf16.gmra.mrb[108].mxu1 %v2950_v37  ;;  %v2975_v37 = vmax.bf16 %v16678_v52, %v2719_v16 }
 0x628   : > { %5891 = vmatprep.mubr.bf16.mxu0 %v2959_v8  ;;  %7303 = vmatprep.mubr.bf16.mxu1 %v2959_v8  ;;  %v7497_v8 = vcombine.high %v7495_v51, %v7495_v51 }
 0x62a   : > { %v14447_v10 = vpop.f32.mrb[4].mxu0  ;;  %v14449_v29 = vpop.f32.mrb[4].mxu1  ;;  %v7520_v11 = vpack.i.b16 %v7497_v8, %v7497_v8 }
 0x62b   : > { %v14451_v0 = vpop.f32.mrb[5].mxu0  ;;  %v14456_v45 = vpop.f32.mrb[5].mxu1 }
 0x62c   : > { %v14458_v61 = vpop.f32.mrb[6].mxu0  ;;  %v14463_v3 = vpop.f32.mrb[6].mxu1  ;;  %v14548_v23 = vrot.slane %v7520_v11, %v17581_v19 }
 0x62d   : > { %v7348_v48 = vpack.c.bf16 %v14458_v61, %v14447_v10  ;;  %v14465_v63 = vpop.f32.mrb[7].mxu0  ;;  %v7350_v44 = vpack.c.bf16 %v14463_v3, %v14449_v29  ;;  %v14471_v55 = vpop.f32.mrb[7].mxu1 }
 0x62e   : > { %v7349_v59 = vpack.c.bf16 %v14465_v63, %v14451_v0  ;;  %v7351_v60 = vpack.c.bf16 %v14471_v55, %v14456_v45 }
 0x62f   : > { %5892 = vmatmul.mubr.bf16.gmra.mrb[112].mxu0 %v2958_v56  ;;  %7304 = vmatmul.mubr.bf16.gmra.mrb[112].mxu1 %v2958_v56  ;;  %v2727_v56 = vadd.bf16 %v13993_v7, %v17774_v47  ;;  %v2726_v47 = vadd.bf16 %v14005_v42, %v17777_v13 }
 0x630   : > { %5901 = vmatprep.mubr.bf16.mxu0 %v2967_v9  ;;  %7313 = vmatprep.mubr.bf16.mxu1 %v2967_v9  ;;  %v7488_v9 = vrot.slane %v9388_v24, %v17768_v39  ;;  %v7533_v49 = vadd.bf16 %v14548_v23, %v7351_v60 }
 0x631   : > { %v2983_v39 = vmax.bf16 %v16678_v52, %v2727_v56 }
 0x632   : > { %v14484_v31 = vpop.f32.mrb[8].mxu0  ;;  %v14487_v54 = vpop.f32.mrb[8].mxu1  ;;  %v7496_v51 = vcombine.high %v7488_v9, %v7488_v9  ;;  %v7499_v56 = vpack.i.b16 %v7488_v9, %v7488_v9 }
 0x633   : > { %v14489_v46 = vpop.f32.mrb[9].mxu0  ;;  %v14491_v41 = vpop.f32.mrb[9].mxu1 }
 0x634   : > { %v14493_v58 = vpop.f32.mrb[10].mxu0  ;;  %v14498_v43 = vpop.f32.mrb[10].mxu1  ;;  %v14576_v2 = vrot.slane %v7499_v56, %v17581_v19 }
 0x635   : > { %v7352_v26 = vpack.c.bf16 %v14493_v58, %v14484_v31  ;;  %v14500_v6 = vpop.f32.mrb[11].mxu0  ;;  %v7354_v20 = vpack.c.bf16 %v14498_v43, %v14487_v54  ;;  %v14506_v34 = vpop.f32.mrb[11].mxu1 }
 0x636   : > { %v7353_v17 = vpack.c.bf16 %v14500_v6, %v14489_v46  ;;  %v7355_v15 = vpack.c.bf16 %v14506_v34, %v14491_v41 }
 0x637   : > { %5902 = vmatmul.mubr.bf16.gmra.mrb[116].mxu0 %v2966_v21  ;;  %7314 = vmatmul.mubr.bf16.gmra.mrb[116].mxu1 %v2966_v21  ;;  %v14539_v21 = vrot.slane %v7506_v57, %v17581_v19  ;;  %v7513_v57 = vpack.i.b16 %v7496_v51, %v7496_v51 }
 0x638   : > { %5911 = vmatprep.mubr.bf16.mxu0 %v2975_v37  ;;  %7323 = vmatprep.mubr.bf16.mxu1 %v2975_v37  ;;  %v7537_v10 = vadd.bf16 %v14548_v23, %v7355_v15 }
 0x639   : > { %v7527_v11 = vadd.bf16 %v14539_v21, %v7345_v25  ;;  %v14585_v5 = vrot.slane %v7513_v57, %v17581_v19  ;;  %v7526_v19 = vadd.bf16 %v14576_v2, %v7344_v14 }
 0x63a   : > { %v14520_v30 = vpop.f32.mrb[12].mxu0  ;;  %v14522_v50 = vpop.f32.mrb[12].mxu1 }
 0x63b   : > { %v14524_v36 = vpop.f32.mrb[13].mxu0  ;;  %v14526_v35 = vpop.f32.mrb[13].mxu1  ;;  %v7655_v13 = vmax.bf16 %v16678_v52, %v7527_v11  ;;  %v7528_v57 = vadd.bf16 %v14585_v5, %v7346_v38  ;;  %v7531_v11 = vadd.bf16 %v14539_v21, %v7349_v59  ;;  %v7654_v12 = vmax.bf16 %v16678_v52, %v7526_v19 }
 0x63c   : > { %v14528_v1 = vpop.f32.mrb[14].mxu0  ;;  %v14533_v16 = vpop.f32.mrb[14].mxu1  ;;  %v7530_v19 = vadd.bf16 %v14576_v2, %v7348_v48 }
 0x63d   : > { %v14535_v24 = vpop.f32.mrb[15].mxu0  ;;  %v14545_v33 = vpop.f32.mrb[15].mxu1  ;;  %v7656_v45 = vmax.bf16 %v16678_v52, %v7528_v57  ;;  %v7532_v57 = vadd.bf16 %v14585_v5, %v7350_v44 }
 0x63e   : > { %v7357_v8 = vpack.c.bf16 %v14535_v24, %v14524_v36  ;;  %v7359_v22 = vpack.c.bf16 %v14545_v33, %v14526_v35  ;;  %v7658_v3 = vmax.bf16 %v16678_v52, %v7530_v19  ;;  %v7534_v19 = vadd.bf16 %v14576_v2, %v7352_v26 }
 0x63f   : > { %5912 = vmatmul.mubr.bf16.gmra.mrb[120].mxu0 %v2974_v62  ;;  %7324 = vmatmul.mubr.bf16.gmra.mrb[120].mxu1 %v2974_v62  ;;  %v7529_v62 = vadd.bf16 %v14548_v23, %v7347_v4  ;;  %v7660_v41 = vmax.bf16 %v16678_v52, %v7532_v57  ;;  %v7536_v57 = vadd.bf16 %v14585_v5, %v7354_v20 }
 0x640   : > { %5921 = vmatprep.mubr.bf16.mxu0 %v2983_v39  ;;  %7333 = vmatprep.mubr.bf16.mxu1 %v2983_v39  ;;  %v2982_v39 = vmax.bf16 %v16678_v52, %v2726_v47  ;;  %v7541_v31 = vadd.bf16 %v14548_v23, %v7359_v22  ;;  %v7662_v43 = vmax.bf16 %v16678_v52, %v7534_v19 }
 0x641   : > { %v7657_v56 = vmax.bf16 %v16678_v52, %v7529_v62  ;;  %v7664_v35 = vmax.bf16 %v16678_v52, %v7536_v57  ;;  %v17778_v19 = vpack.c.bf16 %v14528_v1, %v14520_v30 }
 0x642   : > { %v14560_v37 = vpop.f32.mrb[16].mxu0  ;;  %v14566_v7 = vpop.f32.mrb[16].mxu1 }
 0x643   : > { %v14568_v28 = vpop.f32.mrb[17].mxu0  ;;  %v14570_v42 = vpop.f32.mrb[17].mxu1  ;;  %v7538_v57 = vadd.bf16 %v14576_v2, %v17778_v19 }
 0x644   : > { %v14572_v9 = vpop.f32.mrb[18].mxu0  ;;  %v14580_v25 = vpop.f32.mrb[18].mxu1 }
 0x645   : > { %v7360_v18 = vpack.c.bf16 %v14572_v9, %v14560_v37  ;;  %v14582_v53 = vpop.f32.mrb[19].mxu0  ;;  %v14591_v32 = vpop.f32.mrb[19].mxu1 }
 0x646   : > { %v7361_v51 = vpack.c.bf16 %v14582_v53, %v14568_v28  ;;  %v7363_v47 = vpack.c.bf16 %v14591_v32, %v14570_v42 }
 0x647   : > { %5922 = vmatmul.mubr.bf16.gmra.mrb[124].mxu0 %v2982_v39  ;;  %7334 = vmatmul.mubr.bf16.gmra.mrb[124].mxu1 %v2982_v39  ;;  %v7659_v39 = vmax.bf16 %v16678_v52, %v7531_v11  ;;  %v7535_v11 = vadd.bf16 %v14539_v21, %v7353_v17 }
 0x648   : > { %8070 = vmatprep.mubr.bf16.mxu0 %v7655_v13  ;;  %8359 = vmatprep.mubr.bf16.mxu1 %v7657_v56  ;;  %v7661_v56 = vmax.bf16 %v16678_v52, %v7533_v49  ;;  %v7545_v30 = vadd.bf16 %v14548_v23, %v7363_v47 }
 0x64a   : > { %v14609_v4 = vpop.f32.mrb[20].mxu0  ;;  %v14615_v40 = vpop.f32.mrb[20].mxu1  ;;  %v7673_v19 = vmax.bf16 %v16678_v52, %v7545_v30 }
 0x64b   : > { %v14617_v14 = vpop.f32.mrb[21].mxu0  ;;  %v14619_v62 = vpop.f32.mrb[21].mxu1 }
 0x64c   : > { %v14621_v27 = vpop.f32.mrb[22].mxu0  ;;  %v14626_v0 = vpop.f32.mrb[22].mxu1 }
 0x64d   : > { %v7364_v38 = vpack.c.bf16 %v14621_v27, %v14609_v4  ;;  %v14628_v63 = vpop.f32.mrb[23].mxu0  ;;  %v7366_v59 = vpack.c.bf16 %v14626_v0, %v14615_v40  ;;  %v14635_v60 = vpop.f32.mrb[23].mxu1 }
 0x64e   : > { %v7365_v55 = vpack.c.bf16 %v14628_v63, %v14617_v14  ;;  %v7367_v13 = vpack.c.bf16 %v14635_v60, %v14619_v62 }
 0x64f   : > { %8071 = vmatmul.mubr.bf16.vlgmr.msra.gmra.mrb[128].mxu0 %v7654_v12  ;;  %8360 = vmatmul.mubr.bf16.vlgmr.msra.gmra.mrb[128].mxu1 %v7656_v45  ;;  %v7663_v45 = vmax.bf16 %v16678_v52, %v7535_v11  ;;  %v7539_v11 = vadd.bf16 %v14539_v21, %v7357_v8  ;;  %v17779_v8 = vpack.c.bf16 %v14533_v16, %v14522_v50 }
 0x650   : > { %8078 = vmatprep.mubr.bf16.mxu0 %v7659_v39  ;;  %8367 = vmatprep.mubr.bf16.mxu1 %v7661_v56  ;;  %v7665_v56 = vmax.bf16 %v16678_v52, %v7537_v10  ;;  %v7666_v16 = vmax.bf16 %v16678_v52, %v7538_v57  ;;  %v17780_v57 = vpack.c.bf16 %v14580_v25, %v14566_v7 }
 0x651   : > { %v7540_v20 = vadd.bf16 %v14585_v5, %v17779_v8  ;;  %v7549_v37 = vadd.bf16 %v14548_v23, %v7367_v13 }
 0x652   : > { %v14653_v12 = vpop.f32.mrb[24].mxu0  ;;  %v14659_v61 = vpop.f32.mrb[24].mxu1  ;;  %v7544_v32 = vadd.bf16 %v14585_v5, %v17780_v57  ;;  %v7548_v57 = vadd.bf16 %v14585_v5, %v7366_v59 }
 0x653   : > { %v14661_v48 = vpop.f32.mrb[25].mxu0  ;;  %v14663_v49 = vpop.f32.mrb[25].mxu1  ;;  %v7668_v42 = vmax.bf16 %v16678_v52, %v7540_v20  ;;  %v7542_v20 = vadd.bf16 %v14576_v2, %v7360_v18 }
 0x654   : > { %v14665_v29 = vpop.f32.mrb[26].mxu0  ;;  %v14670_v46 = vpop.f32.mrb[26].mxu1  ;;  %v7672_v62 = vmax.bf16 %v16678_v52, %v7544_v32  ;;  %v7546_v32 = vadd.bf16 %v14576_v2, %v7364_v38 }
 0x655   : > { %v7368_v44 = vpack.c.bf16 %v14665_v29, %v14653_v12  ;;  %v14672_v6 = vpop.f32.mrb[27].mxu0  ;;  %v7370_v17 = vpack.c.bf16 %v14670_v46, %v14659_v61  ;;  %v14679_v15 = vpop.f32.mrb[27].mxu1  ;;  %v7670_v25 = vmax.bf16 %v16678_v52, %v7542_v20  ;;  %v7677_v20 = vmax.bf16 %v16678_v52, %v7549_v37 }
 0x656   : > { %v7369_v34 = vpack.c.bf16 %v14672_v6, %v14661_v48  ;;  %v7371_v39 = vpack.c.bf16 %v14679_v15, %v14663_v49  ;;  %v7674_v0 = vmax.bf16 %v16678_v52, %v7546_v32  ;;  %v7676_v49 = vmax.bf16 %v16678_v52, %v7548_v57 }
 0x657   : > { %8079 = vmatmul.mubr.bf16.gmra.mrb[132].mxu0 %v7658_v3  ;;  %8368 = vmatmul.mubr.bf16.gmra.mrb[132].mxu1 %v7660_v41  ;;  %v7667_v41 = vmax.bf16 %v16678_v52, %v7539_v11  ;;  %v7543_v11 = vadd.bf16 %v14539_v21, %v7361_v51  ;;  %v7550_v32 = vadd.bf16 %v14576_v2, %v7368_v44 }
 0x658   : > { %8086 = vmatprep.mubr.bf16.mxu0 %v7663_v45  ;;  %8375 = vmatprep.mubr.bf16.mxu1 %v7665_v56  ;;  %v7669_v56 = vmax.bf16 %v16678_v52, %v7541_v31  ;;  %v7553_v4 = vadd.bf16 %v14548_v23, %v7371_v39  ;;  %v7552_v57 = vadd.bf16 %v14585_v5, %v7370_v17 }
 0x659   : > { %v7678_v46 = vmax.bf16 %v16678_v52, %v7550_v32 }
 0x65a   : > { %v14697_v3 = vpop.f32.mrb[28].mxu0  ;;  %v14703_v58 = vpop.f32.mrb[28].mxu1 }
 0x65b   : > { %v14705_v26 = vpop.f32.mrb[29].mxu0  ;;  %v14707_v10 = vpop.f32.mrb[29].mxu1 }
 0x65c   : > { %v14709_v54 = vpop.f32.mrb[30].mxu0  ;;  %v14714_v36 = vpop.f32.mrb[30].mxu1 }
 0x65d   : > { %v14716_v24 = vpop.f32.mrb[31].mxu0  ;;  %v14723_v22 = vpop.f32.mrb[31].mxu1  ;;  %v17781_v32 = vpack.c.bf16 %v14709_v54, %v14697_v3 }
 0x65e   : > { %v7373_v33 = vpack.c.bf16 %v14716_v24, %v14705_v26  ;;  %v7375_v45 = vpack.c.bf16 %v14723_v22, %v14707_v10  ;;  %v7680_v10 = vmax.bf16 %v16678_v52, %v7552_v57 }
 0x65f   : > { %8087 = vmatmul.mubr.bf16.gmra.mrb[136].mxu0 %v7662_v43  ;;  %8376 = vmatmul.mubr.bf16.gmra.mrb[136].mxu1 %v7664_v35  ;;  %v7554_v57 = vadd.bf16 %v14576_v2, %v17781_v32 }
 0x660   : > { %8094 = vmatprep.mubr.bf16.mxu0 %v7667_v41  ;;  %8383 = vmatprep.mubr.bf16.mxu1 %v7669_v56  ;;  %v7671_v41 = vmax.bf16 %v16678_v52, %v7543_v11  ;;  %v7547_v11 = vadd.bf16 %v14539_v21, %v7365_v55  ;;  %v7557_v12 = vadd.bf16 %v14548_v23, %v7375_v45 }
 0x662   : > { %v14741_v43 = vpop.f32.mrb[32].mxu0  ;;  %v14747_v1 = vpop.f32.mrb[32].mxu1 }
 0x663   : > { %v14749_v31 = vpop.f32.mrb[33].mxu0  ;;  %v14751_v35 = vpop.f32.mrb[33].mxu1 }
 0x664   : > { %v14753_v50 = vpop.f32.mrb[34].mxu0  ;;  %v14758_v53 = vpop.f32.mrb[34].mxu1 }
 0x665   : > { %v7376_v28 = vpack.c.bf16 %v14753_v50, %v14741_v43  ;;  %v14760_v51 = vpop.f32.mrb[35].mxu0  ;;  %v14767_v8 = vpop.f32.mrb[35].mxu1 }
 0x666   : > { %v7377_v47 = vpack.c.bf16 %v14760_v51, %v14749_v31  ;;  %v7379_v56 = vpack.c.bf16 %v14767_v8, %v14751_v35 }
 0x667   : > { %8095 = vmatmul.mubr.bf16.gmra.mrb[140].mxu0 %v7666_v16  ;;  %8384 = vmatmul.mubr.bf16.gmra.mrb[140].mxu1 %v7668_v42 }
 0x668   : > { %8102 = vmatprep.mubr.bf16.mxu0 %v7671_v41  ;;  %8391 = vmatprep.mubr.bf16.mxu1 %v7673_v19  ;;  %v7675_v41 = vmax.bf16 %v16678_v52, %v7547_v11  ;;  %v7551_v11 = vadd.bf16 %v14539_v21, %v7369_v34  ;;  %v7561_v3 = vadd.bf16 %v14548_v23, %v7379_v56 }
 0x66a   : > { %v14785_v16 = vpop.f32.mrb[36].mxu0  ;;  %v14791_v9 = vpop.f32.mrb[36].mxu1  ;;  %v7689_v32 = vmax.bf16 %v16678_v52, %v7561_v3 }
 0x66b   : > { %v14793_v18 = vpop.f32.mrb[37].mxu0  ;;  %v14795_v30 = vpop.f32.mrb[37].mxu1 }
 0x66c   : > { %v14797_v7 = vpop.f32.mrb[38].mxu0  ;;  %v14802_v63 = vpop.f32.mrb[38].mxu1 }
 0x66d   : > { %v7380_v14 = vpack.c.bf16 %v14797_v7, %v14785_v16  ;;  %v14804_v55 = vpop.f32.mrb[39].mxu0  ;;  %v7382_v60 = vpack.c.bf16 %v14802_v63, %v14791_v9  ;;  %v14811_v42 = vpop.f32.mrb[39].mxu1 }
 0x66e   : > { %v7381_v13 = vpack.c.bf16 %v14804_v55, %v14793_v18  ;;  %v7383_v19 = vpack.c.bf16 %v14811_v42, %v14795_v30 }
 0x66f   : > { %8103 = vmatmul.mubr.bf16.gmra.mrb[144].mxu0 %v7670_v25  ;;  %8392 = vmatmul.mubr.bf16.gmra.mrb[144].mxu1 %v7672_v62  ;;  %v7679_v62 = vmax.bf16 %v16678_v52, %v7551_v11  ;;  %v7555_v11 = vadd.bf16 %v14539_v21, %v7373_v33  ;;  %v17782_v33 = vpack.c.bf16 %v14714_v36, %v14703_v58 }
 0x670   : > { %8110 = vmatprep.mubr.bf16.mxu0 %v7675_v41  ;;  %8399 = vmatprep.mubr.bf16.mxu1 %v7677_v20  ;;  %v7681_v20 = vmax.bf16 %v16678_v52, %v7553_v4  ;;  %v7682_v36 = vmax.bf16 %v16678_v52, %v7554_v57  ;;  %v17783_v57 = vpack.c.bf16 %v14758_v53, %v14747_v1 }
 0x671   : > { %v7556_v17 = vadd.bf16 %v14585_v5, %v17782_v33  ;;  %v7565_v43 = vadd.bf16 %v14548_v23, %v7383_v19 }
 0x672   : > { %v14829_v25 = vpop.f32.mrb[40].mxu0  ;;  %v14835_v27 = vpop.f32.mrb[40].mxu1  ;;  %v7560_v8 = vadd.bf16 %v14585_v5, %v17783_v57  ;;  %v7564_v57 = vadd.bf16 %v14585_v5, %v7382_v60 }
 0x673   : > { %v14837_v38 = vpop.f32.mrb[41].mxu0  ;;  %v14839_v37 = vpop.f32.mrb[41].mxu1  ;;  %v7684_v35 = vmax.bf16 %v16678_v52, %v7556_v17  ;;  %v7558_v17 = vadd.bf16 %v14576_v2, %v7376_v28 }
 0x674   : > { %v14841_v40 = vpop.f32.mrb[42].mxu0  ;;  %v14846_v48 = vpop.f32.mrb[42].mxu1  ;;  %v7688_v30 = vmax.bf16 %v16678_v52, %v7560_v8  ;;  %v7562_v8 = vadd.bf16 %v14576_v2, %v7380_v14 }
 0x675   : > { %v7384_v59 = vpack.c.bf16 %v14841_v40, %v14829_v25  ;;  %v14848_v6 = vpop.f32.mrb[43].mxu0  ;;  %v7386_v34 = vpack.c.bf16 %v14846_v48, %v14835_v27  ;;  %v14855_v39 = vpop.f32.mrb[43].mxu1  ;;  %v7686_v53 = vmax.bf16 %v16678_v52, %v7558_v17  ;;  %v7693_v17 = vmax.bf16 %v16678_v52, %v7565_v43 }
 0x676   : > { %v7385_v15 = vpack.c.bf16 %v14848_v6, %v14837_v38  ;;  %v7387_v41 = vpack.c.bf16 %v14855_v39, %v14839_v37  ;;  %v7690_v63 = vmax.bf16 %v16678_v52, %v7562_v8  ;;  %v7692_v37 = vmax.bf16 %v16678_v52, %v7564_v57 }
 0x677   : > { %8111 = vmatmul.mubr.bf16.gmra.mrb[148].mxu0 %v7674_v0  ;;  %8400 = vmatmul.mubr.bf16.gmra.mrb[148].mxu1 %v7676_v49  ;;  %v7683_v49 = vmax.bf16 %v16678_v52, %v7555_v11  ;;  %v7559_v11 = vadd.bf16 %v14539_v21, %v7377_v47  ;;  %v7566_v8 = vadd.bf16 %v14576_v2, %v7384_v59 }
 0x678   : > { %8118 = vmatprep.mubr.bf16.mxu0 %v7679_v62  ;;  %8407 = vmatprep.mubr.bf16.mxu1 %v7681_v20  ;;  %v7685_v20 = vmax.bf16 %v16678_v52, %v7557_v12  ;;  %v7569_v16 = vadd.bf16 %v14548_v23, %v7387_v41  ;;  %v7568_v57 = vadd.bf16 %v14585_v5, %v7386_v34 }
 0x679   : > { %v7694_v48 = vmax.bf16 %v16678_v52, %v7566_v8 }
 0x67a   : > { %v14873_v0 = vpop.f32.mrb[44].mxu0  ;;  %v14879_v29 = vpop.f32.mrb[44].mxu1 }
 0x67b   : > { %v14881_v44 = vpop.f32.mrb[45].mxu0  ;;  %v14883_v4 = vpop.f32.mrb[45].mxu1 }
 0x67c   : > { %v14885_v61 = vpop.f32.mrb[46].mxu0  ;;  %v14890_v26 = vpop.f32.mrb[46].mxu1 }
 0x67d   : > { %v14892_v24 = vpop.f32.mrb[47].mxu0  ;;  %v14899_v45 = vpop.f32.mrb[47].mxu1  ;;  %v17784_v8 = vpack.c.bf16 %v14885_v61, %v14873_v0 }
 0x67e   : > { %v7389_v22 = vpack.c.bf16 %v14892_v24, %v14881_v44  ;;  %v7391_v62 = vpack.c.bf16 %v14899_v45, %v14883_v4  ;;  %v7696_v4 = vmax.bf16 %v16678_v52, %v7568_v57 }
 0x67f   : > { %8119 = vmatmul.mubr.bf16.gmra.mrb[152].mxu0 %v7678_v46  ;;  %8408 = vmatmul.mubr.bf16.gmra.mrb[152].mxu1 %v7680_v10  ;;  %v7570_v57 = vadd.bf16 %v14576_v2, %v17784_v8 }
 0x680   : > { %8126 = vmatprep.mubr.bf16.mxu0 %v7683_v49  ;;  %8415 = vmatprep.mubr.bf16.mxu1 %v7685_v20  ;;  %v7687_v49 = vmax.bf16 %v16678_v52, %v7559_v11  ;;  %v7563_v11 = vadd.bf16 %v14539_v21, %v7381_v13  ;;  %v7573_v25 = vadd.bf16 %v14548_v23, %v7391_v62 }
 0x682   : > { %v14917_v46 = vpop.f32.mrb[48].mxu0  ;;  %v14923_v54 = vpop.f32.mrb[48].mxu1 }
 0x683   : > { %v14925_v12 = vpop.f32.mrb[49].mxu0  ;;  %v14927_v10 = vpop.f32.mrb[49].mxu1 }
 0x684   : > { %v14929_v58 = vpop.f32.mrb[50].mxu0  ;;  %v14934_v51 = vpop.f32.mrb[50].mxu1 }
 0x685   : > { %v7392_v31 = vpack.c.bf16 %v14929_v58, %v14917_v46  ;;  %v14936_v47 = vpop.f32.mrb[51].mxu0  ;;  %v14943_v33 = vpop.f32.mrb[51].mxu1 }
 0x686   : > { %v7393_v56 = vpack.c.bf16 %v14936_v47, %v14925_v12  ;;  %v7395_v20 = vpack.c.bf16 %v14943_v33, %v14927_v10 }
 0x687   : > { %8127 = vmatmul.mubr.bf16.gmra.mrb[156].mxu0 %v7682_v36  ;;  %8416 = vmatmul.mubr.bf16.gmra.mrb[156].mxu1 %v7684_v35 }
 0x688   : > { %8134 = vmatprep.mubr.bf16.mxu0 %v7687_v49  ;;  %8423 = vmatprep.mubr.bf16.mxu1 %v7689_v32  ;;  %v7691_v49 = vmax.bf16 %v16678_v52, %v7563_v11  ;;  %v7567_v11 = vadd.bf16 %v14539_v21, %v7385_v15  ;;  %v7577_v0 = vadd.bf16 %v14548_v23, %v7395_v20 }
 0x68a   : > { %v14961_v36 = vpop.f32.mrb[52].mxu0  ;;  %v14967_v50 = vpop.f32.mrb[52].mxu1  ;;  %v7705_v8 = vmax.bf16 %v16678_v52, %v7577_v0 }
 0x68b   : > { %v14969_v28 = vpop.f32.mrb[53].mxu0  ;;  %v14971_v3 = vpop.f32.mrb[53].mxu1 }
 0x68c   : > { %v14973_v1 = vpop.f32.mrb[54].mxu0  ;;  %v14978_v55 = vpop.f32.mrb[54].mxu1 }
 0x68d   : > { %v7396_v18 = vpack.c.bf16 %v14973_v1, %v14961_v36  ;;  %v14980_v13 = vpop.f32.mrb[55].mxu0  ;;  %v7398_v42 = vpack.c.bf16 %v14978_v55, %v14967_v50  ;;  %v14987_v35 = vpop.f32.mrb[55].mxu1 }
 0x68e   : > { %v7397_v19 = vpack.c.bf16 %v14980_v13, %v14969_v28  ;;  %v7399_v32 = vpack.c.bf16 %v14987_v35, %v14971_v3 }
 0x68f   : > { %8135 = vmatmul.mubr.bf16.gmra.mrb[160].mxu0 %v7686_v53  ;;  %8424 = vmatmul.mubr.bf16.gmra.mrb[160].mxu1 %v7688_v30  ;;  %v7695_v30 = vmax.bf16 %v16678_v52, %v7567_v11  ;;  %v7571_v11 = vadd.bf16 %v14539_v21, %v7389_v22  ;;  %v17785_v22 = vpack.c.bf16 %v14890_v26, %v14879_v29 }
 0x690   : > { %8142 = vmatprep.mubr.bf16.mxu0 %v7691_v49  ;;  %8431 = vmatprep.mubr.bf16.mxu1 %v7693_v17  ;;  %v7697_v17 = vmax.bf16 %v16678_v52, %v7569_v16  ;;  %v7698_v26 = vmax.bf16 %v16678_v52, %v7570_v57  ;;  %v17786_v57 = vpack.c.bf16 %v14934_v51, %v14923_v54 }
 0x691   : > { %v7572_v34 = vadd.bf16 %v14585_v5, %v17785_v22  ;;  %v7581_v46 = vadd.bf16 %v14548_v23, %v7399_v32 }
 0x692   : > { %v15005_v53 = vpop.f32.mrb[56].mxu0  ;;  %v15011_v7 = vpop.f32.mrb[56].mxu1  ;;  %v7576_v33 = vadd.bf16 %v14585_v5, %v17786_v57  ;;  %v7580_v57 = vadd.bf16 %v14585_v5, %v7398_v42 }
 0x693   : > { %v15013_v14 = vpop.f32.mrb[57].mxu0  ;;  %v15015_v43 = vpop.f32.mrb[57].mxu1  ;;  %v7700_v10 = vmax.bf16 %v16678_v52, %v7572_v34  ;;  %v7574_v34 = vadd.bf16 %v14576_v2, %v7392_v31 }
 0x694   : > { %v15017_v9 = vpop.f32.mrb[58].mxu0  ;;  %v15022_v38 = vpop.f32.mrb[58].mxu1  ;;  %v7704_v3 = vmax.bf16 %v16678_v52, %v7576_v33  ;;  %v7578_v33 = vadd.bf16 %v14576_v2, %v7396_v18 }
 0x695   : > { %v7400_v60 = vpack.c.bf16 %v15017_v9, %v15005_v53  ;;  %v15024_v6 = vpop.f32.mrb[59].mxu0  ;;  %v7402_v15 = vpack.c.bf16 %v15022_v38, %v15011_v7  ;;  %v15031_v41 = vpop.f32.mrb[59].mxu1  ;;  %v7702_v51 = vmax.bf16 %v16678_v52, %v7574_v34  ;;  %v7709_v34 = vmax.bf16 %v16678_v52, %v7581_v46 }
 0x696   : > { %v7401_v39 = vpack.c.bf16 %v15024_v6, %v15013_v14  ;;  %v7403_v49 = vpack.c.bf16 %v15031_v41, %v15015_v43  ;;  %v7706_v55 = vmax.bf16 %v16678_v52, %v7578_v33  ;;  %v7708_v43 = vmax.bf16 %v16678_v52, %v7580_v57 }
 0x697   : > { %8143 = vmatmul.mubr.bf16.gmra.mrb[164].mxu0 %v7690_v63  ;;  %8432 = vmatmul.mubr.bf16.gmra.mrb[164].mxu1 %v7692_v37  ;;  %v7699_v37 = vmax.bf16 %v16678_v52, %v7571_v11  ;;  %v7575_v11 = vadd.bf16 %v14539_v21, %v7393_v56  ;;  %v7582_v33 = vadd.bf16 %v14576_v2, %v7400_v60 }
 0x698   : > { %8150 = vmatprep.mubr.bf16.mxu0 %v7695_v30  ;;  %8439 = vmatprep.mubr.bf16.mxu1 %v7697_v17  ;;  %v7701_v17 = vmax.bf16 %v16678_v52, %v7573_v25  ;;  %v7585_v36 = vadd.bf16 %v14548_v23, %v7403_v49  ;;  %v7584_v57 = vadd.bf16 %v14585_v5, %v7402_v15 }
 0x699   : > { %v7710_v38 = vmax.bf16 %v16678_v52, %v7582_v33 }
 0x69a   : > { %v15049_v63 = vpop.f32.mrb[60].mxu0  ;;  %v15055_v40 = vpop.f32.mrb[60].mxu1 }
 0x69b   : > { %v15057_v59 = vpop.f32.mrb[61].mxu0  ;;  %v15059_v16 = vpop.f32.mrb[61].mxu1 }
 0x69c   : > { %v15061_v27 = vpop.f32.mrb[62].mxu0  ;;  %v15066_v44 = vpop.f32.mrb[62].mxu1 }
 0x69d   : > { %v15068_v24 = vpop.f32.mrb[63].mxu0  ;;  %v15075_v62 = vpop.f32.mrb[63].mxu1  ;;  %v17787_v33 = vpack.c.bf16 %v15061_v27, %v15049_v63 }
 0x69e   : > { %v7405_v45 = vpack.c.bf16 %v15068_v24, %v15057_v59  ;;  %v7407_v30 = vpack.c.bf16 %v15075_v62, %v15059_v16  ;;  %v7712_v16 = vmax.bf16 %v16678_v52, %v7584_v57 }
 0x69f   : > { %8151 = vmatmul.mubr.bf16.gmra.mrb[168].mxu0 %v7694_v48  ;;  %8440 = vmatmul.mubr.bf16.gmra.mrb[168].mxu1 %v7696_v4  ;;  %v7586_v57 = vadd.bf16 %v14576_v2, %v17787_v33 }
 0x6a0   : > { %8158 = vmatprep.mubr.bf16.mxu0 %v7699_v37  ;;  %8447 = vmatprep.mubr.bf16.mxu1 %v7701_v17  ;;  %v7703_v37 = vmax.bf16 %v16678_v52, %v7575_v11  ;;  %v7579_v11 = vadd.bf16 %v14539_v21, %v7397_v19  ;;  %v7589_v53 = vadd.bf16 %v14548_v23, %v7407_v30 }
 0x6a2   : > { %v15093_v48 = vpop.f32.mrb[64].mxu0  ;;  %v15099_v61 = vpop.f32.mrb[64].mxu1 }
 0x6a3   : > { %v15101_v25 = vpop.f32.mrb[65].mxu0  ;;  %v15103_v4 = vpop.f32.mrb[65].mxu1 }
 0x6a4   : > { %v15105_v29 = vpop.f32.mrb[66].mxu0  ;;  %v15110_v47 = vpop.f32.mrb[66].mxu1 }
 0x6a5   : > { %v7408_v12 = vpack.c.bf16 %v15105_v29, %v15093_v48  ;;  %v15112_v56 = vpop.f32.mrb[67].mxu0  ;;  %v15119_v22 = vpop.f32.mrb[67].mxu1 }
 0x6a6   : > { %v7409_v20 = vpack.c.bf16 %v15112_v56, %v15101_v25  ;;  %v7411_v17 = vpack.c.bf16 %v15119_v22, %v15103_v4 }
 0x6a7   : > { %8159 = vmatmul.mubr.bf16.gmra.mrb[172].mxu0 %v7698_v26  ;;  %8448 = vmatmul.mubr.bf16.gmra.mrb[172].mxu1 %v7700_v10 }
 0x6a8   : > { %8166 = vmatprep.mubr.bf16.mxu0 %v7703_v37  ;;  %8455 = vmatprep.mubr.bf16.mxu1 %v7705_v8  ;;  %v7707_v37 = vmax.bf16 %v16678_v52, %v7579_v11  ;;  %v7583_v11 = vadd.bf16 %v14539_v21, %v7401_v39  ;;  %v7593_v63 = vadd.bf16 %v14548_v23, %v7411_v17 }
 0x6aa   : > { %v15137_v26 = vpop.f32.mrb[68].mxu0  ;;  %v15143_v58 = vpop.f32.mrb[68].mxu1  ;;  %v7721_v33 = vmax.bf16 %v16678_v52, %v7593_v63 }
 0x6ab   : > { %v15145_v31 = vpop.f32.mrb[69].mxu0  ;;  %v15147_v0 = vpop.f32.mrb[69].mxu1 }
 0x6ac   : > { %v15149_v54 = vpop.f32.mrb[70].mxu0  ;;  %v15154_v13 = vpop.f32.mrb[70].mxu1 }
 0x6ad   : > { %v7412_v28 = vpack.c.bf16 %v15149_v54, %v15137_v26  ;;  %v15156_v19 = vpop.f32.mrb[71].mxu0  ;;  %v7414_v35 = vpack.c.bf16 %v15154_v13, %v15143_v58  ;;  %v15163_v10 = vpop.f32.mrb[71].mxu1 }
 0x6ae   : > { %v7413_v32 = vpack.c.bf16 %v15156_v19, %v15145_v31  ;;  %v7415_v8 = vpack.c.bf16 %v15163_v10, %v15147_v0 }
 0x6af   : > { %8167 = vmatmul.mubr.bf16.gmra.mrb[176].mxu0 %v7702_v51  ;;  %8456 = vmatmul.mubr.bf16.gmra.mrb[176].mxu1 %v7704_v3  ;;  %v7711_v3 = vmax.bf16 %v16678_v52, %v7583_v11  ;;  %v7587_v11 = vadd.bf16 %v14539_v21, %v7405_v45  ;;  %v17788_v45 = vpack.c.bf16 %v15066_v44, %v15055_v40 }
 0x6b0   : > { %8174 = vmatprep.mubr.bf16.mxu0 %v7707_v37  ;;  %8463 = vmatprep.mubr.bf16.mxu1 %v7709_v34  ;;  %v7713_v34 = vmax.bf16 %v16678_v52, %v7585_v36  ;;  %v7714_v44 = vmax.bf16 %v16678_v52, %v7586_v57  ;;  %v17789_v57 = vpack.c.bf16 %v15110_v47, %v15099_v61 }
 0x6b1   : > { %v7588_v15 = vadd.bf16 %v14585_v5, %v17788_v45  ;;  %v7597_v48 = vadd.bf16 %v14548_v23, %v7415_v8 }
 0x6b2   : > { %v15181_v51 = vpop.f32.mrb[72].mxu0  ;;  %v15187_v1 = vpop.f32.mrb[72].mxu1  ;;  %v7592_v22 = vadd.bf16 %v14585_v5, %v17789_v57  ;;  %v7596_v57 = vadd.bf16 %v14585_v5, %v7414_v35 }
 0x6b3   : > { %v15189_v18 = vpop.f32.mrb[73].mxu0  ;;  %v15191_v46 = vpop.f32.mrb[73].mxu1  ;;  %v7716_v4 = vmax.bf16 %v16678_v52, %v7588_v15  ;;  %v7590_v15 = vadd.bf16 %v14576_v2, %v7408_v12 }
 0x6b4   : > { %v15193_v50 = vpop.f32.mrb[74].mxu0  ;;  %v15198_v14 = vpop.f32.mrb[74].mxu1  ;;  %v7720_v0 = vmax.bf16 %v16678_v52, %v7592_v22  ;;  %v7594_v22 = vadd.bf16 %v14576_v2, %v7412_v28 }
 0x6b5   : > { %v7416_v42 = vpack.c.bf16 %v15193_v50, %v15181_v51  ;;  %v15200_v6 = vpop.f32.mrb[75].mxu0  ;;  %v7418_v39 = vpack.c.bf16 %v15198_v14, %v15187_v1  ;;  %v15207_v49 = vpop.f32.mrb[75].mxu1  ;;  %v7718_v47 = vmax.bf16 %v16678_v52, %v7590_v15  ;;  %v7725_v15 = vmax.bf16 %v16678_v52, %v7597_v48 }
 0x6b6   : > { %v7417_v41 = vpack.c.bf16 %v15200_v6, %v15189_v18  ;;  %v7419_v37 = vpack.c.bf16 %v15207_v49, %v15191_v46  ;;  %v7722_v13 = vmax.bf16 %v16678_v52, %v7594_v22  ;;  %v7724_v46 = vmax.bf16 %v16678_v52, %v7596_v57 }
 0x6b7   : > { %8175 = vmatmul.mubr.bf16.gmra.mrb[180].mxu0 %v7706_v55  ;;  %8464 = vmatmul.mubr.bf16.gmra.mrb[180].mxu1 %v7708_v43  ;;  %v7715_v43 = vmax.bf16 %v16678_v52, %v7587_v11  ;;  %v7591_v11 = vadd.bf16 %v14539_v21, %v7409_v20  ;;  %v7598_v22 = vadd.bf16 %v14576_v2, %v7416_v42 }
 0x6b8   : > { %8182 = vmatprep.mubr.bf16.mxu0 %v7711_v3  ;;  %8471 = vmatprep.mubr.bf16.mxu1 %v7713_v34  ;;  %v7717_v34 = vmax.bf16 %v16678_v52, %v7589_v53  ;;  %v7601_v26 = vadd.bf16 %v14548_v23, %v7419_v37  ;;  %v7600_v57 = vadd.bf16 %v14585_v5, %v7418_v39 }
 0x6b9   : > { %v7726_v14 = vmax.bf16 %v16678_v52, %v7598_v22 }
 0x6ba   : > { %v15225_v55 = vpop.f32.mrb[76].mxu0  ;;  %v15231_v9 = vpop.f32.mrb[76].mxu1 }
 0x6bb   : > { %v15233_v60 = vpop.f32.mrb[77].mxu0  ;;  %v15235_v36 = vpop.f32.mrb[77].mxu1 }
 0x6bc   : > { %v15237_v7 = vpop.f32.mrb[78].mxu0  ;;  %v15242_v59 = vpop.f32.mrb[78].mxu1 }
 0x6bd   : > { %v15244_v24 = vpop.f32.mrb[79].mxu0  ;;  %v15251_v30 = vpop.f32.mrb[79].mxu1  ;;  %v17790_v22 = vpack.c.bf16 %v15237_v7, %v15225_v55 }
 0x6be   : > { %v7421_v62 = vpack.c.bf16 %v15244_v24, %v15233_v60  ;;  %v7423_v3 = vpack.c.bf16 %v15251_v30, %v15235_v36  ;;  %v7728_v36 = vmax.bf16 %v16678_v52, %v7600_v57 }
 0x6bf   : > { %8183 = vmatmul.mubr.bf16.gmra.mrb[184].mxu0 %v7710_v38  ;;  %8472 = vmatmul.mubr.bf16.gmra.mrb[184].mxu1 %v7712_v16  ;;  %v7602_v57 = vadd.bf16 %v14576_v2, %v17790_v22 }
 0x6c0   : > { %8190 = vmatprep.mubr.bf16.mxu0 %v7715_v43  ;;  %8479 = vmatprep.mubr.bf16.mxu1 %v7717_v34  ;;  %v7719_v43 = vmax.bf16 %v16678_v52, %v7591_v11  ;;  %v7595_v11 = vadd.bf16 %v14539_v21, %v7413_v32  ;;  %v7605_v51 = vadd.bf16 %v14548_v23, %v7423_v3 }
 0x6c2   : > { %v15269_v38 = vpop.f32.mrb[80].mxu0  ;;  %v15275_v27 = vpop.f32.mrb[80].mxu1 }
 0x6c3   : > { %v15277_v53 = vpop.f32.mrb[81].mxu0  ;;  %v15279_v16 = vpop.f32.mrb[81].mxu1 }
 0x6c4   : > { %v15281_v40 = vpop.f32.mrb[82].mxu0  ;;  %v15286_v56 = vpop.f32.mrb[82].mxu1 }
 0x6c5   : > { %v7424_v25 = vpack.c.bf16 %v15281_v40, %v15269_v38  ;;  %v15288_v20 = vpop.f32.mrb[83].mxu0  ;;  %v15295_v45 = vpop.f32.mrb[83].mxu1 }
 0x6c6   : > { %v7425_v17 = vpack.c.bf16 %v15288_v20, %v15277_v53  ;;  %v7427_v34 = vpack.c.bf16 %v15295_v45, %v15279_v16 }
 0x6c7   : > { %8191 = vmatmul.mubr.bf16.gmra.mrb[188].mxu0 %v7714_v44  ;;  %8480 = vmatmul.mubr.bf16.gmra.mrb[188].mxu1 %v7716_v4 }
 0x6c8   : > { %8198 = vmatprep.mubr.bf16.mxu0 %v7719_v43  ;;  %8487 = vmatprep.mubr.bf16.mxu1 %v7721_v33  ;;  %v7723_v43 = vmax.bf16 %v16678_v52, %v7595_v11  ;;  %v7599_v11 = vadd.bf16 %v14539_v21, %v7417_v41  ;;  %v7609_v55 = vadd.bf16 %v14548_v23, %v7427_v34 }
 0x6ca   : > { %v15313_v44 = vpop.f32.mrb[84].mxu0  ;;  %v15319_v29 = vpop.f32.mrb[84].mxu1  ;;  %v7737_v22 = vmax.bf16 %v16678_v52, %v7609_v55 }
 0x6cb   : > { %v15321_v12 = vpop.f32.mrb[85].mxu0  ;;  %v15323_v63 = vpop.f32.mrb[85].mxu1 }
 0x6cc   : > { %v15325_v61 = vpop.f32.mrb[86].mxu0  ;;  %v15330_v19 = vpop.f32.mrb[86].mxu1 }
 0x6cd   : > { %v7428_v31 = vpack.c.bf16 %v15325_v61, %v15313_v44  ;;  %v15332_v32 = vpop.f32.mrb[87].mxu0  ;;  %v7430_v10 = vpack.c.bf16 %v15330_v19, %v15319_v29  ;;  %v15339_v4 = vpop.f32.mrb[87].mxu1 }
 0x6ce   : > { %v7429_v8 = vpack.c.bf16 %v15332_v32, %v15321_v12  ;;  %v7431_v33 = vpack.c.bf16 %v15339_v4, %v15323_v63 }
 0x6cf   : > { %8199 = vmatmul.mubr.bf16.gmra.mrb[192].mxu0 %v7718_v47  ;;  %8488 = vmatmul.mubr.bf16.gmra.mrb[192].mxu1 %v7720_v0  ;;  %v7727_v0 = vmax.bf16 %v16678_v52, %v7599_v11  ;;  %v7603_v11 = vadd.bf16 %v14539_v21, %v7421_v62  ;;  %v17791_v62 = vpack.c.bf16 %v15242_v59, %v15231_v9 }
 0x6d0   : > { %8206 = vmatprep.mubr.bf16.mxu0 %v7723_v43  ;;  %8495 = vmatprep.mubr.bf16.mxu1 %v7725_v15  ;;  %v7729_v15 = vmax.bf16 %v16678_v52, %v7601_v26  ;;  %v7730_v59 = vmax.bf16 %v16678_v52, %v7602_v57  ;;  %v17792_v57 = vpack.c.bf16 %v15286_v56, %v15275_v27 }
 0x6d1   : > { %v7604_v39 = vadd.bf16 %v14585_v5, %v17791_v62  ;;  %v7613_v38 = vadd.bf16 %v14548_v23, %v7431_v33 }
 0x6d2   : > { %v15357_v47 = vpop.f32.mrb[88].mxu0  ;;  %v15363_v54 = vpop.f32.mrb[88].mxu1  ;;  %v7608_v45 = vadd.bf16 %v14585_v5, %v17792_v57  ;;  %v7612_v57 = vadd.bf16 %v14585_v5, %v7430_v10 }
 0x6d3   : > { %v15365_v28 = vpop.f32.mrb[89].mxu0  ;;  %v15367_v48 = vpop.f32.mrb[89].mxu1  ;;  %v7732_v16 = vmax.bf16 %v16678_v52, %v7604_v39  ;;  %v7606_v39 = vadd.bf16 %v14576_v2, %v7424_v25 }
 0x6d4   : > { %v15369_v58 = vpop.f32.mrb[90].mxu0  ;;  %v15374_v18 = vpop.f32.mrb[90].mxu1  ;;  %v7736_v63 = vmax.bf16 %v16678_v52, %v7608_v45  ;;  %v7610_v45 = vadd.bf16 %v14576_v2, %v7428_v31 }
 0x6d5   : > { %v7432_v35 = vpack.c.bf16 %v15369_v58, %v15357_v47  ;;  %v15376_v6 = vpop.f32.mrb[91].mxu0  ;;  %v7434_v41 = vpack.c.bf16 %v15374_v18, %v15363_v54  ;;  %v15383_v37 = vpop.f32.mrb[91].mxu1  ;;  %v7734_v56 = vmax.bf16 %v16678_v52, %v7606_v39  ;;  %v7741_v39 = vmax.bf16 %v16678_v52, %v7613_v38 }
 0x6d6   : > { %v7433_v49 = vpack.c.bf16 %v15376_v6, %v15365_v28  ;;  %v7435_v43 = vpack.c.bf16 %v15383_v37, %v15367_v48  ;;  %v7738_v19 = vmax.bf16 %v16678_v52, %v7610_v45  ;;  %v7740_v48 = vmax.bf16 %v16678_v52, %v7612_v57 }
 0x6d7   : > { %8207 = vmatmul.mubr.bf16.gmra.mrb[196].mxu0 %v7722_v13  ;;  %8496 = vmatmul.mubr.bf16.gmra.mrb[196].mxu1 %v7724_v46  ;;  %v7731_v46 = vmax.bf16 %v16678_v52, %v7603_v11  ;;  %v7607_v11 = vadd.bf16 %v14539_v21, %v7425_v17  ;;  %v7614_v45 = vadd.bf16 %v14576_v2, %v7432_v35 }
 0x6d8   : > { %8214 = vmatprep.mubr.bf16.mxu0 %v7727_v0  ;;  %8503 = vmatprep.mubr.bf16.mxu1 %v7729_v15  ;;  %v7733_v15 = vmax.bf16 %v16678_v52, %v7605_v51  ;;  %v7617_v44 = vadd.bf16 %v14548_v23, %v7435_v43  ;;  %v7616_v57 = vadd.bf16 %v14585_v5, %v7434_v41 }
 0x6d9   : > { %v7742_v18 = vmax.bf16 %v16678_v52, %v7614_v45 }
 0x6da   : > { %v15401_v13 = vpop.f32.mrb[92].mxu0  ;;  %v15407_v50 = vpop.f32.mrb[92].mxu1 }
 0x6db   : > { %v15409_v42 = vpop.f32.mrb[93].mxu0  ;;  %v15411_v26 = vpop.f32.mrb[93].mxu1 }
 0x6dc   : > { %v15413_v1 = vpop.f32.mrb[94].mxu0  ;;  %v15418_v60 = vpop.f32.mrb[94].mxu1 }
 0x6dd   : > { %v15420_v24 = vpop.f32.mrb[95].mxu0  ;;  %v15427_v3 = vpop.f32.mrb[95].mxu1  ;;  %v17793_v45 = vpack.c.bf16 %v15413_v1, %v15401_v13 }
 0x6de   : > { %v7437_v30 = vpack.c.bf16 %v15420_v24, %v15409_v42  ;;  %v7439_v0 = vpack.c.bf16 %v15427_v3, %v15411_v26  ;;  %v7744_v26 = vmax.bf16 %v16678_v52, %v7616_v57 }
 0x6df   : > { %8215 = vmatmul.mubr.bf16.gmra.mrb[200].mxu0 %v7726_v14  ;;  %8504 = vmatmul.mubr.bf16.gmra.mrb[200].mxu1 %v7728_v36  ;;  %v7618_v57 = vadd.bf16 %v14576_v2, %v17793_v45 }
 0x6e0   : > { %8222 = vmatprep.mubr.bf16.mxu0 %v7731_v46  ;;  %8511 = vmatprep.mubr.bf16.mxu1 %v7733_v15  ;;  %v7735_v46 = vmax.bf16 %v16678_v52, %v7607_v11  ;;  %v7611_v11 = vadd.bf16 %v14539_v21, %v7429_v8  ;;  %v7621_v47 = vadd.bf16 %v14548_v23, %v7439_v0 }
 0x6e2   : > { %v15445_v14 = vpop.f32.mrb[96].mxu0  ;;  %v15451_v7 = vpop.f32.mrb[96].mxu1 }
 0x6e3   : > { %v15453_v51 = vpop.f32.mrb[97].mxu0  ;;  %v15455_v36 = vpop.f32.mrb[97].mxu1 }
 0x6e4   : > { %v15457_v9 = vpop.f32.mrb[98].mxu0  ;;  %v15462_v20 = vpop.f32.mrb[98].mxu1 }
 0x6e5   : > { %v7440_v53 = vpack.c.bf16 %v15457_v9, %v15445_v14  ;;  %v15464_v17 = vpop.f32.mrb[99].mxu0  ;;  %v15471_v62 = vpop.f32.mrb[99].mxu1 }
 0x6e6   : > { %v7441_v34 = vpack.c.bf16 %v15464_v17, %v15453_v51  ;;  %v7443_v15 = vpack.c.bf16 %v15471_v62, %v15455_v36 }
 0x6e7   : > { %8223 = vmatmul.mubr.bf16.gmra.mrb[204].mxu0 %v7730_v59  ;;  %8512 = vmatmul.mubr.bf16.gmra.mrb[204].mxu1 %v7732_v16 }
 0x6e8   : > { %8230 = vmatprep.mubr.bf16.mxu0 %v7735_v46  ;;  %8519 = vmatprep.mubr.bf16.mxu1 %v7737_v22  ;;  %v7739_v46 = vmax.bf16 %v16678_v52, %v7611_v11  ;;  %v7615_v11 = vadd.bf16 %v14539_v21, %v7433_v49  ;;  %v7625_v13 = vadd.bf16 %v14548_v23, %v7443_v15 }
 0x6ea   : > { %v15489_v59 = vpop.f32.mrb[100].mxu0  ;;  %v15495_v40 = vpop.f32.mrb[100].mxu1  ;;  %v7753_v45 = vmax.bf16 %v16678_v52, %v7625_v13 }
 0x6eb   : > { %v15497_v25 = vpop.f32.mrb[101].mxu0  ;;  %v15499_v55 = vpop.f32.mrb[101].mxu1 }
 0x6ec   : > { %v15501_v27 = vpop.f32.mrb[102].mxu0  ;;  %v15506_v32 = vpop.f32.mrb[102].mxu1 }
 0x6ed   : > { %v7444_v12 = vpack.c.bf16 %v15501_v27, %v15489_v59  ;;  %v15508_v8 = vpop.f32.mrb[103].mxu0  ;;  %v7446_v4 = vpack.c.bf16 %v15506_v32, %v15495_v40  ;;  %v15515_v16 = vpop.f32.mrb[103].mxu1 }
 0x6ee   : > { %v7445_v33 = vpack.c.bf16 %v15508_v8, %v15497_v25  ;;  %v7447_v22 = vpack.c.bf16 %v15515_v16, %v15499_v55 }
 0x6ef   : > { %8231 = vmatmul.mubr.bf16.gmra.mrb[208].mxu0 %v7734_v56  ;;  %8520 = vmatmul.mubr.bf16.gmra.mrb[208].mxu1 %v7736_v63  ;;  %v7743_v63 = vmax.bf16 %v16678_v52, %v7615_v11  ;;  %v7619_v11 = vadd.bf16 %v14539_v21, %v7437_v30  ;;  %v17794_v30 = vpack.c.bf16 %v15418_v60, %v15407_v50 }
 0x6f0   : > { %8238 = vmatprep.mubr.bf16.mxu0 %v7739_v46  ;;  %8527 = vmatprep.mubr.bf16.mxu1 %v7741_v39  ;;  %v7745_v39 = vmax.bf16 %v16678_v52, %v7617_v44  ;;  %v7746_v60 = vmax.bf16 %v16678_v52, %v7618_v57  ;;  %v17795_v57 = vpack.c.bf16 %v15462_v20, %v15451_v7 }
 0x6f1   : > { %v7620_v41 = vadd.bf16 %v14585_v5, %v17794_v30  ;;  %v7629_v14 = vadd.bf16 %v14548_v23, %v7447_v22 }
 0x6f2   : > { %v15533_v56 = vpop.f32.mrb[104].mxu0  ;;  %v15539_v61 = vpop.f32.mrb[104].mxu1  ;;  %v7624_v62 = vadd.bf16 %v14585_v5, %v17795_v57  ;;  %v7628_v57 = vadd.bf16 %v14585_v5, %v7446_v4 }
 0x6f3   : > { %v15541_v31 = vpop.f32.mrb[105].mxu0  ;;  %v15543_v38 = vpop.f32.mrb[105].mxu1  ;;  %v7748_v36 = vmax.bf16 %v16678_v52, %v7620_v41  ;;  %v7622_v41 = vadd.bf16 %v14576_v2, %v7440_v53 }
 0x6f4   : > { %v15545_v29 = vpop.f32.mrb[106].mxu0  ;;  %v15550_v28 = vpop.f32.mrb[106].mxu1  ;;  %v7752_v55 = vmax.bf16 %v16678_v52, %v7624_v62  ;;  %v7626_v62 = vadd.bf16 %v14576_v2, %v7444_v12 }
 0x6f5   : > { %v7448_v10 = vpack.c.bf16 %v15545_v29, %v15533_v56  ;;  %v15552_v6 = vpop.f32.mrb[107].mxu0  ;;  %v7450_v49 = vpack.c.bf16 %v15550_v28, %v15539_v61  ;;  %v15559_v43 = vpop.f32.mrb[107].mxu1  ;;  %v7750_v20 = vmax.bf16 %v16678_v52, %v7622_v41  ;;  %v7757_v41 = vmax.bf16 %v16678_v52, %v7629_v14 }
 0x6f6   : > { %v7449_v37 = vpack.c.bf16 %v15552_v6, %v15541_v31  ;;  %v7451_v46 = vpack.c.bf16 %v15559_v43, %v15543_v38  ;;  %v7754_v32 = vmax.bf16 %v16678_v52, %v7626_v62  ;;  %v7756_v38 = vmax.bf16 %v16678_v52, %v7628_v57 }
 0x6f7   : > { %8239 = vmatmul.mubr.bf16.gmra.mrb[212].mxu0 %v7738_v19  ;;  %8528 = vmatmul.mubr.bf16.gmra.mrb[212].mxu1 %v7740_v48  ;;  %v7747_v48 = vmax.bf16 %v16678_v52, %v7619_v11  ;;  %v7623_v11 = vadd.bf16 %v14539_v21, %v7441_v34  ;;  %v7630_v62 = vadd.bf16 %v14576_v2, %v7448_v10 }
 0x6f8   : > { %8246 = vmatprep.mubr.bf16.mxu0 %v7743_v63  ;;  %8535 = vmatprep.mubr.bf16.mxu1 %v7745_v39  ;;  %v7749_v39 = vmax.bf16 %v16678_v52, %v7621_v47  ;;  %v7633_v59 = vadd.bf16 %v14548_v23, %v7451_v46  ;;  %v7632_v57 = vadd.bf16 %v14585_v5, %v7450_v49 }
 0x6f9   : > { %v7758_v49 = vmax.bf16 %v16678_v52, %v7630_v62 }
 0x6fa   : > { %v15577_v19 = vpop.f32.mrb[108].mxu0  ;;  %v15583_v58 = vpop.f32.mrb[108].mxu1 }
 0x6fb   : > { %v15585_v35 = vpop.f32.mrb[109].mxu0  ;;  %v15587_v44 = vpop.f32.mrb[109].mxu1 }
 0x6fc   : > { %v15589_v54 = vpop.f32.mrb[110].mxu0  ;;  %v15594_v42 = vpop.f32.mrb[110].mxu1 }
 0x6fd   : > { %v15596_v24 = vpop.f32.mrb[111].mxu0  ;;  %v15603_v0 = vpop.f32.mrb[111].mxu1  ;;  %v17796_v62 = vpack.c.bf16 %v15589_v54, %v15577_v19  ;;  %v15801_v54 = vstv %s8616_s22 }
 0x6fe   : > { %v7453_v3 = vpack.c.bf16 %v15596_v24, %v15585_v35  ;;  %v7455_v63 = vpack.c.bf16 %v15603_v0, %v15587_v44  ;;  %v7760_v44 = vmax.bf16 %v16678_v52, %v7632_v57  ;;  %v17797_v0 = vpack.c.bf16 %v15594_v42, %v15583_v58 }
 0x6ff   : > { %8247 = vmatmul.mubr.bf16.gmra.mrb[216].mxu0 %v7742_v18  ;;  %8536 = vmatmul.mubr.bf16.gmra.mrb[216].mxu1 %v7744_v26  ;;  %v7634_v57 = vadd.bf16 %v14576_v2, %v17796_v62 }
 0x700   : > { %8254 = vmatprep.mubr.bf16.mxu0 %v7747_v48  ;;  %8543 = vmatprep.mubr.bf16.mxu1 %v7749_v39  ;;  %v7751_v48 = vmax.bf16 %v16678_v52, %v7623_v11  ;;  %v7627_v11 = vadd.bf16 %v14539_v21, %v7445_v33  ;;  %v7637_v56 = vadd.bf16 %v14548_v23, %v7455_v63 }
 0x701   : > { %v7762_v42 = vmax.bf16 %v16678_v52, %v7634_v57 }
 0x702   : > { %v15621_v18 = vpop.f32.mrb[112].mxu0  ;;  %v15627_v1 = vpop.f32.mrb[112].mxu1 }
 0x703   : > { %v15629_v47 = vpop.f32.mrb[113].mxu0  ;;  %v15631_v26 = vpop.f32.mrb[113].mxu1 }
 0x704   : > { %v15633_v50 = vpop.f32.mrb[114].mxu0  ;;  %v15638_v17 = vpop.f32.mrb[114].mxu1 }
 0x705   : > { %v7456_v51 = vpack.c.bf16 %v15633_v50, %v15621_v18  ;;  %v15640_v34 = vpop.f32.mrb[115].mxu0  ;;  %v15647_v30 = vpop.f32.mrb[115].mxu1 }
 0x706   : > { %v7457_v15 = vpack.c.bf16 %v15640_v34, %v15629_v47  ;;  %v7459_v39 = vpack.c.bf16 %v15647_v30, %v15631_v26 }
 0x707   : > { %8255 = vmatmul.mubr.bf16.gmra.mrb[220].mxu0 %v7746_v60  ;;  %8544 = vmatmul.mubr.bf16.gmra.mrb[220].mxu1 %v7748_v36 }
 0x708   : > { %8262 = vmatprep.mubr.bf16.mxu0 %v7751_v48  ;;  %8551 = vmatprep.mubr.bf16.mxu1 %v7753_v45  ;;  %v7755_v48 = vmax.bf16 %v16678_v52, %v7627_v11  ;;  %v7631_v11 = vadd.bf16 %v14539_v21, %v7449_v37 }
 0x70a   : > { %v15665_v60 = vpop.f32.mrb[116].mxu0  ;;  %v15671_v9 = vpop.f32.mrb[116].mxu1 }
 0x70b   : > { %v15673_v53 = vpop.f32.mrb[117].mxu0  ;;  %v15675_v13 = vpop.f32.mrb[117].mxu1 }
 0x70c   : > { %v15677_v7 = vpop.f32.mrb[118].mxu0  ;;  %v15682_v8 = vpop.f32.mrb[118].mxu1 }
 0x70d   : > { %v7460_v25 = vpack.c.bf16 %v15677_v7, %v15665_v60  ;;  %v15684_v33 = vpop.f32.mrb[119].mxu0  ;;  %v7462_v16 = vpack.c.bf16 %v15682_v8, %v15671_v9  ;;  %v15691_v36 = vpop.f32.mrb[119].mxu1 }
 0x70e   : > { %v7461_v22 = vpack.c.bf16 %v15684_v33, %v15673_v53  ;;  %v7463_v45 = vpack.c.bf16 %v15691_v36, %v15675_v13 }
 0x70f   : > { %8263 = vmatmul.mubr.bf16.gmra.mrb[224].mxu0 %v7750_v20  ;;  %8552 = vmatmul.mubr.bf16.gmra.mrb[224].mxu1 %v7752_v55  ;;  %v7759_v55 = vmax.bf16 %v16678_v52, %v7631_v11  ;;  %v7635_v11 = vadd.bf16 %v14539_v21, %v7453_v3 }
 0x710   : > { %8270 = vmatprep.mubr.bf16.mxu0 %v7755_v48  ;;  %8559 = vmatprep.mubr.bf16.mxu1 %v7757_v41  ;;  %v7761_v41 = vmax.bf16 %v16678_v52, %v7633_v59  ;;  %v7643_v18 = vadd.bf16 %v14539_v21, %v7461_v22 }
 0x712   : > { %v15709_v20 = vpop.f32.mrb[120].mxu0  ;;  %v15715_v27 = vpop.f32.mrb[120].mxu1 }
 0x713   : > { %v15717_v12 = vpop.f32.mrb[121].mxu0  ;;  %v15719_v14 = vpop.f32.mrb[121].mxu1 }
 0x714   : > { %v15721_v40 = vpop.f32.mrb[122].mxu0  ;;  %v15726_v31 = vpop.f32.mrb[122].mxu1 }
 0x715   : > { %v7464_v4 = vpack.c.bf16 %v15721_v40, %v15709_v20  ;;  %v15728_v6 = vpop.f32.mrb[123].mxu0  ;;  %v7466_v37 = vpack.c.bf16 %v15726_v31, %v15715_v27  ;;  %v15735_v46 = vpop.f32.mrb[123].mxu1 }
 0x716   : > { %v7465_v43 = vpack.c.bf16 %v15728_v6, %v15717_v12  ;;  %v7467_v48 = vpack.c.bf16 %v15735_v46, %v15719_v14 }
 0x717   : > { %8271 = vmatmul.mubr.bf16.gmra.mrb[228].mxu0 %v7754_v32  ;;  %8560 = vmatmul.mubr.bf16.gmra.mrb[228].mxu1 %v7756_v38  ;;  %v7763_v38 = vmax.bf16 %v16678_v52, %v7635_v11  ;;  %v7636_v11 = vadd.bf16 %v14585_v5, %v17797_v0  ;;  %v15804_v0 = vstv %s9422_s23 }
 0x718   : > { %8278 = vmatprep.mubr.bf16.mxu0 %v7759_v55  ;;  %8567 = vmatprep.mubr.bf16.mxu1 %v7761_v41  ;;  %v7765_v41 = vmax.bf16 %v16678_v52, %v7637_v56  ;;  %v15809_v55 = vstv %s9421_s26  ;;  %v7649_v60 = vadd.bf16 %v14548_v23, %v7467_v48 }
 0x71a   : > { %v15753_v32 = vpop.f32.mrb[124].mxu0  ;;  %v15759_v29 = vpop.f32.mrb[124].mxu1 }
 0x71b   : > { %v15761_v10 = vpop.f32.mrb[125].mxu0  ;;  %v15763_v61 = vpop.f32.mrb[125].mxu1 }
 0x71c   : > { %v15765_v28 = vpop.f32.mrb[126].mxu0  ;;  %v15770_v24 = vpop.f32.mrb[126].mxu1 }
 0x71d   : > { %v15772_v3 = vpop.f32.mrb[127].mxu0  ;;  %v15779_v59 = vpop.f32.mrb[127].mxu1 }
 0x71e   : > { %v7469_v63 = vpack.c.bf16 %v15772_v3, %v15761_v10  ;;  %v17799_v20 = vpack.c.bf16 %v15779_v59, %v15763_v61 }
 0x71f   : > { %8279 = vmatmul.mubr.bf16.gmra.mrb[232].mxu0 %v7758_v49  ;;  %8568 = vmatmul.mubr.bf16.gmra.mrb[232].mxu1 %v7760_v44  ;;  %v7639_v49 = vadd.bf16 %v14539_v21, %v7457_v15  ;;  %v7641_v44 = vadd.bf16 %v14548_v23, %v7459_v39  ;;  %v7764_v15 = vmax.bf16 %v16678_v52, %v7636_v11 }
 0x720   : > { %8286 = vmatprep.mubr.bf16.mxu0 %v7763_v38  ;;  %8575 = vmatprep.mubr.bf16.mxu1 %v7765_v41  ;;  %v7638_v11 = vadd.bf16 %v14576_v2, %v7456_v51  ;;  %v7653_v40 = vadd.bf16 %v14548_v23, %v17799_v20 }
 0x721   : > { %v7767_v35 = vmax.bf16 %v16678_v52, %v7639_v49  ;;  %v17798_v49 = vpack.c.bf16 %v15638_v17, %v15627_v1 }
 0x722   : > { %v8072_v56 = vpop.f32.mrb[128].mxu0  ;;  %v8361_v19 = vpop.f32.mrb[128].mxu1 }
 0x723   : > { %v8074_v38 = vpop.f32.mrb[129].mxu0  ;;  %v8362_v41 = vadd.f32 %v8361_v19, %v8072_v56  ;;  %v8363_v62 = vpop.f32.mrb[129].mxu1  ;;  %v7769_v56 = vmax.bf16 %v16678_v52, %v7641_v44  ;;  %v7640_v44 = vadd.bf16 %v14585_v5, %v17798_v49 }
 0x724   : > { %v8075_v58 = vpop.f32.mrb[130].mxu0  ;;  %v8364_v47 = vpop.f32.mrb[130].mxu1  ;;  %v7645_v38 = vadd.bf16 %v14548_v23, %v7463_v45  ;;  %v7766_v62 = vmax.bf16 %v16678_v52, %v7638_v11 }
 0x725   : > { %v8077_v34 = vpop.f32.mrb[131].mxu0  ;;  %v8620_v26 = vadd.f32 %v15801_v54, %v8362_v41  ;;  %v8365_v30 = vadd.f32 %v8364_v47, %v8075_v58  ;;  %v8366_v39 = vpop.f32.mrb[131].mxu1  ;;  %v7768_v47 = vmax.bf16 %v16678_v52, %v7640_v44 }
 0x726   : > { %v7771_v34 = vmax.bf16 %v16678_v52, %v7643_v18  ;;  %v7642_v39 = vadd.bf16 %v14576_v2, %v7460_v25 }
 0x727   : > { %8287 = vmatmul.mubr.bf16.gmra.mrb[236].mxu0 %v7762_v42  ;;  %v8685_v57 = vmul.f32 %v15804_v0, %v8620_v26  ;;  %v8621_v19 = vadd.f32 %v15801_v54, %v8365_v30  ;;  %8576 = vmatmul.mubr.bf16.gmra.mrb[236].mxu1 %v7764_v15  ;;  %v7773_v15 = vmax.bf16 %v16678_v52, %v7645_v38 }
 0x728   : > { %8294 = vmatprep.mubr.bf16.mxu0 %v7767_v35  ;;  %8583 = vmatprep.mubr.bf16.mxu1 %v7769_v56  ;;  %v7644_v56 = vadd.bf16 %v14585_v5, %v7462_v16  ;;  %v7770_v6 = vmax.bf16 %v16678_v52, %v7642_v39 }
 0x729   : > { %v8750_v50 = vadd.f32 %v15809_v55, %v8685_v57  ;;  %v8686_v51 = vmul.f32 %v15804_v0, %v8621_v19  ;;  %v7647_v57 = vadd.bf16 %v14539_v21, %v7465_v43 }
 0x72a   : > { %v8080_v35 = vpop.f32.mrb[132].mxu0  ;;  %v8369_v41 = vpop.f32.mrb[132].mxu1  ;;  %v7772_v18 = vmax.bf16 %v16678_v52, %v7644_v56 }
 0x72b   : > { %v8082_v1 = vpop.f32.mrb[133].mxu0  ;;  %8815 = vst.msk [vmem:[%s15823_s28] sm:$0xff] %vm8814_vm1, %v8750_v50  ;;  %v8751_v17 = vadd.f32 %v15809_v55, %v8686_v51  ;;  %v8370_v53 = vadd.f32 %v8369_v41, %v8080_v35  ;;  %v8371_v33 = vpop.f32.mrb[133].mxu1  ;;  %v7775_v50 = vmax.bf16 %v16678_v52, %v7647_v57  ;;  %v7777_v51 = vmax.bf16 %v16678_v52, %v7649_v60 }
 0x72c   : > { %v8083_v22 = vpop.f32.mrb[134].mxu0  ;;  %v8372_v58 = vpop.f32.mrb[134].mxu1  ;;  %v7646_v41 = vadd.bf16 %v14576_v2, %v7464_v4  ;;  %v7648_v1 = vadd.bf16 %v14585_v5, %v7466_v37 }
 0x72d   : > { %v8085_v42 = vpop.f32.mrb[135].mxu0  ;;  %8816 = vst.msk [vmem:[%s15823_s28 + $0x8] sm:$0xff] %vm8814_vm1, %v8751_v17  ;;  %v8622_v13 = vadd.f32 %v15801_v54, %v8370_v53  ;;  %v8373_v36 = vadd.f32 %v8372_v58, %v8083_v22  ;;  %v8374_v45 = vpop.f32.mrb[135].mxu1  ;;  %v7651_v17 = vadd.bf16 %v14539_v21, %v7469_v63 }
 0x72e   : > { %v7774_v3 = vmax.bf16 %v16678_v52, %v7646_v41  ;;  %v7776_v58 = vmax.bf16 %v16678_v52, %v7648_v1  ;;  %v17800_v45 = vpack.c.bf16 %v15765_v28, %v15753_v32 }
 0x72f   : > { %8295 = vmatmul.mubr.bf16.gmra.mrb[240].mxu0 %v7766_v62  ;;  %v8687_v26 = vmul.f32 %v15804_v0, %v8622_v13  ;;  %v8623_v30 = vadd.f32 %v15801_v54, %v8373_v36  ;;  %8584 = vmatmul.mubr.bf16.gmra.mrb[240].mxu1 %v7768_v47  ;;  %v7779_v42 = vmax.bf16 %v16678_v52, %v7651_v17 }
 0x730   : > { %8302 = vmatprep.mubr.bf16.mxu0 %v7771_v34  ;;  %8591 = vmatprep.mubr.bf16.mxu1 %v7773_v15  ;;  %v7781_v47 = vmax.bf16 %v16678_v52, %v7653_v40  ;;  %v7650_v34 = vadd.bf16 %v14576_v2, %v17800_v45  ;;  %v17801_v15 = vpack.c.bf16 %v15770_v24, %v15759_v29 }
 0x731   : > { %v8752_v19 = vadd.f32 %v15809_v55, %v8687_v26  ;;  %v8688_v11 = vmul.f32 %v15804_v0, %v8623_v30 }
 0x732   : > { %v8088_v49 = vpop.f32.mrb[136].mxu0  ;;  %v8377_v7 = vpop.f32.mrb[136].mxu1  ;;  %v7652_v26 = vadd.bf16 %v14585_v5, %v17801_v15 }
 0x733   : > { %v8090_v9 = vpop.f32.mrb[137].mxu0  ;;  %8817 = vst.msk [vmem:[%s15823_s28 + $0x10] sm:$0xff] %vm8814_vm1, %v8752_v19  ;;  %v8753_v25 = vadd.f32 %v15809_v55, %v8688_v11  ;;  %v8378_v8 = vadd.f32 %v8377_v7, %v8088_v49  ;;  %v8379_v16 = vpop.f32.mrb[137].mxu1  ;;  %v7778_v49 = vmax.bf16 %v16678_v52, %v7650_v34 }
 0x734   : > { %v8091_v12 = vpop.f32.mrb[138].mxu0  ;;  %v8380_v43 = vpop.f32.mrb[138].mxu1  ;;  %v7780_v5 = vmax.bf16 %v16678_v52, %v7652_v26 }
 0x735   : > { %v8093_v44 = vpop.f32.mrb[139].mxu0  ;;  %8818 = vst.msk [vmem:[%s15823_s28 + $0x18] sm:$0xff] %vm8814_vm1, %v8753_v25  ;;  %v8624_v14 = vadd.f32 %v15801_v54, %v8378_v8  ;;  %v8381_v46 = vadd.f32 %v8380_v43, %v8091_v12  ;;  %v8382_v48 = vpop.f32.mrb[139].mxu1 }
 0x737   : > { %8303 = vmatmul.mubr.bf16.gmra.mrb[244].mxu0 %v7770_v6  ;;  %v8689_v35 = vmul.f32 %v15804_v0, %v8624_v14  ;;  %v8625_v38 = vadd.f32 %v15801_v54, %v8381_v46  ;;  %8592 = vmatmul.mubr.bf16.gmra.mrb[244].mxu1 %v7772_v18 }
 0x738   : > { %8310 = vmatprep.mubr.bf16.mxu0 %v7775_v50  ;;  %8599 = vmatprep.mubr.bf16.mxu1 %v7777_v51 }
 0x739   : > { %v8754_v53 = vadd.f32 %v15809_v55, %v8689_v35  ;;  %v8690_v33 = vmul.f32 %v15804_v0, %v8625_v38 }
 0x73a   : > { %v8096_v22 = vpop.f32.mrb[140].mxu0  ;;  %v8385_v4 = vpop.f32.mrb[140].mxu1 }
 0x73b   : > { %v8098_v27 = vpop.f32.mrb[141].mxu0  ;;  %8819 = vst.msk [vmem:[%s15823_s28 + $0x20] sm:$0xff] %vm8814_vm1, %v8754_v53  ;;  %v8755_v31 = vadd.f32 %v15809_v55, %v8690_v33  ;;  %v8386_v37 = vadd.f32 %v8385_v4, %v8096_v22  ;;  %v8387_v10 = vpop.f32.mrb[141].mxu1 }
 0x73c   : > { %v8099_v21 = vpop.f32.mrb[142].mxu0  ;;  %v8388_v63 = vpop.f32.mrb[142].mxu1 }
 0x73d   : > { %v8101_v62 = vpop.f32.mrb[143].mxu0  ;;  %8820 = vst.msk [vmem:[%s15823_s28 + $0x28] sm:$0xff] %vm8814_vm1, %v8755_v31  ;;  %v8626_v61 = vadd.f32 %v15801_v54, %v8386_v37  ;;  %v8389_v23 = vadd.f32 %v8388_v63, %v8099_v21  ;;  %v8390_v59 = vpop.f32.mrb[143].mxu1 }
 0x73f   : > { %8311 = vmatmul.mubr.bf16.gmra.mrb[248].mxu0 %v7774_v3  ;;  %v8691_v13 = vmul.f32 %v15804_v0, %v8626_v61  ;;  %v8627_v36 = vadd.f32 %v15801_v54, %v8389_v23  ;;  %8600 = vmatmul.mubr.bf16.gmra.mrb[248].mxu1 %v7776_v58 }
 0x740   : > { %8318 = vmatprep.mubr.bf16.mxu0 %v7779_v42  ;;  %8607 = vmatprep.mubr.bf16.mxu1 %v7781_v47 }
 0x741   : > { %v8756_v30 = vadd.f32 %v15809_v55, %v8691_v13  ;;  %v8692_v39 = vmul.f32 %v15804_v0, %v8627_v36 }
 0x742   : > { %v8104_v56 = vpop.f32.mrb[144].mxu0  ;;  %v8393_v57 = vpop.f32.mrb[144].mxu1 }
 0x743   : > { %v8106_v19 = vpop.f32.mrb[145].mxu0  ;;  %8821 = vst.msk [vmem:[%s15823_s28 + $0x30] sm:$0xff] %vm8814_vm1, %v8756_v30  ;;  %v8757_v32 = vadd.f32 %v15809_v55, %v8692_v39  ;;  %v8394_v28 = vadd.f32 %v8393_v57, %v8104_v56  ;;  %v8395_v2 = vpop.f32.mrb[145].mxu1 }
 0x744   : > { %v8107_v11 = vpop.f32.mrb[146].mxu0  ;;  %v8396_v29 = vpop.f32.mrb[146].mxu1 }
 0x745   : > { %v8109_v24 = vpop.f32.mrb[147].mxu0  ;;  %8822 = vst.msk [vmem:[%s15823_s28 + $0x38] sm:$0xff] %vm8814_vm1, %v8757_v32  ;;  %v8628_v60 = vadd.f32 %v15801_v54, %v8394_v28  ;;  %v8397_v7 = vadd.f32 %v8396_v29, %v8107_v11  ;;  %v8398_v9 = vpop.f32.mrb[147].mxu1 }
 0x747   : > { %8319 = vmatmul.mubr.bf16.gmra.mrb[252].mxu0 %v7778_v49  ;;  %v8693_v25 = vmul.f32 %v15804_v0, %v8628_v60  ;;  %v8629_v8 = vadd.f32 %v15801_v54, %v8397_v7  ;;  %8608 = vmatmul.mubr.bf16.gmra.mrb[252].mxu1 %v7780_v5 }
 0x749   : > { %v8758_v16 = vadd.f32 %v15809_v55, %v8693_v25  ;;  %v8694_v12 = vmul.f32 %v15804_v0, %v8629_v8 }
 0x74a   : > { %v8112_v6 = vpop.f32.mrb[148].mxu0  ;;  %v8401_v43 = vpop.f32.mrb[148].mxu1 }
 0x74b   : > { %v8114_v52 = vpop.f32.mrb[149].mxu0  ;;  %8823 = vst.msk [vmem:[%s15823_s28 + $0x40] sm:$0xff] %vm8814_vm1, %v8758_v16  ;;  %v8759_v44 = vadd.f32 %v15809_v55, %v8694_v12  ;;  %v8402_v18 = vadd.f32 %v8401_v43, %v8112_v6  ;;  %v8403_v14 = vpop.f32.mrb[149].mxu1 }
 0x74c   : > { %v8115_v46 = vpop.f32.mrb[150].mxu0  ;;  %v8404_v48 = vpop.f32.mrb[150].mxu1 }
 0x74d   : > { %v8117_v50 = vpop.f32.mrb[151].mxu0  ;;  %8824 = vst.msk [vmem:[%s15823_s28 + $0x48] sm:$0xff] %vm8814_vm1, %v8759_v44  ;;  %v8630_v51 = vadd.f32 %v15801_v54, %v8402_v18  ;;  %v8405_v35 = vadd.f32 %v8404_v48, %v8115_v46  ;;  %v8406_v38 = vpop.f32.mrb[151].mxu1 }
 0x74f   : > { %v8695_v41 = vmul.f32 %v15804_v0, %v8630_v51  ;;  %v8631_v1 = vadd.f32 %v15801_v54, %v8405_v35 }
 0x751   : > { %v8760_v17 = vadd.f32 %v15809_v55, %v8695_v41  ;;  %v8696_v53 = vmul.f32 %v15804_v0, %v8631_v1 }
 0x752   : > { %v8120_v33 = vpop.f32.mrb[152].mxu0  ;;  %v8409_v22 = vpop.f32.mrb[152].mxu1 }
 0x753   : > { %v8122_v20 = vpop.f32.mrb[153].mxu0  ;;  %8825 = vst.msk [vmem:[%s15823_s28 + $0x50] sm:$0xff] %vm8814_vm1, %v8760_v17  ;;  %v8761_v40 = vadd.f32 %v15809_v55, %v8696_v53  ;;  %v8410_v4 = vadd.f32 %v8409_v22, %v8120_v33  ;;  %v8411_v27 = vpop.f32.mrb[153].mxu1 }
 0x754   : > { %v8123_v31 = vpop.f32.mrb[154].mxu0  ;;  %v8412_v37 = vpop.f32.mrb[154].mxu1 }
 0x755   : > { %v8125_v10 = vpop.f32.mrb[155].mxu0  ;;  %8826 = vst.msk [vmem:[%s15823_s28 + $0x58] sm:$0xff] %vm8814_vm1, %v8761_v40  ;;  %v8632_v21 = vadd.f32 %v15801_v54, %v8410_v4  ;;  %v8413_v3 = vadd.f32 %v8412_v37, %v8123_v31  ;;  %v8414_v63 = vpop.f32.mrb[155].mxu1 }
 0x757   : > { %v8697_v62 = vmul.f32 %v15804_v0, %v8632_v21  ;;  %v8633_v58 = vadd.f32 %v15801_v54, %v8413_v3 }
 0x759   : > { %v8762_v61 = vadd.f32 %v15809_v55, %v8697_v62  ;;  %v8698_v23 = vmul.f32 %v15804_v0, %v8633_v58 }
 0x75a   : > { %v8128_v59 = vpop.f32.mrb[156].mxu0  ;;  %v8417_v42 = vpop.f32.mrb[156].mxu1 }
 0x75b   : > { %v8130_v47 = vpop.f32.mrb[157].mxu0  ;;  %8827 = vst.msk [vmem:[%s15823_s28 + $0x60] sm:$0xff] %vm8814_vm1, %v8762_v61  ;;  %v8763_v13 = vadd.f32 %v15809_v55, %v8698_v23  ;;  %v8418_v36 = vadd.f32 %v8417_v42, %v8128_v59  ;;  %v8419_v45 = vpop.f32.mrb[157].mxu1 }
 0x75c   : > { %v8131_v34 = vpop.f32.mrb[158].mxu0  ;;  %v8420_v15 = vpop.f32.mrb[158].mxu1 }
 0x75d   : > { %v8133_v26 = vpop.f32.mrb[159].mxu0  ;;  %8828 = vst.msk [vmem:[%s15823_s28 + $0x68] sm:$0xff] %vm8814_vm1, %v8763_v13  ;;  %v8634_v30 = vadd.f32 %v15801_v54, %v8418_v36  ;;  %v8421_v39 = vadd.f32 %v8420_v15, %v8131_v34  ;;  %v8422_v56 = vpop.f32.mrb[159].mxu1 }
 0x75f   : > { %v8699_v57 = vmul.f32 %v15804_v0, %v8634_v30  ;;  %v8635_v19 = vadd.f32 %v15801_v54, %v8421_v39 }
 0x761   : > { %v8764_v32 = vadd.f32 %v15809_v55, %v8699_v57  ;;  %v8700_v28 = vmul.f32 %v15804_v0, %v8635_v19 }
 0x762   : > { %v8136_v2 = vpop.f32.mrb[160].mxu0  ;;  %v8425_v11 = vpop.f32.mrb[160].mxu1 }
 0x763   : > { %v8138_v49 = vpop.f32.mrb[161].mxu0  ;;  %8829 = vst.msk [vmem:[%s15823_s28 + $0x70] sm:$0xff] %vm8814_vm1, %v8764_v32  ;;  %v8765_v29 = vadd.f32 %v15809_v55, %v8700_v28  ;;  %v8426_v24 = vadd.f32 %v8425_v11, %v8136_v2  ;;  %v8427_v5 = vpop.f32.mrb[161].mxu1 }
 0x764   : > { %v8139_v60 = vpop.f32.mrb[162].mxu0  ;;  %v8428_v7 = vpop.f32.mrb[162].mxu1 }
 0x765   : > { %v8141_v9 = vpop.f32.mrb[163].mxu0  ;;  %8830 = vst.msk [vmem:[%s15823_s28 + $0x78] sm:$0xff] %vm8814_vm1, %v8765_v29  ;;  %v8636_v25 = vadd.f32 %v15801_v54, %v8426_v24  ;;  %v8429_v8 = vadd.f32 %v8428_v7, %v8139_v60  ;;  %v8430_v16 = vpop.f32.mrb[163].mxu1 }
 0x767   : > { %v8701_v12 = vmul.f32 %v15804_v0, %v8636_v25  ;;  %v8637_v6 = vadd.f32 %v15801_v54, %v8429_v8 }
 0x769   : > { %v8766_v43 = vadd.f32 %v15809_v55, %v8701_v12  ;;  %v8702_v52 = vmul.f32 %v15804_v0, %v8637_v6 }
 0x76a   : > { %v8144_v44 = vpop.f32.mrb[164].mxu0  ;;  %v8433_v18 = vpop.f32.mrb[164].mxu1 }
 0x76b   : > { %v8146_v14 = vpop.f32.mrb[165].mxu0  ;;  %8831 = vst.msk [vmem:[%s15823_s28 + $0x80] sm:$0xff] %vm8814_vm1, %v8766_v43  ;;  %v8767_v46 = vadd.f32 %v15809_v55, %v8702_v52  ;;  %v8434_v48 = vadd.f32 %v8433_v18, %v8144_v44  ;;  %v8435_v50 = vpop.f32.mrb[165].mxu1 }
 0x76c   : > { %v8147_v51 = vpop.f32.mrb[166].mxu0  ;;  %v8436_v35 = vpop.f32.mrb[166].mxu1 }
 0x76d   : > { %v8149_v38 = vpop.f32.mrb[167].mxu0  ;;  %8832 = vst.msk [vmem:[%s15823_s28 + $0x88] sm:$0xff] %vm8814_vm1, %v8767_v46  ;;  %v8638_v41 = vadd.f32 %v15801_v54, %v8434_v48  ;;  %v8437_v1 = vadd.f32 %v8436_v35, %v8147_v51  ;;  %v8438_v17 = vpop.f32.mrb[167].mxu1 }
 0x76f   : > { %v8703_v53 = vmul.f32 %v15804_v0, %v8638_v41  ;;  %v8639_v33 = vadd.f32 %v15801_v54, %v8437_v1 }
 0x771   : > { %v8768_v22 = vadd.f32 %v15809_v55, %v8703_v53  ;;  %v8704_v20 = vmul.f32 %v15804_v0, %v8639_v33 }
 0x772   : > { %v8152_v40 = vpop.f32.mrb[168].mxu0  ;;  %v8441_v4 = vpop.f32.mrb[168].mxu1 }
 0x773   : > { %v8154_v27 = vpop.f32.mrb[169].mxu0  ;;  %8833 = vst.msk [vmem:[%s15823_s28 + $0x90] sm:$0xff] %vm8814_vm1, %v8768_v22  ;;  %v8769_v31 = vadd.f32 %v15809_v55, %v8704_v20  ;;  %v8442_v37 = vadd.f32 %v8441_v4, %v8152_v40  ;;  %v8443_v10 = vpop.f32.mrb[169].mxu1 }
 0x774   : > { %v8155_v21 = vpop.f32.mrb[170].mxu0  ;;  %v8444_v3 = vpop.f32.mrb[170].mxu1 }
 0x775   : > { %v8157_v63 = vpop.f32.mrb[171].mxu0  ;;  %8834 = vst.msk [vmem:[%s15823_s28 + $0x98] sm:$0xff] %vm8814_vm1, %v8769_v31  ;;  %v8640_v62 = vadd.f32 %v15801_v54, %v8442_v37  ;;  %v8445_v58 = vadd.f32 %v8444_v3, %v8155_v21  ;;  %v8446_v61 = vpop.f32.mrb[171].mxu1 }
 0x777   : > { %v8705_v23 = vmul.f32 %v15804_v0, %v8640_v62  ;;  %v8641_v59 = vadd.f32 %v15801_v54, %v8445_v58 }
 0x779   : > { %v8770_v42 = vadd.f32 %v15809_v55, %v8705_v23  ;;  %v8706_v47 = vmul.f32 %v15804_v0, %v8641_v59 }
 0x77a   : > { %v8160_v13 = vpop.f32.mrb[172].mxu0  ;;  %v8449_v36 = vpop.f32.mrb[172].mxu1 }
 0x77b   : > { %v8162_v45 = vpop.f32.mrb[173].mxu0  ;;  %8835 = vst.msk [vmem:[%s15823_s28 + $0xa0] sm:$0xff] %vm8814_vm1, %v8770_v42  ;;  %v8771_v34 = vadd.f32 %v15809_v55, %v8706_v47  ;;  %v8450_v15 = vadd.f32 %v8449_v36, %v8160_v13  ;;  %v8451_v26 = vpop.f32.mrb[173].mxu1 }
 0x77c   : > { %v8163_v30 = vpop.f32.mrb[174].mxu0  ;;  %v8452_v39 = vpop.f32.mrb[174].mxu1 }
 0x77d   : > { %v8165_v56 = vpop.f32.mrb[175].mxu0  ;;  %8836 = vst.msk [vmem:[%s15823_s28 + $0xa8] sm:$0xff] %vm8814_vm1, %v8771_v34  ;;  %v8642_v57 = vadd.f32 %v15801_v54, %v8450_v15  ;;  %v8453_v19 = vadd.f32 %v8452_v39, %v8163_v30  ;;  %v8454_v32 = vpop.f32.mrb[175].mxu1 }
 0x77f   : > { %v8707_v28 = vmul.f32 %v15804_v0, %v8642_v57  ;;  %v8643_v2 = vadd.f32 %v15801_v54, %v8453_v19 }
 0x781   : > { %v8772_v11 = vadd.f32 %v15809_v55, %v8707_v28  ;;  %v8708_v49 = vmul.f32 %v15804_v0, %v8643_v2 }
 0x782   : > { %v8168_v29 = vpop.f32.mrb[176].mxu0  ;;  %v8457_v24 = vpop.f32.mrb[176].mxu1 }
 0x783   : > { %v8170_v5 = vpop.f32.mrb[177].mxu0  ;;  %8837 = vst.msk [vmem:[%s15823_s28 + $0xb0] sm:$0xff] %vm8814_vm1, %v8772_v11  ;;  %v8773_v60 = vadd.f32 %v15809_v55, %v8708_v49  ;;  %v8458_v7 = vadd.f32 %v8457_v24, %v8168_v29  ;;  %v8459_v9 = vpop.f32.mrb[177].mxu1 }
 0x784   : > { %v8171_v25 = vpop.f32.mrb[178].mxu0  ;;  %v8460_v8 = vpop.f32.mrb[178].mxu1 }
 0x785   : > { %v8173_v16 = vpop.f32.mrb[179].mxu0  ;;  %8838 = vst.msk [vmem:[%s15823_s28 + $0xb8] sm:$0xff] %vm8814_vm1, %v8773_v60  ;;  %v8644_v12 = vadd.f32 %v15801_v54, %v8458_v7  ;;  %v8461_v6 = vadd.f32 %v8460_v8, %v8171_v25  ;;  %v8462_v43 = vpop.f32.mrb[179].mxu1 }
 0x787   : > { %v8709_v52 = vmul.f32 %v15804_v0, %v8644_v12  ;;  %v8645_v44 = vadd.f32 %v15801_v54, %v8461_v6 }
 0x789   : > { %v8774_v18 = vadd.f32 %v15809_v55, %v8709_v52  ;;  %v8710_v14 = vmul.f32 %v15804_v0, %v8645_v44 }
 0x78a   : > { %v8176_v46 = vpop.f32.mrb[180].mxu0  ;;  %v8465_v48 = vpop.f32.mrb[180].mxu1 }
 0x78b   : > { %v8178_v50 = vpop.f32.mrb[181].mxu0  ;;  %8839 = vst.msk [vmem:[%s15823_s28 + $0xc0] sm:$0xff] %vm8814_vm1, %v8774_v18  ;;  %v8775_v51 = vadd.f32 %v15809_v55, %v8710_v14  ;;  %v8466_v35 = vadd.f32 %v8465_v48, %v8176_v46  ;;  %v8467_v38 = vpop.f32.mrb[181].mxu1 }
 0x78c   : > { %v8179_v41 = vpop.f32.mrb[182].mxu0  ;;  %v8468_v1 = vpop.f32.mrb[182].mxu1 }
 0x78d   : > { %v8181_v17 = vpop.f32.mrb[183].mxu0  ;;  %8840 = vst.msk [vmem:[%s15823_s28 + $0xc8] sm:$0xff] %vm8814_vm1, %v8775_v51  ;;  %v8646_v53 = vadd.f32 %v15801_v54, %v8466_v35  ;;  %v8469_v33 = vadd.f32 %v8468_v1, %v8179_v41  ;;  %v8470_v22 = vpop.f32.mrb[183].mxu1 }
 0x78f   : > { %v8711_v20 = vmul.f32 %v15804_v0, %v8646_v53  ;;  %v8647_v40 = vadd.f32 %v15801_v54, %v8469_v33 }
 0x791   : > { %v8776_v4 = vadd.f32 %v15809_v55, %v8711_v20  ;;  %v8712_v27 = vmul.f32 %v15804_v0, %v8647_v40 }
 0x792   : > { %v8184_v31 = vpop.f32.mrb[184].mxu0  ;;  %v8473_v37 = vpop.f32.mrb[184].mxu1 }
 0x793   : > { %v8186_v10 = vpop.f32.mrb[185].mxu0  ;;  %8841 = vst.msk [vmem:[%s15823_s28 + $0xd0] sm:$0xff] %vm8814_vm1, %v8776_v4  ;;  %v8777_v21 = vadd.f32 %v15809_v55, %v8712_v27  ;;  %v8474_v3 = vadd.f32 %v8473_v37, %v8184_v31  ;;  %v8475_v63 = vpop.f32.mrb[185].mxu1 }
 0x794   : > { %v8187_v62 = vpop.f32.mrb[186].mxu0  ;;  %v8476_v58 = vpop.f32.mrb[186].mxu1 }
 0x795   : > { %v8189_v61 = vpop.f32.mrb[187].mxu0  ;;  %8842 = vst.msk [vmem:[%s15823_s28 + $0xd8] sm:$0xff] %vm8814_vm1, %v8777_v21  ;;  %v8648_v23 = vadd.f32 %v15801_v54, %v8474_v3  ;;  %v8477_v59 = vadd.f32 %v8476_v58, %v8187_v62  ;;  %v8478_v42 = vpop.f32.mrb[187].mxu1 }
 0x797   : > { %v8713_v47 = vmul.f32 %v15804_v0, %v8648_v23  ;;  %v8649_v13 = vadd.f32 %v15801_v54, %v8477_v59 }
 0x799   : > { %v8778_v36 = vadd.f32 %v15809_v55, %v8713_v47  ;;  %v8714_v45 = vmul.f32 %v15804_v0, %v8649_v13 }
 0x79a   : > { %v8192_v34 = vpop.f32.mrb[188].mxu0  ;;  %v8481_v15 = vpop.f32.mrb[188].mxu1 }
 0x79b   : > { %v8194_v26 = vpop.f32.mrb[189].mxu0  ;;  %8843 = vst.msk [vmem:[%s15823_s28 + $0xe0] sm:$0xff] %vm8814_vm1, %v8778_v36  ;;  %v8779_v30 = vadd.f32 %v15809_v55, %v8714_v45  ;;  %v8482_v39 = vadd.f32 %v8481_v15, %v8192_v34  ;;  %v8483_v56 = vpop.f32.mrb[189].mxu1 }
 0x79c   : > { %v8195_v57 = vpop.f32.mrb[190].mxu0  ;;  %v8484_v19 = vpop.f32.mrb[190].mxu1 }
 0x79d   : > { %v8197_v32 = vpop.f32.mrb[191].mxu0  ;;  %8844 = vst.msk [vmem:[%s15823_s28 + $0xe8] sm:$0xff] %vm8814_vm1, %v8779_v30  ;;  %v8650_v28 = vadd.f32 %v15801_v54, %v8482_v39  ;;  %v8485_v2 = vadd.f32 %v8484_v19, %v8195_v57  ;;  %v8486_v11 = vpop.f32.mrb[191].mxu1 }
 0x79f   : > { %v8715_v49 = vmul.f32 %v15804_v0, %v8650_v28  ;;  %v8651_v29 = vadd.f32 %v15801_v54, %v8485_v2 }
 0x7a1   : > { %v8780_v24 = vadd.f32 %v15809_v55, %v8715_v49  ;;  %v8716_v5 = vmul.f32 %v15804_v0, %v8651_v29 }
 0x7a2   : > { %v8200_v60 = vpop.f32.mrb[192].mxu0  ;;  %v8489_v7 = vpop.f32.mrb[192].mxu1 }
 0x7a3   : > { %v8202_v9 = vpop.f32.mrb[193].mxu0  ;;  %8845 = vst.msk [vmem:[%s15823_s28 + $0xf0] sm:$0xff] %vm8814_vm1, %v8780_v24  ;;  %v8781_v25 = vadd.f32 %v15809_v55, %v8716_v5  ;;  %v8490_v8 = vadd.f32 %v8489_v7, %v8200_v60  ;;  %v8491_v16 = vpop.f32.mrb[193].mxu1 }
 0x7a4   : > { %v8203_v12 = vpop.f32.mrb[194].mxu0  ;;  %v8492_v6 = vpop.f32.mrb[194].mxu1 }
 0x7a5   : > { %v8205_v43 = vpop.f32.mrb[195].mxu0  ;;  %8846 = vst.msk [vmem:[%s15823_s28 + $0xf8] sm:$0xff] %vm8814_vm1, %v8781_v25  ;;  %v8652_v52 = vadd.f32 %v15801_v54, %v8490_v8  ;;  %v8493_v44 = vadd.f32 %v8492_v6, %v8203_v12  ;;  %v8494_v18 = vpop.f32.mrb[195].mxu1 }
 0x7a7   : > { %v8717_v14 = vmul.f32 %v15804_v0, %v8652_v52  ;;  %v8653_v46 = vadd.f32 %v15801_v54, %v8493_v44 }
 0x7a9   : > { %v8782_v48 = vadd.f32 %v15809_v55, %v8717_v14  ;;  %v8718_v50 = vmul.f32 %v15804_v0, %v8653_v46 }
 0x7aa   : > { %v8208_v51 = vpop.f32.mrb[196].mxu0  ;;  %v8497_v35 = vpop.f32.mrb[196].mxu1 }
 0x7ab   : > { %v8210_v38 = vpop.f32.mrb[197].mxu0  ;;  %8847 = vst.msk [vmem:[%s15823_s28 + $0x100] sm:$0xff] %vm8814_vm1, %v8782_v48  ;;  %v8783_v41 = vadd.f32 %v15809_v55, %v8718_v50  ;;  %v8498_v1 = vadd.f32 %v8497_v35, %v8208_v51  ;;  %v8499_v17 = vpop.f32.mrb[197].mxu1 }
 0x7ac   : > { %v8211_v53 = vpop.f32.mrb[198].mxu0  ;;  %v8500_v33 = vpop.f32.mrb[198].mxu1 }
 0x7ad   : > { %v8213_v22 = vpop.f32.mrb[199].mxu0  ;;  %8848 = vst.msk [vmem:[%s15823_s28 + $0x108] sm:$0xff] %vm8814_vm1, %v8783_v41  ;;  %v8654_v20 = vadd.f32 %v15801_v54, %v8498_v1  ;;  %v8501_v40 = vadd.f32 %v8500_v33, %v8211_v53  ;;  %v8502_v4 = vpop.f32.mrb[199].mxu1 }
 0x7af   : > { %v8719_v27 = vmul.f32 %v15804_v0, %v8654_v20  ;;  %v8655_v31 = vadd.f32 %v15801_v54, %v8501_v40 }
 0x7b1   : > { %v8784_v37 = vadd.f32 %v15809_v55, %v8719_v27  ;;  %v8720_v10 = vmul.f32 %v15804_v0, %v8655_v31 }
 0x7b2   : > { %v8216_v21 = vpop.f32.mrb[200].mxu0  ;;  %v8505_v3 = vpop.f32.mrb[200].mxu1 }
 0x7b3   : > { %v8218_v63 = vpop.f32.mrb[201].mxu0  ;;  %8849 = vst.msk [vmem:[%s15823_s28 + $0x110] sm:$0xff] %vm8814_vm1, %v8784_v37  ;;  %v8785_v62 = vadd.f32 %v15809_v55, %v8720_v10  ;;  %v8506_v58 = vadd.f32 %v8505_v3, %v8216_v21  ;;  %v8507_v61 = vpop.f32.mrb[201].mxu1 }
 0x7b4   : > { %v8219_v23 = vpop.f32.mrb[202].mxu0  ;;  %v8508_v59 = vpop.f32.mrb[202].mxu1 }
 0x7b5   : > { %v8221_v42 = vpop.f32.mrb[203].mxu0  ;;  %8850 = vst.msk [vmem:[%s15823_s28 + $0x118] sm:$0xff] %vm8814_vm1, %v8785_v62  ;;  %v8656_v47 = vadd.f32 %v15801_v54, %v8506_v58  ;;  %v8509_v13 = vadd.f32 %v8508_v59, %v8219_v23  ;;  %v8510_v36 = vpop.f32.mrb[203].mxu1 }
 0x7b7   : > { %v8721_v45 = vmul.f32 %v15804_v0, %v8656_v47  ;;  %v8657_v34 = vadd.f32 %v15801_v54, %v8509_v13 }
 0x7b9   : > { %v8786_v15 = vadd.f32 %v15809_v55, %v8721_v45  ;;  %v8722_v26 = vmul.f32 %v15804_v0, %v8657_v34 }
 0x7ba   : > { %v8224_v30 = vpop.f32.mrb[204].mxu0  ;;  %v8513_v39 = vpop.f32.mrb[204].mxu1 }
 0x7bb   : > { %v8226_v56 = vpop.f32.mrb[205].mxu0  ;;  %8851 = vst.msk [vmem:[%s15823_s28 + $0x120] sm:$0xff] %vm8814_vm1, %v8786_v15  ;;  %v8787_v57 = vadd.f32 %v15809_v55, %v8722_v26  ;;  %v8514_v19 = vadd.f32 %v8513_v39, %v8224_v30  ;;  %v8515_v32 = vpop.f32.mrb[205].mxu1 }
 0x7bc   : > { %v8227_v28 = vpop.f32.mrb[206].mxu0  ;;  %v8516_v2 = vpop.f32.mrb[206].mxu1 }
 0x7bd   : > { %v8229_v11 = vpop.f32.mrb[207].mxu0  ;;  %8852 = vst.msk [vmem:[%s15823_s28 + $0x128] sm:$0xff] %vm8814_vm1, %v8787_v57  ;;  %v8658_v49 = vadd.f32 %v15801_v54, %v8514_v19  ;;  %v8517_v29 = vadd.f32 %v8516_v2, %v8227_v28  ;;  %v8518_v24 = vpop.f32.mrb[207].mxu1 }
 0x7bf   : > { %v8723_v5 = vmul.f32 %v15804_v0, %v8658_v49  ;;  %v8659_v60 = vadd.f32 %v15801_v54, %v8517_v29 }
 0x7c1   : > { %v8788_v7 = vadd.f32 %v15809_v55, %v8723_v5  ;;  %v8724_v9 = vmul.f32 %v15804_v0, %v8659_v60 }
 0x7c2   : > { %v8232_v25 = vpop.f32.mrb[208].mxu0  ;;  %v8521_v8 = vpop.f32.mrb[208].mxu1 }
 0x7c3   : > { %v8234_v16 = vpop.f32.mrb[209].mxu0  ;;  %8853 = vst.msk [vmem:[%s15823_s28 + $0x130] sm:$0xff] %vm8814_vm1, %v8788_v7  ;;  %v8789_v12 = vadd.f32 %v15809_v55, %v8724_v9  ;;  %v8522_v6 = vadd.f32 %v8521_v8, %v8232_v25  ;;  %v8523_v43 = vpop.f32.mrb[209].mxu1 }
 0x7c4   : > { %v8235_v52 = vpop.f32.mrb[210].mxu0  ;;  %v8524_v44 = vpop.f32.mrb[210].mxu1 }
 0x7c5   : > { %v8237_v18 = vpop.f32.mrb[211].mxu0  ;;  %8854 = vst.msk [vmem:[%s15823_s28 + $0x138] sm:$0xff] %vm8814_vm1, %v8789_v12  ;;  %v8660_v14 = vadd.f32 %v15801_v54, %v8522_v6  ;;  %v8525_v46 = vadd.f32 %v8524_v44, %v8235_v52  ;;  %v8526_v48 = vpop.f32.mrb[211].mxu1 }
 0x7c7   : > { %v8725_v50 = vmul.f32 %v15804_v0, %v8660_v14  ;;  %v8661_v51 = vadd.f32 %v15801_v54, %v8525_v46 }
 0x7c9   : > { %v8790_v35 = vadd.f32 %v15809_v55, %v8725_v50  ;;  %v8726_v38 = vmul.f32 %v15804_v0, %v8661_v51 }
 0x7ca   : > { %v8240_v41 = vpop.f32.mrb[212].mxu0  ;;  %v8529_v1 = vpop.f32.mrb[212].mxu1 }
 0x7cb   : > { %v8242_v17 = vpop.f32.mrb[213].mxu0  ;;  %8855 = vst.msk [vmem:[%s15823_s28 + $0x140] sm:$0xff] %vm8814_vm1, %v8790_v35  ;;  %v8791_v53 = vadd.f32 %v15809_v55, %v8726_v38  ;;  %v8530_v33 = vadd.f32 %v8529_v1, %v8240_v41  ;;  %v8531_v22 = vpop.f32.mrb[213].mxu1 }
 0x7cc   : > { %v8243_v20 = vpop.f32.mrb[214].mxu0  ;;  %v8532_v40 = vpop.f32.mrb[214].mxu1 }
 0x7cd   : > { %v8245_v4 = vpop.f32.mrb[215].mxu0  ;;  %8856 = vst.msk [vmem:[%s15823_s28 + $0x148] sm:$0xff] %vm8814_vm1, %v8791_v53  ;;  %v8662_v27 = vadd.f32 %v15801_v54, %v8530_v33  ;;  %v8533_v31 = vadd.f32 %v8532_v40, %v8243_v20  ;;  %v8534_v37 = vpop.f32.mrb[215].mxu1 }
 0x7cf   : > { %v8727_v10 = vmul.f32 %v15804_v0, %v8662_v27  ;;  %v8663_v21 = vadd.f32 %v15801_v54, %v8533_v31 }
 0x7d1   : > { %v8792_v3 = vadd.f32 %v15809_v55, %v8727_v10  ;;  %v8728_v63 = vmul.f32 %v15804_v0, %v8663_v21 }
 0x7d2   : > { %v8248_v62 = vpop.f32.mrb[216].mxu0  ;;  %v8537_v58 = vpop.f32.mrb[216].mxu1 }
 0x7d3   : > { %v8250_v61 = vpop.f32.mrb[217].mxu0  ;;  %8857 = vst.msk [vmem:[%s15823_s28 + $0x150] sm:$0xff] %vm8814_vm1, %v8792_v3  ;;  %v8793_v23 = vadd.f32 %v15809_v55, %v8728_v63  ;;  %v8538_v59 = vadd.f32 %v8537_v58, %v8248_v62  ;;  %v8539_v42 = vpop.f32.mrb[217].mxu1 }
 0x7d4   : > { %v8251_v47 = vpop.f32.mrb[218].mxu0  ;;  %v8540_v13 = vpop.f32.mrb[218].mxu1 }
 0x7d5   : > { %v8253_v36 = vpop.f32.mrb[219].mxu0  ;;  %8858 = vst.msk [vmem:[%s15823_s28 + $0x158] sm:$0xff] %vm8814_vm1, %v8793_v23  ;;  %v8664_v45 = vadd.f32 %v15801_v54, %v8538_v59  ;;  %v8541_v34 = vadd.f32 %v8540_v13, %v8251_v47  ;;  %v8542_v15 = vpop.f32.mrb[219].mxu1 }
 0x7d7   : > { %v8729_v26 = vmul.f32 %v15804_v0, %v8664_v45  ;;  %v8665_v30 = vadd.f32 %v15801_v54, %v8541_v34 }
 0x7d9   : > { %v8794_v39 = vadd.f32 %v15809_v55, %v8729_v26  ;;  %v8730_v56 = vmul.f32 %v15804_v0, %v8665_v30 }
 0x7da   : > { %v8256_v57 = vpop.f32.mrb[220].mxu0  ;;  %v8545_v19 = vpop.f32.mrb[220].mxu1 }
 0x7db   : > { %v8258_v32 = vpop.f32.mrb[221].mxu0  ;;  %8859 = vst.msk [vmem:[%s15823_s28 + $0x160] sm:$0xff] %vm8814_vm1, %v8794_v39  ;;  %v8795_v28 = vadd.f32 %v15809_v55, %v8730_v56  ;;  %v8546_v2 = vadd.f32 %v8545_v19, %v8256_v57  ;;  %v8547_v11 = vpop.f32.mrb[221].mxu1 }
 0x7dc   : > { %v8259_v49 = vpop.f32.mrb[222].mxu0  ;;  %v8548_v29 = vpop.f32.mrb[222].mxu1 }
 0x7dd   : > { %v8261_v24 = vpop.f32.mrb[223].mxu0  ;;  %8860 = vst.msk [vmem:[%s15823_s28 + $0x168] sm:$0xff] %vm8814_vm1, %v8795_v28  ;;  %v8666_v5 = vadd.f32 %v15801_v54, %v8546_v2  ;;  %v8549_v60 = vadd.f32 %v8548_v29, %v8259_v49  ;;  %v8550_v7 = vpop.f32.mrb[223].mxu1 }
 0x7df   : > { %v8731_v9 = vmul.f32 %v15804_v0, %v8666_v5  ;;  %v8667_v25 = vadd.f32 %v15801_v54, %v8549_v60 }
 0x7e1   : > { %v8796_v8 = vadd.f32 %v15809_v55, %v8731_v9  ;;  %v8732_v16 = vmul.f32 %v15804_v0, %v8667_v25 }
 0x7e2   : > { %v8264_v12 = vpop.f32.mrb[224].mxu0  ;;  %v8553_v6 = vpop.f32.mrb[224].mxu1 }
 0x7e3   : > { %v8266_v43 = vpop.f32.mrb[225].mxu0  ;;  %8861 = vst.msk [vmem:[%s15823_s28 + $0x170] sm:$0xff] %vm8814_vm1, %v8796_v8  ;;  %v8797_v52 = vadd.f32 %v15809_v55, %v8732_v16  ;;  %v8554_v44 = vadd.f32 %v8553_v6, %v8264_v12  ;;  %v8555_v18 = vpop.f32.mrb[225].mxu1 }
 0x7e4   : > { %v8267_v14 = vpop.f32.mrb[226].mxu0  ;;  %v8556_v46 = vpop.f32.mrb[226].mxu1 }
 0x7e5   : > { %v8269_v48 = vpop.f32.mrb[227].mxu0  ;;  %8862 = vst.msk [vmem:[%s15823_s28 + $0x178] sm:$0xff] %vm8814_vm1, %v8797_v52  ;;  %v8668_v50 = vadd.f32 %v15801_v54, %v8554_v44  ;;  %v8557_v51 = vadd.f32 %v8556_v46, %v8267_v14  ;;  %v8558_v35 = vpop.f32.mrb[227].mxu1 }
 0x7e7   : > { %v8733_v38 = vmul.f32 %v15804_v0, %v8668_v50  ;;  %v8669_v41 = vadd.f32 %v15801_v54, %v8557_v51 }
 0x7e9   : > { %v8798_v1 = vadd.f32 %v15809_v55, %v8733_v38  ;;  %v8734_v17 = vmul.f32 %v15804_v0, %v8669_v41 }
 0x7ea   : > { %v8272_v53 = vpop.f32.mrb[228].mxu0  ;;  %v8561_v33 = vpop.f32.mrb[228].mxu1 }
 0x7eb   : > { %v8274_v22 = vpop.f32.mrb[229].mxu0  ;;  %8863 = vst.msk [vmem:[%s15823_s28 + $0x180] sm:$0xff] %vm8814_vm1, %v8798_v1  ;;  %v8799_v20 = vadd.f32 %v15809_v55, %v8734_v17  ;;  %v8562_v40 = vadd.f32 %v8561_v33, %v8272_v53  ;;  %v8563_v4 = vpop.f32.mrb[229].mxu1 }
 0x7ec   : > { %v8275_v27 = vpop.f32.mrb[230].mxu0  ;;  %v8564_v31 = vpop.f32.mrb[230].mxu1 }
 0x7ed   : > { %v8277_v37 = vpop.f32.mrb[231].mxu0  ;;  %8864 = vst.msk [vmem:[%s15823_s28 + $0x188] sm:$0xff] %vm8814_vm1, %v8799_v20  ;;  %v8670_v10 = vadd.f32 %v15801_v54, %v8562_v40  ;;  %v8565_v21 = vadd.f32 %v8564_v31, %v8275_v27  ;;  %v8566_v3 = vpop.f32.mrb[231].mxu1 }
 0x7ef   : > { %v8735_v63 = vmul.f32 %v15804_v0, %v8670_v10  ;;  %v8671_v62 = vadd.f32 %v15801_v54, %v8565_v21 }
 0x7f1   : > { %v8800_v58 = vadd.f32 %v15809_v55, %v8735_v63  ;;  %v8736_v61 = vmul.f32 %v15804_v0, %v8671_v62 }
 0x7f2   : > { %v8280_v23 = vpop.f32.mrb[232].mxu0  ;;  %v8569_v59 = vpop.f32.mrb[232].mxu1 }
 0x7f3   : > { %v8282_v42 = vpop.f32.mrb[233].mxu0  ;;  %8865 = vst.msk [vmem:[%s15823_s28 + $0x190] sm:$0xff] %vm8814_vm1, %v8800_v58  ;;  %v8801_v47 = vadd.f32 %v15809_v55, %v8736_v61  ;;  %v8570_v13 = vadd.f32 %v8569_v59, %v8280_v23  ;;  %v8571_v36 = vpop.f32.mrb[233].mxu1 }
 0x7f4   : > { %v8283_v45 = vpop.f32.mrb[234].mxu0  ;;  %v8572_v34 = vpop.f32.mrb[234].mxu1 }
 0x7f5   : > { %v8285_v15 = vpop.f32.mrb[235].mxu0  ;;  %8866 = vst.msk [vmem:[%s15823_s28 + $0x198] sm:$0xff] %vm8814_vm1, %v8801_v47  ;;  %v8672_v26 = vadd.f32 %v15801_v54, %v8570_v13  ;;  %v8573_v30 = vadd.f32 %v8572_v34, %v8283_v45  ;;  %v8574_v39 = vpop.f32.mrb[235].mxu1 }
 0x7f7   : > { %v8737_v56 = vmul.f32 %v15804_v0, %v8672_v26  ;;  %v8673_v57 = vadd.f32 %v15801_v54, %v8573_v30 }
 0x7f9   : > { %v8802_v19 = vadd.f32 %v15809_v55, %v8737_v56  ;;  %v8738_v32 = vmul.f32 %v15804_v0, %v8673_v57 }
 0x7fa   : > { %v8288_v28 = vpop.f32.mrb[236].mxu0  ;;  %v8577_v2 = vpop.f32.mrb[236].mxu1 }
 0x7fb   : > { %v8290_v11 = vpop.f32.mrb[237].mxu0  ;;  %8867 = vst.msk [vmem:[%s15823_s28 + $0x1a0] sm:$0xff] %vm8814_vm1, %v8802_v19  ;;  %v8803_v49 = vadd.f32 %v15809_v55, %v8738_v32  ;;  %v8578_v29 = vadd.f32 %v8577_v2, %v8288_v28  ;;  %v8579_v24 = vpop.f32.mrb[237].mxu1 }
 0x7fc   : > { %v8291_v5 = vpop.f32.mrb[238].mxu0  ;;  %v8580_v60 = vpop.f32.mrb[238].mxu1 }
 0x7fd   : > { %v8293_v7 = vpop.f32.mrb[239].mxu0  ;;  %8868 = vst.msk [vmem:[%s15823_s28 + $0x1a8] sm:$0xff] %vm8814_vm1, %v8803_v49  ;;  %v8674_v9 = vadd.f32 %v15801_v54, %v8578_v29  ;;  %v8581_v25 = vadd.f32 %v8580_v60, %v8291_v5  ;;  %v8582_v8 = vpop.f32.mrb[239].mxu1 }
 0x7ff   : > { %v8739_v16 = vmul.f32 %v15804_v0, %v8674_v9  ;;  %v8675_v12 = vadd.f32 %v15801_v54, %v8581_v25 }
 0x801   : > { %v8804_v6 = vadd.f32 %v15809_v55, %v8739_v16  ;;  %v8740_v43 = vmul.f32 %v15804_v0, %v8675_v12 }
 0x802   : > { %v8296_v52 = vpop.f32.mrb[240].mxu0  ;;  %v8585_v44 = vpop.f32.mrb[240].mxu1 }
 0x803   : > { %v8298_v18 = vpop.f32.mrb[241].mxu0  ;;  %8869 = vst.msk [vmem:[%s15823_s28 + $0x1b0] sm:$0xff] %vm8814_vm1, %v8804_v6  ;;  %v8805_v14 = vadd.f32 %v15809_v55, %v8740_v43  ;;  %v8586_v46 = vadd.f32 %v8585_v44, %v8296_v52  ;;  %v8587_v48 = vpop.f32.mrb[241].mxu1 }
 0x804   : > { %v8299_v50 = vpop.f32.mrb[242].mxu0  ;;  %v8588_v51 = vpop.f32.mrb[242].mxu1 }
 0x805   : > { %v8301_v35 = vpop.f32.mrb[243].mxu0  ;;  %8870 = vst.msk [vmem:[%s15823_s28 + $0x1b8] sm:$0xff] %vm8814_vm1, %v8805_v14  ;;  %v8676_v38 = vadd.f32 %v15801_v54, %v8586_v46  ;;  %v8589_v41 = vadd.f32 %v8588_v51, %v8299_v50  ;;  %v8590_v1 = vpop.f32.mrb[243].mxu1 }
 0x807   : > { %v8741_v17 = vmul.f32 %v15804_v0, %v8676_v38  ;;  %v8677_v53 = vadd.f32 %v15801_v54, %v8589_v41 }
 0x809   : > { %v8806_v33 = vadd.f32 %v15809_v55, %v8741_v17  ;;  %v8742_v22 = vmul.f32 %v15804_v0, %v8677_v53 }
 0x80a   : > { %v8304_v20 = vpop.f32.mrb[244].mxu0  ;;  %v8593_v40 = vpop.f32.mrb[244].mxu1 }
 0x80b   : > { %v8306_v4 = vpop.f32.mrb[245].mxu0  ;;  %8871 = vst.msk [vmem:[%s15823_s28 + $0x1c0] sm:$0xff] %vm8814_vm1, %v8806_v33  ;;  %v8807_v27 = vadd.f32 %v15809_v55, %v8742_v22  ;;  %v8594_v31 = vadd.f32 %v8593_v40, %v8304_v20  ;;  %v8595_v37 = vpop.f32.mrb[245].mxu1 }
 0x80c   : > { %v8307_v10 = vpop.f32.mrb[246].mxu0  ;;  %v8596_v21 = vpop.f32.mrb[246].mxu1 }
 0x80d   : > { %v8309_v3 = vpop.f32.mrb[247].mxu0  ;;  %8872 = vst.msk [vmem:[%s15823_s28 + $0x1c8] sm:$0xff] %vm8814_vm1, %v8807_v27  ;;  %v8678_v63 = vadd.f32 %v15801_v54, %v8594_v31  ;;  %v8597_v62 = vadd.f32 %v8596_v21, %v8307_v10  ;;  %v8598_v58 = vpop.f32.mrb[247].mxu1 }
 0x80f   : > { %v8743_v61 = vmul.f32 %v15804_v0, %v8678_v63  ;;  %v8679_v23 = vadd.f32 %v15801_v54, %v8597_v62 }
 0x811   : > { %v8808_v59 = vadd.f32 %v15809_v55, %v8743_v61  ;;  %v8744_v42 = vmul.f32 %v15804_v0, %v8679_v23 }
 0x812   : > { %v8312_v47 = vpop.f32.mrb[248].mxu0  ;;  %v8601_v13 = vpop.f32.mrb[248].mxu1 }
 0x813   : > { %v8314_v36 = vpop.f32.mrb[249].mxu0  ;;  %8873 = vst.msk [vmem:[%s15823_s28 + $0x1d0] sm:$0xff] %vm8814_vm1, %v8808_v59  ;;  %v8809_v45 = vadd.f32 %v15809_v55, %v8744_v42  ;;  %v8602_v34 = vadd.f32 %v8601_v13, %v8312_v47  ;;  %v8603_v15 = vpop.f32.mrb[249].mxu1 }
 0x814   : > { %v8315_v26 = vpop.f32.mrb[250].mxu0  ;;  %v8604_v30 = vpop.f32.mrb[250].mxu1 }
 0x815   : > { %v8317_v39 = vpop.f32.mrb[251].mxu0  ;;  %8874 = vst.msk [vmem:[%s15823_s28 + $0x1d8] sm:$0xff] %vm8814_vm1, %v8809_v45  ;;  %v8680_v56 = vadd.f32 %v15801_v54, %v8602_v34  ;;  %v8605_v57 = vadd.f32 %v8604_v30, %v8315_v26  ;;  %v8606_v19 = vpop.f32.mrb[251].mxu1 }
 0x817   : > { %v8745_v32 = vmul.f32 %v15804_v0, %v8680_v56  ;;  %v8681_v28 = vadd.f32 %v15801_v54, %v8605_v57 }
 0x819   : > { %v8810_v2 = vadd.f32 %v15809_v55, %v8745_v32  ;;  %v8746_v11 = vmul.f32 %v15804_v0, %v8681_v28 }
 0x81a   : > { %v8320_v49 = vpop.f32.mrb[252].mxu0  ;;  %v8609_v29 = vpop.f32.mrb[252].mxu1 }
 0x81b   : > { %v8322_v24 = vpop.f32.mrb[253].mxu0  ;;  %8875 = vst.msk [vmem:[%s15823_s28 + $0x1e0] sm:$0xff] %vm8814_vm1, %v8810_v2  ;;  %v8811_v5 = vadd.f32 %v15809_v55, %v8746_v11  ;;  %v8610_v60 = vadd.f32 %v8609_v29, %v8320_v49  ;;  %v8611_v7 = vpop.f32.mrb[253].mxu1 }
 0x81c   : > { %v8323_v9 = vpop.f32.mrb[254].mxu0  ;;  %v8612_v25 = vpop.f32.mrb[254].mxu1 }
 0x81d   : > { %v8325_v8 = vpop.f32.mrb[255].mxu0  ;;  %8876 = vst.msk [vmem:[%s15823_s28 + $0x1e8] sm:$0xff] %vm8814_vm1, %v8811_v5  ;;  %v8682_v16 = vadd.f32 %v15801_v54, %v8610_v60  ;;  %v8613_v12 = vadd.f32 %v8612_v25, %v8323_v9  ;;  %v8614_v6 = vpop.f32.mrb[255].mxu1 }
 0x81f   : > { %v8747_v43 = vmul.f32 %v15804_v0, %v8682_v16  ;;  %v8683_v52 = vadd.f32 %v15801_v54, %v8613_v12 }
 0x821   : > { %v8812_v44 = vadd.f32 %v15809_v55, %v8747_v43  ;;  %v8748_v18 = vmul.f32 %v15804_v0, %v8683_v52 }
 0x823   : > { %8877 = vst.msk [vmem:[%s15823_s28 + $0x1f0] sm:$0xff] %vm8814_vm1, %v8812_v44  ;;  %v8813_v14 = vadd.f32 %v15809_v55, %v8748_v18 }
 0x825   : > { %8878 = vst.msk [vmem:[%s15823_s28 + $0x1f8] sm:$0xff] %vm8814_vm1, %v8813_v14 }
 0x826 PF: > { %s19_s24 = sadd.s32 1, %s10702_s24  }
 0x827   : > { %p16_p7 = scmp.ge.s32.totalorder %s19_s24, 4  }
 0x829   :  { %18 = sbr.rel (!%p16_p7) target bundleno = 2 (0x2), region = 88 }
 0x830   :  { %8901 = vsyncpa [#allocation3], 1 }
 0x831   :  { %8903 = vsyncpa [#allocation3 + $0x1], 1 }
 0x832   :  { %8904 = vsyncpa [#allocation4], 1 }
 0x833   :  { %8906 = vsyncpa [#allocation4 + $0x1], 1 }

</bundles_post_ra>
